<compile_context>
chip_gen: v5e
topology: v5e:2x2
jax: 0.10.0
libtpu: 0.0.40
codegen_flags: <defaults>
</compile_context>

<pallas_src>
import numpy as np
import jax
import jax.numpy as jnp
from jax import lax
from jax.experimental import pallas as pl
from jax.experimental.pallas import tpu as pltpu


NEG_SLOPE = 0.2           # LeakyReLU slope used by ConvBlock
SOFTPLUS_THRESH = 20.0    # PyTorch nn.Softplus default threshold
BICUBIC_A = -0.75         # PyTorch F.interpolate(mode='bicubic') kernel constant
MIN_LANES = 128           # pad the flattened-spatial (lane) axis up to this width
MXU_DTYPE = jnp.bfloat16  # MXU operand dtype (accumulation stays f32)


# ---------------------------------------------------------------------------
# Host-side shape-derived constants (numpy, computed once at trace time)
# ---------------------------------------------------------------------------

def _bicubic_taps_x2(n_in):
    """PyTorch-exact bicubic x2 (align_corners=False): 4 clamped taps + weights."""
    a = BICUBIC_A
    n_out = 2 * n_in
    idx = np.zeros((n_out, 4), np.int64)
    wts = np.zeros((n_out, 4), np.float64)
    for o in range(n_out):
        x = 0.5 * o - 0.25                       # (o + 0.5) * 0.5 - 0.5
        f = int(np.floor(x))
        t = x - f
        c0 = ((a * (t + 1) - 5 * a) * (t + 1) + 8 * a) * (t + 1) - 4 * a
        c1 = ((a + 2) * t - (a + 3)) * t * t + 1
        c2 = ((a + 2) * (1 - t) - (a + 3)) * (1 - t) * (1 - t) + 1
        c3 = ((a * (2 - t) - 5 * a) * (2 - t) + 8 * a) * (2 - t) - 4 * a
        for j, c in enumerate((c0, c1, c2, c3)):
            idx[o, j] = min(max(f - 1 + j, 0), n_in - 1)
            wts[o, j] = c
    return idx, wts


def _bicubic_matrix_1d(n_in):
    """(n_in, 2*n_in) matrix U so that out_vec = in_vec @ U (per-axis bicubic x2)."""
    idx, wts = _bicubic_taps_x2(n_in)
    u = np.zeros((n_in, 2 * n_in), np.float64)
    for o in range(2 * n_in):
        for j in range(4):
            u[idx[o, j], o] += wts[o, j]
    return u


def _avgpool_matrix_1d(n_in):
    p = np.zeros((n_in, n_in // 2), np.float64)
    for o in range(n_in // 2):
        p[2 * o, o] = 0.5
        p[2 * o + 1, o] = 0.5
    return p


def _spatial_matrix(mat_h, mat_w, mp_in, mp_out):
    """Per-image kron(mat_h, mat_w), zero-padded to (mp_in, mp_out)."""
    k = np.kron(mat_h, mat_w)
    out = np.zeros((mp_in, mp_out), np.float32)
    out[: k.shape[0], : k.shape[1]] = k
    return out


def _conv_masks(h, w, mp):
    """(9, mp) boundary-validity masks for the 3x3 taps, per-image flattened layout."""
    m = h * w
    cols = np.arange(m)
    ww = cols % w
    hh = cols // w
    masks = np.zeros((9, mp), np.float32)
    k = 0
    for dy in (-1, 0, 1):
        for dx in (-1, 0, 1):
            valid = (hh + dy >= 0) & (hh + dy < h) & (ww + dx >= 0) & (ww + dx < w)
            masks[k, :m] = valid.astype(np.float32)
            k += 1
    return masks


# ---------------------------------------------------------------------------
# Parameters (match the PyTorch module structure; Kaiming-uniform-like init)
# ---------------------------------------------------------------------------

def init_unet_evid_params(key, in_chans, chans, stages):
    def conv_init(k, cin, cout):
        kw, kb = jax.random.split(k)
        bound = 1.0 / np.sqrt(cin * 9)
        w = jax.random.uniform(kw, (cout, cin, 3, 3), jnp.float32, -bound, bound)
        b = jax.random.uniform(kb, (cout,), jnp.float32, -bound, bound)
        return w, b

    n_convs = stages + 1 + 2 * stages + 3
    ki = iter(jax.random.split(key, n_convs))

    down = []
    cin = in_chans
    for i in range(stages):
        cout = chans * (2 ** i)
        down.append(conv_init(next(ki), cin, cout))
        cin = cout

    bottleneck = conv_init(next(ki), cin, cin * 2)
    ch = cin * 2

    upsampling_conv, up_conv = [], []
    for _ in range(stages):
        upsampling_conv.append(conv_init(next(ki), ch, ch // 2))
        up_conv.append(conv_init(next(ki), ch, ch // 2))
        ch //= 2

    return {
        "down": down,
        "bottleneck": bottleneck,
        "upsampling_conv": upsampling_conv,
        "up_conv": up_conv,
        "gamma": conv_init(next(ki), ch, in_chans),
        "v": conv_init(next(ki), ch, 1),
        "alpha": conv_init(next(ki), ch, 1),
    }


# ---------------------------------------------------------------------------
# Pallas forward
# ---------------------------------------------------------------------------

def unet_evid_pallas(image, params, *, stages):
    image = jnp.asarray(image, jnp.float32)
    n, in_chans, h, w = image.shape
    assert h % (2 ** stages) == 0 and w % (2 ** stages) == 0, (
        "H, W must be divisible by 2**stages")
    # TODO(synk): implement the reflect-pad branch of the decoder used for odd sizes.

    n_lvl = stages + 1
    hs = [h >> l for l in range(n_lvl)]
    ws_ = [w >> l for l in range(n_lvl)]
    ms = [hs[l] * ws_[l] for l in range(n_lvl)]          # per-image spatial size
    mps = [max(m, MIN_LANES) for m in ms]
    m0 = ms[0]

    masks = [jnp.asarray(_conv_masks(hs[l], ws_[l], mps[l])) for l in range(n_lvl)]
    pools = [jnp.asarray(_spatial_matrix(_avgpool_matrix_1d(hs[l]),
                                         _avgpool_matrix_1d(ws_[l]),
                                         mps[l], mps[l + 1]), MXU_DTYPE)
             for l in range(stages)]
    ups = [jnp.asarray(_spatial_matrix(_bicubic_matrix_1d(hs[l + 1]),
                                       _bicubic_matrix_1d(ws_[l + 1]),
                                       mps[l + 1], mps[l]), MXU_DTYPE)
           for l in range(stages)]

    def pack_w(wt, pad_out=None):
        """(Cout,Cin,3,3) -> (Cout', 9*Cin) bf16, tap-major / cin-minor columns."""
        wt = jnp.asarray(wt, jnp.float32)
        cout, cin = wt.shape[0], wt.shape[1]
        if pad_out is not None and pad_out > cout:
            wt = jnp.concatenate(
                [wt, jnp.zeros((pad_out - cout, cin, 3, 3), jnp.float32)], axis=0)
        wp = jnp.transpose(wt, (0, 2, 3, 1)).reshape(wt.shape[0], 9 * cin)
        return wp.astype(MXU_DTYPE)

    def pack_b(bv, pad_out=None):
        bv = jnp.asarray(bv, jnp.float32)
        if pad_out is not None and pad_out > bv.shape[0]:
            bv = jnp.concatenate([bv, jnp.zeros((pad_out - bv.shape[0],), jnp.float32)])
        return bv.reshape(-1, 1)

    down_w = [pack_w(wt) for wt, _ in params["down"]]
    down_b = [pack_b(bv) for _, bv in params["down"]]
    bot_w = pack_w(params["bottleneck"][0])
    bot_b = pack_b(params["bottleneck"][1])
    ups_w = [pack_w(wt) for wt, _ in params["upsampling_conv"]]
    ups_b = [pack_b(bv) for _, bv in params["upsampling_conv"]]
    upc_w = [pack_w(wt) for wt, _ in params["up_conv"]]      # cat order [up, skip]
    upc_b = [pack_b(bv) for _, bv in params["up_conv"]]

    n_head = in_chans + 2
    out_rows = ((n_head + 7) // 8) * 8                       # sublane-aligned head slab
    head_w = pack_w(jnp.concatenate(
        [params["gamma"][0], params["v"][0], params["alpha"][0]], axis=0),
        pad_out=out_rows)
    head_b = pack_b(jnp.concatenate(
        [params["gamma"][1], params["v"][1], params["alpha"][1]], axis=0),
        pad_out=out_rows)

    all_w = down_w + [bot_w] + ups_w + upc_w + [head_w]
    max_rows = max(wp.shape[1] for wp in all_w)              # max 9*Cin_total
    max_rows = ((max_rows + 7) // 8) * 8

    # per-image layout: x[c, h*W + w], lanes padded up to mps[0]
    x_in = image.reshape(n, in_chans, m0)
    if mps[0] > m0:
        x_in = jnp.pad(x_in, ((0, 0), (0, 0), (0, mps[0] - m0)))

    inputs = [x_in]
    in_specs = [pl.BlockSpec((None, in_chans, mps[0]), lambda b: (b, 0, 0))]

    def add_const(arr):
        inputs.append(arr)
        in_specs.append(pl.BlockSpec(arr.shape, lambda b: (0,) * arr.ndim))

    for a in masks:
        add_const(a)
    for a in pools:
        add_const(a)
    for a in ups:
        add_const(a)
    for i in range(stages):
        add_const(down_w[i]); add_const(down_b[i])
    add_const(bot_w); add_const(bot_b)
    for j in range(stages):
        add_const(ups_w[j]); add_const(ups_b[j])
    for j in range(stages):
        add_const(upc_w[j]); add_const(upc_b[j])
    add_const(head_w); add_const(head_b)
    n_inputs = len(inputs)

    # ---------------------------------------------------------------- kernel
    def kernel(*refs):
        out_ref = refs[n_inputs]
        stack_ref = refs[n_inputs + 1]            # reused (max_rows, mps[0]) bf16 slab
        pos = [0]

        def nxt():
            r = refs[pos[0]]
            pos[0] += 1
            return r

        x_ref = nxt()
        mask_refs = [nxt() for _ in range(n_lvl)]
        pool_refs = [nxt() for _ in range(stages)]
        up_refs = [nxt() for _ in range(stages)]
        down_wb = [(nxt(), nxt()) for _ in range(stages)]
        bot_wb = (nxt(), nxt())
        ups_wb = [(nxt(), nxt()) for _ in range(stages)]
        upc_wb = [(nxt(), nxt()) for _ in range(stages)]
        head_wb = (nxt(), nxt())

        def conv3x3(xs, w_ref, b_ref, lvl, act):
            """3x3 'SAME' conv + bias (+LeakyReLU) as ONE MXU matmul.

            The 9 masked, lane-rotated copies of every input piece (channel
            concat included) are written into `stack_ref` as a (9*Cin_total, M)
            bf16 activation; the packed weight is (Cout, 9*Cin_total) bf16 and
            the contraction runs with f32 accumulation.
            """
            mp = mps[lvl]
            wl = ws_[lvl]
            cin_tot = sum(int(x.shape[0]) for x in xs)
            k = 0
            for dy in (-1, 0, 1):
                for dx in (-1, 0, 1):
                    shift = dy * wl + dx
                    mk = mask_refs[lvl][k:k + 1, :]            # (1, mp) f32
                    off = k * cin_tot
                    for x in xs:
                        cx = int(x.shape[0])
                        xk = x if shift == 0 else pltpu.roll(
                            x, shift=(-shift) % mp, axis=1)
                        stack_ref[off:off + cx, :mp] = (xk * mk).astype(MXU_DTYPE)
                        off += cx
                    k += 1
            stack = stack_ref[0:9 * cin_tot, 0:mp]
            y = jnp.dot(w_ref[...], stack, preferred_element_type=jnp.float32)
            y = y + b_ref[...]
            if act:
                y = jnp.where(y >= 0.0, y, NEG_SLOPE * y)
            return y

        def softplus(t):
            return jnp.where(t > SOFTPLUS_THRESH, t, jnp.log(1.0 + jnp.exp(t)))

        # ------------------------- encoder -------------------------
        skips = []
        cur = x_ref[...]
        for i in range(stages):
            w_ref, b_ref = down_wb[i]
            cur = conv3x3([cur], w_ref, b_ref, lvl=i, act=True)
            skips.append(cur)
            cur = jnp.dot(cur.astype(MXU_DTYPE), pool_refs[i][...],
                          preferred_element_type=jnp.float32)      # 2x2 avg-pool
        # ------------------------ bottleneck -----------------------
        cur = conv3x3([cur], bot_wb[0], bot_wb[1], lvl=stages, act=True)
        # ------------------------- decoder -------------------------
        for j in range(stages):
            lvl = stages - j
            w_ref, b_ref = ups_wb[j]
            cur = conv3x3([cur], w_ref, b_ref, lvl=lvl, act=True)
            cur = jnp.dot(cur.astype(MXU_DTYPE), up_refs[lvl - 1][...],
                          preferred_element_type=jnp.float32)      # bicubic x2
            skip = skips[stages - 1 - j]
            cw_ref, cb_ref = upc_wb[j]
            cur = conv3x3([cur, skip], cw_ref, cb_ref, lvl=lvl - 1, act=True)
        # -------- evidential heads: fused conv, single aligned store --------
        head = conv3x3([cur], head_wb[0], head_wb[1], lvl=0, act=False)
        rows = lax.broadcasted_iota(jnp.int32, head.shape, 0)
        sp = softplus(head)
        out_ref[...] = jnp.where(rows < in_chans, head,
                                 jnp.where(rows == in_chans, sp, sp + 1.0))

    # -------------------------------------------------------------- wrapper
    out_shape = jax.ShapeDtypeStruct((n, out_rows, mps[0]), jnp.float32)
    out_spec = pl.BlockSpec((None, out_rows, mps[0]), lambda b: (b, 0, 0))
    scratch = [pltpu.VMEM((max_rows, mps[0]), MXU_DTYPE)]

    resident = sum(int(np.prod(a.shape)) * a.dtype.itemsize for a in inputs)
    resident += int(np.prod(out_shape.shape)) * 4
    resident += max_rows * mps[0] * jnp.dtype(MXU_DTYPE).itemsize
    vmem_limit = int(min(64 * 2 ** 20, max(32 * 2 ** 20, 6 * resident)))

    conv_lvls = (list(range(stages)) + [stages]
                 + [stages - j for j in range(stages)]
                 + [stages - 1 - j for j in range(stages)]
                 + [0])
    flops_img = sum(2 * wp.shape[0] * wp.shape[1] * mps[l]
                    for wp, l in zip(all_w, conv_lvls))
    for l in range(stages):
        flops_img += 2 * down_w[l].shape[0] * mps[l] * mps[l + 1]           # pool
        flops_img += 2 * ups_w[l].shape[0] * mps[stages - l] * mps[stages - l - 1]  # up
    cost = pl.CostEstimate(flops=int(n * flops_img),
                           transcendentals=int(n * out_rows * mps[0]),
                           bytes_accessed=int(resident))

    out = pl.pallas_call(
        kernel,
        out_shape=out_shape,
        grid=(n,),
        in_specs=in_specs,
        out_specs=out_spec,
        scratch_shapes=scratch,
        compiler_params=pltpu.CompilerParams(
            dimension_semantics=("parallel",),
            vmem_limit_bytes=vmem_limit),
        cost_estimate=cost,
    )(*inputs)

    out = out[:, :, :m0]
    gamma = out[:, :in_chans, :].reshape(n, in_chans, h, w)
    v_map = out[:, in_chans, :].reshape(n, 1, h, w)
    alpha_map = out[:, in_chans + 1, :].reshape(n, 1, h, w)
    # utils.chan_dim_to_complex: assume first half of channels = real, second = imag.
    # TODO(synk): confirm the channel convention of utils.chan_dim_to_complex.
    half = in_chans // 2
    gamma_c = lax.complex(gamma[:, :half], gamma[:, half:])
    return gamma_c, v_map, alpha_map


# ---------------------------------------------------------------------------
# Pure-JAX reference (independent implementation, for validation)
# ---------------------------------------------------------------------------

def _bicubic_x2_ref(x):
    n, c, h, w = x.shape
    ih_np, wh_np = _bicubic_taps_x2(h)
    iw_np, ww_np = _bicubic_taps_x2(w)
    ih = jnp.asarray(ih_np, jnp.int32)
    wh = jnp.asarray(wh_np, jnp.float32)
    iw = jnp.asarray(iw_np, jnp.int32)
    ww = jnp.asarray(ww_np, jnp.float32)
    xh = (x[:, :, ih, :] * wh[None, None, :, :, None]).sum(axis=3)    # (n,c,2h,w)
    xw = (xh[:, :, :, iw] * ww[None, None, None, :, :]).sum(axis=4)   # (n,c,2h,2w)
    return xw


def unet_evid_ref(image, params, *, stages):
    x = jnp.asarray(image, jnp.float32)
    dn = ("NCHW", "OIHW", "NCHW")

    def convblock(t, wt, bv, act=True):
        y = lax.conv_general_dilated(t, wt, (1, 1), "SAME", dimension_numbers=dn)
        y = y + bv[None, :, None, None]
        if act:
            y = jnp.where(y >= 0, y, NEG_SLOPE * y)
        return y

    def softplus(t):
        return jnp.where(t > SOFTPLUS_THRESH, t, jnp.log(1.0 + jnp.exp(t)))

    stack = []
    out = x
    for wt, bv in params["down"]:
        out = convblock(out, wt, bv)
        stack.append(out)
        nb, cb, hb, wb = out.shape
        out = out.reshape(nb, cb, hb // 2, 2, wb // 2, 2).mean(axis=(3, 5))
    out = convblock(out, *params["bottleneck"])
    for j in range(stages):
        skip = stack.pop()
        out = convblock(out, *params["upsampling_conv"][j])
        out = _bicubic_x2_ref(out)
        out = jnp.concatenate([out, skip], axis=1)
        out = convblock(out, *params["up_conv"][j])
    gamma = convblock(out, *params["gamma"], act=False)
    v = softplus(convblock(out, *params["v"], act=False))
    alpha = softplus(convblock(out, *params["alpha"], act=False)) + 1.0
    half = gamma.shape[1] // 2
    gamma_c = lax.complex(gamma[:, :half], gamma[:, half:])
    return gamma_c, v, alpha


# ---------------------------------------------------------------------------

if __name__ == "__main__":
    key = jax.random.PRNGKey(0)
    k_img, k_par = jax.random.split(key)

    N, IN_CHANS, H, W = 2, 2, 16, 16
    CHANS, STAGES = 8, 3

    image = jax.random.normal(k_img, (N, IN_CHANS, H, W), dtype=jnp.float32)
    params = init_unet_evid_params(k_par, IN_CHANS, CHANS, STAGES)

    gamma, v, alpha = unet_evid_pallas(image, params, stages=STAGES)
    (gamma, v, alpha) = jax.block_until_ready((gamma, v, alpha))

    g_ref, v_ref, a_ref = unet_evid_ref(image, params, stages=STAGES)
    # bf16 MXU operands (f32 accumulation) vs the f32 reference -> looser tolerance.
    np.testing.assert_allclose(np.asarray(gamma), np.asarray(g_ref), rtol=5e-2, atol=2e-2)
    np.testing.assert_allclose(np.asarray(v), np.asarray(v_ref), rtol=5e-2, atol=2e-2)
    np.testing.assert_allclose(np.asarray(alpha), np.asarray(a_ref), rtol=5e-2, atol=2e-2)

    print("KERNEL_OK")
</pallas_src>

<mosaic_0001>
module attributes {stable_mosaic.version = 11 : i64} {
  func.func @kernel(%arg0: i32, %arg1: memref<1x2x256xf32, #tpu.memory_space<vmem>>, %arg2: memref<9x256xf32, #tpu.memory_space<vmem>>, %arg3: memref<9x128xf32, #tpu.memory_space<vmem>>, %arg4: memref<9x128xf32, #tpu.memory_space<vmem>>, %arg5: memref<9x128xf32, #tpu.memory_space<vmem>>, %arg6: memref<256x128xbf16, #tpu.memory_space<vmem>>, %arg7: memref<128x128xbf16, #tpu.memory_space<vmem>>, %arg8: memref<128x128xbf16, #tpu.memory_space<vmem>>, %arg9: memref<128x256xbf16, #tpu.memory_space<vmem>>, %arg10: memref<128x128xbf16, #tpu.memory_space<vmem>>, %arg11: memref<128x128xbf16, #tpu.memory_space<vmem>>, %arg12: memref<8x18xbf16, #tpu.memory_space<vmem>>, %arg13: memref<8x1xf32, #tpu.memory_space<vmem>>, %arg14: memref<16x72xbf16, #tpu.memory_space<vmem>>, %arg15: memref<16x1xf32, #tpu.memory_space<vmem>>, %arg16: memref<32x144xbf16, #tpu.memory_space<vmem>>, %arg17: memref<32x1xf32, #tpu.memory_space<vmem>>, %arg18: memref<64x288xbf16, #tpu.memory_space<vmem>>, %arg19: memref<64x1xf32, #tpu.memory_space<vmem>>, %arg20: memref<32x576xbf16, #tpu.memory_space<vmem>>, %arg21: memref<32x1xf32, #tpu.memory_space<vmem>>, %arg22: memref<16x288xbf16, #tpu.memory_space<vmem>>, %arg23: memref<16x1xf32, #tpu.memory_space<vmem>>, %arg24: memref<8x144xbf16, #tpu.memory_space<vmem>>, %arg25: memref<8x1xf32, #tpu.memory_space<vmem>>, %arg26: memref<32x576xbf16, #tpu.memory_space<vmem>>, %arg27: memref<32x1xf32, #tpu.memory_space<vmem>>, %arg28: memref<16x288xbf16, #tpu.memory_space<vmem>>, %arg29: memref<16x1xf32, #tpu.memory_space<vmem>>, %arg30: memref<8x144xbf16, #tpu.memory_space<vmem>>, %arg31: memref<8x1xf32, #tpu.memory_space<vmem>>, %arg32: memref<8x72xbf16, #tpu.memory_space<vmem>>, %arg33: memref<8x1xf32, #tpu.memory_space<vmem>>, %arg34: memref<1x8x256xf32, #tpu.memory_space<vmem>>, %arg35: memref<576x256xbf16, #tpu.memory_space<vmem>>) attributes {dimension_semantics = [#tpu.dimension_semantics<parallel>], iteration_bounds = array<i64: 2>, scalar_prefetch = 0 : i64, scratch_operands = 1 : i64, tpu.core_type = #tpu.core_type<tc>, window_params = [{transform_indices = @transform_0, window_bounds = array<i64: 1, 2, 256>}, {pipeline_mode = #tpu.pipeline_mode<synchronous>, transform_indices = @transform_1, window_bounds = array<i64: 9, 256>}, {pipeline_mode = #tpu.pipeline_mode<synchronous>, transform_indices = @transform_2, window_bounds = array<i64: 9, 128>}, {pipeline_mode = #tpu.pipeline_mode<synchronous>, transform_indices = @transform_3, window_bounds = array<i64: 9, 128>}, {pipeline_mode = #tpu.pipeline_mode<synchronous>, transform_indices = @transform_4, window_bounds = array<i64: 9, 128>}, {pipeline_mode = #tpu.pipeline_mode<synchronous>, transform_indices = @transform_5, window_bounds = array<i64: 256, 128>}, {pipeline_mode = #tpu.pipeline_mode<synchronous>, transform_indices = @transform_6, window_bounds = array<i64: 128, 128>}, {pipeline_mode = #tpu.pipeline_mode<synchronous>, transform_indices = @transform_7, window_bounds = array<i64: 128, 128>}, {pipeline_mode = #tpu.pipeline_mode<synchronous>, transform_indices = @transform_8, window_bounds = array<i64: 128, 256>}, {pipeline_mode = #tpu.pipeline_mode<synchronous>, transform_indices = @transform_9, window_bounds = array<i64: 128, 128>}, {pipeline_mode = #tpu.pipeline_mode<synchronous>, transform_indices = @transform_10, window_bounds = array<i64: 128, 128>}, {pipeline_mode = #tpu.pipeline_mode<synchronous>, transform_indices = @transform_11, window_bounds = array<i64: 8, 18>}, {pipeline_mode = #tpu.pipeline_mode<synchronous>, transform_indices = @transform_12, window_bounds = array<i64: 8, 1>}, {pipeline_mode = #tpu.pipeline_mode<synchronous>, transform_indices = @transform_13, window_bounds = array<i64: 16, 72>}, {pipeline_mode = #tpu.pipeline_mode<synchronous>, transform_indices = @transform_14, window_bounds = array<i64: 16, 1>}, {pipeline_mode = #tpu.pipeline_mode<synchronous>, transform_indices = @transform_15, window_bounds = array<i64: 32, 144>}, {pipeline_mode = #tpu.pipeline_mode<synchronous>, transform_indices = @transform_16, window_bounds = array<i64: 32, 1>}, {pipeline_mode = #tpu.pipeline_mode<synchronous>, transform_indices = @transform_17, window_bounds = array<i64: 64, 288>}, {pipeline_mode = #tpu.pipeline_mode<synchronous>, transform_indices = @transform_18, window_bounds = array<i64: 64, 1>}, {pipeline_mode = #tpu.pipeline_mode<synchronous>, transform_indices = @transform_19, window_bounds = array<i64: 32, 576>}, {pipeline_mode = #tpu.pipeline_mode<synchronous>, transform_indices = @transform_20, window_bounds = array<i64: 32, 1>}, {pipeline_mode = #tpu.pipeline_mode<synchronous>, transform_indices = @transform_21, window_bounds = array<i64: 16, 288>}, {pipeline_mode = #tpu.pipeline_mode<synchronous>, transform_indices = @transform_22, window_bounds = array<i64: 16, 1>}, {pipeline_mode = #tpu.pipeline_mode<synchronous>, transform_indices = @transform_23, window_bounds = array<i64: 8, 144>}, {pipeline_mode = #tpu.pipeline_mode<synchronous>, transform_indices = @transform_24, window_bounds = array<i64: 8, 1>}, {pipeline_mode = #tpu.pipeline_mode<synchronous>, transform_indices = @transform_25, window_bounds = array<i64: 32, 576>}, {pipeline_mode = #tpu.pipeline_mode<synchronous>, transform_indices = @transform_26, window_bounds = array<i64: 32, 1>}, {pipeline_mode = #tpu.pipeline_mode<synchronous>, transform_indices = @transform_27, window_bounds = array<i64: 16, 288>}, {pipeline_mode = #tpu.pipeline_mode<synchronous>, transform_indices = @transform_28, window_bounds = array<i64: 16, 1>}, {pipeline_mode = #tpu.pipeline_mode<synchronous>, transform_indices = @transform_29, window_bounds = array<i64: 8, 144>}, {pipeline_mode = #tpu.pipeline_mode<synchronous>, transform_indices = @transform_30, window_bounds = array<i64: 8, 1>}, {pipeline_mode = #tpu.pipeline_mode<synchronous>, transform_indices = @transform_31, window_bounds = array<i64: 8, 72>}, {pipeline_mode = #tpu.pipeline_mode<synchronous>, transform_indices = @transform_32, window_bounds = array<i64: 8, 1>}, {transform_indices = @transform_33, window_bounds = array<i64: 1, 8, 256>}]} {
    %c0 = arith.constant 0 : index
    %c0_0 = arith.constant 0 : index
    %c0_1 = arith.constant 0 : index
    %0 = vector.load %arg1[%c0, %c0_0, %c0_1] : memref<1x2x256xf32, #tpu.memory_space<vmem>>, vector<1x2x256xf32>
    %1 = vector.shape_cast %0 : vector<1x2x256xf32> to vector<2x256xf32>
    %c0_2 = arith.constant 0 : index
    %c0_3 = arith.constant 0 : index
    %2 = vector.load %arg2[%c0_2, %c0_3] : memref<9x256xf32, #tpu.memory_space<vmem>>, vector<1x256xf32>
    %c17_i32 = arith.constant 17 : i32
    %3 = tpu.dynamic_rotate %1 by %c17_i32 dim 1 : vector<2x256xf32>, i32 -> vector<2x256xf32>
    %4 = vector.broadcast %2 : vector<1x256xf32> to vector<2x256xf32>
    %5 = arith.mulf %3, %4 : vector<2x256xf32>
    %6 = arith.truncf %5 : vector<2x256xf32> to vector<2x256xbf16>
    %c0_4 = arith.constant 0 : index
    %c0_5 = arith.constant 0 : index
    %7 = vector.load %arg35[%c0_4, %c0_5] : memref<576x256xbf16, #tpu.memory_space<vmem>>, vector<2x256xbf16>
    tpu.vector_store %arg35[%c0_4, %c0_5], %6 {strides = array<i32>} : memref<576x256xbf16, #tpu.memory_space<vmem>>, vector<2x256xbf16>,
    %c1 = arith.constant 1 : index
    %c0_6 = arith.constant 0 : index
    %8 = vector.load %arg2[%c1, %c0_6] : memref<9x256xf32, #tpu.memory_space<vmem>>, vector<1x256xf32>
    %c16_i32 = arith.constant 16 : i32
    %9 = tpu.dynamic_rotate %1 by %c16_i32 dim 1 : vector<2x256xf32>, i32 -> vector<2x256xf32>
    %10 = vector.broadcast %8 : vector<1x256xf32> to vector<2x256xf32>
    %11 = arith.mulf %9, %10 : vector<2x256xf32>
    %12 = arith.truncf %11 : vector<2x256xf32> to vector<2x256xbf16>
    %c2 = arith.constant 2 : index
    %c0_7 = arith.constant 0 : index
    %13 = vector.load %arg35[%c2, %c0_7] : memref<576x256xbf16, #tpu.memory_space<vmem>>, vector<2x256xbf16>
    tpu.vector_store %arg35[%c2, %c0_7], %12 {strides = array<i32>} : memref<576x256xbf16, #tpu.memory_space<vmem>>, vector<2x256xbf16>,
    %c2_8 = arith.constant 2 : index
    %c0_9 = arith.constant 0 : index
    %14 = vector.load %arg2[%c2_8, %c0_9] : memref<9x256xf32, #tpu.memory_space<vmem>>, vector<1x256xf32>
    %c15_i32 = arith.constant 15 : i32
    %15 = tpu.dynamic_rotate %1 by %c15_i32 dim 1 : vector<2x256xf32>, i32 -> vector<2x256xf32>
    %16 = vector.broadcast %14 : vector<1x256xf32> to vector<2x256xf32>
    %17 = arith.mulf %15, %16 : vector<2x256xf32>
    %18 = arith.truncf %17 : vector<2x256xf32> to vector<2x256xbf16>
    %c4 = arith.constant 4 : index
    %c0_10 = arith.constant 0 : index
    %19 = vector.load %arg35[%c4, %c0_10] : memref<576x256xbf16, #tpu.memory_space<vmem>>, vector<2x256xbf16>
    tpu.vector_store %arg35[%c4, %c0_10], %18 {strides = array<i32>} : memref<576x256xbf16, #tpu.memory_space<vmem>>, vector<2x256xbf16>,
    %c3 = arith.constant 3 : index
    %c0_11 = arith.constant 0 : index
    %20 = vector.load %arg2[%c3, %c0_11] : memref<9x256xf32, #tpu.memory_space<vmem>>, vector<1x256xf32>
    %c1_i32 = arith.constant 1 : i32
    %21 = tpu.dynamic_rotate %1 by %c1_i32 dim 1 : vector<2x256xf32>, i32 -> vector<2x256xf32>
    %22 = vector.broadcast %20 : vector<1x256xf32> to vector<2x256xf32>
    %23 = arith.mulf %21, %22 : vector<2x256xf32>
    %24 = arith.truncf %23 : vector<2x256xf32> to vector<2x256xbf16>
    %c6 = arith.constant 6 : index
    %c0_12 = arith.constant 0 : index
    %25 = vector.load %arg35[%c6, %c0_12] : memref<576x256xbf16, #tpu.memory_space<vmem>>, vector<2x256xbf16>
    tpu.vector_store %arg35[%c6, %c0_12], %24 {strides = array<i32>} : memref<576x256xbf16, #tpu.memory_space<vmem>>, vector<2x256xbf16>,
    %c4_13 = arith.constant 4 : index
    %c0_14 = arith.constant 0 : index
    %26 = vector.load %arg2[%c4_13, %c0_14] : memref<9x256xf32, #tpu.memory_space<vmem>>, vector<1x256xf32>
    %27 = vector.broadcast %26 : vector<1x256xf32> to vector<2x256xf32>
    %28 = arith.mulf %1, %27 : vector<2x256xf32>
    %29 = arith.truncf %28 : vector<2x256xf32> to vector<2x256xbf16>
    %c8 = arith.constant 8 : index
    %c0_15 = arith.constant 0 : index
    %30 = vector.load %arg35[%c8, %c0_15] : memref<576x256xbf16, #tpu.memory_space<vmem>>, vector<2x256xbf16>
    tpu.vector_store %arg35[%c8, %c0_15], %29 {strides = array<i32>} : memref<576x256xbf16, #tpu.memory_space<vmem>>, vector<2x256xbf16>,
    %c5 = arith.constant 5 : index
    %c0_16 = arith.constant 0 : index
    %31 = vector.load %arg2[%c5, %c0_16] : memref<9x256xf32, #tpu.memory_space<vmem>>, vector<1x256xf32>
    %c255_i32 = arith.constant 255 : i32
    %32 = tpu.dynamic_rotate %1 by %c255_i32 dim 1 : vector<2x256xf32>, i32 -> vector<2x256xf32>
    %33 = vector.broadcast %31 : vector<1x256xf32> to vector<2x256xf32>
    %34 = arith.mulf %32, %33 : vector<2x256xf32>
    %35 = arith.truncf %34 : vector<2x256xf32> to vector<2x256xbf16>
    %c10 = arith.constant 10 : index
    %c0_17 = arith.constant 0 : index
    %36 = vector.load %arg35[%c10, %c0_17] : memref<576x256xbf16, #tpu.memory_space<vmem>>, vector<2x256xbf16>
    tpu.vector_store %arg35[%c10, %c0_17], %35 {strides = array<i32>} : memref<576x256xbf16, #tpu.memory_space<vmem>>, vector<2x256xbf16>,
    %c6_18 = arith.constant 6 : index
    %c0_19 = arith.constant 0 : index
    %37 = vector.load %arg2[%c6_18, %c0_19] : memref<9x256xf32, #tpu.memory_space<vmem>>, vector<1x256xf32>
    %c241_i32 = arith.constant 241 : i32
    %38 = tpu.dynamic_rotate %1 by %c241_i32 dim 1 : vector<2x256xf32>, i32 -> vector<2x256xf32>
    %39 = vector.broadcast %37 : vector<1x256xf32> to vector<2x256xf32>
    %40 = arith.mulf %38, %39 : vector<2x256xf32>
    %41 = arith.truncf %40 : vector<2x256xf32> to vector<2x256xbf16>
    %c12 = arith.constant 12 : index
    %c0_20 = arith.constant 0 : index
    %42 = vector.load %arg35[%c12, %c0_20] : memref<576x256xbf16, #tpu.memory_space<vmem>>, vector<2x256xbf16>
    tpu.vector_store %arg35[%c12, %c0_20], %41 {strides = array<i32>} : memref<576x256xbf16, #tpu.memory_space<vmem>>, vector<2x256xbf16>,
    %c7 = arith.constant 7 : index
    %c0_21 = arith.constant 0 : index
    %43 = vector.load %arg2[%c7, %c0_21] : memref<9x256xf32, #tpu.memory_space<vmem>>, vector<1x256xf32>
    %c240_i32 = arith.constant 240 : i32
    %44 = tpu.dynamic_rotate %1 by %c240_i32 dim 1 : vector<2x256xf32>, i32 -> vector<2x256xf32>
    %45 = vector.broadcast %43 : vector<1x256xf32> to vector<2x256xf32>
    %46 = arith.mulf %44, %45 : vector<2x256xf32>
    %47 = arith.truncf %46 : vector<2x256xf32> to vector<2x256xbf16>
    %c14 = arith.constant 14 : index
    %c0_22 = arith.constant 0 : index
    %48 = vector.load %arg35[%c14, %c0_22] : memref<576x256xbf16, #tpu.memory_space<vmem>>, vector<2x256xbf16>
    tpu.vector_store %arg35[%c14, %c0_22], %47 {strides = array<i32>} : memref<576x256xbf16, #tpu.memory_space<vmem>>, vector<2x256xbf16>,
    %c8_23 = arith.constant 8 : index
    %c0_24 = arith.constant 0 : index
    %49 = vector.load %arg2[%c8_23, %c0_24] : memref<9x256xf32, #tpu.memory_space<vmem>>, vector<1x256xf32>
    %c239_i32 = arith.constant 239 : i32
    %50 = tpu.dynamic_rotate %1 by %c239_i32 dim 1 : vector<2x256xf32>, i32 -> vector<2x256xf32>
    %51 = vector.broadcast %49 : vector<1x256xf32> to vector<2x256xf32>
    %52 = arith.mulf %50, %51 : vector<2x256xf32>
    %53 = arith.truncf %52 : vector<2x256xf32> to vector<2x256xbf16>
    %c16 = arith.constant 16 : index
    %c0_25 = arith.constant 0 : index
    %54 = vector.load %arg35[%c16, %c0_25] : memref<576x256xbf16, #tpu.memory_space<vmem>>, vector<2x256xbf16>
    tpu.vector_store %arg35[%c16, %c0_25], %53 {strides = array<i32>} : memref<576x256xbf16, #tpu.memory_space<vmem>>, vector<2x256xbf16>,
    %c0_26 = arith.constant 0 : index
    %c0_27 = arith.constant 0 : index
    %55 = vector.load %arg35[%c0_26, %c0_27] : memref<576x256xbf16, #tpu.memory_space<vmem>>, vector<18x256xbf16>
    %c0_28 = arith.constant 0 : index
    %c0_29 = arith.constant 0 : index
    %56 = vector.load %arg12[%c0_28, %c0_29] : memref<8x18xbf16, #tpu.memory_space<vmem>>, vector<8x18xbf16>
    %cst = arith.constant dense<0.000000e+00> : vector<8x256xf32>
    %57 = tpu.matmul %56, %55, %cst {dimension_numbers = #tpu.dot_dimension_numbers<[1], [0], [0], [1], [0, 0, 1, 1], [], []>} : vector<8x18xbf16>, vector<18x256xbf16>, vector<8x256xf32> -> vector<8x256xf32>
    %c0_30 = arith.constant 0 : index
    %c0_31 = arith.constant 0 : index
    %58 = vector.load %arg13[%c0_30, %c0_31] : memref<8x1xf32, #tpu.memory_space<vmem>>, vector<8x1xf32>
    %59 = vector.broadcast %58 : vector<8x1xf32> to vector<8x256xf32>
    %60 = arith.addf %57, %59 : vector<8x256xf32>
    %cst_32 = arith.constant 0.000000e+00 : f32
    %61 = vector.broadcast %cst_32 : f32 to vector<8x256xf32>
    %62 = arith.cmpf oge, %60, %61 : vector<8x256xf32>
    %cst_33 = arith.constant 2.000000e-01 : f32
    %63 = vector.broadcast %cst_33 : f32 to vector<8x256xf32>
    %64 = arith.mulf %63, %60 : vector<8x256xf32>
    %65 = arith.select %62, %60, %64 : vector<8x256xi1>, vector<8x256xf32>
    %66 = arith.truncf %65 : vector<8x256xf32> to vector<8x256xbf16>
    %c0_34 = arith.constant 0 : index
    %c0_35 = arith.constant 0 : index
    %67 = vector.load %arg6[%c0_34, %c0_35] : memref<256x128xbf16, #tpu.memory_space<vmem>>, vector<256x128xbf16>
    %cst_36 = arith.constant dense<0.000000e+00> : vector<8x128xf32>
    %68 = tpu.matmul %66, %67, %cst_36 {dimension_numbers = #tpu.dot_dimension_numbers<[1], [0], [0], [1], [0, 0, 1, 1], [], []>} : vector<8x256xbf16>, vector<256x128xbf16>, vector<8x128xf32> -> vector<8x128xf32>
    %c0_37 = arith.constant 0 : index
    %c0_38 = arith.constant 0 : index
    %69 = vector.load %arg3[%c0_37, %c0_38] : memref<9x128xf32, #tpu.memory_space<vmem>>, vector<1x128xf32>
    %c9_i32 = arith.constant 9 : i32
    %70 = tpu.dynamic_rotate %68 by %c9_i32 dim 1 : vector<8x128xf32>, i32 -> vector<8x128xf32>
    %71 = vector.broadcast %69 : vector<1x128xf32> to vector<8x128xf32>
    %72 = arith.mulf %70, %71 : vector<8x128xf32>
    %73 = arith.truncf %72 : vector<8x128xf32> to vector<8x128xbf16>
    %c0_39 = arith.constant 0 : index
    %c0_40 = arith.constant 0 : index
    %74 = vector.load %arg35[%c0_39, %c0_40] : memref<576x256xbf16, #tpu.memory_space<vmem>>, vector<8x128xbf16>
    tpu.vector_store %arg35[%c0_39, %c0_40], %73 {strides = array<i32>} : memref<576x256xbf16, #tpu.memory_space<vmem>>, vector<8x128xbf16>,
    %c1_41 = arith.constant 1 : index
    %c0_42 = arith.constant 0 : index
    %75 = vector.load %arg3[%c1_41, %c0_42] : memref<9x128xf32, #tpu.memory_space<vmem>>, vector<1x128xf32>
    %c8_i32 = arith.constant 8 : i32
    %76 = tpu.dynamic_rotate %68 by %c8_i32 dim 1 : vector<8x128xf32>, i32 -> vector<8x128xf32>
    %77 = vector.broadcast %75 : vector<1x128xf32> to vector<8x128xf32>
    %78 = arith.mulf %76, %77 : vector<8x128xf32>
    %79 = arith.truncf %78 : vector<8x128xf32> to vector<8x128xbf16>
    %c8_43 = arith.constant 8 : index
    %c0_44 = arith.constant 0 : index
    %80 = vector.load %arg35[%c8_43, %c0_44] : memref<576x256xbf16, #tpu.memory_space<vmem>>, vector<8x128xbf16>
    tpu.vector_store %arg35[%c8_43, %c0_44], %79 {strides = array<i32>} : memref<576x256xbf16, #tpu.memory_space<vmem>>, vector<8x128xbf16>,
    %c2_45 = arith.constant 2 : index
    %c0_46 = arith.constant 0 : index
    %81 = vector.load %arg3[%c2_45, %c0_46] : memref<9x128xf32, #tpu.memory_space<vmem>>, vector<1x128xf32>
    %c7_i32 = arith.constant 7 : i32
    %82 = tpu.dynamic_rotate %68 by %c7_i32 dim 1 : vector<8x128xf32>, i32 -> vector<8x128xf32>
    %83 = vector.broadcast %81 : vector<1x128xf32> to vector<8x128xf32>
    %84 = arith.mulf %82, %83 : vector<8x128xf32>
    %85 = arith.truncf %84 : vector<8x128xf32> to vector<8x128xbf16>
    %c16_47 = arith.constant 16 : index
    %c0_48 = arith.constant 0 : index
    %86 = vector.load %arg35[%c16_47, %c0_48] : memref<576x256xbf16, #tpu.memory_space<vmem>>, vector<8x128xbf16>
    tpu.vector_store %arg35[%c16_47, %c0_48], %85 {strides = array<i32>} : memref<576x256xbf16, #tpu.memory_space<vmem>>, vector<8x128xbf16>,
    %c3_49 = arith.constant 3 : index
    %c0_50 = arith.constant 0 : index
    %87 = vector.load %arg3[%c3_49, %c0_50] : memref<9x128xf32, #tpu.memory_space<vmem>>, vector<1x128xf32>
    %c1_i32_51 = arith.constant 1 : i32
    %88 = tpu.dynamic_rotate %68 by %c1_i32_51 dim 1 : vector<8x128xf32>, i32 -> vector<8x128xf32>
    %89 = vector.broadcast %87 : vector<1x128xf32> to vector<8x128xf32>
    %90 = arith.mulf %88, %89 : vector<8x128xf32>
    %91 = arith.truncf %90 : vector<8x128xf32> to vector<8x128xbf16>
    %c24 = arith.constant 24 : index
    %c0_52 = arith.constant 0 : index
    %92 = vector.load %arg35[%c24, %c0_52] : memref<576x256xbf16, #tpu.memory_space<vmem>>, vector<8x128xbf16>
    tpu.vector_store %arg35[%c24, %c0_52], %91 {strides = array<i32>} : memref<576x256xbf16, #tpu.memory_space<vmem>>, vector<8x128xbf16>,
    %c4_53 = arith.constant 4 : index
    %c0_54 = arith.constant 0 : index
    %93 = vector.load %arg3[%c4_53, %c0_54] : memref<9x128xf32, #tpu.memory_space<vmem>>, vector<1x128xf32>
    %94 = vector.broadcast %93 : vector<1x128xf32> to vector<8x128xf32>
    %95 = arith.mulf %68, %94 : vector<8x128xf32>
    %96 = arith.truncf %95 : vector<8x128xf32> to vector<8x128xbf16>
    %c32 = arith.constant 32 : index
    %c0_55 = arith.constant 0 : index
    %97 = vector.load %arg35[%c32, %c0_55] : memref<576x256xbf16, #tpu.memory_space<vmem>>, vector<8x128xbf16>
    tpu.vector_store %arg35[%c32, %c0_55], %96 {strides = array<i32>} : memref<576x256xbf16, #tpu.memory_space<vmem>>, vector<8x128xbf16>,
    %c5_56 = arith.constant 5 : index
    %c0_57 = arith.constant 0 : index
    %98 = vector.load %arg3[%c5_56, %c0_57] : memref<9x128xf32, #tpu.memory_space<vmem>>, vector<1x128xf32>
    %c127_i32 = arith.constant 127 : i32
    %99 = tpu.dynamic_rotate %68 by %c127_i32 dim 1 : vector<8x128xf32>, i32 -> vector<8x128xf32>
    %100 = vector.broadcast %98 : vector<1x128xf32> to vector<8x128xf32>
    %101 = arith.mulf %99, %100 : vector<8x128xf32>
    %102 = arith.truncf %101 : vector<8x128xf32> to vector<8x128xbf16>
    %c40 = arith.constant 40 : index
    %c0_58 = arith.constant 0 : index
    %103 = vector.load %arg35[%c40, %c0_58] : memref<576x256xbf16, #tpu.memory_space<vmem>>, vector<8x128xbf16>
    tpu.vector_store %arg35[%c40, %c0_58], %102 {strides = array<i32>} : memref<576x256xbf16, #tpu.memory_space<vmem>>, vector<8x128xbf16>,
    %c6_59 = arith.constant 6 : index
    %c0_60 = arith.constant 0 : index
    %104 = vector.load %arg3[%c6_59, %c0_60] : memref<9x128xf32, #tpu.memory_space<vmem>>, vector<1x128xf32>
    %c121_i32 = arith.constant 121 : i32
    %105 = tpu.dynamic_rotate %68 by %c121_i32 dim 1 : vector<8x128xf32>, i32 -> vector<8x128xf32>
    %106 = vector.broadcast %104 : vector<1x128xf32> to vector<8x128xf32>
    %107 = arith.mulf %105, %106 : vector<8x128xf32>
    %108 = arith.truncf %107 : vector<8x128xf32> to vector<8x128xbf16>
    %c48 = arith.constant 48 : index
    %c0_61 = arith.constant 0 : index
    %109 = vector.load %arg35[%c48, %c0_61] : memref<576x256xbf16, #tpu.memory_space<vmem>>, vector<8x128xbf16>
    tpu.vector_store %arg35[%c48, %c0_61], %108 {strides = array<i32>} : memref<576x256xbf16, #tpu.memory_space<vmem>>, vector<8x128xbf16>,
    %c7_62 = arith.constant 7 : index
    %c0_63 = arith.constant 0 : index
    %110 = vector.load %arg3[%c7_62, %c0_63] : memref<9x128xf32, #tpu.memory_space<vmem>>, vector<1x128xf32>
    %c120_i32 = arith.constant 120 : i32
    %111 = tpu.dynamic_rotate %68 by %c120_i32 dim 1 : vector<8x128xf32>, i32 -> vector<8x128xf32>
    %112 = vector.broadcast %110 : vector<1x128xf32> to vector<8x128xf32>
    %113 = arith.mulf %111, %112 : vector<8x128xf32>
    %114 = arith.truncf %113 : vector<8x128xf32> to vector<8x128xbf16>
    %c56 = arith.constant 56 : index
    %c0_64 = arith.constant 0 : index
    %115 = vector.load %arg35[%c56, %c0_64] : memref<576x256xbf16, #tpu.memory_space<vmem>>, vector<8x128xbf16>
    tpu.vector_store %arg35[%c56, %c0_64], %114 {strides = array<i32>} : memref<576x256xbf16, #tpu.memory_space<vmem>>, vector<8x128xbf16>,
    %c8_65 = arith.constant 8 : index
    %c0_66 = arith.constant 0 : index
    %116 = vector.load %arg3[%c8_65, %c0_66] : memref<9x128xf32, #tpu.memory_space<vmem>>, vector<1x128xf32>
    %c119_i32 = arith.constant 119 : i32
    %117 = tpu.dynamic_rotate %68 by %c119_i32 dim 1 : vector<8x128xf32>, i32 -> vector<8x128xf32>
    %118 = vector.broadcast %116 : vector<1x128xf32> to vector<8x128xf32>
    %119 = arith.mulf %117, %118 : vector<8x128xf32>
    %120 = arith.truncf %119 : vector<8x128xf32> to vector<8x128xbf16>
    %c64 = arith.constant 64 : index
    %c0_67 = arith.constant 0 : index
    %121 = vector.load %arg35[%c64, %c0_67] : memref<576x256xbf16, #tpu.memory_space<vmem>>, vector<8x128xbf16>
    tpu.vector_store %arg35[%c64, %c0_67], %120 {strides = array<i32>} : memref<576x256xbf16, #tpu.memory_space<vmem>>, vector<8x128xbf16>,
    %c0_68 = arith.constant 0 : index
    %c0_69 = arith.constant 0 : index
    %122 = vector.load %arg35[%c0_68, %c0_69] : memref<576x256xbf16, #tpu.memory_space<vmem>>, vector<72x128xbf16>
    %c0_70 = arith.constant 0 : index
    %c0_71 = arith.constant 0 : index
    %123 = vector.load %arg14[%c0_70, %c0_71] : memref<16x72xbf16, #tpu.memory_space<vmem>>, vector<16x72xbf16>
    %cst_72 = arith.constant dense<0.000000e+00> : vector<16x128xf32>
    %124 = tpu.matmul %123, %122, %cst_72 {dimension_numbers = #tpu.dot_dimension_numbers<[1], [0], [0], [1], [0, 0, 1, 1], [], []>} : vector<16x72xbf16>, vector<72x128xbf16>, vector<16x128xf32> -> vector<16x128xf32>
    %c0_73 = arith.constant 0 : index
    %c0_74 = arith.constant 0 : index
    %125 = vector.load %arg15[%c0_73, %c0_74] : memref<16x1xf32, #tpu.memory_space<vmem>>, vector<16x1xf32>
    %126 = vector.broadcast %125 : vector<16x1xf32> to vector<16x128xf32>
    %127 = arith.addf %124, %126 : vector<16x128xf32>
    %cst_75 = arith.constant 0.000000e+00 : f32
    %128 = vector.broadcast %cst_75 : f32 to vector<16x128xf32>
    %129 = arith.cmpf oge, %127, %128 : vector<16x128xf32>
    %cst_76 = arith.constant 2.000000e-01 : f32
    %130 = vector.broadcast %cst_76 : f32 to vector<16x128xf32>
    %131 = arith.mulf %130, %127 : vector<16x128xf32>
    %132 = arith.select %129, %127, %131 : vector<16x128xi1>, vector<16x128xf32>
    %133 = arith.truncf %132 : vector<16x128xf32> to vector<16x128xbf16>
    %c0_77 = arith.constant 0 : index
    %c0_78 = arith.constant 0 : index
    %134 = vector.load %arg7[%c0_77, %c0_78] : memref<128x128xbf16, #tpu.memory_space<vmem>>, vector<128x128xbf16>
    %cst_79 = arith.constant dense<0.000000e+00> : vector<16x128xf32>
    %135 = tpu.matmul %133, %134, %cst_79 {dimension_numbers = #tpu.dot_dimension_numbers<[1], [0], [0], [1], [0, 0, 1, 1], [], []>} : vector<16x128xbf16>, vector<128x128xbf16>, vector<16x128xf32> -> vector<16x128xf32>
    %c0_80 = arith.constant 0 : index
    %c0_81 = arith.constant 0 : index
    %136 = vector.load %arg4[%c0_80, %c0_81] : memref<9x128xf32, #tpu.memory_space<vmem>>, vector<1x128xf32>
    %c5_i32 = arith.constant 5 : i32
    %137 = tpu.dynamic_rotate %135 by %c5_i32 dim 1 : vector<16x128xf32>, i32 -> vector<16x128xf32>
    %138 = vector.broadcast %136 : vector<1x128xf32> to vector<16x128xf32>
    %139 = arith.mulf %137, %138 : vector<16x128xf32>
    %140 = arith.truncf %139 : vector<16x128xf32> to vector<16x128xbf16>
    %c0_82 = arith.constant 0 : index
    %c0_83 = arith.constant 0 : index
    %141 = vector.load %arg35[%c0_82, %c0_83] : memref<576x256xbf16, #tpu.memory_space<vmem>>, vector<16x128xbf16>
    tpu.vector_store %arg35[%c0_82, %c0_83], %140 {strides = array<i32>} : memref<576x256xbf16, #tpu.memory_space<vmem>>, vector<16x128xbf16>,
    %c1_84 = arith.constant 1 : index
    %c0_85 = arith.constant 0 : index
    %142 = vector.load %arg4[%c1_84, %c0_85] : memref<9x128xf32, #tpu.memory_space<vmem>>, vector<1x128xf32>
    %c4_i32 = arith.constant 4 : i32
    %143 = tpu.dynamic_rotate %135 by %c4_i32 dim 1 : vector<16x128xf32>, i32 -> vector<16x128xf32>
    %144 = vector.broadcast %142 : vector<1x128xf32> to vector<16x128xf32>
    %145 = arith.mulf %143, %144 : vector<16x128xf32>
    %146 = arith.truncf %145 : vector<16x128xf32> to vector<16x128xbf16>
    %c16_86 = arith.constant 16 : index
    %c0_87 = arith.constant 0 : index
    %147 = vector.load %arg35[%c16_86, %c0_87] : memref<576x256xbf16, #tpu.memory_space<vmem>>, vector<16x128xbf16>
    tpu.vector_store %arg35[%c16_86, %c0_87], %146 {strides = array<i32>} : memref<576x256xbf16, #tpu.memory_space<vmem>>, vector<16x128xbf16>,
    %c2_88 = arith.constant 2 : index
    %c0_89 = arith.constant 0 : index
    %148 = vector.load %arg4[%c2_88, %c0_89] : memref<9x128xf32, #tpu.memory_space<vmem>>, vector<1x128xf32>
    %c3_i32 = arith.constant 3 : i32
    %149 = tpu.dynamic_rotate %135 by %c3_i32 dim 1 : vector<16x128xf32>, i32 -> vector<16x128xf32>
    %150 = vector.broadcast %148 : vector<1x128xf32> to vector<16x128xf32>
    %151 = arith.mulf %149, %150 : vector<16x128xf32>
    %152 = arith.truncf %151 : vector<16x128xf32> to vector<16x128xbf16>
    %c32_90 = arith.constant 32 : index
    %c0_91 = arith.constant 0 : index
    %153 = vector.load %arg35[%c32_90, %c0_91] : memref<576x256xbf16, #tpu.memory_space<vmem>>, vector<16x128xbf16>
    tpu.vector_store %arg35[%c32_90, %c0_91], %152 {strides = array<i32>} : memref<576x256xbf16, #tpu.memory_space<vmem>>, vector<16x128xbf16>,
    %c3_92 = arith.constant 3 : index
    %c0_93 = arith.constant 0 : index
    %154 = vector.load %arg4[%c3_92, %c0_93] : memref<9x128xf32, #tpu.memory_space<vmem>>, vector<1x128xf32>
    %c1_i32_94 = arith.constant 1 : i32
    %155 = tpu.dynamic_rotate %135 by %c1_i32_94 dim 1 : vector<16x128xf32>, i32 -> vector<16x128xf32>
    %156 = vector.broadcast %154 : vector<1x128xf32> to vector<16x128xf32>
    %157 = arith.mulf %155, %156 : vector<16x128xf32>
    %158 = arith.truncf %157 : vector<16x128xf32> to vector<16x128xbf16>
    %c48_95 = arith.constant 48 : index
    %c0_96 = arith.constant 0 : index
    %159 = vector.load %arg35[%c48_95, %c0_96] : memref<576x256xbf16, #tpu.memory_space<vmem>>, vector<16x128xbf16>
    tpu.vector_store %arg35[%c48_95, %c0_96], %158 {strides = array<i32>} : memref<576x256xbf16, #tpu.memory_space<vmem>>, vector<16x128xbf16>,
    %c4_97 = arith.constant 4 : index
    %c0_98 = arith.constant 0 : index
    %160 = vector.load %arg4[%c4_97, %c0_98] : memref<9x128xf32, #tpu.memory_space<vmem>>, vector<1x128xf32>
    %161 = vector.broadcast %160 : vector<1x128xf32> to vector<16x128xf32>
    %162 = arith.mulf %135, %161 : vector<16x128xf32>
    %163 = arith.truncf %162 : vector<16x128xf32> to vector<16x128xbf16>
    %c64_99 = arith.constant 64 : index
    %c0_100 = arith.constant 0 : index
    %164 = vector.load %arg35[%c64_99, %c0_100] : memref<576x256xbf16, #tpu.memory_space<vmem>>, vector<16x128xbf16>
    tpu.vector_store %arg35[%c64_99, %c0_100], %163 {strides = array<i32>} : memref<576x256xbf16, #tpu.memory_space<vmem>>, vector<16x128xbf16>,
    %c5_101 = arith.constant 5 : index
    %c0_102 = arith.constant 0 : index
    %165 = vector.load %arg4[%c5_101, %c0_102] : memref<9x128xf32, #tpu.memory_space<vmem>>, vector<1x128xf32>
    %c127_i32_103 = arith.constant 127 : i32
    %166 = tpu.dynamic_rotate %135 by %c127_i32_103 dim 1 : vector<16x128xf32>, i32 -> vector<16x128xf32>
    %167 = vector.broadcast %165 : vector<1x128xf32> to vector<16x128xf32>
    %168 = arith.mulf %166, %167 : vector<16x128xf32>
    %169 = arith.truncf %168 : vector<16x128xf32> to vector<16x128xbf16>
    %c80 = arith.constant 80 : index
    %c0_104 = arith.constant 0 : index
    %170 = vector.load %arg35[%c80, %c0_104] : memref<576x256xbf16, #tpu.memory_space<vmem>>, vector<16x128xbf16>
    tpu.vector_store %arg35[%c80, %c0_104], %169 {strides = array<i32>} : memref<576x256xbf16, #tpu.memory_space<vmem>>, vector<16x128xbf16>,
    %c6_105 = arith.constant 6 : index
    %c0_106 = arith.constant 0 : index
    %171 = vector.load %arg4[%c6_105, %c0_106] : memref<9x128xf32, #tpu.memory_space<vmem>>, vector<1x128xf32>
    %c125_i32 = arith.constant 125 : i32
    %172 = tpu.dynamic_rotate %135 by %c125_i32 dim 1 : vector<16x128xf32>, i32 -> vector<16x128xf32>
    %173 = vector.broadcast %171 : vector<1x128xf32> to vector<16x128xf32>
    %174 = arith.mulf %172, %173 : vector<16x128xf32>
    %175 = arith.truncf %174 : vector<16x128xf32> to vector<16x128xbf16>
    %c96 = arith.constant 96 : index
    %c0_107 = arith.constant 0 : index
    %176 = vector.load %arg35[%c96, %c0_107] : memref<576x256xbf16, #tpu.memory_space<vmem>>, vector<16x128xbf16>
    tpu.vector_store %arg35[%c96, %c0_107], %175 {strides = array<i32>} : memref<576x256xbf16, #tpu.memory_space<vmem>>, vector<16x128xbf16>,
    %c7_108 = arith.constant 7 : index
    %c0_109 = arith.constant 0 : index
    %177 = vector.load %arg4[%c7_108, %c0_109] : memref<9x128xf32, #tpu.memory_space<vmem>>, vector<1x128xf32>
    %c124_i32 = arith.constant 124 : i32
    %178 = tpu.dynamic_rotate %135 by %c124_i32 dim 1 : vector<16x128xf32>, i32 -> vector<16x128xf32>
    %179 = vector.broadcast %177 : vector<1x128xf32> to vector<16x128xf32>
    %180 = arith.mulf %178, %179 : vector<16x128xf32>
    %181 = arith.truncf %180 : vector<16x128xf32> to vector<16x128xbf16>
    %c112 = arith.constant 112 : index
    %c0_110 = arith.constant 0 : index
    %182 = vector.load %arg35[%c112, %c0_110] : memref<576x256xbf16, #tpu.memory_space<vmem>>, vector<16x128xbf16>
    tpu.vector_store %arg35[%c112, %c0_110], %181 {strides = array<i32>} : memref<576x256xbf16, #tpu.memory_space<vmem>>, vector<16x128xbf16>,
    %c8_111 = arith.constant 8 : index
    %c0_112 = arith.constant 0 : index
    %183 = vector.load %arg4[%c8_111, %c0_112] : memref<9x128xf32, #tpu.memory_space<vmem>>, vector<1x128xf32>
    %c123_i32 = arith.constant 123 : i32
    %184 = tpu.dynamic_rotate %135 by %c123_i32 dim 1 : vector<16x128xf32>, i32 -> vector<16x128xf32>
    %185 = vector.broadcast %183 : vector<1x128xf32> to vector<16x128xf32>
    %186 = arith.mulf %184, %185 : vector<16x128xf32>
    %187 = arith.truncf %186 : vector<16x128xf32> to vector<16x128xbf16>
    %c128 = arith.constant 128 : index
    %c0_113 = arith.constant 0 : index
    %188 = vector.load %arg35[%c128, %c0_113] : memref<576x256xbf16, #tpu.memory_space<vmem>>, vector<16x128xbf16>
    tpu.vector_store %arg35[%c128, %c0_113], %187 {strides = array<i32>} : memref<576x256xbf16, #tpu.memory_space<vmem>>, vector<16x128xbf16>,
    %c0_114 = arith.constant 0 : index
    %c0_115 = arith.constant 0 : index
    %189 = vector.load %arg35[%c0_114, %c0_115] : memref<576x256xbf16, #tpu.memory_space<vmem>>, vector<144x128xbf16>
    %c0_116 = arith.constant 0 : index
    %c0_117 = arith.constant 0 : index
    %190 = vector.load %arg16[%c0_116, %c0_117] : memref<32x144xbf16, #tpu.memory_space<vmem>>, vector<32x144xbf16>
    %cst_118 = arith.constant dense<0.000000e+00> : vector<32x128xf32>
    %191 = tpu.matmul %190, %189, %cst_118 {dimension_numbers = #tpu.dot_dimension_numbers<[1], [0], [0], [1], [0, 0, 1, 1], [], []>} : vector<32x144xbf16>, vector<144x128xbf16>, vector<32x128xf32> -> vector<32x128xf32>
    %c0_119 = arith.constant 0 : index
    %c0_120 = arith.constant 0 : index
    %192 = vector.load %arg17[%c0_119, %c0_120] : memref<32x1xf32, #tpu.memory_space<vmem>>, vector<32x1xf32>
    %193 = vector.broadcast %192 : vector<32x1xf32> to vector<32x128xf32>
    %194 = arith.addf %191, %193 : vector<32x128xf32>
    %cst_121 = arith.constant 0.000000e+00 : f32
    %195 = vector.broadcast %cst_121 : f32 to vector<32x128xf32>
    %196 = arith.cmpf oge, %194, %195 : vector<32x128xf32>
    %cst_122 = arith.constant 2.000000e-01 : f32
    %197 = vector.broadcast %cst_122 : f32 to vector<32x128xf32>
    %198 = arith.mulf %197, %194 : vector<32x128xf32>
    %199 = arith.select %196, %194, %198 : vector<32x128xi1>, vector<32x128xf32>
    %200 = arith.truncf %199 : vector<32x128xf32> to vector<32x128xbf16>
    %c0_123 = arith.constant 0 : index
    %c0_124 = arith.constant 0 : index
    %201 = vector.load %arg8[%c0_123, %c0_124] : memref<128x128xbf16, #tpu.memory_space<vmem>>, vector<128x128xbf16>
    %cst_125 = arith.constant dense<0.000000e+00> : vector<32x128xf32>
    %202 = tpu.matmul %200, %201, %cst_125 {dimension_numbers = #tpu.dot_dimension_numbers<[1], [0], [0], [1], [0, 0, 1, 1], [], []>} : vector<32x128xbf16>, vector<128x128xbf16>, vector<32x128xf32> -> vector<32x128xf32>
    %c0_126 = arith.constant 0 : index
    %c0_127 = arith.constant 0 : index
    %203 = vector.load %arg5[%c0_126, %c0_127] : memref<9x128xf32, #tpu.memory_space<vmem>>, vector<1x128xf32>
    %c3_i32_128 = arith.constant 3 : i32
    %204 = tpu.dynamic_rotate %202 by %c3_i32_128 dim 1 : vector<32x128xf32>, i32 -> vector<32x128xf32>
    %205 = vector.broadcast %203 : vector<1x128xf32> to vector<32x128xf32>
    %206 = arith.mulf %204, %205 : vector<32x128xf32>
    %207 = arith.truncf %206 : vector<32x128xf32> to vector<32x128xbf16>
    %c0_129 = arith.constant 0 : index
    %c0_130 = arith.constant 0 : index
    %208 = vector.load %arg35[%c0_129, %c0_130] : memref<576x256xbf16, #tpu.memory_space<vmem>>, vector<32x128xbf16>
    tpu.vector_store %arg35[%c0_129, %c0_130], %207 {strides = array<i32>} : memref<576x256xbf16, #tpu.memory_space<vmem>>, vector<32x128xbf16>,
    %c1_131 = arith.constant 1 : index
    %c0_132 = arith.constant 0 : index
    %209 = vector.load %arg5[%c1_131, %c0_132] : memref<9x128xf32, #tpu.memory_space<vmem>>, vector<1x128xf32>
    %c2_i32 = arith.constant 2 : i32
    %210 = tpu.dynamic_rotate %202 by %c2_i32 dim 1 : vector<32x128xf32>, i32 -> vector<32x128xf32>
    %211 = vector.broadcast %209 : vector<1x128xf32> to vector<32x128xf32>
    %212 = arith.mulf %210, %211 : vector<32x128xf32>
    %213 = arith.truncf %212 : vector<32x128xf32> to vector<32x128xbf16>
    %c32_133 = arith.constant 32 : index
    %c0_134 = arith.constant 0 : index
    %214 = vector.load %arg35[%c32_133, %c0_134] : memref<576x256xbf16, #tpu.memory_space<vmem>>, vector<32x128xbf16>
    tpu.vector_store %arg35[%c32_133, %c0_134], %213 {strides = array<i32>} : memref<576x256xbf16, #tpu.memory_space<vmem>>, vector<32x128xbf16>,
    %c2_135 = arith.constant 2 : index
    %c0_136 = arith.constant 0 : index
    %215 = vector.load %arg5[%c2_135, %c0_136] : memref<9x128xf32, #tpu.memory_space<vmem>>, vector<1x128xf32>
    %c1_i32_137 = arith.constant 1 : i32
    %216 = tpu.dynamic_rotate %202 by %c1_i32_137 dim 1 : vector<32x128xf32>, i32 -> vector<32x128xf32>
    %217 = vector.broadcast %215 : vector<1x128xf32> to vector<32x128xf32>
    %218 = arith.mulf %216, %217 : vector<32x128xf32>
    %219 = arith.truncf %218 : vector<32x128xf32> to vector<32x128xbf16>
    %c64_138 = arith.constant 64 : index
    %c0_139 = arith.constant 0 : index
    %220 = vector.load %arg35[%c64_138, %c0_139] : memref<576x256xbf16, #tpu.memory_space<vmem>>, vector<32x128xbf16>
    tpu.vector_store %arg35[%c64_138, %c0_139], %219 {strides = array<i32>} : memref<576x256xbf16, #tpu.memory_space<vmem>>, vector<32x128xbf16>,
    %c3_140 = arith.constant 3 : index
    %c0_141 = arith.constant 0 : index
    %221 = vector.load %arg5[%c3_140, %c0_141] : memref<9x128xf32, #tpu.memory_space<vmem>>, vector<1x128xf32>
    %c1_i32_142 = arith.constant 1 : i32
    %222 = tpu.dynamic_rotate %202 by %c1_i32_142 dim 1 : vector<32x128xf32>, i32 -> vector<32x128xf32>
    %223 = vector.broadcast %221 : vector<1x128xf32> to vector<32x128xf32>
    %224 = arith.mulf %222, %223 : vector<32x128xf32>
    %225 = arith.truncf %224 : vector<32x128xf32> to vector<32x128xbf16>
    %c96_143 = arith.constant 96 : index
    %c0_144 = arith.constant 0 : index
    %226 = vector.load %arg35[%c96_143, %c0_144] : memref<576x256xbf16, #tpu.memory_space<vmem>>, vector<32x128xbf16>
    tpu.vector_store %arg35[%c96_143, %c0_144], %225 {strides = array<i32>} : memref<576x256xbf16, #tpu.memory_space<vmem>>, vector<32x128xbf16>,
    %c4_145 = arith.constant 4 : index
    %c0_146 = arith.constant 0 : index
    %227 = vector.load %arg5[%c4_145, %c0_146] : memref<9x128xf32, #tpu.memory_space<vmem>>, vector<1x128xf32>
    %228 = vector.broadcast %227 : vector<1x128xf32> to vector<32x128xf32>
    %229 = arith.mulf %202, %228 : vector<32x128xf32>
    %230 = arith.truncf %229 : vector<32x128xf32> to vector<32x128xbf16>
    %c128_147 = arith.constant 128 : index
    %c0_148 = arith.constant 0 : index
    %231 = vector.load %arg35[%c128_147, %c0_148] : memref<576x256xbf16, #tpu.memory_space<vmem>>, vector<32x128xbf16>
    tpu.vector_store %arg35[%c128_147, %c0_148], %230 {strides = array<i32>} : memref<576x256xbf16, #tpu.memory_space<vmem>>, vector<32x128xbf16>,
    %c5_149 = arith.constant 5 : index
    %c0_150 = arith.constant 0 : index
    %232 = vector.load %arg5[%c5_149, %c0_150] : memref<9x128xf32, #tpu.memory_space<vmem>>, vector<1x128xf32>
    %c127_i32_151 = arith.constant 127 : i32
    %233 = tpu.dynamic_rotate %202 by %c127_i32_151 dim 1 : vector<32x128xf32>, i32 -> vector<32x128xf32>
    %234 = vector.broadcast %232 : vector<1x128xf32> to vector<32x128xf32>
    %235 = arith.mulf %233, %234 : vector<32x128xf32>
    %236 = arith.truncf %235 : vector<32x128xf32> to vector<32x128xbf16>
    %c160 = arith.constant 160 : index
    %c0_152 = arith.constant 0 : index
    %237 = vector.load %arg35[%c160, %c0_152] : memref<576x256xbf16, #tpu.memory_space<vmem>>, vector<32x128xbf16>
    tpu.vector_store %arg35[%c160, %c0_152], %236 {strides = array<i32>} : memref<576x256xbf16, #tpu.memory_space<vmem>>, vector<32x128xbf16>,
    %c6_153 = arith.constant 6 : index
    %c0_154 = arith.constant 0 : index
    %238 = vector.load %arg5[%c6_153, %c0_154] : memref<9x128xf32, #tpu.memory_space<vmem>>, vector<1x128xf32>
    %c127_i32_155 = arith.constant 127 : i32
    %239 = tpu.dynamic_rotate %202 by %c127_i32_155 dim 1 : vector<32x128xf32>, i32 -> vector<32x128xf32>
    %240 = vector.broadcast %238 : vector<1x128xf32> to vector<32x128xf32>
    %241 = arith.mulf %239, %240 : vector<32x128xf32>
    %242 = arith.truncf %241 : vector<32x128xf32> to vector<32x128xbf16>
    %c192 = arith.constant 192 : index
    %c0_156 = arith.constant 0 : index
    %243 = vector.load %arg35[%c192, %c0_156] : memref<576x256xbf16, #tpu.memory_space<vmem>>, vector<32x128xbf16>
    tpu.vector_store %arg35[%c192, %c0_156], %242 {strides = array<i32>} : memref<576x256xbf16, #tpu.memory_space<vmem>>, vector<32x128xbf16>,
    %c7_157 = arith.constant 7 : index
    %c0_158 = arith.constant 0 : index
    %244 = vector.load %arg5[%c7_157, %c0_158] : memref<9x128xf32, #tpu.memory_space<vmem>>, vector<1x128xf32>
    %c126_i32 = arith.constant 126 : i32
    %245 = tpu.dynamic_rotate %202 by %c126_i32 dim 1 : vector<32x128xf32>, i32 -> vector<32x128xf32>
    %246 = vector.broadcast %244 : vector<1x128xf32> to vector<32x128xf32>
    %247 = arith.mulf %245, %246 : vector<32x128xf32>
    %248 = arith.truncf %247 : vector<32x128xf32> to vector<32x128xbf16>
    %c224 = arith.constant 224 : index
    %c0_159 = arith.constant 0 : index
    %249 = vector.load %arg35[%c224, %c0_159] : memref<576x256xbf16, #tpu.memory_space<vmem>>, vector<32x128xbf16>
    tpu.vector_store %arg35[%c224, %c0_159], %248 {strides = array<i32>} : memref<576x256xbf16, #tpu.memory_space<vmem>>, vector<32x128xbf16>,
    %c8_160 = arith.constant 8 : index
    %c0_161 = arith.constant 0 : index
    %250 = vector.load %arg5[%c8_160, %c0_161] : memref<9x128xf32, #tpu.memory_space<vmem>>, vector<1x128xf32>
    %c125_i32_162 = arith.constant 125 : i32
    %251 = tpu.dynamic_rotate %202 by %c125_i32_162 dim 1 : vector<32x128xf32>, i32 -> vector<32x128xf32>
    %252 = vector.broadcast %250 : vector<1x128xf32> to vector<32x128xf32>
    %253 = arith.mulf %251, %252 : vector<32x128xf32>
    %254 = arith.truncf %253 : vector<32x128xf32> to vector<32x128xbf16>
    %c256 = arith.constant 256 : index
    %c0_163 = arith.constant 0 : index
    %255 = vector.load %arg35[%c256, %c0_163] : memref<576x256xbf16, #tpu.memory_space<vmem>>, vector<32x128xbf16>
    tpu.vector_store %arg35[%c256, %c0_163], %254 {strides = array<i32>} : memref<576x256xbf16, #tpu.memory_space<vmem>>, vector<32x128xbf16>,
    %c0_164 = arith.constant 0 : index
    %c0_165 = arith.constant 0 : index
    %256 = vector.load %arg35[%c0_164, %c0_165] : memref<576x256xbf16, #tpu.memory_space<vmem>>, vector<288x128xbf16>
    %c0_166 = arith.constant 0 : index
    %c0_167 = arith.constant 0 : index
    %257 = vector.load %arg18[%c0_166, %c0_167] : memref<64x288xbf16, #tpu.memory_space<vmem>>, vector<64x288xbf16>
    %cst_168 = arith.constant dense<0.000000e+00> : vector<64x128xf32>
    %258 = tpu.matmul %257, %256, %cst_168 {dimension_numbers = #tpu.dot_dimension_numbers<[1], [0], [0], [1], [0, 0, 1, 1], [], []>} : vector<64x288xbf16>, vector<288x128xbf16>, vector<64x128xf32> -> vector<64x128xf32>
    %c0_169 = arith.constant 0 : index
    %c0_170 = arith.constant 0 : index
    %259 = vector.load %arg19[%c0_169, %c0_170] : memref<64x1xf32, #tpu.memory_space<vmem>>, vector<64x1xf32>
    %260 = vector.broadcast %259 : vector<64x1xf32> to vector<64x128xf32>
    %261 = arith.addf %258, %260 : vector<64x128xf32>
    %cst_171 = arith.constant 0.000000e+00 : f32
    %262 = vector.broadcast %cst_171 : f32 to vector<64x128xf32>
    %263 = arith.cmpf oge, %261, %262 : vector<64x128xf32>
    %cst_172 = arith.constant 2.000000e-01 : f32
    %264 = vector.broadcast %cst_172 : f32 to vector<64x128xf32>
    %265 = arith.mulf %264, %261 : vector<64x128xf32>
    %266 = arith.select %263, %261, %265 : vector<64x128xi1>, vector<64x128xf32>
    %c0_173 = arith.constant 0 : index
    %c0_174 = arith.constant 0 : index
    %267 = vector.load %arg5[%c0_173, %c0_174] : memref<9x128xf32, #tpu.memory_space<vmem>>, vector<1x128xf32>
    %c3_i32_175 = arith.constant 3 : i32
    %268 = tpu.dynamic_rotate %266 by %c3_i32_175 dim 1 : vector<64x128xf32>, i32 -> vector<64x128xf32>
    %269 = vector.broadcast %267 : vector<1x128xf32> to vector<64x128xf32>
    %270 = arith.mulf %268, %269 : vector<64x128xf32>
    %271 = arith.truncf %270 : vector<64x128xf32> to vector<64x128xbf16>
    %c0_176 = arith.constant 0 : index
    %c0_177 = arith.constant 0 : index
    %272 = vector.load %arg35[%c0_176, %c0_177] : memref<576x256xbf16, #tpu.memory_space<vmem>>, vector<64x128xbf16>
    tpu.vector_store %arg35[%c0_176, %c0_177], %271 {strides = array<i32>} : memref<576x256xbf16, #tpu.memory_space<vmem>>, vector<64x128xbf16>,
    %c1_178 = arith.constant 1 : index
    %c0_179 = arith.constant 0 : index
    %273 = vector.load %arg5[%c1_178, %c0_179] : memref<9x128xf32, #tpu.memory_space<vmem>>, vector<1x128xf32>
    %c2_i32_180 = arith.constant 2 : i32
    %274 = tpu.dynamic_rotate %266 by %c2_i32_180 dim 1 : vector<64x128xf32>, i32 -> vector<64x128xf32>
    %275 = vector.broadcast %273 : vector<1x128xf32> to vector<64x128xf32>
    %276 = arith.mulf %274, %275 : vector<64x128xf32>
    %277 = arith.truncf %276 : vector<64x128xf32> to vector<64x128xbf16>
    %c64_181 = arith.constant 64 : index
    %c0_182 = arith.constant 0 : index
    %278 = vector.load %arg35[%c64_181, %c0_182] : memref<576x256xbf16, #tpu.memory_space<vmem>>, vector<64x128xbf16>
    tpu.vector_store %arg35[%c64_181, %c0_182], %277 {strides = array<i32>} : memref<576x256xbf16, #tpu.memory_space<vmem>>, vector<64x128xbf16>,
    %c2_183 = arith.constant 2 : index
    %c0_184 = arith.constant 0 : index
    %279 = vector.load %arg5[%c2_183, %c0_184] : memref<9x128xf32, #tpu.memory_space<vmem>>, vector<1x128xf32>
    %c1_i32_185 = arith.constant 1 : i32
    %280 = tpu.dynamic_rotate %266 by %c1_i32_185 dim 1 : vector<64x128xf32>, i32 -> vector<64x128xf32>
    %281 = vector.broadcast %279 : vector<1x128xf32> to vector<64x128xf32>
    %282 = arith.mulf %280, %281 : vector<64x128xf32>
    %283 = arith.truncf %282 : vector<64x128xf32> to vector<64x128xbf16>
    %c128_186 = arith.constant 128 : index
    %c0_187 = arith.constant 0 : index
    %284 = vector.load %arg35[%c128_186, %c0_187] : memref<576x256xbf16, #tpu.memory_space<vmem>>, vector<64x128xbf16>
    tpu.vector_store %arg35[%c128_186, %c0_187], %283 {strides = array<i32>} : memref<576x256xbf16, #tpu.memory_space<vmem>>, vector<64x128xbf16>,
    %c3_188 = arith.constant 3 : index
    %c0_189 = arith.constant 0 : index
    %285 = vector.load %arg5[%c3_188, %c0_189] : memref<9x128xf32, #tpu.memory_space<vmem>>, vector<1x128xf32>
    %c1_i32_190 = arith.constant 1 : i32
    %286 = tpu.dynamic_rotate %266 by %c1_i32_190 dim 1 : vector<64x128xf32>, i32 -> vector<64x128xf32>
    %287 = vector.broadcast %285 : vector<1x128xf32> to vector<64x128xf32>
    %288 = arith.mulf %286, %287 : vector<64x128xf32>
    %289 = arith.truncf %288 : vector<64x128xf32> to vector<64x128xbf16>
    %c192_191 = arith.constant 192 : index
    %c0_192 = arith.constant 0 : index
    %290 = vector.load %arg35[%c192_191, %c0_192] : memref<576x256xbf16, #tpu.memory_space<vmem>>, vector<64x128xbf16>
    tpu.vector_store %arg35[%c192_191, %c0_192], %289 {strides = array<i32>} : memref<576x256xbf16, #tpu.memory_space<vmem>>, vector<64x128xbf16>,
    %c4_193 = arith.constant 4 : index
    %c0_194 = arith.constant 0 : index
    %291 = vector.load %arg5[%c4_193, %c0_194] : memref<9x128xf32, #tpu.memory_space<vmem>>, vector<1x128xf32>
    %292 = vector.broadcast %291 : vector<1x128xf32> to vector<64x128xf32>
    %293 = arith.mulf %266, %292 : vector<64x128xf32>
    %294 = arith.truncf %293 : vector<64x128xf32> to vector<64x128xbf16>
    %c256_195 = arith.constant 256 : index
    %c0_196 = arith.constant 0 : index
    %295 = vector.load %arg35[%c256_195, %c0_196] : memref<576x256xbf16, #tpu.memory_space<vmem>>, vector<64x128xbf16>
    tpu.vector_store %arg35[%c256_195, %c0_196], %294 {strides = array<i32>} : memref<576x256xbf16, #tpu.memory_space<vmem>>, vector<64x128xbf16>,
    %c5_197 = arith.constant 5 : index
    %c0_198 = arith.constant 0 : index
    %296 = vector.load %arg5[%c5_197, %c0_198] : memref<9x128xf32, #tpu.memory_space<vmem>>, vector<1x128xf32>
    %c127_i32_199 = arith.constant 127 : i32
    %297 = tpu.dynamic_rotate %266 by %c127_i32_199 dim 1 : vector<64x128xf32>, i32 -> vector<64x128xf32>
    %298 = vector.broadcast %296 : vector<1x128xf32> to vector<64x128xf32>
    %299 = arith.mulf %297, %298 : vector<64x128xf32>
    %300 = arith.truncf %299 : vector<64x128xf32> to vector<64x128xbf16>
    %c320 = arith.constant 320 : index
    %c0_200 = arith.constant 0 : index
    %301 = vector.load %arg35[%c320, %c0_200] : memref<576x256xbf16, #tpu.memory_space<vmem>>, vector<64x128xbf16>
    tpu.vector_store %arg35[%c320, %c0_200], %300 {strides = array<i32>} : memref<576x256xbf16, #tpu.memory_space<vmem>>, vector<64x128xbf16>,
    %c6_201 = arith.constant 6 : index
    %c0_202 = arith.constant 0 : index
    %302 = vector.load %arg5[%c6_201, %c0_202] : memref<9x128xf32, #tpu.memory_space<vmem>>, vector<1x128xf32>
    %c127_i32_203 = arith.constant 127 : i32
    %303 = tpu.dynamic_rotate %266 by %c127_i32_203 dim 1 : vector<64x128xf32>, i32 -> vector<64x128xf32>
    %304 = vector.broadcast %302 : vector<1x128xf32> to vector<64x128xf32>
    %305 = arith.mulf %303, %304 : vector<64x128xf32>
    %306 = arith.truncf %305 : vector<64x128xf32> to vector<64x128xbf16>
    %c384 = arith.constant 384 : index
    %c0_204 = arith.constant 0 : index
    %307 = vector.load %arg35[%c384, %c0_204] : memref<576x256xbf16, #tpu.memory_space<vmem>>, vector<64x128xbf16>
    tpu.vector_store %arg35[%c384, %c0_204], %306 {strides = array<i32>} : memref<576x256xbf16, #tpu.memory_space<vmem>>, vector<64x128xbf16>,
    %c7_205 = arith.constant 7 : index
    %c0_206 = arith.constant 0 : index
    %308 = vector.load %arg5[%c7_205, %c0_206] : memref<9x128xf32, #tpu.memory_space<vmem>>, vector<1x128xf32>
    %c126_i32_207 = arith.constant 126 : i32
    %309 = tpu.dynamic_rotate %266 by %c126_i32_207 dim 1 : vector<64x128xf32>, i32 -> vector<64x128xf32>
    %310 = vector.broadcast %308 : vector<1x128xf32> to vector<64x128xf32>
    %311 = arith.mulf %309, %310 : vector<64x128xf32>
    %312 = arith.truncf %311 : vector<64x128xf32> to vector<64x128xbf16>
    %c448 = arith.constant 448 : index
    %c0_208 = arith.constant 0 : index
    %313 = vector.load %arg35[%c448, %c0_208] : memref<576x256xbf16, #tpu.memory_space<vmem>>, vector<64x128xbf16>
    tpu.vector_store %arg35[%c448, %c0_208], %312 {strides = array<i32>} : memref<576x256xbf16, #tpu.memory_space<vmem>>, vector<64x128xbf16>,
    %c8_209 = arith.constant 8 : index
    %c0_210 = arith.constant 0 : index
    %314 = vector.load %arg5[%c8_209, %c0_210] : memref<9x128xf32, #tpu.memory_space<vmem>>, vector<1x128xf32>
    %c125_i32_211 = arith.constant 125 : i32
    %315 = tpu.dynamic_rotate %266 by %c125_i32_211 dim 1 : vector<64x128xf32>, i32 -> vector<64x128xf32>
    %316 = vector.broadcast %314 : vector<1x128xf32> to vector<64x128xf32>
    %317 = arith.mulf %315, %316 : vector<64x128xf32>
    %318 = arith.truncf %317 : vector<64x128xf32> to vector<64x128xbf16>
    %c512 = arith.constant 512 : index
    %c0_212 = arith.constant 0 : index
    %319 = vector.load %arg35[%c512, %c0_212] : memref<576x256xbf16, #tpu.memory_space<vmem>>, vector<64x128xbf16>
    tpu.vector_store %arg35[%c512, %c0_212], %318 {strides = array<i32>} : memref<576x256xbf16, #tpu.memory_space<vmem>>, vector<64x128xbf16>,
    %c0_213 = arith.constant 0 : index
    %c0_214 = arith.constant 0 : index
    %320 = vector.load %arg35[%c0_213, %c0_214] : memref<576x256xbf16, #tpu.memory_space<vmem>>, vector<576x128xbf16>
    %c0_215 = arith.constant 0 : index
    %c0_216 = arith.constant 0 : index
    %321 = vector.load %arg20[%c0_215, %c0_216] : memref<32x576xbf16, #tpu.memory_space<vmem>>, vector<32x576xbf16>
    %cst_217 = arith.constant dense<0.000000e+00> : vector<32x128xf32>
    %322 = tpu.matmul %321, %320, %cst_217 {dimension_numbers = #tpu.dot_dimension_numbers<[1], [0], [0], [1], [0, 0, 1, 1], [], []>} : vector<32x576xbf16>, vector<576x128xbf16>, vector<32x128xf32> -> vector<32x128xf32>
    %c0_218 = arith.constant 0 : index
    %c0_219 = arith.constant 0 : index
    %323 = vector.load %arg21[%c0_218, %c0_219] : memref<32x1xf32, #tpu.memory_space<vmem>>, vector<32x1xf32>
    %324 = vector.broadcast %323 : vector<32x1xf32> to vector<32x128xf32>
    %325 = arith.addf %322, %324 : vector<32x128xf32>
    %cst_220 = arith.constant 0.000000e+00 : f32
    %326 = vector.broadcast %cst_220 : f32 to vector<32x128xf32>
    %327 = arith.cmpf oge, %325, %326 : vector<32x128xf32>
    %cst_221 = arith.constant 2.000000e-01 : f32
    %328 = vector.broadcast %cst_221 : f32 to vector<32x128xf32>
    %329 = arith.mulf %328, %325 : vector<32x128xf32>
    %330 = arith.select %327, %325, %329 : vector<32x128xi1>, vector<32x128xf32>
    %331 = arith.truncf %330 : vector<32x128xf32> to vector<32x128xbf16>
    %c0_222 = arith.constant 0 : index
    %c0_223 = arith.constant 0 : index
    %332 = vector.load %arg11[%c0_222, %c0_223] : memref<128x128xbf16, #tpu.memory_space<vmem>>, vector<128x128xbf16>
    %cst_224 = arith.constant dense<0.000000e+00> : vector<32x128xf32>
    %333 = tpu.matmul %331, %332, %cst_224 {dimension_numbers = #tpu.dot_dimension_numbers<[1], [0], [0], [1], [0, 0, 1, 1], [], []>} : vector<32x128xbf16>, vector<128x128xbf16>, vector<32x128xf32> -> vector<32x128xf32>
    %c0_225 = arith.constant 0 : index
    %c0_226 = arith.constant 0 : index
    %334 = vector.load %arg4[%c0_225, %c0_226] : memref<9x128xf32, #tpu.memory_space<vmem>>, vector<1x128xf32>
    %c5_i32_227 = arith.constant 5 : i32
    %335 = tpu.dynamic_rotate %333 by %c5_i32_227 dim 1 : vector<32x128xf32>, i32 -> vector<32x128xf32>
    %336 = vector.broadcast %334 : vector<1x128xf32> to vector<32x128xf32>
    %337 = arith.mulf %335, %336 : vector<32x128xf32>
    %338 = arith.truncf %337 : vector<32x128xf32> to vector<32x128xbf16>
    %c0_228 = arith.constant 0 : index
    %c0_229 = arith.constant 0 : index
    %339 = vector.load %arg35[%c0_228, %c0_229] : memref<576x256xbf16, #tpu.memory_space<vmem>>, vector<32x128xbf16>
    tpu.vector_store %arg35[%c0_228, %c0_229], %338 {strides = array<i32>} : memref<576x256xbf16, #tpu.memory_space<vmem>>, vector<32x128xbf16>,
    %c5_i32_230 = arith.constant 5 : i32
    %340 = tpu.dynamic_rotate %199 by %c5_i32_230 dim 1 : vector<32x128xf32>, i32 -> vector<32x128xf32>
    %341 = vector.broadcast %334 : vector<1x128xf32> to vector<32x128xf32>
    %342 = arith.mulf %340, %341 : vector<32x128xf32>
    %343 = arith.truncf %342 : vector<32x128xf32> to vector<32x128xbf16>
    %c32_231 = arith.constant 32 : index
    %c0_232 = arith.constant 0 : index
    %344 = vector.load %arg35[%c32_231, %c0_232] : memref<576x256xbf16, #tpu.memory_space<vmem>>, vector<32x128xbf16>
    tpu.vector_store %arg35[%c32_231, %c0_232], %343 {strides = array<i32>} : memref<576x256xbf16, #tpu.memory_space<vmem>>, vector<32x128xbf16>,
    %c1_233 = arith.constant 1 : index
    %c0_234 = arith.constant 0 : index
    %345 = vector.load %arg4[%c1_233, %c0_234] : memref<9x128xf32, #tpu.memory_space<vmem>>, vector<1x128xf32>
    %c4_i32_235 = arith.constant 4 : i32
    %346 = tpu.dynamic_rotate %333 by %c4_i32_235 dim 1 : vector<32x128xf32>, i32 -> vector<32x128xf32>
    %347 = vector.broadcast %345 : vector<1x128xf32> to vector<32x128xf32>
    %348 = arith.mulf %346, %347 : vector<32x128xf32>
    %349 = arith.truncf %348 : vector<32x128xf32> to vector<32x128xbf16>
    %c64_236 = arith.constant 64 : index
    %c0_237 = arith.constant 0 : index
    %350 = vector.load %arg35[%c64_236, %c0_237] : memref<576x256xbf16, #tpu.memory_space<vmem>>, vector<32x128xbf16>
    tpu.vector_store %arg35[%c64_236, %c0_237], %349 {strides = array<i32>} : memref<576x256xbf16, #tpu.memory_space<vmem>>, vector<32x128xbf16>,
    %c4_i32_238 = arith.constant 4 : i32
    %351 = tpu.dynamic_rotate %199 by %c4_i32_238 dim 1 : vector<32x128xf32>, i32 -> vector<32x128xf32>
    %352 = vector.broadcast %345 : vector<1x128xf32> to vector<32x128xf32>
    %353 = arith.mulf %351, %352 : vector<32x128xf32>
    %354 = arith.truncf %353 : vector<32x128xf32> to vector<32x128xbf16>
    %c96_239 = arith.constant 96 : index
    %c0_240 = arith.constant 0 : index
    %355 = vector.load %arg35[%c96_239, %c0_240] : memref<576x256xbf16, #tpu.memory_space<vmem>>, vector<32x128xbf16>
    tpu.vector_store %arg35[%c96_239, %c0_240], %354 {strides = array<i32>} : memref<576x256xbf16, #tpu.memory_space<vmem>>, vector<32x128xbf16>,
    %c2_241 = arith.constant 2 : index
    %c0_242 = arith.constant 0 : index
    %356 = vector.load %arg4[%c2_241, %c0_242] : memref<9x128xf32, #tpu.memory_space<vmem>>, vector<1x128xf32>
    %c3_i32_243 = arith.constant 3 : i32
    %357 = tpu.dynamic_rotate %333 by %c3_i32_243 dim 1 : vector<32x128xf32>, i32 -> vector<32x128xf32>
    %358 = vector.broadcast %356 : vector<1x128xf32> to vector<32x128xf32>
    %359 = arith.mulf %357, %358 : vector<32x128xf32>
    %360 = arith.truncf %359 : vector<32x128xf32> to vector<32x128xbf16>
    %c128_244 = arith.constant 128 : index
    %c0_245 = arith.constant 0 : index
    %361 = vector.load %arg35[%c128_244, %c0_245] : memref<576x256xbf16, #tpu.memory_space<vmem>>, vector<32x128xbf16>
    tpu.vector_store %arg35[%c128_244, %c0_245], %360 {strides = array<i32>} : memref<576x256xbf16, #tpu.memory_space<vmem>>, vector<32x128xbf16>,
    %c3_i32_246 = arith.constant 3 : i32
    %362 = tpu.dynamic_rotate %199 by %c3_i32_246 dim 1 : vector<32x128xf32>, i32 -> vector<32x128xf32>
    %363 = vector.broadcast %356 : vector<1x128xf32> to vector<32x128xf32>
    %364 = arith.mulf %362, %363 : vector<32x128xf32>
    %365 = arith.truncf %364 : vector<32x128xf32> to vector<32x128xbf16>
    %c160_247 = arith.constant 160 : index
    %c0_248 = arith.constant 0 : index
    %366 = vector.load %arg35[%c160_247, %c0_248] : memref<576x256xbf16, #tpu.memory_space<vmem>>, vector<32x128xbf16>
    tpu.vector_store %arg35[%c160_247, %c0_248], %365 {strides = array<i32>} : memref<576x256xbf16, #tpu.memory_space<vmem>>, vector<32x128xbf16>,
    %c3_249 = arith.constant 3 : index
    %c0_250 = arith.constant 0 : index
    %367 = vector.load %arg4[%c3_249, %c0_250] : memref<9x128xf32, #tpu.memory_space<vmem>>, vector<1x128xf32>
    %c1_i32_251 = arith.constant 1 : i32
    %368 = tpu.dynamic_rotate %333 by %c1_i32_251 dim 1 : vector<32x128xf32>, i32 -> vector<32x128xf32>
    %369 = vector.broadcast %367 : vector<1x128xf32> to vector<32x128xf32>
    %370 = arith.mulf %368, %369 : vector<32x128xf32>
    %371 = arith.truncf %370 : vector<32x128xf32> to vector<32x128xbf16>
    %c192_252 = arith.constant 192 : index
    %c0_253 = arith.constant 0 : index
    %372 = vector.load %arg35[%c192_252, %c0_253] : memref<576x256xbf16, #tpu.memory_space<vmem>>, vector<32x128xbf16>
    tpu.vector_store %arg35[%c192_252, %c0_253], %371 {strides = array<i32>} : memref<576x256xbf16, #tpu.memory_space<vmem>>, vector<32x128xbf16>,
    %c1_i32_254 = arith.constant 1 : i32
    %373 = tpu.dynamic_rotate %199 by %c1_i32_254 dim 1 : vector<32x128xf32>, i32 -> vector<32x128xf32>
    %374 = vector.broadcast %367 : vector<1x128xf32> to vector<32x128xf32>
    %375 = arith.mulf %373, %374 : vector<32x128xf32>
    %376 = arith.truncf %375 : vector<32x128xf32> to vector<32x128xbf16>
    %c224_255 = arith.constant 224 : index
    %c0_256 = arith.constant 0 : index
    %377 = vector.load %arg35[%c224_255, %c0_256] : memref<576x256xbf16, #tpu.memory_space<vmem>>, vector<32x128xbf16>
    tpu.vector_store %arg35[%c224_255, %c0_256], %376 {strides = array<i32>} : memref<576x256xbf16, #tpu.memory_space<vmem>>, vector<32x128xbf16>,
    %c4_257 = arith.constant 4 : index
    %c0_258 = arith.constant 0 : index
    %378 = vector.load %arg4[%c4_257, %c0_258] : memref<9x128xf32, #tpu.memory_space<vmem>>, vector<1x128xf32>
    %379 = vector.broadcast %378 : vector<1x128xf32> to vector<32x128xf32>
    %380 = arith.mulf %333, %379 : vector<32x128xf32>
    %381 = arith.truncf %380 : vector<32x128xf32> to vector<32x128xbf16>
    %c256_259 = arith.constant 256 : index
    %c0_260 = arith.constant 0 : index
    %382 = vector.load %arg35[%c256_259, %c0_260] : memref<576x256xbf16, #tpu.memory_space<vmem>>, vector<32x128xbf16>
    tpu.vector_store %arg35[%c256_259, %c0_260], %381 {strides = array<i32>} : memref<576x256xbf16, #tpu.memory_space<vmem>>, vector<32x128xbf16>,
    %383 = vector.broadcast %378 : vector<1x128xf32> to vector<32x128xf32>
    %384 = arith.mulf %199, %383 : vector<32x128xf32>
    %385 = arith.truncf %384 : vector<32x128xf32> to vector<32x128xbf16>
    %c288 = arith.constant 288 : index
    %c0_261 = arith.constant 0 : index
    %386 = vector.load %arg35[%c288, %c0_261] : memref<576x256xbf16, #tpu.memory_space<vmem>>, vector<32x128xbf16>
    tpu.vector_store %arg35[%c288, %c0_261], %385 {strides = array<i32>} : memref<576x256xbf16, #tpu.memory_space<vmem>>, vector<32x128xbf16>,
    %c5_262 = arith.constant 5 : index
    %c0_263 = arith.constant 0 : index
    %387 = vector.load %arg4[%c5_262, %c0_263] : memref<9x128xf32, #tpu.memory_space<vmem>>, vector<1x128xf32>
    %c127_i32_264 = arith.constant 127 : i32
    %388 = tpu.dynamic_rotate %333 by %c127_i32_264 dim 1 : vector<32x128xf32>, i32 -> vector<32x128xf32>
    %389 = vector.broadcast %387 : vector<1x128xf32> to vector<32x128xf32>
    %390 = arith.mulf %388, %389 : vector<32x128xf32>
    %391 = arith.truncf %390 : vector<32x128xf32> to vector<32x128xbf16>
    %c320_265 = arith.constant 320 : index
    %c0_266 = arith.constant 0 : index
    %392 = vector.load %arg35[%c320_265, %c0_266] : memref<576x256xbf16, #tpu.memory_space<vmem>>, vector<32x128xbf16>
    tpu.vector_store %arg35[%c320_265, %c0_266], %391 {strides = array<i32>} : memref<576x256xbf16, #tpu.memory_space<vmem>>, vector<32x128xbf16>,
    %c127_i32_267 = arith.constant 127 : i32
    %393 = tpu.dynamic_rotate %199 by %c127_i32_267 dim 1 : vector<32x128xf32>, i32 -> vector<32x128xf32>
    %394 = vector.broadcast %387 : vector<1x128xf32> to vector<32x128xf32>
    %395 = arith.mulf %393, %394 : vector<32x128xf32>
    %396 = arith.truncf %395 : vector<32x128xf32> to vector<32x128xbf16>
    %c352 = arith.constant 352 : index
    %c0_268 = arith.constant 0 : index
    %397 = vector.load %arg35[%c352, %c0_268] : memref<576x256xbf16, #tpu.memory_space<vmem>>, vector<32x128xbf16>
    tpu.vector_store %arg35[%c352, %c0_268], %396 {strides = array<i32>} : memref<576x256xbf16, #tpu.memory_space<vmem>>, vector<32x128xbf16>,
    %c6_269 = arith.constant 6 : index
    %c0_270 = arith.constant 0 : index
    %398 = vector.load %arg4[%c6_269, %c0_270] : memref<9x128xf32, #tpu.memory_space<vmem>>, vector<1x128xf32>
    %c125_i32_271 = arith.constant 125 : i32
    %399 = tpu.dynamic_rotate %333 by %c125_i32_271 dim 1 : vector<32x128xf32>, i32 -> vector<32x128xf32>
    %400 = vector.broadcast %398 : vector<1x128xf32> to vector<32x128xf32>
    %401 = arith.mulf %399, %400 : vector<32x128xf32>
    %402 = arith.truncf %401 : vector<32x128xf32> to vector<32x128xbf16>
    %c384_272 = arith.constant 384 : index
    %c0_273 = arith.constant 0 : index
    %403 = vector.load %arg35[%c384_272, %c0_273] : memref<576x256xbf16, #tpu.memory_space<vmem>>, vector<32x128xbf16>
    tpu.vector_store %arg35[%c384_272, %c0_273], %402 {strides = array<i32>} : memref<576x256xbf16, #tpu.memory_space<vmem>>, vector<32x128xbf16>,
    %c125_i32_274 = arith.constant 125 : i32
    %404 = tpu.dynamic_rotate %199 by %c125_i32_274 dim 1 : vector<32x128xf32>, i32 -> vector<32x128xf32>
    %405 = vector.broadcast %398 : vector<1x128xf32> to vector<32x128xf32>
    %406 = arith.mulf %404, %405 : vector<32x128xf32>
    %407 = arith.truncf %406 : vector<32x128xf32> to vector<32x128xbf16>
    %c416 = arith.constant 416 : index
    %c0_275 = arith.constant 0 : index
    %408 = vector.load %arg35[%c416, %c0_275] : memref<576x256xbf16, #tpu.memory_space<vmem>>, vector<32x128xbf16>
    tpu.vector_store %arg35[%c416, %c0_275], %407 {strides = array<i32>} : memref<576x256xbf16, #tpu.memory_space<vmem>>, vector<32x128xbf16>,
    %c7_276 = arith.constant 7 : index
    %c0_277 = arith.constant 0 : index
    %409 = vector.load %arg4[%c7_276, %c0_277] : memref<9x128xf32, #tpu.memory_space<vmem>>, vector<1x128xf32>
    %c124_i32_278 = arith.constant 124 : i32
    %410 = tpu.dynamic_rotate %333 by %c124_i32_278 dim 1 : vector<32x128xf32>, i32 -> vector<32x128xf32>
    %411 = vector.broadcast %409 : vector<1x128xf32> to vector<32x128xf32>
    %412 = arith.mulf %410, %411 : vector<32x128xf32>
    %413 = arith.truncf %412 : vector<32x128xf32> to vector<32x128xbf16>
    %c448_279 = arith.constant 448 : index
    %c0_280 = arith.constant 0 : index
    %414 = vector.load %arg35[%c448_279, %c0_280] : memref<576x256xbf16, #tpu.memory_space<vmem>>, vector<32x128xbf16>
    tpu.vector_store %arg35[%c448_279, %c0_280], %413 {strides = array<i32>} : memref<576x256xbf16, #tpu.memory_space<vmem>>, vector<32x128xbf16>,
    %c124_i32_281 = arith.constant 124 : i32
    %415 = tpu.dynamic_rotate %199 by %c124_i32_281 dim 1 : vector<32x128xf32>, i32 -> vector<32x128xf32>
    %416 = vector.broadcast %409 : vector<1x128xf32> to vector<32x128xf32>
    %417 = arith.mulf %415, %416 : vector<32x128xf32>
    %418 = arith.truncf %417 : vector<32x128xf32> to vector<32x128xbf16>
    %c480 = arith.constant 480 : index
    %c0_282 = arith.constant 0 : index
    %419 = vector.load %arg35[%c480, %c0_282] : memref<576x256xbf16, #tpu.memory_space<vmem>>, vector<32x128xbf16>
    tpu.vector_store %arg35[%c480, %c0_282], %418 {strides = array<i32>} : memref<576x256xbf16, #tpu.memory_space<vmem>>, vector<32x128xbf16>,
    %c8_283 = arith.constant 8 : index
    %c0_284 = arith.constant 0 : index
    %420 = vector.load %arg4[%c8_283, %c0_284] : memref<9x128xf32, #tpu.memory_space<vmem>>, vector<1x128xf32>
    %c123_i32_285 = arith.constant 123 : i32
    %421 = tpu.dynamic_rotate %333 by %c123_i32_285 dim 1 : vector<32x128xf32>, i32 -> vector<32x128xf32>
    %422 = vector.broadcast %420 : vector<1x128xf32> to vector<32x128xf32>
    %423 = arith.mulf %421, %422 : vector<32x128xf32>
    %424 = arith.truncf %423 : vector<32x128xf32> to vector<32x128xbf16>
    %c512_286 = arith.constant 512 : index
    %c0_287 = arith.constant 0 : index
    %425 = vector.load %arg35[%c512_286, %c0_287] : memref<576x256xbf16, #tpu.memory_space<vmem>>, vector<32x128xbf16>
    tpu.vector_store %arg35[%c512_286, %c0_287], %424 {strides = array<i32>} : memref<576x256xbf16, #tpu.memory_space<vmem>>, vector<32x128xbf16>,
    %c123_i32_288 = arith.constant 123 : i32
    %426 = tpu.dynamic_rotate %199 by %c123_i32_288 dim 1 : vector<32x128xf32>, i32 -> vector<32x128xf32>
    %427 = vector.broadcast %420 : vector<1x128xf32> to vector<32x128xf32>
    %428 = arith.mulf %426, %427 : vector<32x128xf32>
    %429 = arith.truncf %428 : vector<32x128xf32> to vector<32x128xbf16>
    %c544 = arith.constant 544 : index
    %c0_289 = arith.constant 0 : index
    %430 = vector.load %arg35[%c544, %c0_289] : memref<576x256xbf16, #tpu.memory_space<vmem>>, vector<32x128xbf16>
    tpu.vector_store %arg35[%c544, %c0_289], %429 {strides = array<i32>} : memref<576x256xbf16, #tpu.memory_space<vmem>>, vector<32x128xbf16>,
    %c0_290 = arith.constant 0 : index
    %c0_291 = arith.constant 0 : index
    %431 = vector.load %arg35[%c0_290, %c0_291] : memref<576x256xbf16, #tpu.memory_space<vmem>>, vector<576x128xbf16>
    %c0_292 = arith.constant 0 : index
    %c0_293 = arith.constant 0 : index
    %432 = vector.load %arg26[%c0_292, %c0_293] : memref<32x576xbf16, #tpu.memory_space<vmem>>, vector<32x576xbf16>
    %cst_294 = arith.constant dense<0.000000e+00> : vector<32x128xf32>
    %433 = tpu.matmul %432, %431, %cst_294 {dimension_numbers = #tpu.dot_dimension_numbers<[1], [0], [0], [1], [0, 0, 1, 1], [], []>} : vector<32x576xbf16>, vector<576x128xbf16>, vector<32x128xf32> -> vector<32x128xf32>
    %c0_295 = arith.constant 0 : index
    %c0_296 = arith.constant 0 : index
    %434 = vector.load %arg27[%c0_295, %c0_296] : memref<32x1xf32, #tpu.memory_space<vmem>>, vector<32x1xf32>
    %435 = vector.broadcast %434 : vector<32x1xf32> to vector<32x128xf32>
    %436 = arith.addf %433, %435 : vector<32x128xf32>
    %cst_297 = arith.constant 0.000000e+00 : f32
    %437 = vector.broadcast %cst_297 : f32 to vector<32x128xf32>
    %438 = arith.cmpf oge, %436, %437 : vector<32x128xf32>
    %cst_298 = arith.constant 2.000000e-01 : f32
    %439 = vector.broadcast %cst_298 : f32 to vector<32x128xf32>
    %440 = arith.mulf %439, %436 : vector<32x128xf32>
    %441 = arith.select %438, %436, %440 : vector<32x128xi1>, vector<32x128xf32>
    %c0_299 = arith.constant 0 : index
    %c0_300 = arith.constant 0 : index
    %442 = vector.load %arg4[%c0_299, %c0_300] : memref<9x128xf32, #tpu.memory_space<vmem>>, vector<1x128xf32>
    %c5_i32_301 = arith.constant 5 : i32
    %443 = tpu.dynamic_rotate %441 by %c5_i32_301 dim 1 : vector<32x128xf32>, i32 -> vector<32x128xf32>
    %444 = vector.broadcast %442 : vector<1x128xf32> to vector<32x128xf32>
    %445 = arith.mulf %443, %444 : vector<32x128xf32>
    %446 = arith.truncf %445 : vector<32x128xf32> to vector<32x128xbf16>
    %c0_302 = arith.constant 0 : index
    %c0_303 = arith.constant 0 : index
    %447 = vector.load %arg35[%c0_302, %c0_303] : memref<576x256xbf16, #tpu.memory_space<vmem>>, vector<32x128xbf16>
    tpu.vector_store %arg35[%c0_302, %c0_303], %446 {strides = array<i32>} : memref<576x256xbf16, #tpu.memory_space<vmem>>, vector<32x128xbf16>,
    %c1_304 = arith.constant 1 : index
    %c0_305 = arith.constant 0 : index
    %448 = vector.load %arg4[%c1_304, %c0_305] : memref<9x128xf32, #tpu.memory_space<vmem>>, vector<1x128xf32>
    %c4_i32_306 = arith.constant 4 : i32
    %449 = tpu.dynamic_rotate %441 by %c4_i32_306 dim 1 : vector<32x128xf32>, i32 -> vector<32x128xf32>
    %450 = vector.broadcast %448 : vector<1x128xf32> to vector<32x128xf32>
    %451 = arith.mulf %449, %450 : vector<32x128xf32>
    %452 = arith.truncf %451 : vector<32x128xf32> to vector<32x128xbf16>
    %c32_307 = arith.constant 32 : index
    %c0_308 = arith.constant 0 : index
    %453 = vector.load %arg35[%c32_307, %c0_308] : memref<576x256xbf16, #tpu.memory_space<vmem>>, vector<32x128xbf16>
    tpu.vector_store %arg35[%c32_307, %c0_308], %452 {strides = array<i32>} : memref<576x256xbf16, #tpu.memory_space<vmem>>, vector<32x128xbf16>,
    %c2_309 = arith.constant 2 : index
    %c0_310 = arith.constant 0 : index
    %454 = vector.load %arg4[%c2_309, %c0_310] : memref<9x128xf32, #tpu.memory_space<vmem>>, vector<1x128xf32>
    %c3_i32_311 = arith.constant 3 : i32
    %455 = tpu.dynamic_rotate %441 by %c3_i32_311 dim 1 : vector<32x128xf32>, i32 -> vector<32x128xf32>
    %456 = vector.broadcast %454 : vector<1x128xf32> to vector<32x128xf32>
    %457 = arith.mulf %455, %456 : vector<32x128xf32>
    %458 = arith.truncf %457 : vector<32x128xf32> to vector<32x128xbf16>
    %c64_312 = arith.constant 64 : index
    %c0_313 = arith.constant 0 : index
    %459 = vector.load %arg35[%c64_312, %c0_313] : memref<576x256xbf16, #tpu.memory_space<vmem>>, vector<32x128xbf16>
    tpu.vector_store %arg35[%c64_312, %c0_313], %458 {strides = array<i32>} : memref<576x256xbf16, #tpu.memory_space<vmem>>, vector<32x128xbf16>,
    %c3_314 = arith.constant 3 : index
    %c0_315 = arith.constant 0 : index
    %460 = vector.load %arg4[%c3_314, %c0_315] : memref<9x128xf32, #tpu.memory_space<vmem>>, vector<1x128xf32>
    %c1_i32_316 = arith.constant 1 : i32
    %461 = tpu.dynamic_rotate %441 by %c1_i32_316 dim 1 : vector<32x128xf32>, i32 -> vector<32x128xf32>
    %462 = vector.broadcast %460 : vector<1x128xf32> to vector<32x128xf32>
    %463 = arith.mulf %461, %462 : vector<32x128xf32>
    %464 = arith.truncf %463 : vector<32x128xf32> to vector<32x128xbf16>
    %c96_317 = arith.constant 96 : index
    %c0_318 = arith.constant 0 : index
    %465 = vector.load %arg35[%c96_317, %c0_318] : memref<576x256xbf16, #tpu.memory_space<vmem>>, vector<32x128xbf16>
    tpu.vector_store %arg35[%c96_317, %c0_318], %464 {strides = array<i32>} : memref<576x256xbf16, #tpu.memory_space<vmem>>, vector<32x128xbf16>,
    %c4_319 = arith.constant 4 : index
    %c0_320 = arith.constant 0 : index
    %466 = vector.load %arg4[%c4_319, %c0_320] : memref<9x128xf32, #tpu.memory_space<vmem>>, vector<1x128xf32>
    %467 = vector.broadcast %466 : vector<1x128xf32> to vector<32x128xf32>
    %468 = arith.mulf %441, %467 : vector<32x128xf32>
    %469 = arith.truncf %468 : vector<32x128xf32> to vector<32x128xbf16>
    %c128_321 = arith.constant 128 : index
    %c0_322 = arith.constant 0 : index
    %470 = vector.load %arg35[%c128_321, %c0_322] : memref<576x256xbf16, #tpu.memory_space<vmem>>, vector<32x128xbf16>
    tpu.vector_store %arg35[%c128_321, %c0_322], %469 {strides = array<i32>} : memref<576x256xbf16, #tpu.memory_space<vmem>>, vector<32x128xbf16>,
    %c5_323 = arith.constant 5 : index
    %c0_324 = arith.constant 0 : index
    %471 = vector.load %arg4[%c5_323, %c0_324] : memref<9x128xf32, #tpu.memory_space<vmem>>, vector<1x128xf32>
    %c127_i32_325 = arith.constant 127 : i32
    %472 = tpu.dynamic_rotate %441 by %c127_i32_325 dim 1 : vector<32x128xf32>, i32 -> vector<32x128xf32>
    %473 = vector.broadcast %471 : vector<1x128xf32> to vector<32x128xf32>
    %474 = arith.mulf %472, %473 : vector<32x128xf32>
    %475 = arith.truncf %474 : vector<32x128xf32> to vector<32x128xbf16>
    %c160_326 = arith.constant 160 : index
    %c0_327 = arith.constant 0 : index
    %476 = vector.load %arg35[%c160_326, %c0_327] : memref<576x256xbf16, #tpu.memory_space<vmem>>, vector<32x128xbf16>
    tpu.vector_store %arg35[%c160_326, %c0_327], %475 {strides = array<i32>} : memref<576x256xbf16, #tpu.memory_space<vmem>>, vector<32x128xbf16>,
    %c6_328 = arith.constant 6 : index
    %c0_329 = arith.constant 0 : index
    %477 = vector.load %arg4[%c6_328, %c0_329] : memref<9x128xf32, #tpu.memory_space<vmem>>, vector<1x128xf32>
    %c125_i32_330 = arith.constant 125 : i32
    %478 = tpu.dynamic_rotate %441 by %c125_i32_330 dim 1 : vector<32x128xf32>, i32 -> vector<32x128xf32>
    %479 = vector.broadcast %477 : vector<1x128xf32> to vector<32x128xf32>
    %480 = arith.mulf %478, %479 : vector<32x128xf32>
    %481 = arith.truncf %480 : vector<32x128xf32> to vector<32x128xbf16>
    %c192_331 = arith.constant 192 : index
    %c0_332 = arith.constant 0 : index
    %482 = vector.load %arg35[%c192_331, %c0_332] : memref<576x256xbf16, #tpu.memory_space<vmem>>, vector<32x128xbf16>
    tpu.vector_store %arg35[%c192_331, %c0_332], %481 {strides = array<i32>} : memref<576x256xbf16, #tpu.memory_space<vmem>>, vector<32x128xbf16>,
    %c7_333 = arith.constant 7 : index
    %c0_334 = arith.constant 0 : index
    %483 = vector.load %arg4[%c7_333, %c0_334] : memref<9x128xf32, #tpu.memory_space<vmem>>, vector<1x128xf32>
    %c124_i32_335 = arith.constant 124 : i32
    %484 = tpu.dynamic_rotate %441 by %c124_i32_335 dim 1 : vector<32x128xf32>, i32 -> vector<32x128xf32>
    %485 = vector.broadcast %483 : vector<1x128xf32> to vector<32x128xf32>
    %486 = arith.mulf %484, %485 : vector<32x128xf32>
    %487 = arith.truncf %486 : vector<32x128xf32> to vector<32x128xbf16>
    %c224_336 = arith.constant 224 : index
    %c0_337 = arith.constant 0 : index
    %488 = vector.load %arg35[%c224_336, %c0_337] : memref<576x256xbf16, #tpu.memory_space<vmem>>, vector<32x128xbf16>
    tpu.vector_store %arg35[%c224_336, %c0_337], %487 {strides = array<i32>} : memref<576x256xbf16, #tpu.memory_space<vmem>>, vector<32x128xbf16>,
    %c8_338 = arith.constant 8 : index
    %c0_339 = arith.constant 0 : index
    %489 = vector.load %arg4[%c8_338, %c0_339] : memref<9x128xf32, #tpu.memory_space<vmem>>, vector<1x128xf32>
    %c123_i32_340 = arith.constant 123 : i32
    %490 = tpu.dynamic_rotate %441 by %c123_i32_340 dim 1 : vector<32x128xf32>, i32 -> vector<32x128xf32>
    %491 = vector.broadcast %489 : vector<1x128xf32> to vector<32x128xf32>
    %492 = arith.mulf %490, %491 : vector<32x128xf32>
    %493 = arith.truncf %492 : vector<32x128xf32> to vector<32x128xbf16>
    %c256_341 = arith.constant 256 : index
    %c0_342 = arith.constant 0 : index
    %494 = vector.load %arg35[%c256_341, %c0_342] : memref<576x256xbf16, #tpu.memory_space<vmem>>, vector<32x128xbf16>
    tpu.vector_store %arg35[%c256_341, %c0_342], %493 {strides = array<i32>} : memref<576x256xbf16, #tpu.memory_space<vmem>>, vector<32x128xbf16>,
    %c0_343 = arith.constant 0 : index
    %c0_344 = arith.constant 0 : index
    %495 = vector.load %arg35[%c0_343, %c0_344] : memref<576x256xbf16, #tpu.memory_space<vmem>>, vector<288x128xbf16>
    %c0_345 = arith.constant 0 : index
    %c0_346 = arith.constant 0 : index
    %496 = vector.load %arg22[%c0_345, %c0_346] : memref<16x288xbf16, #tpu.memory_space<vmem>>, vector<16x288xbf16>
    %cst_347 = arith.constant dense<0.000000e+00> : vector<16x128xf32>
    %497 = tpu.matmul %496, %495, %cst_347 {dimension_numbers = #tpu.dot_dimension_numbers<[1], [0], [0], [1], [0, 0, 1, 1], [], []>} : vector<16x288xbf16>, vector<288x128xbf16>, vector<16x128xf32> -> vector<16x128xf32>
    %c0_348 = arith.constant 0 : index
    %c0_349 = arith.constant 0 : index
    %498 = vector.load %arg23[%c0_348, %c0_349] : memref<16x1xf32, #tpu.memory_space<vmem>>, vector<16x1xf32>
    %499 = vector.broadcast %498 : vector<16x1xf32> to vector<16x128xf32>
    %500 = arith.addf %497, %499 : vector<16x128xf32>
    %cst_350 = arith.constant 0.000000e+00 : f32
    %501 = vector.broadcast %cst_350 : f32 to vector<16x128xf32>
    %502 = arith.cmpf oge, %500, %501 : vector<16x128xf32>
    %cst_351 = arith.constant 2.000000e-01 : f32
    %503 = vector.broadcast %cst_351 : f32 to vector<16x128xf32>
    %504 = arith.mulf %503, %500 : vector<16x128xf32>
    %505 = arith.select %502, %500, %504 : vector<16x128xi1>, vector<16x128xf32>
    %506 = arith.truncf %505 : vector<16x128xf32> to vector<16x128xbf16>
    %c0_352 = arith.constant 0 : index
    %c0_353 = arith.constant 0 : index
    %507 = vector.load %arg10[%c0_352, %c0_353] : memref<128x128xbf16, #tpu.memory_space<vmem>>, vector<128x128xbf16>
    %cst_354 = arith.constant dense<0.000000e+00> : vector<16x128xf32>
    %508 = tpu.matmul %506, %507, %cst_354 {dimension_numbers = #tpu.dot_dimension_numbers<[1], [0], [0], [1], [0, 0, 1, 1], [], []>} : vector<16x128xbf16>, vector<128x128xbf16>, vector<16x128xf32> -> vector<16x128xf32>
    %c0_355 = arith.constant 0 : index
    %c0_356 = arith.constant 0 : index
    %509 = vector.load %arg3[%c0_355, %c0_356] : memref<9x128xf32, #tpu.memory_space<vmem>>, vector<1x128xf32>
    %c9_i32_357 = arith.constant 9 : i32
    %510 = tpu.dynamic_rotate %508 by %c9_i32_357 dim 1 : vector<16x128xf32>, i32 -> vector<16x128xf32>
    %511 = vector.broadcast %509 : vector<1x128xf32> to vector<16x128xf32>
    %512 = arith.mulf %510, %511 : vector<16x128xf32>
    %513 = arith.truncf %512 : vector<16x128xf32> to vector<16x128xbf16>
    %c0_358 = arith.constant 0 : index
    %c0_359 = arith.constant 0 : index
    %514 = vector.load %arg35[%c0_358, %c0_359] : memref<576x256xbf16, #tpu.memory_space<vmem>>, vector<16x128xbf16>
    tpu.vector_store %arg35[%c0_358, %c0_359], %513 {strides = array<i32>} : memref<576x256xbf16, #tpu.memory_space<vmem>>, vector<16x128xbf16>,
    %c9_i32_360 = arith.constant 9 : i32
    %515 = tpu.dynamic_rotate %132 by %c9_i32_360 dim 1 : vector<16x128xf32>, i32 -> vector<16x128xf32>
    %516 = vector.broadcast %509 : vector<1x128xf32> to vector<16x128xf32>
    %517 = arith.mulf %515, %516 : vector<16x128xf32>
    %518 = arith.truncf %517 : vector<16x128xf32> to vector<16x128xbf16>
    %c16_361 = arith.constant 16 : index
    %c0_362 = arith.constant 0 : index
    %519 = vector.load %arg35[%c16_361, %c0_362] : memref<576x256xbf16, #tpu.memory_space<vmem>>, vector<16x128xbf16>
    tpu.vector_store %arg35[%c16_361, %c0_362], %518 {strides = array<i32>} : memref<576x256xbf16, #tpu.memory_space<vmem>>, vector<16x128xbf16>,
    %c1_363 = arith.constant 1 : index
    %c0_364 = arith.constant 0 : index
    %520 = vector.load %arg3[%c1_363, %c0_364] : memref<9x128xf32, #tpu.memory_space<vmem>>, vector<1x128xf32>
    %c8_i32_365 = arith.constant 8 : i32
    %521 = tpu.dynamic_rotate %508 by %c8_i32_365 dim 1 : vector<16x128xf32>, i32 -> vector<16x128xf32>
    %522 = vector.broadcast %520 : vector<1x128xf32> to vector<16x128xf32>
    %523 = arith.mulf %521, %522 : vector<16x128xf32>
    %524 = arith.truncf %523 : vector<16x128xf32> to vector<16x128xbf16>
    %c32_366 = arith.constant 32 : index
    %c0_367 = arith.constant 0 : index
    %525 = vector.load %arg35[%c32_366, %c0_367] : memref<576x256xbf16, #tpu.memory_space<vmem>>, vector<16x128xbf16>
    tpu.vector_store %arg35[%c32_366, %c0_367], %524 {strides = array<i32>} : memref<576x256xbf16, #tpu.memory_space<vmem>>, vector<16x128xbf16>,
    %c8_i32_368 = arith.constant 8 : i32
    %526 = tpu.dynamic_rotate %132 by %c8_i32_368 dim 1 : vector<16x128xf32>, i32 -> vector<16x128xf32>
    %527 = vector.broadcast %520 : vector<1x128xf32> to vector<16x128xf32>
    %528 = arith.mulf %526, %527 : vector<16x128xf32>
    %529 = arith.truncf %528 : vector<16x128xf32> to vector<16x128xbf16>
    %c48_369 = arith.constant 48 : index
    %c0_370 = arith.constant 0 : index
    %530 = vector.load %arg35[%c48_369, %c0_370] : memref<576x256xbf16, #tpu.memory_space<vmem>>, vector<16x128xbf16>
    tpu.vector_store %arg35[%c48_369, %c0_370], %529 {strides = array<i32>} : memref<576x256xbf16, #tpu.memory_space<vmem>>, vector<16x128xbf16>,
    %c2_371 = arith.constant 2 : index
    %c0_372 = arith.constant 0 : index
    %531 = vector.load %arg3[%c2_371, %c0_372] : memref<9x128xf32, #tpu.memory_space<vmem>>, vector<1x128xf32>
    %c7_i32_373 = arith.constant 7 : i32
    %532 = tpu.dynamic_rotate %508 by %c7_i32_373 dim 1 : vector<16x128xf32>, i32 -> vector<16x128xf32>
    %533 = vector.broadcast %531 : vector<1x128xf32> to vector<16x128xf32>
    %534 = arith.mulf %532, %533 : vector<16x128xf32>
    %535 = arith.truncf %534 : vector<16x128xf32> to vector<16x128xbf16>
    %c64_374 = arith.constant 64 : index
    %c0_375 = arith.constant 0 : index
    %536 = vector.load %arg35[%c64_374, %c0_375] : memref<576x256xbf16, #tpu.memory_space<vmem>>, vector<16x128xbf16>
    tpu.vector_store %arg35[%c64_374, %c0_375], %535 {strides = array<i32>} : memref<576x256xbf16, #tpu.memory_space<vmem>>, vector<16x128xbf16>,
    %c7_i32_376 = arith.constant 7 : i32
    %537 = tpu.dynamic_rotate %132 by %c7_i32_376 dim 1 : vector<16x128xf32>, i32 -> vector<16x128xf32>
    %538 = vector.broadcast %531 : vector<1x128xf32> to vector<16x128xf32>
    %539 = arith.mulf %537, %538 : vector<16x128xf32>
    %540 = arith.truncf %539 : vector<16x128xf32> to vector<16x128xbf16>
    %c80_377 = arith.constant 80 : index
    %c0_378 = arith.constant 0 : index
    %541 = vector.load %arg35[%c80_377, %c0_378] : memref<576x256xbf16, #tpu.memory_space<vmem>>, vector<16x128xbf16>
    tpu.vector_store %arg35[%c80_377, %c0_378], %540 {strides = array<i32>} : memref<576x256xbf16, #tpu.memory_space<vmem>>, vector<16x128xbf16>,
    %c3_379 = arith.constant 3 : index
    %c0_380 = arith.constant 0 : index
    %542 = vector.load %arg3[%c3_379, %c0_380] : memref<9x128xf32, #tpu.memory_space<vmem>>, vector<1x128xf32>
    %c1_i32_381 = arith.constant 1 : i32
    %543 = tpu.dynamic_rotate %508 by %c1_i32_381 dim 1 : vector<16x128xf32>, i32 -> vector<16x128xf32>
    %544 = vector.broadcast %542 : vector<1x128xf32> to vector<16x128xf32>
    %545 = arith.mulf %543, %544 : vector<16x128xf32>
    %546 = arith.truncf %545 : vector<16x128xf32> to vector<16x128xbf16>
    %c96_382 = arith.constant 96 : index
    %c0_383 = arith.constant 0 : index
    %547 = vector.load %arg35[%c96_382, %c0_383] : memref<576x256xbf16, #tpu.memory_space<vmem>>, vector<16x128xbf16>
    tpu.vector_store %arg35[%c96_382, %c0_383], %546 {strides = array<i32>} : memref<576x256xbf16, #tpu.memory_space<vmem>>, vector<16x128xbf16>,
    %c1_i32_384 = arith.constant 1 : i32
    %548 = tpu.dynamic_rotate %132 by %c1_i32_384 dim 1 : vector<16x128xf32>, i32 -> vector<16x128xf32>
    %549 = vector.broadcast %542 : vector<1x128xf32> to vector<16x128xf32>
    %550 = arith.mulf %548, %549 : vector<16x128xf32>
    %551 = arith.truncf %550 : vector<16x128xf32> to vector<16x128xbf16>
    %c112_385 = arith.constant 112 : index
    %c0_386 = arith.constant 0 : index
    %552 = vector.load %arg35[%c112_385, %c0_386] : memref<576x256xbf16, #tpu.memory_space<vmem>>, vector<16x128xbf16>
    tpu.vector_store %arg35[%c112_385, %c0_386], %551 {strides = array<i32>} : memref<576x256xbf16, #tpu.memory_space<vmem>>, vector<16x128xbf16>,
    %c4_387 = arith.constant 4 : index
    %c0_388 = arith.constant 0 : index
    %553 = vector.load %arg3[%c4_387, %c0_388] : memref<9x128xf32, #tpu.memory_space<vmem>>, vector<1x128xf32>
    %554 = vector.broadcast %553 : vector<1x128xf32> to vector<16x128xf32>
    %555 = arith.mulf %508, %554 : vector<16x128xf32>
    %556 = arith.truncf %555 : vector<16x128xf32> to vector<16x128xbf16>
    %c128_389 = arith.constant 128 : index
    %c0_390 = arith.constant 0 : index
    %557 = vector.load %arg35[%c128_389, %c0_390] : memref<576x256xbf16, #tpu.memory_space<vmem>>, vector<16x128xbf16>
    tpu.vector_store %arg35[%c128_389, %c0_390], %556 {strides = array<i32>} : memref<576x256xbf16, #tpu.memory_space<vmem>>, vector<16x128xbf16>,
    %558 = vector.broadcast %553 : vector<1x128xf32> to vector<16x128xf32>
    %559 = arith.mulf %132, %558 : vector<16x128xf32>
    %560 = arith.truncf %559 : vector<16x128xf32> to vector<16x128xbf16>
    %c144 = arith.constant 144 : index
    %c0_391 = arith.constant 0 : index
    %561 = vector.load %arg35[%c144, %c0_391] : memref<576x256xbf16, #tpu.memory_space<vmem>>, vector<16x128xbf16>
    tpu.vector_store %arg35[%c144, %c0_391], %560 {strides = array<i32>} : memref<576x256xbf16, #tpu.memory_space<vmem>>, vector<16x128xbf16>,
    %c5_392 = arith.constant 5 : index
    %c0_393 = arith.constant 0 : index
    %562 = vector.load %arg3[%c5_392, %c0_393] : memref<9x128xf32, #tpu.memory_space<vmem>>, vector<1x128xf32>
    %c127_i32_394 = arith.constant 127 : i32
    %563 = tpu.dynamic_rotate %508 by %c127_i32_394 dim 1 : vector<16x128xf32>, i32 -> vector<16x128xf32>
    %564 = vector.broadcast %562 : vector<1x128xf32> to vector<16x128xf32>
    %565 = arith.mulf %563, %564 : vector<16x128xf32>
    %566 = arith.truncf %565 : vector<16x128xf32> to vector<16x128xbf16>
    %c160_395 = arith.constant 160 : index
    %c0_396 = arith.constant 0 : index
    %567 = vector.load %arg35[%c160_395, %c0_396] : memref<576x256xbf16, #tpu.memory_space<vmem>>, vector<16x128xbf16>
    tpu.vector_store %arg35[%c160_395, %c0_396], %566 {strides = array<i32>} : memref<576x256xbf16, #tpu.memory_space<vmem>>, vector<16x128xbf16>,
    %c127_i32_397 = arith.constant 127 : i32
    %568 = tpu.dynamic_rotate %132 by %c127_i32_397 dim 1 : vector<16x128xf32>, i32 -> vector<16x128xf32>
    %569 = vector.broadcast %562 : vector<1x128xf32> to vector<16x128xf32>
    %570 = arith.mulf %568, %569 : vector<16x128xf32>
    %571 = arith.truncf %570 : vector<16x128xf32> to vector<16x128xbf16>
    %c176 = arith.constant 176 : index
    %c0_398 = arith.constant 0 : index
    %572 = vector.load %arg35[%c176, %c0_398] : memref<576x256xbf16, #tpu.memory_space<vmem>>, vector<16x128xbf16>
    tpu.vector_store %arg35[%c176, %c0_398], %571 {strides = array<i32>} : memref<576x256xbf16, #tpu.memory_space<vmem>>, vector<16x128xbf16>,
    %c6_399 = arith.constant 6 : index
    %c0_400 = arith.constant 0 : index
    %573 = vector.load %arg3[%c6_399, %c0_400] : memref<9x128xf32, #tpu.memory_space<vmem>>, vector<1x128xf32>
    %c121_i32_401 = arith.constant 121 : i32
    %574 = tpu.dynamic_rotate %508 by %c121_i32_401 dim 1 : vector<16x128xf32>, i32 -> vector<16x128xf32>
    %575 = vector.broadcast %573 : vector<1x128xf32> to vector<16x128xf32>
    %576 = arith.mulf %574, %575 : vector<16x128xf32>
    %577 = arith.truncf %576 : vector<16x128xf32> to vector<16x128xbf16>
    %c192_402 = arith.constant 192 : index
    %c0_403 = arith.constant 0 : index
    %578 = vector.load %arg35[%c192_402, %c0_403] : memref<576x256xbf16, #tpu.memory_space<vmem>>, vector<16x128xbf16>
    tpu.vector_store %arg35[%c192_402, %c0_403], %577 {strides = array<i32>} : memref<576x256xbf16, #tpu.memory_space<vmem>>, vector<16x128xbf16>,
    %c121_i32_404 = arith.constant 121 : i32
    %579 = tpu.dynamic_rotate %132 by %c121_i32_404 dim 1 : vector<16x128xf32>, i32 -> vector<16x128xf32>
    %580 = vector.broadcast %573 : vector<1x128xf32> to vector<16x128xf32>
    %581 = arith.mulf %579, %580 : vector<16x128xf32>
    %582 = arith.truncf %581 : vector<16x128xf32> to vector<16x128xbf16>
    %c208 = arith.constant 208 : index
    %c0_405 = arith.constant 0 : index
    %583 = vector.load %arg35[%c208, %c0_405] : memref<576x256xbf16, #tpu.memory_space<vmem>>, vector<16x128xbf16>
    tpu.vector_store %arg35[%c208, %c0_405], %582 {strides = array<i32>} : memref<576x256xbf16, #tpu.memory_space<vmem>>, vector<16x128xbf16>,
    %c7_406 = arith.constant 7 : index
    %c0_407 = arith.constant 0 : index
    %584 = vector.load %arg3[%c7_406, %c0_407] : memref<9x128xf32, #tpu.memory_space<vmem>>, vector<1x128xf32>
    %c120_i32_408 = arith.constant 120 : i32
    %585 = tpu.dynamic_rotate %508 by %c120_i32_408 dim 1 : vector<16x128xf32>, i32 -> vector<16x128xf32>
    %586 = vector.broadcast %584 : vector<1x128xf32> to vector<16x128xf32>
    %587 = arith.mulf %585, %586 : vector<16x128xf32>
    %588 = arith.truncf %587 : vector<16x128xf32> to vector<16x128xbf16>
    %c224_409 = arith.constant 224 : index
    %c0_410 = arith.constant 0 : index
    %589 = vector.load %arg35[%c224_409, %c0_410] : memref<576x256xbf16, #tpu.memory_space<vmem>>, vector<16x128xbf16>
    tpu.vector_store %arg35[%c224_409, %c0_410], %588 {strides = array<i32>} : memref<576x256xbf16, #tpu.memory_space<vmem>>, vector<16x128xbf16>,
    %c120_i32_411 = arith.constant 120 : i32
    %590 = tpu.dynamic_rotate %132 by %c120_i32_411 dim 1 : vector<16x128xf32>, i32 -> vector<16x128xf32>
    %591 = vector.broadcast %584 : vector<1x128xf32> to vector<16x128xf32>
    %592 = arith.mulf %590, %591 : vector<16x128xf32>
    %593 = arith.truncf %592 : vector<16x128xf32> to vector<16x128xbf16>
    %c240 = arith.constant 240 : index
    %c0_412 = arith.constant 0 : index
    %594 = vector.load %arg35[%c240, %c0_412] : memref<576x256xbf16, #tpu.memory_space<vmem>>, vector<16x128xbf16>
    tpu.vector_store %arg35[%c240, %c0_412], %593 {strides = array<i32>} : memref<576x256xbf16, #tpu.memory_space<vmem>>, vector<16x128xbf16>,
    %c8_413 = arith.constant 8 : index
    %c0_414 = arith.constant 0 : index
    %595 = vector.load %arg3[%c8_413, %c0_414] : memref<9x128xf32, #tpu.memory_space<vmem>>, vector<1x128xf32>
    %c119_i32_415 = arith.constant 119 : i32
    %596 = tpu.dynamic_rotate %508 by %c119_i32_415 dim 1 : vector<16x128xf32>, i32 -> vector<16x128xf32>
    %597 = vector.broadcast %595 : vector<1x128xf32> to vector<16x128xf32>
    %598 = arith.mulf %596, %597 : vector<16x128xf32>
    %599 = arith.truncf %598 : vector<16x128xf32> to vector<16x128xbf16>
    %c256_416 = arith.constant 256 : index
    %c0_417 = arith.constant 0 : index
    %600 = vector.load %arg35[%c256_416, %c0_417] : memref<576x256xbf16, #tpu.memory_space<vmem>>, vector<16x128xbf16>
    tpu.vector_store %arg35[%c256_416, %c0_417], %599 {strides = array<i32>} : memref<576x256xbf16, #tpu.memory_space<vmem>>, vector<16x128xbf16>,
    %c119_i32_418 = arith.constant 119 : i32
    %601 = tpu.dynamic_rotate %132 by %c119_i32_418 dim 1 : vector<16x128xf32>, i32 -> vector<16x128xf32>
    %602 = vector.broadcast %595 : vector<1x128xf32> to vector<16x128xf32>
    %603 = arith.mulf %601, %602 : vector<16x128xf32>
    %604 = arith.truncf %603 : vector<16x128xf32> to vector<16x128xbf16>
    %c272 = arith.constant 272 : index
    %c0_419 = arith.constant 0 : index
    %605 = vector.load %arg35[%c272, %c0_419] : memref<576x256xbf16, #tpu.memory_space<vmem>>, vector<16x128xbf16>
    tpu.vector_store %arg35[%c272, %c0_419], %604 {strides = array<i32>} : memref<576x256xbf16, #tpu.memory_space<vmem>>, vector<16x128xbf16>,
    %c0_420 = arith.constant 0 : index
    %c0_421 = arith.constant 0 : index
    %606 = vector.load %arg35[%c0_420, %c0_421] : memref<576x256xbf16, #tpu.memory_space<vmem>>, vector<288x128xbf16>
    %c0_422 = arith.constant 0 : index
    %c0_423 = arith.constant 0 : index
    %607 = vector.load %arg28[%c0_422, %c0_423] : memref<16x288xbf16, #tpu.memory_space<vmem>>, vector<16x288xbf16>
    %cst_424 = arith.constant dense<0.000000e+00> : vector<16x128xf32>
    %608 = tpu.matmul %607, %606, %cst_424 {dimension_numbers = #tpu.dot_dimension_numbers<[1], [0], [0], [1], [0, 0, 1, 1], [], []>} : vector<16x288xbf16>, vector<288x128xbf16>, vector<16x128xf32> -> vector<16x128xf32>
    %c0_425 = arith.constant 0 : index
    %c0_426 = arith.constant 0 : index
    %609 = vector.load %arg29[%c0_425, %c0_426] : memref<16x1xf32, #tpu.memory_space<vmem>>, vector<16x1xf32>
    %610 = vector.broadcast %609 : vector<16x1xf32> to vector<16x128xf32>
    %611 = arith.addf %608, %610 : vector<16x128xf32>
    %cst_427 = arith.constant 0.000000e+00 : f32
    %612 = vector.broadcast %cst_427 : f32 to vector<16x128xf32>
    %613 = arith.cmpf oge, %611, %612 : vector<16x128xf32>
    %cst_428 = arith.constant 2.000000e-01 : f32
    %614 = vector.broadcast %cst_428 : f32 to vector<16x128xf32>
    %615 = arith.mulf %614, %611 : vector<16x128xf32>
    %616 = arith.select %613, %611, %615 : vector<16x128xi1>, vector<16x128xf32>
    %c0_429 = arith.constant 0 : index
    %c0_430 = arith.constant 0 : index
    %617 = vector.load %arg3[%c0_429, %c0_430] : memref<9x128xf32, #tpu.memory_space<vmem>>, vector<1x128xf32>
    %c9_i32_431 = arith.constant 9 : i32
    %618 = tpu.dynamic_rotate %616 by %c9_i32_431 dim 1 : vector<16x128xf32>, i32 -> vector<16x128xf32>
    %619 = vector.broadcast %617 : vector<1x128xf32> to vector<16x128xf32>
    %620 = arith.mulf %618, %619 : vector<16x128xf32>
    %621 = arith.truncf %620 : vector<16x128xf32> to vector<16x128xbf16>
    %c0_432 = arith.constant 0 : index
    %c0_433 = arith.constant 0 : index
    %622 = vector.load %arg35[%c0_432, %c0_433] : memref<576x256xbf16, #tpu.memory_space<vmem>>, vector<16x128xbf16>
    tpu.vector_store %arg35[%c0_432, %c0_433], %621 {strides = array<i32>} : memref<576x256xbf16, #tpu.memory_space<vmem>>, vector<16x128xbf16>,
    %c1_434 = arith.constant 1 : index
    %c0_435 = arith.constant 0 : index
    %623 = vector.load %arg3[%c1_434, %c0_435] : memref<9x128xf32, #tpu.memory_space<vmem>>, vector<1x128xf32>
    %c8_i32_436 = arith.constant 8 : i32
    %624 = tpu.dynamic_rotate %616 by %c8_i32_436 dim 1 : vector<16x128xf32>, i32 -> vector<16x128xf32>
    %625 = vector.broadcast %623 : vector<1x128xf32> to vector<16x128xf32>
    %626 = arith.mulf %624, %625 : vector<16x128xf32>
    %627 = arith.truncf %626 : vector<16x128xf32> to vector<16x128xbf16>
    %c16_437 = arith.constant 16 : index
    %c0_438 = arith.constant 0 : index
    %628 = vector.load %arg35[%c16_437, %c0_438] : memref<576x256xbf16, #tpu.memory_space<vmem>>, vector<16x128xbf16>
    tpu.vector_store %arg35[%c16_437, %c0_438], %627 {strides = array<i32>} : memref<576x256xbf16, #tpu.memory_space<vmem>>, vector<16x128xbf16>,
    %c2_439 = arith.constant 2 : index
    %c0_440 = arith.constant 0 : index
    %629 = vector.load %arg3[%c2_439, %c0_440] : memref<9x128xf32, #tpu.memory_space<vmem>>, vector<1x128xf32>
    %c7_i32_441 = arith.constant 7 : i32
    %630 = tpu.dynamic_rotate %616 by %c7_i32_441 dim 1 : vector<16x128xf32>, i32 -> vector<16x128xf32>
    %631 = vector.broadcast %629 : vector<1x128xf32> to vector<16x128xf32>
    %632 = arith.mulf %630, %631 : vector<16x128xf32>
    %633 = arith.truncf %632 : vector<16x128xf32> to vector<16x128xbf16>
    %c32_442 = arith.constant 32 : index
    %c0_443 = arith.constant 0 : index
    %634 = vector.load %arg35[%c32_442, %c0_443] : memref<576x256xbf16, #tpu.memory_space<vmem>>, vector<16x128xbf16>
    tpu.vector_store %arg35[%c32_442, %c0_443], %633 {strides = array<i32>} : memref<576x256xbf16, #tpu.memory_space<vmem>>, vector<16x128xbf16>,
    %c3_444 = arith.constant 3 : index
    %c0_445 = arith.constant 0 : index
    %635 = vector.load %arg3[%c3_444, %c0_445] : memref<9x128xf32, #tpu.memory_space<vmem>>, vector<1x128xf32>
    %c1_i32_446 = arith.constant 1 : i32
    %636 = tpu.dynamic_rotate %616 by %c1_i32_446 dim 1 : vector<16x128xf32>, i32 -> vector<16x128xf32>
    %637 = vector.broadcast %635 : vector<1x128xf32> to vector<16x128xf32>
    %638 = arith.mulf %636, %637 : vector<16x128xf32>
    %639 = arith.truncf %638 : vector<16x128xf32> to vector<16x128xbf16>
    %c48_447 = arith.constant 48 : index
    %c0_448 = arith.constant 0 : index
    %640 = vector.load %arg35[%c48_447, %c0_448] : memref<576x256xbf16, #tpu.memory_space<vmem>>, vector<16x128xbf16>
    tpu.vector_store %arg35[%c48_447, %c0_448], %639 {strides = array<i32>} : memref<576x256xbf16, #tpu.memory_space<vmem>>, vector<16x128xbf16>,
    %c4_449 = arith.constant 4 : index
    %c0_450 = arith.constant 0 : index
    %641 = vector.load %arg3[%c4_449, %c0_450] : memref<9x128xf32, #tpu.memory_space<vmem>>, vector<1x128xf32>
    %642 = vector.broadcast %641 : vector<1x128xf32> to vector<16x128xf32>
    %643 = arith.mulf %616, %642 : vector<16x128xf32>
    %644 = arith.truncf %643 : vector<16x128xf32> to vector<16x128xbf16>
    %c64_451 = arith.constant 64 : index
    %c0_452 = arith.constant 0 : index
    %645 = vector.load %arg35[%c64_451, %c0_452] : memref<576x256xbf16, #tpu.memory_space<vmem>>, vector<16x128xbf16>
    tpu.vector_store %arg35[%c64_451, %c0_452], %644 {strides = array<i32>} : memref<576x256xbf16, #tpu.memory_space<vmem>>, vector<16x128xbf16>,
    %c5_453 = arith.constant 5 : index
    %c0_454 = arith.constant 0 : index
    %646 = vector.load %arg3[%c5_453, %c0_454] : memref<9x128xf32, #tpu.memory_space<vmem>>, vector<1x128xf32>
    %c127_i32_455 = arith.constant 127 : i32
    %647 = tpu.dynamic_rotate %616 by %c127_i32_455 dim 1 : vector<16x128xf32>, i32 -> vector<16x128xf32>
    %648 = vector.broadcast %646 : vector<1x128xf32> to vector<16x128xf32>
    %649 = arith.mulf %647, %648 : vector<16x128xf32>
    %650 = arith.truncf %649 : vector<16x128xf32> to vector<16x128xbf16>
    %c80_456 = arith.constant 80 : index
    %c0_457 = arith.constant 0 : index
    %651 = vector.load %arg35[%c80_456, %c0_457] : memref<576x256xbf16, #tpu.memory_space<vmem>>, vector<16x128xbf16>
    tpu.vector_store %arg35[%c80_456, %c0_457], %650 {strides = array<i32>} : memref<576x256xbf16, #tpu.memory_space<vmem>>, vector<16x128xbf16>,
    %c6_458 = arith.constant 6 : index
    %c0_459 = arith.constant 0 : index
    %652 = vector.load %arg3[%c6_458, %c0_459] : memref<9x128xf32, #tpu.memory_space<vmem>>, vector<1x128xf32>
    %c121_i32_460 = arith.constant 121 : i32
    %653 = tpu.dynamic_rotate %616 by %c121_i32_460 dim 1 : vector<16x128xf32>, i32 -> vector<16x128xf32>
    %654 = vector.broadcast %652 : vector<1x128xf32> to vector<16x128xf32>
    %655 = arith.mulf %653, %654 : vector<16x128xf32>
    %656 = arith.truncf %655 : vector<16x128xf32> to vector<16x128xbf16>
    %c96_461 = arith.constant 96 : index
    %c0_462 = arith.constant 0 : index
    %657 = vector.load %arg35[%c96_461, %c0_462] : memref<576x256xbf16, #tpu.memory_space<vmem>>, vector<16x128xbf16>
    tpu.vector_store %arg35[%c96_461, %c0_462], %656 {strides = array<i32>} : memref<576x256xbf16, #tpu.memory_space<vmem>>, vector<16x128xbf16>,
    %c7_463 = arith.constant 7 : index
    %c0_464 = arith.constant 0 : index
    %658 = vector.load %arg3[%c7_463, %c0_464] : memref<9x128xf32, #tpu.memory_space<vmem>>, vector<1x128xf32>
    %c120_i32_465 = arith.constant 120 : i32
    %659 = tpu.dynamic_rotate %616 by %c120_i32_465 dim 1 : vector<16x128xf32>, i32 -> vector<16x128xf32>
    %660 = vector.broadcast %658 : vector<1x128xf32> to vector<16x128xf32>
    %661 = arith.mulf %659, %660 : vector<16x128xf32>
    %662 = arith.truncf %661 : vector<16x128xf32> to vector<16x128xbf16>
    %c112_466 = arith.constant 112 : index
    %c0_467 = arith.constant 0 : index
    %663 = vector.load %arg35[%c112_466, %c0_467] : memref<576x256xbf16, #tpu.memory_space<vmem>>, vector<16x128xbf16>
    tpu.vector_store %arg35[%c112_466, %c0_467], %662 {strides = array<i32>} : memref<576x256xbf16, #tpu.memory_space<vmem>>, vector<16x128xbf16>,
    %c8_468 = arith.constant 8 : index
    %c0_469 = arith.constant 0 : index
    %664 = vector.load %arg3[%c8_468, %c0_469] : memref<9x128xf32, #tpu.memory_space<vmem>>, vector<1x128xf32>
    %c119_i32_470 = arith.constant 119 : i32
    %665 = tpu.dynamic_rotate %616 by %c119_i32_470 dim 1 : vector<16x128xf32>, i32 -> vector<16x128xf32>
    %666 = vector.broadcast %664 : vector<1x128xf32> to vector<16x128xf32>
    %667 = arith.mulf %665, %666 : vector<16x128xf32>
    %668 = arith.truncf %667 : vector<16x128xf32> to vector<16x128xbf16>
    %c128_471 = arith.constant 128 : index
    %c0_472 = arith.constant 0 : index
    %669 = vector.load %arg35[%c128_471, %c0_472] : memref<576x256xbf16, #tpu.memory_space<vmem>>, vector<16x128xbf16>
    tpu.vector_store %arg35[%c128_471, %c0_472], %668 {strides = array<i32>} : memref<576x256xbf16, #tpu.memory_space<vmem>>, vector<16x128xbf16>,
    %c0_473 = arith.constant 0 : index
    %c0_474 = arith.constant 0 : index
    %670 = vector.load %arg35[%c0_473, %c0_474] : memref<576x256xbf16, #tpu.memory_space<vmem>>, vector<144x128xbf16>
    %c0_475 = arith.constant 0 : index
    %c0_476 = arith.constant 0 : index
    %671 = vector.load %arg24[%c0_475, %c0_476] : memref<8x144xbf16, #tpu.memory_space<vmem>>, vector<8x144xbf16>
    %cst_477 = arith.constant dense<0.000000e+00> : vector<8x128xf32>
    %672 = tpu.matmul %671, %670, %cst_477 {dimension_numbers = #tpu.dot_dimension_numbers<[1], [0], [0], [1], [0, 0, 1, 1], [], []>} : vector<8x144xbf16>, vector<144x128xbf16>, vector<8x128xf32> -> vector<8x128xf32>
    %c0_478 = arith.constant 0 : index
    %c0_479 = arith.constant 0 : index
    %673 = vector.load %arg25[%c0_478, %c0_479] : memref<8x1xf32, #tpu.memory_space<vmem>>, vector<8x1xf32>
    %674 = vector.broadcast %673 : vector<8x1xf32> to vector<8x128xf32>
    %675 = arith.addf %672, %674 : vector<8x128xf32>
    %cst_480 = arith.constant 0.000000e+00 : f32
    %676 = vector.broadcast %cst_480 : f32 to vector<8x128xf32>
    %677 = arith.cmpf oge, %675, %676 : vector<8x128xf32>
    %cst_481 = arith.constant 2.000000e-01 : f32
    %678 = vector.broadcast %cst_481 : f32 to vector<8x128xf32>
    %679 = arith.mulf %678, %675 : vector<8x128xf32>
    %680 = arith.select %677, %675, %679 : vector<8x128xi1>, vector<8x128xf32>
    %681 = arith.truncf %680 : vector<8x128xf32> to vector<8x128xbf16>
    %c0_482 = arith.constant 0 : index
    %c0_483 = arith.constant 0 : index
    %682 = vector.load %arg9[%c0_482, %c0_483] : memref<128x256xbf16, #tpu.memory_space<vmem>>, vector<128x256xbf16>
    %cst_484 = arith.constant dense<0.000000e+00> : vector<8x256xf32>
    %683 = tpu.matmul %681, %682, %cst_484 {dimension_numbers = #tpu.dot_dimension_numbers<[1], [0], [0], [1], [0, 0, 1, 1], [], []>} : vector<8x128xbf16>, vector<128x256xbf16>, vector<8x256xf32> -> vector<8x256xf32>
    %c0_485 = arith.constant 0 : index
    %c0_486 = arith.constant 0 : index
    %684 = vector.load %arg2[%c0_485, %c0_486] : memref<9x256xf32, #tpu.memory_space<vmem>>, vector<1x256xf32>
    %c17_i32_487 = arith.constant 17 : i32
    %685 = tpu.dynamic_rotate %683 by %c17_i32_487 dim 1 : vector<8x256xf32>, i32 -> vector<8x256xf32>
    %686 = vector.broadcast %684 : vector<1x256xf32> to vector<8x256xf32>
    %687 = arith.mulf %685, %686 : vector<8x256xf32>
    %688 = arith.truncf %687 : vector<8x256xf32> to vector<8x256xbf16>
    %c0_488 = arith.constant 0 : index
    %c0_489 = arith.constant 0 : index
    %689 = vector.load %arg35[%c0_488, %c0_489] : memref<576x256xbf16, #tpu.memory_space<vmem>>, vector<8x256xbf16>
    tpu.vector_store %arg35[%c0_488, %c0_489], %688 {strides = array<i32>} : memref<576x256xbf16, #tpu.memory_space<vmem>>, vector<8x256xbf16>,
    %c17_i32_490 = arith.constant 17 : i32
    %690 = tpu.dynamic_rotate %65 by %c17_i32_490 dim 1 : vector<8x256xf32>, i32 -> vector<8x256xf32>
    %691 = vector.broadcast %684 : vector<1x256xf32> to vector<8x256xf32>
    %692 = arith.mulf %690, %691 : vector<8x256xf32>
    %693 = arith.truncf %692 : vector<8x256xf32> to vector<8x256xbf16>
    %c8_491 = arith.constant 8 : index
    %c0_492 = arith.constant 0 : index
    %694 = vector.load %arg35[%c8_491, %c0_492] : memref<576x256xbf16, #tpu.memory_space<vmem>>, vector<8x256xbf16>
    tpu.vector_store %arg35[%c8_491, %c0_492], %693 {strides = array<i32>} : memref<576x256xbf16, #tpu.memory_space<vmem>>, vector<8x256xbf16>,
    %c1_493 = arith.constant 1 : index
    %c0_494 = arith.constant 0 : index
    %695 = vector.load %arg2[%c1_493, %c0_494] : memref<9x256xf32, #tpu.memory_space<vmem>>, vector<1x256xf32>
    %c16_i32_495 = arith.constant 16 : i32
    %696 = tpu.dynamic_rotate %683 by %c16_i32_495 dim 1 : vector<8x256xf32>, i32 -> vector<8x256xf32>
    %697 = vector.broadcast %695 : vector<1x256xf32> to vector<8x256xf32>
    %698 = arith.mulf %696, %697 : vector<8x256xf32>
    %699 = arith.truncf %698 : vector<8x256xf32> to vector<8x256xbf16>
    %c16_496 = arith.constant 16 : index
    %c0_497 = arith.constant 0 : index
    %700 = vector.load %arg35[%c16_496, %c0_497] : memref<576x256xbf16, #tpu.memory_space<vmem>>, vector<8x256xbf16>
    tpu.vector_store %arg35[%c16_496, %c0_497], %699 {strides = array<i32>} : memref<576x256xbf16, #tpu.memory_space<vmem>>, vector<8x256xbf16>,
    %c16_i32_498 = arith.constant 16 : i32
    %701 = tpu.dynamic_rotate %65 by %c16_i32_498 dim 1 : vector<8x256xf32>, i32 -> vector<8x256xf32>
    %702 = vector.broadcast %695 : vector<1x256xf32> to vector<8x256xf32>
    %703 = arith.mulf %701, %702 : vector<8x256xf32>
    %704 = arith.truncf %703 : vector<8x256xf32> to vector<8x256xbf16>
    %c24_499 = arith.constant 24 : index
    %c0_500 = arith.constant 0 : index
    %705 = vector.load %arg35[%c24_499, %c0_500] : memref<576x256xbf16, #tpu.memory_space<vmem>>, vector<8x256xbf16>
    tpu.vector_store %arg35[%c24_499, %c0_500], %704 {strides = array<i32>} : memref<576x256xbf16, #tpu.memory_space<vmem>>, vector<8x256xbf16>,
    %c2_501 = arith.constant 2 : index
    %c0_502 = arith.constant 0 : index
    %706 = vector.load %arg2[%c2_501, %c0_502] : memref<9x256xf32, #tpu.memory_space<vmem>>, vector<1x256xf32>
    %c15_i32_503 = arith.constant 15 : i32
    %707 = tpu.dynamic_rotate %683 by %c15_i32_503 dim 1 : vector<8x256xf32>, i32 -> vector<8x256xf32>
    %708 = vector.broadcast %706 : vector<1x256xf32> to vector<8x256xf32>
    %709 = arith.mulf %707, %708 : vector<8x256xf32>
    %710 = arith.truncf %709 : vector<8x256xf32> to vector<8x256xbf16>
    %c32_504 = arith.constant 32 : index
    %c0_505 = arith.constant 0 : index
    %711 = vector.load %arg35[%c32_504, %c0_505] : memref<576x256xbf16, #tpu.memory_space<vmem>>, vector<8x256xbf16>
    tpu.vector_store %arg35[%c32_504, %c0_505], %710 {strides = array<i32>} : memref<576x256xbf16, #tpu.memory_space<vmem>>, vector<8x256xbf16>,
    %c15_i32_506 = arith.constant 15 : i32
    %712 = tpu.dynamic_rotate %65 by %c15_i32_506 dim 1 : vector<8x256xf32>, i32 -> vector<8x256xf32>
    %713 = vector.broadcast %706 : vector<1x256xf32> to vector<8x256xf32>
    %714 = arith.mulf %712, %713 : vector<8x256xf32>
    %715 = arith.truncf %714 : vector<8x256xf32> to vector<8x256xbf16>
    %c40_507 = arith.constant 40 : index
    %c0_508 = arith.constant 0 : index
    %716 = vector.load %arg35[%c40_507, %c0_508] : memref<576x256xbf16, #tpu.memory_space<vmem>>, vector<8x256xbf16>
    tpu.vector_store %arg35[%c40_507, %c0_508], %715 {strides = array<i32>} : memref<576x256xbf16, #tpu.memory_space<vmem>>, vector<8x256xbf16>,
    %c3_509 = arith.constant 3 : index
    %c0_510 = arith.constant 0 : index
    %717 = vector.load %arg2[%c3_509, %c0_510] : memref<9x256xf32, #tpu.memory_space<vmem>>, vector<1x256xf32>
    %c1_i32_511 = arith.constant 1 : i32
    %718 = tpu.dynamic_rotate %683 by %c1_i32_511 dim 1 : vector<8x256xf32>, i32 -> vector<8x256xf32>
    %719 = vector.broadcast %717 : vector<1x256xf32> to vector<8x256xf32>
    %720 = arith.mulf %718, %719 : vector<8x256xf32>
    %721 = arith.truncf %720 : vector<8x256xf32> to vector<8x256xbf16>
    %c48_512 = arith.constant 48 : index
    %c0_513 = arith.constant 0 : index
    %722 = vector.load %arg35[%c48_512, %c0_513] : memref<576x256xbf16, #tpu.memory_space<vmem>>, vector<8x256xbf16>
    tpu.vector_store %arg35[%c48_512, %c0_513], %721 {strides = array<i32>} : memref<576x256xbf16, #tpu.memory_space<vmem>>, vector<8x256xbf16>,
    %c1_i32_514 = arith.constant 1 : i32
    %723 = tpu.dynamic_rotate %65 by %c1_i32_514 dim 1 : vector<8x256xf32>, i32 -> vector<8x256xf32>
    %724 = vector.broadcast %717 : vector<1x256xf32> to vector<8x256xf32>
    %725 = arith.mulf %723, %724 : vector<8x256xf32>
    %726 = arith.truncf %725 : vector<8x256xf32> to vector<8x256xbf16>
    %c56_515 = arith.constant 56 : index
    %c0_516 = arith.constant 0 : index
    %727 = vector.load %arg35[%c56_515, %c0_516] : memref<576x256xbf16, #tpu.memory_space<vmem>>, vector<8x256xbf16>
    tpu.vector_store %arg35[%c56_515, %c0_516], %726 {strides = array<i32>} : memref<576x256xbf16, #tpu.memory_space<vmem>>, vector<8x256xbf16>,
    %c4_517 = arith.constant 4 : index
    %c0_518 = arith.constant 0 : index
    %728 = vector.load %arg2[%c4_517, %c0_518] : memref<9x256xf32, #tpu.memory_space<vmem>>, vector<1x256xf32>
    %729 = vector.broadcast %728 : vector<1x256xf32> to vector<8x256xf32>
    %730 = arith.mulf %683, %729 : vector<8x256xf32>
    %731 = arith.truncf %730 : vector<8x256xf32> to vector<8x256xbf16>
    %c64_519 = arith.constant 64 : index
    %c0_520 = arith.constant 0 : index
    %732 = vector.load %arg35[%c64_519, %c0_520] : memref<576x256xbf16, #tpu.memory_space<vmem>>, vector<8x256xbf16>
    tpu.vector_store %arg35[%c64_519, %c0_520], %731 {strides = array<i32>} : memref<576x256xbf16, #tpu.memory_space<vmem>>, vector<8x256xbf16>,
    %733 = vector.broadcast %728 : vector<1x256xf32> to vector<8x256xf32>
    %734 = arith.mulf %65, %733 : vector<8x256xf32>
    %735 = arith.truncf %734 : vector<8x256xf32> to vector<8x256xbf16>
    %c72 = arith.constant 72 : index
    %c0_521 = arith.constant 0 : index
    %736 = vector.load %arg35[%c72, %c0_521] : memref<576x256xbf16, #tpu.memory_space<vmem>>, vector<8x256xbf16>
    tpu.vector_store %arg35[%c72, %c0_521], %735 {strides = array<i32>} : memref<576x256xbf16, #tpu.memory_space<vmem>>, vector<8x256xbf16>,
    %c5_522 = arith.constant 5 : index
    %c0_523 = arith.constant 0 : index
    %737 = vector.load %arg2[%c5_522, %c0_523] : memref<9x256xf32, #tpu.memory_space<vmem>>, vector<1x256xf32>
    %c255_i32_524 = arith.constant 255 : i32
    %738 = tpu.dynamic_rotate %683 by %c255_i32_524 dim 1 : vector<8x256xf32>, i32 -> vector<8x256xf32>
    %739 = vector.broadcast %737 : vector<1x256xf32> to vector<8x256xf32>
    %740 = arith.mulf %738, %739 : vector<8x256xf32>
    %741 = arith.truncf %740 : vector<8x256xf32> to vector<8x256xbf16>
    %c80_525 = arith.constant 80 : index
    %c0_526 = arith.constant 0 : index
    %742 = vector.load %arg35[%c80_525, %c0_526] : memref<576x256xbf16, #tpu.memory_space<vmem>>, vector<8x256xbf16>
    tpu.vector_store %arg35[%c80_525, %c0_526], %741 {strides = array<i32>} : memref<576x256xbf16, #tpu.memory_space<vmem>>, vector<8x256xbf16>,
    %c255_i32_527 = arith.constant 255 : i32
    %743 = tpu.dynamic_rotate %65 by %c255_i32_527 dim 1 : vector<8x256xf32>, i32 -> vector<8x256xf32>
    %744 = vector.broadcast %737 : vector<1x256xf32> to vector<8x256xf32>
    %745 = arith.mulf %743, %744 : vector<8x256xf32>
    %746 = arith.truncf %745 : vector<8x256xf32> to vector<8x256xbf16>
    %c88 = arith.constant 88 : index
    %c0_528 = arith.constant 0 : index
    %747 = vector.load %arg35[%c88, %c0_528] : memref<576x256xbf16, #tpu.memory_space<vmem>>, vector<8x256xbf16>
    tpu.vector_store %arg35[%c88, %c0_528], %746 {strides = array<i32>} : memref<576x256xbf16, #tpu.memory_space<vmem>>, vector<8x256xbf16>,
    %c6_529 = arith.constant 6 : index
    %c0_530 = arith.constant 0 : index
    %748 = vector.load %arg2[%c6_529, %c0_530] : memref<9x256xf32, #tpu.memory_space<vmem>>, vector<1x256xf32>
    %c241_i32_531 = arith.constant 241 : i32
    %749 = tpu.dynamic_rotate %683 by %c241_i32_531 dim 1 : vector<8x256xf32>, i32 -> vector<8x256xf32>
    %750 = vector.broadcast %748 : vector<1x256xf32> to vector<8x256xf32>
    %751 = arith.mulf %749, %750 : vector<8x256xf32>
    %752 = arith.truncf %751 : vector<8x256xf32> to vector<8x256xbf16>
    %c96_532 = arith.constant 96 : index
    %c0_533 = arith.constant 0 : index
    %753 = vector.load %arg35[%c96_532, %c0_533] : memref<576x256xbf16, #tpu.memory_space<vmem>>, vector<8x256xbf16>
    tpu.vector_store %arg35[%c96_532, %c0_533], %752 {strides = array<i32>} : memref<576x256xbf16, #tpu.memory_space<vmem>>, vector<8x256xbf16>,
    %c241_i32_534 = arith.constant 241 : i32
    %754 = tpu.dynamic_rotate %65 by %c241_i32_534 dim 1 : vector<8x256xf32>, i32 -> vector<8x256xf32>
    %755 = vector.broadcast %748 : vector<1x256xf32> to vector<8x256xf32>
    %756 = arith.mulf %754, %755 : vector<8x256xf32>
    %757 = arith.truncf %756 : vector<8x256xf32> to vector<8x256xbf16>
    %c104 = arith.constant 104 : index
    %c0_535 = arith.constant 0 : index
    %758 = vector.load %arg35[%c104, %c0_535] : memref<576x256xbf16, #tpu.memory_space<vmem>>, vector<8x256xbf16>
    tpu.vector_store %arg35[%c104, %c0_535], %757 {strides = array<i32>} : memref<576x256xbf16, #tpu.memory_space<vmem>>, vector<8x256xbf16>,
    %c7_536 = arith.constant 7 : index
    %c0_537 = arith.constant 0 : index
    %759 = vector.load %arg2[%c7_536, %c0_537] : memref<9x256xf32, #tpu.memory_space<vmem>>, vector<1x256xf32>
    %c240_i32_538 = arith.constant 240 : i32
    %760 = tpu.dynamic_rotate %683 by %c240_i32_538 dim 1 : vector<8x256xf32>, i32 -> vector<8x256xf32>
    %761 = vector.broadcast %759 : vector<1x256xf32> to vector<8x256xf32>
    %762 = arith.mulf %760, %761 : vector<8x256xf32>
    %763 = arith.truncf %762 : vector<8x256xf32> to vector<8x256xbf16>
    %c112_539 = arith.constant 112 : index
    %c0_540 = arith.constant 0 : index
    %764 = vector.load %arg35[%c112_539, %c0_540] : memref<576x256xbf16, #tpu.memory_space<vmem>>, vector<8x256xbf16>
    tpu.vector_store %arg35[%c112_539, %c0_540], %763 {strides = array<i32>} : memref<576x256xbf16, #tpu.memory_space<vmem>>, vector<8x256xbf16>,
    %c240_i32_541 = arith.constant 240 : i32
    %765 = tpu.dynamic_rotate %65 by %c240_i32_541 dim 1 : vector<8x256xf32>, i32 -> vector<8x256xf32>
    %766 = vector.broadcast %759 : vector<1x256xf32> to vector<8x256xf32>
    %767 = arith.mulf %765, %766 : vector<8x256xf32>
    %768 = arith.truncf %767 : vector<8x256xf32> to vector<8x256xbf16>
    %c120 = arith.constant 120 : index
    %c0_542 = arith.constant 0 : index
    %769 = vector.load %arg35[%c120, %c0_542] : memref<576x256xbf16, #tpu.memory_space<vmem>>, vector<8x256xbf16>
    tpu.vector_store %arg35[%c120, %c0_542], %768 {strides = array<i32>} : memref<576x256xbf16, #tpu.memory_space<vmem>>, vector<8x256xbf16>,
    %c8_543 = arith.constant 8 : index
    %c0_544 = arith.constant 0 : index
    %770 = vector.load %arg2[%c8_543, %c0_544] : memref<9x256xf32, #tpu.memory_space<vmem>>, vector<1x256xf32>
    %c239_i32_545 = arith.constant 239 : i32
    %771 = tpu.dynamic_rotate %683 by %c239_i32_545 dim 1 : vector<8x256xf32>, i32 -> vector<8x256xf32>
    %772 = vector.broadcast %770 : vector<1x256xf32> to vector<8x256xf32>
    %773 = arith.mulf %771, %772 : vector<8x256xf32>
    %774 = arith.truncf %773 : vector<8x256xf32> to vector<8x256xbf16>
    %c128_546 = arith.constant 128 : index
    %c0_547 = arith.constant 0 : index
    %775 = vector.load %arg35[%c128_546, %c0_547] : memref<576x256xbf16, #tpu.memory_space<vmem>>, vector<8x256xbf16>
    tpu.vector_store %arg35[%c128_546, %c0_547], %774 {strides = array<i32>} : memref<576x256xbf16, #tpu.memory_space<vmem>>, vector<8x256xbf16>,
    %c239_i32_548 = arith.constant 239 : i32
    %776 = tpu.dynamic_rotate %65 by %c239_i32_548 dim 1 : vector<8x256xf32>, i32 -> vector<8x256xf32>
    %777 = vector.broadcast %770 : vector<1x256xf32> to vector<8x256xf32>
    %778 = arith.mulf %776, %777 : vector<8x256xf32>
    %779 = arith.truncf %778 : vector<8x256xf32> to vector<8x256xbf16>
    %c136 = arith.constant 136 : index
    %c0_549 = arith.constant 0 : index
    %780 = vector.load %arg35[%c136, %c0_549] : memref<576x256xbf16, #tpu.memory_space<vmem>>, vector<8x256xbf16>
    tpu.vector_store %arg35[%c136, %c0_549], %779 {strides = array<i32>} : memref<576x256xbf16, #tpu.memory_space<vmem>>, vector<8x256xbf16>,
    %c0_550 = arith.constant 0 : index
    %c0_551 = arith.constant 0 : index
    %781 = vector.load %arg35[%c0_550, %c0_551] : memref<576x256xbf16, #tpu.memory_space<vmem>>, vector<144x256xbf16>
    %c0_552 = arith.constant 0 : index
    %c0_553 = arith.constant 0 : index
    %782 = vector.load %arg30[%c0_552, %c0_553] : memref<8x144xbf16, #tpu.memory_space<vmem>>, vector<8x144xbf16>
    %cst_554 = arith.constant dense<0.000000e+00> : vector<8x256xf32>
    %783 = tpu.matmul %782, %781, %cst_554 {dimension_numbers = #tpu.dot_dimension_numbers<[1], [0], [0], [1], [0, 0, 1, 1], [], []>} : vector<8x144xbf16>, vector<144x256xbf16>, vector<8x256xf32> -> vector<8x256xf32>
    %c0_555 = arith.constant 0 : index
    %c0_556 = arith.constant 0 : index
    %784 = vector.load %arg31[%c0_555, %c0_556] : memref<8x1xf32, #tpu.memory_space<vmem>>, vector<8x1xf32>
    %785 = vector.broadcast %784 : vector<8x1xf32> to vector<8x256xf32>
    %786 = arith.addf %783, %785 : vector<8x256xf32>
    %cst_557 = arith.constant 0.000000e+00 : f32
    %787 = vector.broadcast %cst_557 : f32 to vector<8x256xf32>
    %788 = arith.cmpf oge, %786, %787 : vector<8x256xf32>
    %cst_558 = arith.constant 2.000000e-01 : f32
    %789 = vector.broadcast %cst_558 : f32 to vector<8x256xf32>
    %790 = arith.mulf %789, %786 : vector<8x256xf32>
    %791 = arith.select %788, %786, %790 : vector<8x256xi1>, vector<8x256xf32>
    %c0_559 = arith.constant 0 : index
    %c0_560 = arith.constant 0 : index
    %792 = vector.load %arg2[%c0_559, %c0_560] : memref<9x256xf32, #tpu.memory_space<vmem>>, vector<1x256xf32>
    %c17_i32_561 = arith.constant 17 : i32
    %793 = tpu.dynamic_rotate %791 by %c17_i32_561 dim 1 : vector<8x256xf32>, i32 -> vector<8x256xf32>
    %794 = vector.broadcast %792 : vector<1x256xf32> to vector<8x256xf32>
    %795 = arith.mulf %793, %794 : vector<8x256xf32>
    %796 = arith.truncf %795 : vector<8x256xf32> to vector<8x256xbf16>
    %c0_562 = arith.constant 0 : index
    %c0_563 = arith.constant 0 : index
    %797 = vector.load %arg35[%c0_562, %c0_563] : memref<576x256xbf16, #tpu.memory_space<vmem>>, vector<8x256xbf16>
    tpu.vector_store %arg35[%c0_562, %c0_563], %796 {strides = array<i32>} : memref<576x256xbf16, #tpu.memory_space<vmem>>, vector<8x256xbf16>,
    %c1_564 = arith.constant 1 : index
    %c0_565 = arith.constant 0 : index
    %798 = vector.load %arg2[%c1_564, %c0_565] : memref<9x256xf32, #tpu.memory_space<vmem>>, vector<1x256xf32>
    %c16_i32_566 = arith.constant 16 : i32
    %799 = tpu.dynamic_rotate %791 by %c16_i32_566 dim 1 : vector<8x256xf32>, i32 -> vector<8x256xf32>
    %800 = vector.broadcast %798 : vector<1x256xf32> to vector<8x256xf32>
    %801 = arith.mulf %799, %800 : vector<8x256xf32>
    %802 = arith.truncf %801 : vector<8x256xf32> to vector<8x256xbf16>
    %c8_567 = arith.constant 8 : index
    %c0_568 = arith.constant 0 : index
    %803 = vector.load %arg35[%c8_567, %c0_568] : memref<576x256xbf16, #tpu.memory_space<vmem>>, vector<8x256xbf16>
    tpu.vector_store %arg35[%c8_567, %c0_568], %802 {strides = array<i32>} : memref<576x256xbf16, #tpu.memory_space<vmem>>, vector<8x256xbf16>,
    %c2_569 = arith.constant 2 : index
    %c0_570 = arith.constant 0 : index
    %804 = vector.load %arg2[%c2_569, %c0_570] : memref<9x256xf32, #tpu.memory_space<vmem>>, vector<1x256xf32>
    %c15_i32_571 = arith.constant 15 : i32
    %805 = tpu.dynamic_rotate %791 by %c15_i32_571 dim 1 : vector<8x256xf32>, i32 -> vector<8x256xf32>
    %806 = vector.broadcast %804 : vector<1x256xf32> to vector<8x256xf32>
    %807 = arith.mulf %805, %806 : vector<8x256xf32>
    %808 = arith.truncf %807 : vector<8x256xf32> to vector<8x256xbf16>
    %c16_572 = arith.constant 16 : index
    %c0_573 = arith.constant 0 : index
    %809 = vector.load %arg35[%c16_572, %c0_573] : memref<576x256xbf16, #tpu.memory_space<vmem>>, vector<8x256xbf16>
    tpu.vector_store %arg35[%c16_572, %c0_573], %808 {strides = array<i32>} : memref<576x256xbf16, #tpu.memory_space<vmem>>, vector<8x256xbf16>,
    %c3_574 = arith.constant 3 : index
    %c0_575 = arith.constant 0 : index
    %810 = vector.load %arg2[%c3_574, %c0_575] : memref<9x256xf32, #tpu.memory_space<vmem>>, vector<1x256xf32>
    %c1_i32_576 = arith.constant 1 : i32
    %811 = tpu.dynamic_rotate %791 by %c1_i32_576 dim 1 : vector<8x256xf32>, i32 -> vector<8x256xf32>
    %812 = vector.broadcast %810 : vector<1x256xf32> to vector<8x256xf32>
    %813 = arith.mulf %811, %812 : vector<8x256xf32>
    %814 = arith.truncf %813 : vector<8x256xf32> to vector<8x256xbf16>
    %c24_577 = arith.constant 24 : index
    %c0_578 = arith.constant 0 : index
    %815 = vector.load %arg35[%c24_577, %c0_578] : memref<576x256xbf16, #tpu.memory_space<vmem>>, vector<8x256xbf16>
    tpu.vector_store %arg35[%c24_577, %c0_578], %814 {strides = array<i32>} : memref<576x256xbf16, #tpu.memory_space<vmem>>, vector<8x256xbf16>,
    %c4_579 = arith.constant 4 : index
    %c0_580 = arith.constant 0 : index
    %816 = vector.load %arg2[%c4_579, %c0_580] : memref<9x256xf32, #tpu.memory_space<vmem>>, vector<1x256xf32>
    %817 = vector.broadcast %816 : vector<1x256xf32> to vector<8x256xf32>
    %818 = arith.mulf %791, %817 : vector<8x256xf32>
    %819 = arith.truncf %818 : vector<8x256xf32> to vector<8x256xbf16>
    %c32_581 = arith.constant 32 : index
    %c0_582 = arith.constant 0 : index
    %820 = vector.load %arg35[%c32_581, %c0_582] : memref<576x256xbf16, #tpu.memory_space<vmem>>, vector<8x256xbf16>
    tpu.vector_store %arg35[%c32_581, %c0_582], %819 {strides = array<i32>} : memref<576x256xbf16, #tpu.memory_space<vmem>>, vector<8x256xbf16>,
    %c5_583 = arith.constant 5 : index
    %c0_584 = arith.constant 0 : index
    %821 = vector.load %arg2[%c5_583, %c0_584] : memref<9x256xf32, #tpu.memory_space<vmem>>, vector<1x256xf32>
    %c255_i32_585 = arith.constant 255 : i32
    %822 = tpu.dynamic_rotate %791 by %c255_i32_585 dim 1 : vector<8x256xf32>, i32 -> vector<8x256xf32>
    %823 = vector.broadcast %821 : vector<1x256xf32> to vector<8x256xf32>
    %824 = arith.mulf %822, %823 : vector<8x256xf32>
    %825 = arith.truncf %824 : vector<8x256xf32> to vector<8x256xbf16>
    %c40_586 = arith.constant 40 : index
    %c0_587 = arith.constant 0 : index
    %826 = vector.load %arg35[%c40_586, %c0_587] : memref<576x256xbf16, #tpu.memory_space<vmem>>, vector<8x256xbf16>
    tpu.vector_store %arg35[%c40_586, %c0_587], %825 {strides = array<i32>} : memref<576x256xbf16, #tpu.memory_space<vmem>>, vector<8x256xbf16>,
    %c6_588 = arith.constant 6 : index
    %c0_589 = arith.constant 0 : index
    %827 = vector.load %arg2[%c6_588, %c0_589] : memref<9x256xf32, #tpu.memory_space<vmem>>, vector<1x256xf32>
    %c241_i32_590 = arith.constant 241 : i32
    %828 = tpu.dynamic_rotate %791 by %c241_i32_590 dim 1 : vector<8x256xf32>, i32 -> vector<8x256xf32>
    %829 = vector.broadcast %827 : vector<1x256xf32> to vector<8x256xf32>
    %830 = arith.mulf %828, %829 : vector<8x256xf32>
    %831 = arith.truncf %830 : vector<8x256xf32> to vector<8x256xbf16>
    %c48_591 = arith.constant 48 : index
    %c0_592 = arith.constant 0 : index
    %832 = vector.load %arg35[%c48_591, %c0_592] : memref<576x256xbf16, #tpu.memory_space<vmem>>, vector<8x256xbf16>
    tpu.vector_store %arg35[%c48_591, %c0_592], %831 {strides = array<i32>} : memref<576x256xbf16, #tpu.memory_space<vmem>>, vector<8x256xbf16>,
    %c7_593 = arith.constant 7 : index
    %c0_594 = arith.constant 0 : index
    %833 = vector.load %arg2[%c7_593, %c0_594] : memref<9x256xf32, #tpu.memory_space<vmem>>, vector<1x256xf32>
    %c240_i32_595 = arith.constant 240 : i32
    %834 = tpu.dynamic_rotate %791 by %c240_i32_595 dim 1 : vector<8x256xf32>, i32 -> vector<8x256xf32>
    %835 = vector.broadcast %833 : vector<1x256xf32> to vector<8x256xf32>
    %836 = arith.mulf %834, %835 : vector<8x256xf32>
    %837 = arith.truncf %836 : vector<8x256xf32> to vector<8x256xbf16>
    %c56_596 = arith.constant 56 : index
    %c0_597 = arith.constant 0 : index
    %838 = vector.load %arg35[%c56_596, %c0_597] : memref<576x256xbf16, #tpu.memory_space<vmem>>, vector<8x256xbf16>
    tpu.vector_store %arg35[%c56_596, %c0_597], %837 {strides = array<i32>} : memref<576x256xbf16, #tpu.memory_space<vmem>>, vector<8x256xbf16>,
    %c8_598 = arith.constant 8 : index
    %c0_599 = arith.constant 0 : index
    %839 = vector.load %arg2[%c8_598, %c0_599] : memref<9x256xf32, #tpu.memory_space<vmem>>, vector<1x256xf32>
    %c239_i32_600 = arith.constant 239 : i32
    %840 = tpu.dynamic_rotate %791 by %c239_i32_600 dim 1 : vector<8x256xf32>, i32 -> vector<8x256xf32>
    %841 = vector.broadcast %839 : vector<1x256xf32> to vector<8x256xf32>
    %842 = arith.mulf %840, %841 : vector<8x256xf32>
    %843 = arith.truncf %842 : vector<8x256xf32> to vector<8x256xbf16>
    %c64_601 = arith.constant 64 : index
    %c0_602 = arith.constant 0 : index
    %844 = vector.load %arg35[%c64_601, %c0_602] : memref<576x256xbf16, #tpu.memory_space<vmem>>, vector<8x256xbf16>
    tpu.vector_store %arg35[%c64_601, %c0_602], %843 {strides = array<i32>} : memref<576x256xbf16, #tpu.memory_space<vmem>>, vector<8x256xbf16>,
    %c0_603 = arith.constant 0 : index
    %c0_604 = arith.constant 0 : index
    %845 = vector.load %arg35[%c0_603, %c0_604] : memref<576x256xbf16, #tpu.memory_space<vmem>>, vector<72x256xbf16>
    %c0_605 = arith.constant 0 : index
    %c0_606 = arith.constant 0 : index
    %846 = vector.load %arg32[%c0_605, %c0_606] : memref<8x72xbf16, #tpu.memory_space<vmem>>, vector<8x72xbf16>
    %cst_607 = arith.constant dense<0.000000e+00> : vector<8x256xf32>
    %847 = tpu.matmul %846, %845, %cst_607 {dimension_numbers = #tpu.dot_dimension_numbers<[1], [0], [0], [1], [0, 0, 1, 1], [], []>} : vector<8x72xbf16>, vector<72x256xbf16>, vector<8x256xf32> -> vector<8x256xf32>
    %c0_608 = arith.constant 0 : index
    %c0_609 = arith.constant 0 : index
    %848 = vector.load %arg33[%c0_608, %c0_609] : memref<8x1xf32, #tpu.memory_space<vmem>>, vector<8x1xf32>
    %849 = vector.broadcast %848 : vector<8x1xf32> to vector<8x256xf32>
    %850 = arith.addf %847, %849 : vector<8x256xf32>
    %851 = tpu.iota {dimensions = array<i32: 0>} : vector<8x256xi32>
    %cst_610 = arith.constant 2.000000e+01 : f32
    %852 = vector.broadcast %cst_610 : f32 to vector<8x256xf32>
    %853 = arith.cmpf ogt, %850, %852 : vector<8x256xf32>
    %854 = math.exp %850 : vector<8x256xf32>
    %cst_611 = arith.constant 1.000000e+00 : f32
    %855 = vector.broadcast %cst_611 : f32 to vector<8x256xf32>
    %856 = arith.addf %855, %854 : vector<8x256xf32>
    %857 = math.log %856 : vector<8x256xf32>
    %858 = arith.select %853, %850, %857 : vector<8x256xi1>, vector<8x256xf32>
    %c2_i32_612 = arith.constant 2 : i32
    %859 = vector.broadcast %c2_i32_612 : i32 to vector<8x256xi32>
    %860 = arith.cmpi slt, %851, %859 : vector<8x256xi32>
    %c2_i32_613 = arith.constant 2 : i32
    %861 = vector.broadcast %c2_i32_613 : i32 to vector<8x256xi32>
    %862 = arith.cmpi eq, %851, %861 : vector<8x256xi32>
    %cst_614 = arith.constant 1.000000e+00 : f32
    %863 = vector.broadcast %cst_614 : f32 to vector<8x256xf32>
    %864 = arith.addf %858, %863 : vector<8x256xf32>
    %865 = arith.select %862, %858, %864 : vector<8x256xi1>, vector<8x256xf32>
    %866 = arith.select %860, %850, %865 : vector<8x256xi1>, vector<8x256xf32>
    %c0_615 = arith.constant 0 : index
    %c0_616 = arith.constant 0 : index
    %c0_617 = arith.constant 0 : index
    %867 = vector.load %arg34[%c0_615, %c0_616, %c0_617] : memref<1x8x256xf32, #tpu.memory_space<vmem>>, vector<1x8x256xf32>
    %868 = vector.shape_cast %867 : vector<1x8x256xf32> to vector<8x256xf32>
    %869 = vector.shape_cast %866 : vector<8x256xf32> to vector<1x8x256xf32>
    tpu.vector_store %arg34[%c0_615, %c0_616, %c0_617], %869 {strides = array<i32>} : memref<1x8x256xf32, #tpu.memory_space<vmem>>, vector<1x8x256xf32>,
    return
  }
  func.func @transform_0(%arg0: i32) -> (i32, i32, i32) {
    %c0_i32 = arith.constant 0 : i32
    %c0_i32_0 = arith.constant 0 : i32
    %c0_i32_1 = arith.constant 0 : i32
    return %arg0, %c0_i32, %c0_i32_0 : i32, i32, i32
  }
  func.func @transform_1(%arg0: i32) -> (i32, i32) {
    %c0_i32 = arith.constant 0 : i32
    %c0_i32_0 = arith.constant 0 : i32
    %c0_i32_1 = arith.constant 0 : i32
    return %c0_i32, %c0_i32_0 : i32, i32
  }
  func.func @transform_2(%arg0: i32) -> (i32, i32) {
    %c0_i32 = arith.constant 0 : i32
    %c0_i32_0 = arith.constant 0 : i32
    %c0_i32_1 = arith.constant 0 : i32
    return %c0_i32, %c0_i32_0 : i32, i32
  }
  func.func @transform_3(%arg0: i32) -> (i32, i32) {
    %c0_i32 = arith.constant 0 : i32
    %c0_i32_0 = arith.constant 0 : i32
    %c0_i32_1 = arith.constant 0 : i32
    return %c0_i32, %c0_i32_0 : i32, i32
  }
  func.func @transform_4(%arg0: i32) -> (i32, i32) {
    %c0_i32 = arith.constant 0 : i32
    %c0_i32_0 = arith.constant 0 : i32
    %c0_i32_1 = arith.constant 0 : i32
    return %c0_i32, %c0_i32_0 : i32, i32
  }
  func.func @transform_5(%arg0: i32) -> (i32, i32) {
    %c0_i32 = arith.constant 0 : i32
    %c0_i32_0 = arith.constant 0 : i32
    %c0_i32_1 = arith.constant 0 : i32
    return %c0_i32, %c0_i32_0 : i32, i32
  }
  func.func @transform_6(%arg0: i32) -> (i32, i32) {
    %c0_i32 = arith.constant 0 : i32
    %c0_i32_0 = arith.constant 0 : i32
    %c0_i32_1 = arith.constant 0 : i32
    return %c0_i32, %c0_i32_0 : i32, i32
  }
  func.func @transform_7(%arg0: i32) -> (i32, i32) {
    %c0_i32 = arith.constant 0 : i32
    %c0_i32_0 = arith.constant 0 : i32
    %c0_i32_1 = arith.constant 0 : i32
    return %c0_i32, %c0_i32_0 : i32, i32
  }
  func.func @transform_8(%arg0: i32) -> (i32, i32) {
    %c0_i32 = arith.constant 0 : i32
    %c0_i32_0 = arith.constant 0 : i32
    %c0_i32_1 = arith.constant 0 : i32
    return %c0_i32, %c0_i32_0 : i32, i32
  }
  func.func @transform_9(%arg0: i32) -> (i32, i32) {
    %c0_i32 = arith.constant 0 : i32
    %c0_i32_0 = arith.constant 0 : i32
    %c0_i32_1 = arith.constant 0 : i32
    return %c0_i32, %c0_i32_0 : i32, i32
  }
  func.func @transform_10(%arg0: i32) -> (i32, i32) {
    %c0_i32 = arith.constant 0 : i32
    %c0_i32_0 = arith.constant 0 : i32
    %c0_i32_1 = arith.constant 0 : i32
    return %c0_i32, %c0_i32_0 : i32, i32
  }
  func.func @transform_11(%arg0: i32) -> (i32, i32) {
    %c0_i32 = arith.constant 0 : i32
    %c0_i32_0 = arith.constant 0 : i32
    %c0_i32_1 = arith.constant 0 : i32
    return %c0_i32, %c0_i32_0 : i32, i32
  }
  func.func @transform_12(%arg0: i32) -> (i32, i32) {
    %c0_i32 = arith.constant 0 : i32
    %c0_i32_0 = arith.constant 0 : i32
    %c0_i32_1 = arith.constant 0 : i32
    return %c0_i32, %c0_i32_0 : i32, i32
  }
  func.func @transform_13(%arg0: i32) -> (i32, i32) {
    %c0_i32 = arith.constant 0 : i32
    %c0_i32_0 = arith.constant 0 : i32
    %c0_i32_1 = arith.constant 0 : i32
    return %c0_i32, %c0_i32_0 : i32, i32
  }
  func.func @transform_14(%arg0: i32) -> (i32, i32) {
    %c0_i32 = arith.constant 0 : i32
    %c0_i32_0 = arith.constant 0 : i32
    %c0_i32_1 = arith.constant 0 : i32
    return %c0_i32, %c0_i32_0 : i32, i32
  }
  func.func @transform_15(%arg0: i32) -> (i32, i32) {
    %c0_i32 = arith.constant 0 : i32
    %c0_i32_0 = arith.constant 0 : i32
    %c0_i32_1 = arith.constant 0 : i32
    return %c0_i32, %c0_i32_0 : i32, i32
  }
  func.func @transform_16(%arg0: i32) -> (i32, i32) {
    %c0_i32 = arith.constant 0 : i32
    %c0_i32_0 = arith.constant 0 : i32
    %c0_i32_1 = arith.constant 0 : i32
    return %c0_i32, %c0_i32_0 : i32, i32
  }
  func.func @transform_17(%arg0: i32) -> (i32, i32) {
    %c0_i32 = arith.constant 0 : i32
    %c0_i32_0 = arith.constant 0 : i32
    %c0_i32_1 = arith.constant 0 : i32
    return %c0_i32, %c0_i32_0 : i32, i32
  }
  func.func @transform_18(%arg0: i32) -> (i32, i32) {
    %c0_i32 = arith.constant 0 : i32
    %c0_i32_0 = arith.constant 0 : i32
    %c0_i32_1 = arith.constant 0 : i32
    return %c0_i32, %c0_i32_0 : i32, i32
  }
  func.func @transform_19(%arg0: i32) -> (i32, i32) {
    %c0_i32 = arith.constant 0 : i32
    %c0_i32_0 = arith.constant 0 : i32
    %c0_i32_1 = arith.constant 0 : i32
    return %c0_i32, %c0_i32_0 : i32, i32
  }
  func.func @transform_20(%arg0: i32) -> (i32, i32) {
    %c0_i32 = arith.constant 0 : i32
    %c0_i32_0 = arith.constant 0 : i32
    %c0_i32_1 = arith.constant 0 : i32
    return %c0_i32, %c0_i32_0 : i32, i32
  }
  func.func @transform_21(%arg0: i32) -> (i32, i32) {
    %c0_i32 = arith.constant 0 : i32
    %c0_i32_0 = arith.constant 0 : i32
    %c0_i32_1 = arith.constant 0 : i32
    return %c0_i32, %c0_i32_0 : i32, i32
  }
  func.func @transform_22(%arg0: i32) -> (i32, i32) {
    %c0_i32 = arith.constant 0 : i32
    %c0_i32_0 = arith.constant 0 : i32
    %c0_i32_1 = arith.constant 0 : i32
    return %c0_i32, %c0_i32_0 : i32, i32
  }
  func.func @transform_23(%arg0: i32) -> (i32, i32) {
    %c0_i32 = arith.constant 0 : i32
    %c0_i32_0 = arith.constant 0 : i32
    %c0_i32_1 = arith.constant 0 : i32
    return %c0_i32, %c0_i32_0 : i32, i32
  }
  func.func @transform_24(%arg0: i32) -> (i32, i32) {
    %c0_i32 = arith.constant 0 : i32
    %c0_i32_0 = arith.constant 0 : i32
    %c0_i32_1 = arith.constant 0 : i32
    return %c0_i32, %c0_i32_0 : i32, i32
  }
  func.func @transform_25(%arg0: i32) -> (i32, i32) {
    %c0_i32 = arith.constant 0 : i32
    %c0_i32_0 = arith.constant 0 : i32
    %c0_i32_1 = arith.constant 0 : i32
    return %c0_i32, %c0_i32_0 : i32, i32
  }
  func.func @transform_26(%arg0: i32) -> (i32, i32) {
    %c0_i32 = arith.constant 0 : i32
    %c0_i32_0 = arith.constant 0 : i32
    %c0_i32_1 = arith.constant 0 : i32
    return %c0_i32, %c0_i32_0 : i32, i32
  }
  func.func @transform_27(%arg0: i32) -> (i32, i32) {
    %c0_i32 = arith.constant 0 : i32
    %c0_i32_0 = arith.constant 0 : i32
    %c0_i32_1 = arith.constant 0 : i32
    return %c0_i32, %c0_i32_0 : i32, i32
  }
  func.func @transform_28(%arg0: i32) -> (i32, i32) {
    %c0_i32 = arith.constant 0 : i32
    %c0_i32_0 = arith.constant 0 : i32
    %c0_i32_1 = arith.constant 0 : i32
    return %c0_i32, %c0_i32_0 : i32, i32
  }
  func.func @transform_29(%arg0: i32) -> (i32, i32) {
    %c0_i32 = arith.constant 0 : i32
    %c0_i32_0 = arith.constant 0 : i32
    %c0_i32_1 = arith.constant 0 : i32
    return %c0_i32, %c0_i32_0 : i32, i32
  }
  func.func @transform_30(%arg0: i32) -> (i32, i32) {
    %c0_i32 = arith.constant 0 : i32
    %c0_i32_0 = arith.constant 0 : i32
    %c0_i32_1 = arith.constant 0 : i32
    return %c0_i32, %c0_i32_0 : i32, i32
  }
  func.func @transform_31(%arg0: i32) -> (i32, i32) {
    %c0_i32 = arith.constant 0 : i32
    %c0_i32_0 = arith.constant 0 : i32
    %c0_i32_1 = arith.constant 0 : i32
    return %c0_i32, %c0_i32_0 : i32, i32
  }
  func.func @transform_32(%arg0: i32) -> (i32, i32) {
    %c0_i32 = arith.constant 0 : i32
    %c0_i32_0 = arith.constant 0 : i32
    %c0_i32_1 = arith.constant 0 : i32
    return %c0_i32, %c0_i32_0 : i32, i32
  }
  func.func @transform_33(%arg0: i32) -> (i32, i32, i32) {
    %c0_i32 = arith.constant 0 : i32
    %c0_i32_0 = arith.constant 0 : i32
    %c0_i32_1 = arith.constant 0 : i32
    return %arg0, %c0_i32, %c0_i32_0 : i32, i32, i32
  }
}

</mosaic_0001>

<bundles_post_ra>
// kernel: tpu_custom_call.1
= control target key start
LH: loop header
LB: loop body
LE: loop exit
PB: predicated region body
PF: predicated region fallthrough
CT: control target
= control target key end

     0   :  { %s9289_s6 = smov 1   ;;  %s9290_s10 = smov 2   ;;  %s11095_s0 = inlined_call_operand.smem [shape: u32[34], index: -1, kind: input, shape index: {}] }
   0x1   :  { %s9379_s5 = sld [smem:[%s11095_s0]]   ;;  %s9291_s14 = smov 3  }
   0x2   :  { %s9384_s9 = sld [smem:[%s11095_s0 + %s9289_s6]]   ;;  %s9292_s18 = smov 4  }
   0x3   :  { %s9389_s13 = sld [smem:[%s11095_s0 + %s9290_s10]]   ;;  %s9293_s22 = smov 5  }
   0x4   :  { %s9394_s17 = sld [smem:[%s11095_s0 + %s9291_s14]]   ;;  %s9294_s26 = smov 6  }
   0x5   :  { %s9399_s21 = sld [smem:[%s11095_s0 + %s9292_s18]]   ;;  %s9295_s30 = smov 7  }
   0x6   :  { %s9404_s25 = sld [smem:[%s11095_s0 + %s9293_s22]]   ;;  %s9296_s4 = smov 8  }
   0x7   :  { %11173 = sst [smem:[#allocation41_spill]] %s9379_s5  ;;  %s9297_s10 = smov 9  }
   0x8   :  { %11174 = sst [smem:[#allocation42_spill]] %s9384_s9  ;;  %s9298_s15 = smov 10  }
   0x9   :  { %11175 = sst [smem:[#allocation43_spill]] %s9389_s13  ;;  %s9299_s20 = smov 11  }
   0xa   :  { %s9409_s29 = sld [smem:[%s11095_s0 + %s9294_s26]]   ;;  %s9300_s26 = smov 12  }
   0xb   :  { %s9414_s3 = sld [smem:[%s11095_s0 + %s9295_s30]]   ;;  %s9301_s1 = smov 13  }
   0xc   :  { %11176 = sst [smem:[#allocation44_spill]] %s9404_s25  ;;  %s9302_s7 = smov 14  }
   0xd   :  { %s9419_s8 = sld [smem:[%s11095_s0 + %s9296_s4]]   ;;  %s9304_s22 = smov 16  }
   0xe   :  { %s9424_s14 = sld [smem:[%s11095_s0 + %s9297_s10]]   ;;  %s9305_s28 = smov 17  }
   0xf   :  { %s9429_s19 = sld [smem:[%s11095_s0 + %s9298_s15]]   ;;  %s9303_s15 = smov 15  }
  0x10   :  { %s9434_s24 = sld [smem:[%s11095_s0 + %s9299_s20]]  }
  0x11   :  { %11177 = sst [smem:[#allocation45_spill]] %s9414_s3 }
  0x12   :  { %s9439_s30 = sld [smem:[%s11095_s0 + %s9300_s26]]  }
  0x13   :  { %11178 = sst [smem:[#allocation46_spill]] %s9419_s8 }
  0x14   :  { %s9444_s6 = sld [smem:[%s11095_s0 + %s9301_s1]]  }
  0x15   :  { %s9449_s12 = sld [smem:[%s11095_s0 + %s9302_s7]]   ;;  %s9306_s7 = smov 18  }
  0x16   :  { %s9454_s20 = sld [smem:[%s11095_s0 + %s9303_s15]]   ;;  %s9307_s15 = smov 19  }
  0x17   :  { %s9459_s27 = sld [smem:[%s11095_s0 + %s9304_s22]]   ;;  %s9308_s22 = smov 20  }
  0x18   :  { %11179 = sst [smem:[#allocation47_spill]] %s9439_s30 }
  0x19   :  { %s9464_s4 = sld [smem:[%s11095_s0 + %s9305_s28]]   ;;  %s9309_s28 = smov 21  }
  0x1a   :  { %11180 = sst [smem:[#allocation48_spill]] %s9444_s6 }
  0x1b   :  { %11181 = sst [smem:[#allocation49_spill]] %s9449_s12 }
  0x1c   :  { %s9469_s8 = sld [smem:[%s11095_s0 + %s9306_s7]]   ;;  %s9310_s7 = smov 22  }
  0x1d   :  { %11182 = sst [smem:[#allocation50_spill]] %s9459_s27 }
  0x1e   :  { %s9474_s12 = sld [smem:[%s11095_s0 + %s9307_s15]]   ;;  %s9311_s15 = smov 23  }
  0x1f   :  { %11183 = sst [smem:[#allocation51_spill]] %s9464_s4 }
  0x20   :  { %s9479_s27 = sld [smem:[%s11095_s0 + %s9308_s22]]   ;;  %s9312_s22 = smov 24  }
  0x21   :  { %s9484_s25 = sld [smem:[%s11095_s0 + %s9309_s28]]   ;;  %s9313_s28 = smov 25  }
  0x22   :  { %11184 = sst [smem:[#allocation52_spill]] %s9469_s8 }
  0x23   :  { %s9489_s8 = sld [smem:[%s11095_s0 + %s9310_s7]]   ;;  %s9314_s7 = smov 26  }
  0x24   :  { %11185 = sst [smem:[#allocation53_spill]] %s9474_s12 }
  0x25   :  { %s9494_s30 = sld [smem:[%s11095_s0 + %s9311_s15]]   ;;  %s9315_s15 = smov 27  }
  0x26   :  { %11186 = sst [smem:[#allocation54_spill]] %s9479_s27 }
  0x27   :  { %11187 = sst [smem:[#allocation55_spill]] %s9484_s25 }
  0x28   :  { %s9499_s27 = sld [smem:[%s11095_s0 + %s9312_s22]]   ;;  %s9316_s22 = smov 28  }
  0x29   :  { %11188 = sst [smem:[#allocation56_spill]] %s9489_s8 }
  0x2a   :  { %s9504_s5 = sld [smem:[%s11095_s0 + %s9313_s28]]   ;;  %s9317_s28 = smov 29  }
  0x2b   :  { %11189 = sst [smem:[#allocation57_spill]] %s9494_s30 }
  0x2c   :  { %s9509_s8 = sld [smem:[%s11095_s0 + %s9314_s7]]   ;;  %s9318_s7 = smov 30  }
  0x2d   :  { %s9514_s30 = sld [smem:[%s11095_s0 + %s9315_s15]]   ;;  %s9319_s15 = smov 31  }
  0x2e   :  { %11190 = sst [smem:[#allocation58_spill]] %s9499_s27 }
  0x2f   :  { %s9519_s27 = sld [smem:[%s11095_s0 + %s9316_s22]]   ;;  %s9320_s22 = smov 32  }
  0x30   :  { %11191 = sst [smem:[#allocation59_spill]] %s9504_s5 }
  0x31   :  { %s9524_s25 = sld [smem:[%s11095_s0 + %s9317_s28]]   ;;  %s9321_s28 = smov 33  }
  0x32   :  { %11192 = sst [smem:[#allocation60_spill]] %s9509_s8 }
  0x33   :  { %11193 = sst [smem:[#allocation61_spill]] %s9514_s30 }
  0x34   :  { %s9529_s8 = sld [smem:[%s11095_s0 + %s9318_s7]]  }
  0x35   :  { %11194 = sst [smem:[#allocation62_spill]] %s9519_s27 }
  0x36   :  { %s9534_s30 = sld [smem:[%s11095_s0 + %s9319_s15]]  }
  0x37   :  { %11195 = sst [smem:[#allocation63_spill]] %s9524_s25 }
  0x38   :  { %s9539_s27 = sld [smem:[%s11095_s0 + %s9320_s22]]  }
  0x39   :  { %s9544_s25 = sld [smem:[%s11095_s0 + %s9321_s28]]  }
  0x3a   :  { %11196 = sst [smem:[#allocation64_spill]] %s9529_s8 }
  0x3c   :  { %11197 = sst [smem:[#allocation65_spill]] %s9534_s30 }
  0x3e   :  { %11198 = sst [smem:[#allocation66_spill]] %s9539_s27 }
  0x3f   :  { %11199 = sst [smem:[#allocation67_spill]] %s9544_s25 }
  0x40   :  { %72 = vsyncpa [#allocation4], 0 }
  0x41   :  { %74 = vsyncpa [#allocation4 + $0x1], 0 }
  0x42   :  { %75 = vsyncpa [#allocation7], 0 }
  0x43   :  { %76 = vsyncpa [#allocation10], 0 }
  0x44   :  { %77 = vsyncpa [#allocation13], 0 }
  0x45   :  { %78 = vsyncpa [#allocation16], 0 }
  0x46   :  { %79 = vsyncpa [#allocation19], 0 }
  0x47   :  { %80 = vsyncpa [#allocation22], 0 }
  0x48   :  { %81 = vsyncpa [#allocation25], 0 }
  0x49   :  { %82 = vsyncpa [#allocation28], 0 }
  0x4a   :  { %83 = vsyncpa [#allocation5], 0 }
  0x4b   :  { %85 = vsyncpa [#allocation5 + $0x1], 0  ;;  %s9546_s7 = smov 0   ;;  %s9548_s10 = smov 0  }
  0x4c   :  { %s9550_s11 = smov 0   ;;  %s9552_s0 = smov 0  }
  0x4d LB: > { %s11200_s13 = sld [smem:[#allocation43_spill]]  ;;  %s9570_s16 = sadd.s32 4294967295, %s9287_s0   ;;  %s9283_s11 = sphi %s9550_s11, %s11283_s11   ;;  %s9279_s10 = sphi %s9548_s10, %s11282_s10   ;;  %s9275_s7 = sphi %s9546_s7, %s11281_s7   ;;  %s9287_s0 = sphi %s9552_s0, %s11284_s0  }
  0x4e   : > { %s11201_s6 = sld [smem:[#allocation48_spill]]  ;;  %p6840_p0 = scmp.ge.s32.totalorder %s9287_s0, 1 }
  0x4f   : > { %s11202_s5 = sld [smem:[#allocation59_spill]]  ;;  %p11128_p1 = scmp.eq.s32.totalorder %s9570_s16, 0 }
  0x50   : > { %s11203_s4 = sld [smem:[#allocation51_spill]]  ;;  %p820_p2 = scmp.lt.s32.totalorder %s9287_s0, 3 }
  0x51   : > { %s11204_s3 = sld [smem:[#allocation45_spill]]  ;;  %s9322_s22 = smov [#allocation6]  }
  0x52   : > { %s11205_s12 = sld [smem:[#allocation53_spill]]  ;;  %p9575_p3 = pnand %p6840_p0, %p820_p2 }
  0x53   : > { %s11206_s9 = sld [smem:[#allocation42_spill]]  ;;  %s833_s23 = sshll.u32 %s9322_s22, 4  ;;  %s834_s23 = int_to_ptr.vmem [resolvable:$true] %s833_s23 }
  0x54   : > { %11207 = sst [smem:[#allocation68_spill]] %s9570_s16  ;;  %p8390_p4 = pneg %p9575_p3 }
  0x55   : > { %s11208_s18 = scalar_select %p9575_p3, 1, 0 }
  0x56   : > { %p9584_p6 = pnand %p8390_p4, %p11128_p1  ;;  %s859_s28 = sshll.u32 %s9394_s17, 4  ;;  %s9589_s28 = int_to_ptr.hbm [resolvable:$true] %s859_s28 }
  0x57   : > { %11209 = sst [smem:[#allocation69_spill]] %s11208_s18 }
  0x58   : > { %p9594_p8 = pneg %p9584_p6 }
  0x59   : > { %s831_s15 = sshll.u32 %s11206_s9, 4  ;;  %s8686_s25 = scalar_lea.hbm %s11206_s9, 32  ;;  %s9567_s15 = int_to_ptr.hbm [resolvable:$true] %s831_s15 }
  0x5a   : > { %s8679_s1 = sshra.s32 %s9567_s15, 4  ;;  %s8680_s1 = int_to_ptr.hbm [resolvable:$true] %s8679_s1 }
  0x5b   : > { %s8681_s2 = scalar_lea.hbm %s8680_s1, 32  ;;  %p8687_p11 = scmp.lt.s32.totalorder %s8680_s1, %s11206_s9 }
  0x5c   : > { %p8682_p7 = scmp.ne.s32.totalorder %s8680_s1, %s8681_s2  ;;  %p8688_p12 = scmp.lt.s32.totalorder %s8686_s25, %s8681_s2 }
  0x5e   : > { %p8684_p9 = pnand %p9594_p8, %p8682_p7  ;;  %p8689_p13 = por %p8688_p12, %p8687_p11 }
  0x60   : > { %p8685_p10 = pneg %p8684_p9 }
  0x62   : > { %p8690_p0 = pnand %p8689_p13, %p8685_p10 }
  0x64   : > { %8693 = shalt.err (!%p8690_p0)
}
  0x65   : > { %s9323_s30 = smov 256   ;;  %s9324_s27 = smov 16  }
  0x66   : > { %8393 = dma.hbm_to_vmem [thread:$0]  (!%p9584_p6), %s9567_s15, 512, %s834_s23, [#allocation7], %s9323_s30, %s9323_s30, %s9324_s27  }
  0x67   : > { %s9325_s8 = smov [#allocation9]   ;;  %s890_s16 = sshll.u32 %s9409_s29, 4  ;;  %s9606_s16 = int_to_ptr.hbm [resolvable:$true] %s890_s16 }
  0x68   : > { %s861_s18 = sshll.u32 %s9325_s8, 4  ;;  %s8709_s25 = sshra.s32 %s9589_s28, 4  ;;  %s862_s18 = int_to_ptr.vmem [resolvable:$true] %s861_s18  ;;  %s8710_s25 = int_to_ptr.hbm [resolvable:$true] %s8709_s25 }
  0x69   : > { %s8711_s1 = scalar_lea.hbm %s8710_s25, 16  ;;  %s8716_s2 = scalar_lea.hbm %s9394_s17, 16 }
  0x6a   : > { %p8712_p2 = scmp.ne.s32.totalorder %s8710_s25, %s8711_s1  ;;  %p8717_p9 = scmp.lt.s32.totalorder %s8710_s25, %s9394_s17 }
  0x6b   : > { %p8718_p10 = scmp.lt.s32.totalorder %s8716_s2, %s8711_s1 }
  0x6c   : > { %p8714_p4 = pnand %p8712_p2, %p9594_p8 }
  0x6d   : > { %p8719_p11 = por %p8718_p10, %p8717_p9 }
  0x6e   : > { %p8715_p7 = pneg %p8714_p4 }
  0x70   : > { %p8720_p12 = pnand %p8719_p11, %p8715_p7 }
  0x72   : > { %8723 = shalt.err (!%p8720_p12)
}
  0x73   : > { %s11114_s30 = smov 128   ;;  %s11120_s8 = smov 8  }
  0x74   : > { %8399 = dma.hbm_to_vmem [thread:$0]  (!%p9584_p6), %s9589_s28, 256, %s862_s18, [#allocation10], %s11114_s30, %s11114_s30, %s11120_s8  }
  0x75   : > { %s9328_s27 = smov [#allocation12]   ;;  %s921_s23 = sshll.u32 %s9424_s14, 4  ;;  %s922_s23 = int_to_ptr.hbm [resolvable:$true] %s921_s23 }
  0x76   : > { %s892_s15 = sshll.u32 %s9328_s27, 4  ;;  %s8739_s25 = sshra.s32 %s9606_s16, 4  ;;  %s893_s15 = int_to_ptr.vmem [resolvable:$true] %s892_s15  ;;  %s8740_s25 = int_to_ptr.hbm [resolvable:$true] %s8739_s25 }
  0x77   : > { %s8741_s1 = scalar_lea.hbm %s8740_s25, 64  ;;  %s8746_s2 = scalar_lea.hbm %s9409_s29, 64 }
  0x78   : > { %p8742_p13 = scmp.ne.s32.totalorder %s8740_s25, %s8741_s1  ;;  %p8747_p4 = scmp.lt.s32.totalorder %s8740_s25, %s9409_s29 }
  0x79   : > { %p8748_p7 = scmp.lt.s32.totalorder %s8746_s2, %s8741_s1 }
  0x7a   : > { %p8744_p0 = pnand %p8742_p13, %p9594_p8 }
  0x7b   : > { %p8749_p9 = por %p8748_p7, %p8747_p4 }
  0x7c   : > { %p8745_p2 = pneg %p8744_p0 }
  0x7e   : > { %p8750_p10 = pnand %p8749_p9, %p8745_p2 }
  0x80   : > { %8753 = shalt.err (!%p8750_p10)
}
  0x81   : > { %s11116_s9 = smov 64   ;;  %s11118_s18 = smov 4  }
  0x82   : > { %8405 = dma.hbm_to_vmem [thread:$0]  (!%p9584_p6), %s9606_s16, 1024, %s893_s15, [#allocation13], %s11116_s9, %s11116_s9, %s11118_s18  }
  0x83   : > { %s9331_s28 = smov [#allocation15]   ;;  %s950_s25 = sshll.u32 %s9434_s24, 4  ;;  %s9632_s25 = int_to_ptr.hbm [resolvable:$true] %s950_s25 }
  0x84   : > { %s923_s27 = sshll.u32 %s9331_s28, 4  ;;  %s8769_s1 = sshra.s32 %s922_s23, 4  ;;  %s924_s27 = int_to_ptr.vmem [resolvable:$true] %s923_s27  ;;  %s8770_s1 = int_to_ptr.hbm [resolvable:$true] %s8769_s1 }
  0x85   : > { %s8771_s2 = scalar_lea.hbm %s8770_s1, 64  ;;  %s8776_s30 = scalar_lea.hbm %s9424_s14, 64 }
  0x86   : > { %p8772_p11 = scmp.ne.s32.totalorder %s8770_s1, %s8771_s2  ;;  %p8777_p0 = scmp.lt.s32.totalorder %s8770_s1, %s9424_s14 }
  0x87   : > { %p8778_p2 = scmp.lt.s32.totalorder %s8776_s30, %s8771_s2 }
  0x88   : > { %p8774_p12 = pnand %p8772_p11, %p9594_p8 }
  0x89   : > { %p8779_p4 = por %p8778_p2, %p8777_p0 }
  0x8a   : > { %p8775_p13 = pneg %p8774_p12 }
  0x8c   : > { %p8780_p7 = pnand %p8779_p4, %p8775_p13 }
  0x8e   : > { %8783 = shalt.err (!%p8780_p7)
}
  0x8f   : > { %8411 = dma.hbm_to_vmem [thread:$0]  (!%p9584_p6), %s922_s23, 1024, %s924_s27, [#allocation16], %s11116_s9, %s11116_s9, %s11118_s18  }
  0x90   : > { %s981_s16 = sshll.u32 %s9454_s20, 4  ;;  %s9332_s15 = smov [#allocation18]   ;;  %s9644_s16 = int_to_ptr.hbm [resolvable:$true] %s981_s16 }
  0x91   : > { %s952_s28 = sshll.u32 %s9332_s15, 4  ;;  %s8799_s30 = sshra.s32 %s9632_s25, 4  ;;  %s953_s28 = int_to_ptr.vmem [resolvable:$true] %s952_s28  ;;  %s8800_s30 = int_to_ptr.hbm [resolvable:$true] %s8799_s30 }
  0x92   : > { %s8801_s1 = scalar_lea.hbm %s8800_s30, 4  ;;  %s8806_s2 = scalar_lea.hbm %s9434_s24, 4 }
  0x93   : > { %p8802_p9 = scmp.ne.s32.totalorder %s8800_s30, %s8801_s1  ;;  %p8807_p12 = scmp.lt.s32.totalorder %s8800_s30, %s9434_s24 }
  0x94   : > { %p8808_p13 = scmp.lt.s32.totalorder %s8806_s2, %s8801_s1 }
  0x95   : > { %p8804_p10 = pnand %p8802_p9, %p9594_p8 }
  0x96   : > { %p8809_p0 = por %p8808_p13, %p8807_p12 }
  0x97   : > { %p8805_p11 = pneg %p8804_p10 }
  0x99   : > { %p8810_p2 = pnand %p8809_p0, %p8805_p11 }
  0x9b   : > { %8813 = shalt.err (!%p8810_p2)
}
  0x9c   : > { %8417 = dma.hbm_to_vmem [thread:$0]  (!%p9584_p6), %s9632_s25, 64, %s953_s28, [#allocation19]  }
  0x9d   : > { %s9333_s23 = smov [#allocation21]   ;;  %s1015_s15 = sshll.u32 %s11205_s12, 4  ;;  %s9655_s15 = int_to_ptr.hbm [resolvable:$true] %s1015_s15 }
  0x9e   : > { %s983_s27 = sshll.u32 %s9333_s23, 4  ;;  %s8829_s30 = sshra.s32 %s9644_s16, 4  ;;  %s984_s27 = int_to_ptr.vmem [resolvable:$true] %s983_s27  ;;  %s8830_s30 = int_to_ptr.hbm [resolvable:$true] %s8829_s30 }
  0x9f   : > { %s8831_s1 = scalar_lea.hbm %s8830_s30, 32  ;;  %s8836_s2 = scalar_lea.hbm %s9454_s20, 32 }
  0xa0   : > { %p8832_p4 = scmp.ne.s32.totalorder %s8830_s30, %s8831_s1  ;;  %p8837_p10 = scmp.lt.s32.totalorder %s8830_s30, %s9454_s20 }
  0xa1   : > { %p8838_p11 = scmp.lt.s32.totalorder %s8836_s2, %s8831_s1 }
  0xa2   : > { %p8834_p7 = pnand %p8832_p4, %p9594_p8 }
  0xa3   : > { %p8839_p12 = por %p8838_p11, %p8837_p10 }
  0xa4   : > { %p8835_p9 = pneg %p8834_p7 }
  0xa6   : > { %p8840_p13 = pnand %p8839_p12, %p8835_p9 }
  0xa8   : > { %8843 = shalt.err (!%p8840_p13)
}
  0xa9   : > { %s11212_s25 = smov 128   ;;  %s9334_s28 = smov [#allocation24]  }
  0xaa   : > { %8423 = dma.hbm_to_vmem [thread:$0]  (!%p9584_p6), %s9644_s16, 512, %s984_s27, [#allocation22], %s11212_s25, %s11212_s25, %s11120_s8  }
  0xab   : > { %s1017_s23 = sshll.u32 %s9334_s28, 4  ;;  %s1055_s30 = sshll.u32 %s11202_s5, 4  ;;  %s1018_s23 = int_to_ptr.vmem [resolvable:$true] %s1017_s23  ;;  %s1056_s30 = int_to_ptr.hbm [resolvable:$true] %s1055_s30 }
  0xac   : > { %s8859_s1 = sshra.s32 %s9655_s15, 4  ;;  %s8866_s9 = scalar_lea.hbm %s11205_s12, 80  ;;  %s8860_s1 = int_to_ptr.hbm [resolvable:$true] %s8859_s1 }
  0xad   : > { %s8861_s2 = scalar_lea.hbm %s8860_s1, 80  ;;  %p8867_p7 = scmp.lt.s32.totalorder %s8860_s1, %s11205_s12 }
  0xae   : > { %p8862_p0 = scmp.ne.s32.totalorder %s8860_s1, %s8861_s2  ;;  %p8868_p9 = scmp.lt.s32.totalorder %s8866_s9, %s8861_s2 }
  0xb0   : > { %p8864_p2 = pnand %p8862_p0, %p9594_p8  ;;  %p8869_p10 = por %p8868_p9, %p8867_p7 }
  0xb2   : > { %p8865_p4 = pneg %p8864_p2 }
  0xb4   : > { %p8870_p11 = pnand %p8869_p10, %p8865_p4 }
  0xb6   : > { %8873 = shalt.err (!%p8870_p11)
}
  0xb7   : > { %s9335_s18 = smov 320   ;;  %s9336_s16 = smov 20  }
  0xb8   : > { %8429 = dma.hbm_to_vmem [thread:$0]  (!%p9584_p6), %s9655_s15, 1280, %s1018_s23, [#allocation25], %s9335_s18, %s9335_s18, %s9336_s16  }
  0xb9   : > { %s9337_s27 = smov [#allocation27]   ;;  %s845_s8 = sshll.u32 %s11200_s13, 4  ;;  %s9678_s8 = int_to_ptr.hbm [resolvable:$true] %s845_s8 }
  0xba   : > { %s1057_s28 = sshll.u32 %s9337_s27, 4  ;;  %s8889_s9 = sshra.s32 %s1056_s30, 4  ;;  %s1058_s28 = int_to_ptr.vmem [resolvable:$true] %s1057_s28  ;;  %s8890_s9 = int_to_ptr.hbm [resolvable:$true] %s8889_s9 }
  0xbb   : > { %s8891_s1 = scalar_lea.hbm %s8890_s9, 80  ;;  %s8896_s2 = scalar_lea.hbm %s11202_s5, 80 }
  0xbc   : > { %p8892_p12 = scmp.ne.s32.totalorder %s8890_s9, %s8891_s1  ;;  %p8897_p2 = scmp.lt.s32.totalorder %s8890_s9, %s11202_s5 }
  0xbd   : > { %p8898_p4 = scmp.lt.s32.totalorder %s8896_s2, %s8891_s1 }
  0xbe   : > { %p8894_p13 = pnand %p8892_p12, %p9594_p8 }
  0xbf   : > { %p8899_p7 = por %p8898_p4, %p8897_p2 }
  0xc0   : > { %p8895_p0 = pneg %p8894_p13 }
  0xc2   : > { %p8900_p9 = pnand %p8899_p7, %p8895_p0 }
  0xc4   : > { %8903 = shalt.err (!%p8900_p9)
}
  0xc5   : > { %8435 = dma.hbm_to_vmem [thread:$0]  (!%p9584_p6), %s1056_s30, 1280, %s1058_s28, [#allocation28], %s9335_s18, %s9335_s18, %s9336_s16  }
  0xc6   : > { %s873_s15 = sshll.u32 %s9399_s21, 4  ;;  %s9338_s23 = smov [#allocation8]   ;;  %s9687_s15 = int_to_ptr.hbm [resolvable:$true] %s873_s15 }
  0xc7   : > { %s847_s27 = sshll.u32 %s9338_s23, 4  ;;  %s8919_s12 = sshra.s32 %s9678_s8, 4  ;;  %s848_s27 = int_to_ptr.vmem [resolvable:$true] %s847_s27  ;;  %s8920_s12 = int_to_ptr.hbm [resolvable:$true] %s8919_s12 }
  0xc8   : > { %s8921_s9 = scalar_lea.hbm %s8920_s12, 16  ;;  %s8926_s1 = scalar_lea.hbm %s11200_s13, 16 }
  0xc9   : > { %p8922_p10 = scmp.ne.s32.totalorder %s8920_s12, %s8921_s9  ;;  %p8927_p13 = scmp.lt.s32.totalorder %s8920_s12, %s11200_s13 }
  0xca   : > { %p8928_p0 = scmp.lt.s32.totalorder %s8926_s1, %s8921_s9 }
  0xcb   : > { %p8924_p11 = pnand %p8922_p10, %p9594_p8 }
  0xcc   : > { %p8929_p2 = por %p8928_p0, %p8927_p13 }
  0xcd   : > { %p8925_p12 = pneg %p8924_p11 }
  0xcf   : > { %p8930_p4 = pnand %p8929_p2, %p8925_p12 }
  0xd1   : > { %8933 = shalt.err (!%p8930_p4)
}
  0xd2   : > { %s11213_s18 = smov 8   ;;  %s9339_s30 = smov [#allocation11]  }
  0xd3   : > { %8396 = dma.hbm_to_vmem [thread:$0]  (!%p9584_p6), %s9678_s8, 256, %s848_s27, [#allocation7], %s11212_s25, %s11212_s25, %s11213_s18  }
  0xd4   : > { %s875_s16 = sshll.u32 %s9339_s30, 4  ;;  %s904_s28 = sshll.u32 %s11204_s3, 4  ;;  %s876_s16 = int_to_ptr.vmem [resolvable:$true] %s875_s16  ;;  %s9701_s28 = int_to_ptr.hbm [resolvable:$true] %s904_s28 }
  0xd5   : > { %s8949_s12 = sshra.s32 %s9687_s15, 4  ;;  %s8956_s23 = scalar_lea.hbm %s9399_s21, 16  ;;  %s8950_s12 = int_to_ptr.hbm [resolvable:$true] %s8949_s12 }
  0xd6   : > { %s8951_s2 = scalar_lea.hbm %s8950_s12, 16  ;;  %p8957_p11 = scmp.lt.s32.totalorder %s8950_s12, %s9399_s21 }
  0xd7   : > { %p8952_p7 = scmp.ne.s32.totalorder %s8950_s12, %s8951_s2  ;;  %p8958_p12 = scmp.lt.s32.totalorder %s8956_s23, %s8951_s2 }
  0xd9   : > { %p8954_p9 = pnand %p8952_p7, %p9594_p8  ;;  %p8959_p13 = por %p8958_p12, %p8957_p11 }
  0xdb   : > { %p8955_p10 = pneg %p8954_p9 }
  0xdd   : > { %p8960_p0 = pnand %p8959_p13, %p8955_p10 }
  0xdf   : > { %8963 = shalt.err (!%p8960_p0)
}
  0xe0   : > { %8402 = dma.hbm_to_vmem [thread:$0]  (!%p9584_p6), %s9687_s15, 256, %s876_s16, [#allocation10], %s11212_s25, %s11212_s25, %s11213_s18  }
  0xe1   : > { %s935_s8 = sshll.u32 %s9429_s19, 4  ;;  %s9340_s27 = smov [#allocation14]   ;;  %s9715_s8 = int_to_ptr.hbm [resolvable:$true] %s935_s8 }
  0xe2   : > { %s906_s9 = sshll.u32 %s9340_s27, 4  ;;  %s8979_s1 = sshra.s32 %s9701_s28, 4  ;;  %s907_s9 = int_to_ptr.vmem [resolvable:$true] %s906_s9  ;;  %s8980_s1 = int_to_ptr.hbm [resolvable:$true] %s8979_s1 }
  0xe3   : > { %s8981_s30 = scalar_lea.hbm %s8980_s1, 64  ;;  %s8986_s12 = scalar_lea.hbm %s11204_s3, 64 }
  0xe4   : > { %p8982_p2 = scmp.ne.s32.totalorder %s8980_s1, %s8981_s30  ;;  %p8987_p9 = scmp.lt.s32.totalorder %s8980_s1, %s11204_s3 }
  0xe5   : > { %p8988_p10 = scmp.lt.s32.totalorder %s8986_s12, %s8981_s30 }
  0xe6   : > { %p8984_p4 = pnand %p8982_p2, %p9594_p8 }
  0xe7   : > { %p8989_p11 = por %p8988_p10, %p8987_p9 }
  0xe8   : > { %p8985_p7 = pneg %p8984_p4 }
  0xea   : > { %p8990_p12 = pnand %p8989_p11, %p8985_p7 }
  0xec   : > { %8993 = shalt.err (!%p8990_p12)
}
  0xed   : > { %s11214_s25 = smov 4   ;;  %s11215_s15 = smov 64  }
  0xee   : > { %8408 = dma.hbm_to_vmem [thread:$0]  (!%p9584_p6), %s9701_s28, 1024, %s907_s9, [#allocation13], %s11215_s15, %s11215_s15, %s11214_s25  }
  0xef   : > { %s9341_s18 = smov [#allocation17]   ;;  %s964_s2 = sshll.u32 %s11201_s6, 4  ;;  %s9729_s2 = int_to_ptr.hbm [resolvable:$true] %s964_s2 }
  0xf0   : > { %s937_s16 = sshll.u32 %s9341_s18, 4  ;;  %s9009_s23 = sshra.s32 %s9715_s8, 4  ;;  %s938_s16 = int_to_ptr.vmem [resolvable:$true] %s937_s16  ;;  %s9010_s23 = int_to_ptr.hbm [resolvable:$true] %s9009_s23 }
  0xf1   : > { %s9011_s27 = scalar_lea.hbm %s9010_s23, 64  ;;  %s9016_s1 = scalar_lea.hbm %s9429_s19, 64 }
  0xf2   : > { %p9012_p13 = scmp.ne.s32.totalorder %s9010_s23, %s9011_s27  ;;  %p9017_p4 = scmp.lt.s32.totalorder %s9010_s23, %s9429_s19 }
  0xf3   : > { %p9018_p7 = scmp.lt.s32.totalorder %s9016_s1, %s9011_s27 }
  0xf4   : > { %p9014_p0 = pnand %p9012_p13, %p9594_p8 }
  0xf5   : > { %p9019_p9 = por %p9018_p7, %p9017_p4 }
  0xf6   : > { %p9015_p2 = pneg %p9014_p0 }
  0xf8   : > { %p9020_p10 = pnand %p9019_p9, %p9015_p2 }
  0xfa   : > { %9023 = shalt.err (!%p9020_p10)
}
  0xfb   : > { %8414 = dma.hbm_to_vmem [thread:$0]  (!%p9584_p6), %s9715_s8, 1024, %s938_s16, [#allocation16], %s11215_s15, %s11215_s15, %s11214_s25  }
  0xfc   : > { %s998_s28 = sshll.u32 %s11203_s4, 4  ;;  %s9342_s9 = smov [#allocation20]   ;;  %s9743_s28 = int_to_ptr.hbm [resolvable:$true] %s998_s28 }
  0xfd   : > { %s966_s30 = sshll.u32 %s9342_s9, 4  ;;  %s9039_s12 = sshra.s32 %s9729_s2, 4  ;;  %s967_s30 = int_to_ptr.vmem [resolvable:$true] %s966_s30  ;;  %s9040_s12 = int_to_ptr.hbm [resolvable:$true] %s9039_s12 }
  0xfe   : > { %s9041_s18 = scalar_lea.hbm %s9040_s12, 8  ;;  %s9046_s23 = scalar_lea.hbm %s11201_s6, 8 }
  0xff   : > { %p9042_p11 = scmp.ne.s32.totalorder %s9040_s12, %s9041_s18  ;;  %p9047_p0 = scmp.lt.s32.totalorder %s9040_s12, %s11201_s6 }
 0x100   : > { %p9048_p2 = scmp.lt.s32.totalorder %s9046_s23, %s9041_s18 }
 0x101   : > { %p9044_p12 = pnand %p9042_p11, %p9594_p8 }
 0x102   : > { %p9049_p4 = por %p9048_p2, %p9047_p0 }
 0x103   : > { %p9045_p13 = pneg %p9044_p12 }
 0x105   : > { %p9050_p7 = pnand %p9049_p4, %p9045_p13 }
 0x107   : > { %9053 = shalt.err (!%p9050_p7)
}
 0x108   : > { %8420 = dma.hbm_to_vmem [thread:$0]  (!%p9584_p6), %s9729_s2, 128, %s967_s30, [#allocation19], %s11215_s15, %s11215_s15, %s11214_s25  }
 0x109   : > { %s9343_s8 = smov [#allocation23]   ;;  %s9069_s27 = sshra.s32 %s9743_s28, 4  ;;  %s9070_s27 = int_to_ptr.hbm [resolvable:$true] %s9069_s27 }
 0x10a   : > { %s1000_s16 = sshll.u32 %s9343_s8, 4  ;;  %s9071_s1 = scalar_lea.hbm %s9070_s27, 96  ;;  %s1001_s16 = int_to_ptr.vmem [resolvable:$true] %s1000_s16 }
 0x10b   : > { %p9072_p9 = scmp.ne.s32.totalorder %s9070_s27, %s9071_s1  ;;  %s9076_s9 = scalar_lea.hbm %s11203_s4, 96 }
 0x10c   : > { %p9077_p12 = scmp.lt.s32.totalorder %s9070_s27, %s11203_s4  ;;  %p9078_p13 = scmp.lt.s32.totalorder %s9076_s9, %s9071_s1 }
 0x10d   : > { %p9074_p10 = pnand %p9072_p9, %p9594_p8 }
 0x10e   : > { %p9079_p0 = por %p9078_p13, %p9077_p12 }
 0x10f   : > { %p9075_p11 = pneg %p9074_p10 }
 0x111   : > { %p9080_p2 = pnand %p9079_p0, %p9075_p11 }
 0x113   : > { %9083 = shalt.err (!%p9080_p2)
}
 0x114   : > { %s9344_s12 = smov 192   ;;  %s11216_s25 = sld [smem:[#allocation55_spill]] }
 0x115   : > { %s11217_s15 = sld [smem:[#allocation61_spill]]  ;;  %s9345_s2 = smov 12  }
 0x116   : > { %8426 = dma.hbm_to_vmem [thread:$0]  (!%p9584_p6), %s9743_s28, 1536, %s1001_s16, [#allocation22], %s9344_s12, %s9344_s12, %s9345_s2  }
 0x117   : > { %s9346_s18 = smov [#allocation26]  }
 0x118   : > { %s1034_s23 = sshll.u32 %s9346_s18, 4  ;;  %s1035_s23 = int_to_ptr.vmem [resolvable:$true] %s1034_s23 }
 0x11a   : > { %s1032_s30 = sshll.u32 %s11216_s25, 4  ;;  %s9106_s9 = scalar_lea.hbm %s11216_s25, 24  ;;  %s1033_s30 = int_to_ptr.hbm [resolvable:$true] %s1032_s30 }
 0x11b   : > { %s1072_s8 = sshll.u32 %s11217_s15, 4  ;;  %s9099_s27 = sshra.s32 %s1033_s30, 4  ;;  %s9100_s27 = int_to_ptr.hbm [resolvable:$true] %s9099_s27  ;;  %s1073_s8 = int_to_ptr.hbm [resolvable:$true] %s1072_s8 }
 0x11c   : > { %s9101_s1 = scalar_lea.hbm %s9100_s27, 24  ;;  %p9107_p10 = scmp.lt.s32.totalorder %s9100_s27, %s11216_s25 }
 0x11d   : > { %p9102_p4 = scmp.ne.s32.totalorder %s9100_s27, %s9101_s1  ;;  %p9108_p11 = scmp.lt.s32.totalorder %s9106_s9, %s9101_s1 }
 0x11f   : > { %p9104_p7 = pnand %p9102_p4, %p9594_p8  ;;  %p9109_p12 = por %p9108_p11, %p9107_p10 }
 0x121   : > { %p9105_p9 = pneg %p9104_p7 }
 0x123   : > { %p9110_p13 = pnand %p9109_p12, %p9105_p9 }
 0x125   : > { %9113 = shalt.err (!%p9110_p13)
}
 0x126   : > { %8432 = dma.hbm_to_vmem [thread:$0]  (!%p9584_p6), %s1033_s30, 384, %s1035_s23, [#allocation25], %s9344_s12, %s9344_s12, %s9345_s2  }
 0x127   : > { %s9347_s28 = smov [#allocation29]   ;;  %s9129_s18 = sshra.s32 %s1073_s8, 4  ;;  %s9130_s18 = int_to_ptr.hbm [resolvable:$true] %s9129_s18 }
 0x128   : > { %s1074_s16 = sshll.u32 %s9347_s28, 4  ;;  %s9131_s27 = scalar_lea.hbm %s9130_s18, 24  ;;  %s1075_s16 = int_to_ptr.vmem [resolvable:$true] %s1074_s16 }
 0x129   : > { %p9132_p0 = scmp.ne.s32.totalorder %s9130_s18, %s9131_s27  ;;  %s9136_s1 = scalar_lea.hbm %s11217_s15, 24 }
 0x12a   : > { %p9137_p7 = scmp.lt.s32.totalorder %s9130_s18, %s11217_s15  ;;  %p9138_p9 = scmp.lt.s32.totalorder %s9136_s1, %s9131_s27 }
 0x12b   : > { %p9134_p2 = pnand %p9132_p0, %p9594_p8 }
 0x12c   : > { %p9139_p10 = por %p9138_p9, %p9137_p7 }
 0x12d   : > { %p9135_p4 = pneg %p9134_p2 }
 0x12f   : > { %p9140_p11 = pnand %p9139_p10, %p9135_p4 }
 0x131   : > { %9143 = shalt.err (!%p9140_p11)
}
 0x132   : > { %s11218_s22 = sld [smem:[#allocation68_spill]]  ;;  %s6839_s30 = sadd.s32 4294967294, %s9287_s0  }
 0x133   : > { %8438 = dma.hbm_to_vmem [thread:$0]  (!%p9584_p6), %s1073_s8, 384, %s1075_s16, [#allocation28], %s9344_s12, %s9344_s12, %s9345_s2  }
 0x134   : > { %s9789_s26 = sadd.s32 1, %s9287_s0   ;;  %s98_s9 = sadd.s32 1, %s9283_s11 }
 0x135   : > { %s95_s23 = ssub.s32 %s9287_s0, %s9789_s26  ;;  %s11219_s28 = sld [smem:[#allocation41_spill]] }
 0x136   : > { %p96_p8 = scmp.eq.s32.totalorder %s95_s23, 0  ;;  %p105_p12 = scmp.ne.s32.totalorder %s9283_s11, %s9279_s10 }
 0x137   : > { %p106_p13 = scmp.eq.s32.totalorder %s9287_s0, 0  ;;  %p111_p0 = scmp.ne.s32.totalorder %s9279_s10, %s9275_s7 }
 0x138   : > { %s9800_s18 = scalar_select %p96_p8, %s9283_s11, %s98_s9  }
 0x139   : > { %p9802_p2 = por %p106_p13, %p105_p12  ;;  %p9808_p6 = por %p11128_p1, %p111_p0 }
 0x13a   : > { %p807_p4 = scmp.eq.s32.totalorder %s11218_s22, 1  ;;  %p813_p7 = scmp.eq.s32.totalorder %s6839_s30, 1 }
 0x13b   : > { %p8463_p9 = scmp.lt.s32.totalorder %s9287_s0, 2  ;;  %s1103_s2 = sand.u32 1, %s9283_s11  }
 0x13c   : > { %p9815_p10 = por %p807_p4, %p105_p12  ;;  %p9819_p11 = por %p813_p7, %p111_p0 }
 0x13d   : > { %s6858_s1 = sshll.u32 %s1103_s2, 2  ;;  %s8037_s23 = sshll.u32 %s9287_s0, 2 }
 0x13e   : > { %s11223_s16 = scalar_select %p9819_p11, 1, 0 }
 0x13f   : > { %s1112_s9 = scalar_lea.hbm %s11219_s28, %s8037_s23  ;;  %s1107_s3 = scalar_lea.vmem [#allocation3], %s6858_s1 }
 0x140   : > { %s1116_s4 = sshll.u32 %s1107_s3, 4  ;;  %s1114_s5 = sshll.u32 %s1112_s9, 4  ;;  %s1117_s4 = int_to_ptr.vmem [resolvable:$true] %s1116_s4  ;;  %s1115_s5 = int_to_ptr.hbm [resolvable:$true] %s1114_s5 }
 0x141   : > { %p9827_p8 = pnand %p8463_p9, %p9802_p2  ;;  %s1104_s30 = scalar_lea.sflag [#allocation4], %s1103_s2 }
 0x142   : > { %s9159_s6 = sshra.s32 %s1115_s5, 4  ;;  %s9166_s1 = scalar_lea.hbm %s11219_s28, 8  ;;  %s9160_s6 = int_to_ptr.hbm [resolvable:$true] %s9159_s6 }
 0x143   : > { %s9161_s13 = scalar_lea.hbm %s9160_s6, 4  ;;  %p9163_p13 = pneg %p9827_p8 }
 0x144   : > { %p9162_p12 = scmp.ne.s32.totalorder %s9160_s6, %s9161_s13  ;;  %p9167_p7 = scmp.lt.s32.totalorder %s9160_s6, %s11219_s28 }
 0x145   : > { %p9168_p5 = scmp.lt.s32.totalorder %s9166_s1, %s9161_s13 }
 0x146   : > { %p9164_p0 = pnand %p9163_p13, %p9162_p12 }
 0x147   : > { %p9169_p1 = por %p9168_p5, %p9167_p7 }
 0x148   : > { %p9165_p4 = pneg %p9164_p0 }
 0x14a   : > { %p9170_p11 = pnand %p9169_p1, %p9165_p4 }
 0x14c   : > { %9173 = shalt.err (!%p9170_p11)
}
 0x14d   : > { %8442 = dma.hbm_to_vmem [thread:$0]  (!%p9827_p8), %s1115_s5, 64, %s1117_s4, %s1104_s30  }
 0x14e   : > { %1125 = sbr.rel (%p9575_p3) target bundleno = 4831 (0x12df), region = 152  ;;  %s9840_s27 = sand.u32 (!%p9575_p3), 1, %s9279_s10  }
 0x14f   : > { %s6862_s2 = sshll.u32 (!%p9575_p3), %s9840_s27, 2  ;;  %s1128_s23 = scalar_lea.sflag (!%p9575_p3), [#allocation4], %s9840_s27 }
 0x150   : > { %s1131_s9 = scalar_lea.vmem (!%p9575_p3), [#allocation3], %s6862_s2 }
 0x153   : > { %9234 = dma.done.wait (%p9808_p6), %s1128_s23, 64  }
 0x154   : > { %9236 = vsyncadd (%p9808_p6), %s1128_s23, 4294967232  ;;  %s11226_s13 = sld [smem:[#allocation68_spill]] }
 0x15a   : > { %p11227_p1 = scmp.eq.s32.totalorder %s11226_s13, 0 }
 0x15c   : > { %9238 = dma.done.wait (%p11227_p1), [#allocation7], 768   ;;  %p11228_p5 = pmov %p11227_p1 }
 0x15d   : > { %p11229_p3 = pmov %p11227_p1 }
 0x15e   : > { %9240 = vsyncadd (%p11228_p5), [#allocation7], 4294966528 }
 0x15f   : > { %9242 = dma.done.wait (%p11229_p3), [#allocation10], 512   ;;  %p11230_p2 = pmov %p11227_p1 }
 0x160   : > { %p11231_p9 = pmov %p11227_p1 }
 0x161   : > { %9244 = vsyncadd (%p11230_p2), [#allocation10], 4294966784 }
 0x162   : > { %9246 = dma.done.wait (%p11231_p9), [#allocation13], 2048   ;;  %p11232_p11 = pmov %p11227_p1 }
 0x163   : > { %p11233_p6 = pmov %p11227_p1 }
 0x164   : > { %9248 = vsyncadd (%p11232_p11), [#allocation13], 4294965248 }
 0x165   : > { %9250 = dma.done.wait (%p11233_p6), [#allocation16], 2048   ;;  %p11234_p8 = pmov %p11227_p1 }
 0x166   : > { %p11235_p12 = pmov %p11227_p1 }
 0x167   : > { %9252 = vsyncadd (%p11234_p8), [#allocation16], 4294965248 }
 0x168   : > { %9254 = dma.done.wait (%p11235_p12), [#allocation19], 192   ;;  %p11236_p13 = pmov %p11227_p1 }
 0x169   : > { %p11237_p0 = pmov %p11227_p1 }
 0x16a   : > { %9256 = vsyncadd (%p11236_p13), [#allocation19], 4294967104 }
 0x16b   : > { %9258 = dma.done.wait (%p11237_p0), [#allocation22], 2048   ;;  %p11238_p4 = pmov %p11237_p0 }
 0x16c   : > { %p11239_p7 = pmov %p11237_p0 }
 0x16d   : > { %9260 = vsyncadd (%p11238_p4), [#allocation22], 4294965248 }
 0x16e   : > { %9262 = dma.done.wait (%p11239_p7), [#allocation25], 1664   ;;  %p11240_p1 = pmov %p11237_p0 }
 0x16f   : > { %p11241_p5 = pmov %p11237_p0 }
 0x170   : > { %9264 = vsyncadd (%p11240_p1), [#allocation25], 4294965632 }
 0x171   : > { %9266 = dma.done.wait (%p11241_p5), [#allocation28], 1664   ;;  %p11242_p3 = pmov %p11237_p0 }
 0x172   : > { %v1296_v0 = vld [vmem:[%s1131_s9] sm:$0xf]  ;;  %v1401_v1 = vld [vmem:[#allocation6 + $0x4] ss:$8 sm:$0x3]  ;;  %vm1406_vm0 = vcmask 1041408   ;;  %v1308_v26 = vlaneseq }
 0x173   : > { %9268 = vsyncadd (%p11242_p3), [#allocation28], 4294965632  ;;  %1299 = vst [vmem:[#allocation1] ss:$4 sm:$0xff] %v1296_v0  ;;  %v1404_v2 = vperm.slane %v1401_v1, 1  ;;  %v1403_v3 = vperm.slane %v1401_v1, 0 }
 0x174   : > { %s11131_s5 = smov 16   ;;  %s11133_s6 = smov 15   ;;  %v1349_v27 = vld [vmem:[#allocation6 + $0x2] ss:$8 sm:$0x3]  ;;  %v9901_v28 = vand.u32 127, %v1308_v26 }
 0x175   : > { %v1405_v4 = vrot.slane %v1404_v2, 6  ;;  %s11169_s4 = smov 1   ;;  %s9351_s12 = smov 127   ;;  %v1363_v29 = vperm.slane %v1349_v27, 0  ;;  %v1364_v30 = vperm.slane %v1349_v27, 1  ;;  %vm1548_vm9 = vcmask 1040384  }
 0x176   : > { %s11137_s22 = smov 113   ;;  %s11139_s30 = smov 112   ;;  %vm1359_vm1 = vcmp.lt.s32.totalorder %v9901_v28, 15  ;;  %v1323_v39 = vld [vmem:[#allocation6 + $0x1] ss:$8 sm:$0x3] }
 0x177   : > { %v1407_v11 = vsel %vm1406_vm0, %v1403_v3, %v1405_v4  ;;  %s11129_s1 = smov 17   ;;  %s11135_s3 = smov 111   ;;  %vm1333_vm2 = vcmp.lt.s32.totalorder %v9901_v28, 16  ;;  %v1337_v40 = vperm.slane %v1323_v39, 0  ;;  %v1338_v41 = vperm.slane %v1323_v39, 1 }
 0x178   : > { %v1409_v12 = vmul.f32 %v1407_v11, %v1296_v0  ;;  %v1375_v47 = vld [vmem:[#allocation6 + $0x3] ss:$8 sm:$0x3]  ;;  %vm1385_vm3 = vcmp.lt.s32.totalorder %v9901_v28, 1  ;;  %vm1429_vm4 = vcmp.lt.s32.totalorder %v9901_v28, 127  ;;  %vm1455_vm5 = vcmp.lt.s32.totalorder %v9901_v28, 113 }
 0x179   : > { %v1389_v50 = vperm.slane %v1375_v47, 0  ;;  %v1390_v51 = vperm.slane %v1375_v47, 1  ;;  %v1419_v61 = vld [vmem:[#allocation6 + $0x5] ss:$8 sm:$0x3]  ;;  %s11243_s2 = sld [smem:[#allocation47_spill]] }
 0x17a   : > { %v1300_v5 = vld.sshfl [vmem:[#allocation1] sm:$0xff pattern:$0x73625140]  ;;  %v1301_v6 = vld.sshfl [vmem:[#allocation1 + $0x8] sm:$0xff pattern:$0x73625140] }
 0x17b   : > { %1324 = vst [vmem:[#allocation1] ss:$4 sm:$0xff] %v1296_v0  ;;  %v1433_v63 = vperm.slane %v1419_v61, 0  ;;  %vm1481_vm6 = vcmp.lt.s32.totalorder %v9901_v28, 112  ;;  %s11244_s23 = sld [smem:[#allocation44_spill]]  ;;  %vm1507_vm7 = vcmp.lt.s32.totalorder %v9901_v28, 111 }
 0x17c   : > { %vm1310_vm8 = vcmp.lt.s32.totalorder %v9901_v28, 17  ;;  %vm1544_vm10 = vcmask 146432   ;;  %s11245_s9 = sld [smem:[#allocation49_spill]]  ;;  %vm1863_vm13 = vcmask 1043456   ;;  %vm1859_vm14 = vcmask 588800  }
 0x181   : > { %v8045_v47 = vld [vmem:[%s11244_s23 + $0x28] sm:$0xff] }
 0x182   : > { %v1325_v7 = vld.sshfl [vmem:[#allocation1] sm:$0xff pattern:$0x73625140]  ;;  %v1326_v8 = vld.sshfl [vmem:[#allocation1 + $0x8] sm:$0xff pattern:$0x73625140] }
 0x183   : > { %1329 = vrot.lane.b32.xlu1 %v1325_v7, %s11131_s5  ;;  %1350 = vst [vmem:[#allocation1] ss:$4 sm:$0xff] %v1296_v0 }
 0x18a   : > { %v1351_v9 = vld.sshfl [vmem:[#allocation1] sm:$0xff pattern:$0x73625140]  ;;  %v1352_v10 = vld.sshfl [vmem:[#allocation1 + $0x8] sm:$0xff pattern:$0x73625140] }
 0x18b   : > { %1331 = vrot.lane.b32.xlu1 %v1326_v8, %s11131_s5  ;;  %1376 = vst [vmem:[#allocation1] ss:$4 sm:$0xff] %v1296_v0  ;;  %1355 = vrot.lane.b32.xlu2 %v1351_v9, %s11133_s6  ;;  %s11143_s5 = smov 119  }
 0x192   : > { %v1378_v13 = vld.sshfl [vmem:[#allocation1 + $0x8] sm:$0xff pattern:$0x73625140]  ;;  %v1377_v14 = vld.sshfl [vmem:[#allocation1] sm:$0xff pattern:$0x73625140] }
 0x193   : > { %1383 = vrot.lane.b32.xlu1 %v1378_v13, %s11169_s4  ;;  %1381 = vrot.lane.b32.xlu0 %v1377_v14, %s11169_s4  ;;  %1411 = vst [vmem:[#allocation1] ss:$4 sm:$0xff] %v1409_v12 }
 0x194   : > { %1357 = vrot.lane.b32.xlu2 %v1352_v10, %s11133_s6  ;;  %s11147_s6 = smov 7  }
 0x19a   : > { %v9886_v15 = vld.sshfl [vmem:[#allocation1] sm:$0xff pattern:$0x73625140]  ;;  %v9888_v16 = vld.sshfl [vmem:[#allocation1 + $0x8] sm:$0xff pattern:$0x73625140] }
 0x19b   : > { %1420 = vst [vmem:[#allocation1] ss:$4 sm:$0xff] %v1296_v0  ;;  %v1416_v60 = vpack.c.bf16 %v9888_v16, %v9886_v15 }
 0x19d   : > { %1417 = vst [vmem:[#allocation2 + $0x8] sm:$0x11] %v1416_v60 }
 0x1a2   : > { %v1422_v17 = vld.sshfl [vmem:[#allocation1 + $0x8] sm:$0xff pattern:$0x73625140]  ;;  %v1421_v18 = vld.sshfl [vmem:[#allocation1] sm:$0xff pattern:$0x73625140] }
 0x1a3   : > { %1427 = vrot.lane.b32.xlu0 %v1422_v17, %s9351_s12  ;;  %1446 = vst [vmem:[#allocation1] ss:$4 sm:$0xff] %v1296_v0  ;;  %1425 = vrot.lane.b32.xlu2 %v1421_v18, %s9351_s12  ;;  %v1471_v17 = vld [vmem:[#allocation6 + $0x7] ss:$8 sm:$0x3] }
 0x1aa   : > { %v1448_v19 = vld.sshfl [vmem:[#allocation1 + $0x8] sm:$0xff pattern:$0x73625140]  ;;  %v1447_v20 = vld.sshfl [vmem:[#allocation1] sm:$0xff pattern:$0x73625140] }
 0x1ab   : > { %1451 = vrot.lane.b32.xlu1 %v1447_v20, %s11137_s22  ;;  %1472 = vst [vmem:[#allocation1] ss:$4 sm:$0xff] %v1296_v0  ;;  %1453 = vrot.lane.b32.xlu2 %v1448_v19, %s11137_s22  ;;  %v1485_v20 = vperm.slane %v1471_v17, 0  ;;  %s11141_s22 = smov 9  }
 0x1b2   : > { %v1474_v21 = vld.sshfl [vmem:[#allocation1 + $0x8] sm:$0xff pattern:$0x73625140]  ;;  %v1473_v22 = vld.sshfl [vmem:[#allocation1] sm:$0xff pattern:$0x73625140] }
 0x1b3   : > { %1479 = vrot.lane.b32.xlu1 %v1474_v21, %s11139_s30  ;;  %1477 = vrot.lane.b32.xlu0 %v1473_v22, %s11139_s30  ;;  %1498 = vst [vmem:[#allocation1] ss:$4 sm:$0xff] %v1296_v0  ;;  %v1434_v0 = vperm.slane %v1419_v61, 1  ;;  %v1486_v21 = vperm.slane %v1471_v17, 1  ;;  %v8048_v17 = vld [vmem:[%s11244_s23 + $0x40] sm:$0xff]  ;;  %s11161_s30 = smov 125  }
 0x1b4   : > { %1304 = vrot.lane.b32.xlu2 %v1300_v5, %s11129_s1 }
 0x1ba   : > { %v1499_v23 = vld.sshfl [vmem:[#allocation1] sm:$0xff pattern:$0x73625140]  ;;  %v1500_v24 = vld.sshfl [vmem:[#allocation1 + $0x8] sm:$0xff pattern:$0x73625140] }
 0x1bb   : > { %1503 = vrot.lane.b32.xlu0 %v1499_v23, %s11135_s3 }
 0x1c3   : > { %1505 = vrot.lane.b32.xlu0 %v1500_v24, %s11135_s3  ;;  %s11145_s3 = smov 8  }
 0x1cb   : > { %1306 = vrot.lane.b32.xlu0 %v1301_v6, %s11129_s1  ;;  %v1445_v6 = vld [vmem:[#allocation6 + $0x6] ss:$8 sm:$0x3]  ;;  %s11149_s1 = smov 121  }
 0x1cc   : > { %v1459_v9 = vperm.slane %v1445_v6, 0  ;;  %v1460_v10 = vperm.slane %v1445_v6, 1 }
 0x1e5   : > { %v1356_v25 = vpop.permute.xlu2 %1355 }
 0x1ee   : > { %v1358_v31 = vpop.permute.xlu2 %1357 }
 0x1ef   : > { %v1360_v32 = vsel %vm1359_vm1, %v1356_v25, %v1358_v31  ;;  %v1361_v33 = vsel %vm1359_vm1, %v1358_v31, %v1356_v25 }
 0x1f0   : > { %v1367_v34 = vmul.f32 %v1363_v29, %v1361_v33  ;;  %v1368_v35 = vmul.f32 %v1364_v30, %v1360_v32  ;;  %v1497_v33 = vld [vmem:[#allocation6 + $0x10] ss:$8 sm:$0x3] }
 0x1f2   : > { %v1369_v36 = vpack.c.bf16 %v1368_v35, %v1367_v34  ;;  %v1523_v34 = vld [vmem:[%s11243_s2] sm:$0xff]  ;;  %v9356_v35 = vmov 0   ;;  %s11151_s2 = smov 120  }
 0x1f3   : > { %8595 = vset.pattern.permute.xlu1 %v9356_v35  ;;  %8596 = vset.pattern.permute.xlu2 %v9356_v35 }
 0x1f4   : > { %v1371_v37 = vrot.slane %v1369_v36, 6  ;;  %1526 = vperm.xlu1 %8595, %v1523_v34   ;;  %v8047_v36 = vld [vmem:[%s11244_s23 + $0x38] sm:$0xff]  ;;  %8597 = vset.pattern.permute.xlu0 %v9356_v35 }
 0x1f5   : > { %v1330_v38 = vpop.permute.xlu1 %1329  ;;  %1717 = vmatpush.bf16.msra.mxu2 %v8047_v36  ;;  %v8598_v36 = vld [vmem:[#allocation8 + $0x4] ss:$0 sm:$0xff] }
 0x1f6   : > { %1373 = vst [vmem:[#allocation2] sm:$0x44] %v1371_v37  ;;  %v1511_v37 = vperm.slane %v1497_v33, 0 }
 0x1fd   : > { %v1332_v42 = vpop.permute.xlu1 %1331  ;;  %v1426_v62 = vpop.permute.xlu2 %1425 }
 0x1fe   : > { %v1334_v43 = vsel %vm1333_vm2, %v1330_v38, %v1332_v42  ;;  %v1335_v44 = vsel %vm1333_vm2, %v1332_v42, %v1330_v38  ;;  %v1512_v38 = vperm.slane %v1497_v33, 1  ;;  %v8046_v42 = vld [vmem:[%s11244_s23 + $0x30] sm:$0xff] }
 0x1ff   : > { %v1341_v45 = vmul.f32 %v1337_v40, %v1335_v44  ;;  %v1342_v46 = vmul.f32 %v1338_v41, %v1334_v43  ;;  %1718 = vmatpush.bf16.msra.mxu2 %v8046_v42 }
 0x201   : > { %v1343_v48 = vpack.c.bf16 %v1342_v46, %v1341_v45  ;;  %v1297_v45 = vld [vmem:[#allocation6] ss:$8 sm:$0x3] }
 0x203   : > { %v1345_v49 = vrot.slane %v1343_v48, 7  ;;  %1719 = vmatpush.bf16.msra.mxu2 %v8045_v47 }
 0x205   : > { %1347 = vst [vmem:[#allocation2] sm:$0x22] %v1345_v49  ;;  %v1384_v52 = vpop.permute.xlu1 %1383  ;;  %v1382_v53 = vpop.permute.xlu0 %1381  ;;  %v1314_v49 = vperm.slane %v1297_v45, 0 }
 0x206   : > { %v1386_v54 = vsel %vm1385_vm3, %v1382_v53, %v1384_v52  ;;  %v1387_v55 = vsel %vm1385_vm3, %v1384_v52, %v1382_v53  ;;  %v1454_v11 = vpop.permute.xlu2 %1453 }
 0x207   : > { %v1393_v56 = vmul.f32 %v1389_v50, %v1387_v55  ;;  %v1394_v57 = vmul.f32 %v1390_v51, %v1386_v54  ;;  %v1315_v50 = vperm.slane %v1297_v45, 1  ;;  %v8044_v54 = vld [vmem:[%s11244_s23 + $0x20] sm:$0xff] }
 0x208   : > { %1720 = vmatpush.bf16.msra.mxu2 %v8044_v54 }
 0x209   : > { %v1395_v58 = vpack.c.bf16 %v1394_v57, %v1393_v56 }
 0x20b   : > { %v1397_v59 = vrot.slane %v1395_v58, 5 }
 0x20d   : > { %1399 = vst [vmem:[#allocation2] sm:$0x88] %v1397_v59  ;;  %v8043_v59 = vld [vmem:[%s11244_s23 + $0x18] sm:$0xff] }
 0x20e   : > { %v1305_v48 = vpop.permute.xlu2 %1304  ;;  %1721 = vmatpush.bf16.msra.mxu2 %v8043_v59 }
 0x215   : > { %v1428_v1 = vpop.permute.xlu0 %1427 }
 0x216   : > { %v1430_v2 = vsel %vm1429_vm4, %v1426_v62, %v1428_v1  ;;  %v1431_v3 = vsel %vm1429_vm4, %v1428_v1, %v1426_v62 }
 0x217   : > { %v1437_v4 = vmul.f32 %v1433_v63, %v1430_v2  ;;  %v1438_v5 = vmul.f32 %v1434_v0, %v1431_v3  ;;  %v8055_v3 = vld [vmem:[%s11244_s23 + $0x78] sm:$0xff] }
 0x219   : > { %v1439_v7 = vpack.c.bf16 %v1438_v5, %v1437_v4 }
 0x21b   : > { %v1441_v8 = vrot.slane %v1439_v7, 7 }
 0x21d   : > { %1443 = vst [vmem:[#allocation2 + $0x8] sm:$0x22] %v1441_v8  ;;  %v1452_v12 = vpop.permute.xlu1 %1451 }
 0x21e   : > { %v1456_v13 = vsel %vm1455_vm5, %v1452_v12, %v1454_v11  ;;  %v1457_v14 = vsel %vm1455_vm5, %v1454_v11, %v1452_v12  ;;  %v8053_v11 = vld [vmem:[%s11244_s23 + $0x68] sm:$0xff]  ;;  %v8052_v12 = vld [vmem:[%s11244_s23 + $0x60] sm:$0xff] }
 0x21f   : > { %v1463_v15 = vmul.f32 %v1459_v9, %v1456_v13  ;;  %v1464_v16 = vmul.f32 %v1460_v10, %v1457_v14  ;;  %v1522_v9 = vld [vmem:[#allocation18] sm:$0xf]  ;;  %v8054_v10 = vld [vmem:[%s11244_s23 + $0x70] sm:$0xff]  ;;  %v8051_v13 = vld [vmem:[%s11244_s23 + $0x58] sm:$0xff] }
 0x220   : > { %v8050_v14 = vld [vmem:[%s11244_s23 + $0x50] sm:$0xff] }
 0x221   : > { %v1465_v18 = vpack.c.bf16 %v1464_v16, %v1463_v15  ;;  %v8049_v15 = vld [vmem:[%s11244_s23 + $0x48] sm:$0xff]  ;;  %v8042_v16 = vld [vmem:[%s11244_s23 + $0x10] sm:$0xff] }
 0x222   : > { %1722 = vmatpush.bf16.msra.mxu2 %v8042_v16 }
 0x223   : > { %v1467_v19 = vrot.slane %v1465_v18, 6  ;;  %v8041_v18 = vld [vmem:[%s11244_s23 + $0x8] sm:$0xff] }
 0x225   : > { %1469 = vst [vmem:[#allocation2 + $0x8] sm:$0x44] %v1467_v19  ;;  %v1480_v22 = vpop.permute.xlu1 %1479  ;;  %v1478_v23 = vpop.permute.xlu0 %1477  ;;  %v8040_v19 = vld [vmem:[%s11244_s23] sm:$0xff] }
 0x226   : > { %v1482_v24 = vsel %vm1481_vm6, %v1478_v23, %v1480_v22  ;;  %v1483_v25 = vsel %vm1481_vm6, %v1480_v22, %v1478_v23  ;;  %1723 = vmatpush.bf16.msra.mxu2 %v8041_v18 }
 0x227   : > { %v1489_v27 = vmul.f32 %v1485_v20, %v1482_v24  ;;  %v1490_v29 = vmul.f32 %v1486_v21, %v1483_v25 }
 0x229   : > { %v1491_v30 = vpack.c.bf16 %v1490_v29, %v1489_v27 }
 0x22a   : > { %1724 = vmatpush.bf16.msra.mxu2 %v8040_v19  ;;  %v8606_v19 = vld [vmem:[#allocation8 + $0x1] ss:$0 sm:$0xff] }
 0x22b   : > { %v1493_v31 = vrot.slane %v1491_v30, 5 }
 0x22d   : > { %1495 = vst [vmem:[#allocation2 + $0x8] sm:$0x88] %v1493_v31  ;;  %v1504_v32 = vpop.permute.xlu0 %1503 }
 0x234   : > { %v8039_v2 = vld [vmem:[#allocation2 + $0x4] sm:$0xf0]  ;;  %v6884_v6 = vld [vmem:[#allocation2 + $0x8] sm:$0xf0] }
 0x235   : > { %v1506_v39 = vpop.permute.xlu0 %1505 }
 0x236   : > { %v1508_v40 = vsel %vm1507_vm7, %v1504_v32, %v1506_v39  ;;  %v1509_v41 = vsel %vm1507_vm7, %v1506_v39, %v1504_v32 }
 0x237   : > { %v1515_v43 = vmul.f32 %v1511_v37, %v1508_v40  ;;  %v1516_v44 = vmul.f32 %v1512_v38, %v1509_v41 }
 0x239   : > { %v1517_v46 = vpack.c.bf16 %v1516_v44, %v1515_v43  ;;  %v1815_v43 = vld [vmem:[%s11245_s9] sm:$0xff]  ;;  %v8599_v44 = vld [vmem:[#allocation8 + $0x8] ss:$0 sm:$0xff] }
 0x23b   : > { %1518 = vst [vmem:[#allocation2 + $0x10] sm:$0x11] %v1517_v46 }
 0x23d   : > { %v1307_v51 = vpop.permute.xlu0 %1306 }
 0x23e   : > { %v1311_v52 = vsel %vm1310_vm8, %v1305_v48, %v1307_v51  ;;  %v1312_v53 = vsel %vm1310_vm8, %v1307_v51, %v1305_v48  ;;  %v8600_v48 = vld [vmem:[#allocation8 + $0x5] ss:$0 sm:$0xff] }
 0x23f   : > { %v1318_v55 = vmul.f32 %v1314_v49, %v1312_v53  ;;  %v1319_v56 = vmul.f32 %v1315_v50, %v1311_v52  ;;  %v8601_v53 = vld [vmem:[#allocation8] ss:$0 sm:$0xff] }
 0x241   : > { %v1320_v57 = vpack.c.bf16 %v1319_v56, %v1318_v55 }
 0x242   : > { %v1521_v58 = vld [vmem:[#allocation2 + $0x10] sm:$0x11] }
 0x243   : > { %1321 = vst [vmem:[#allocation2] sm:$0x11] %v1320_v57  ;;  %v1536_v60 = vunpack.c.l.b16 %v1521_v58  ;;  %v1537_v61 = vunpack.c.h.b16 %v1521_v58 }
 0x245   : > { %v1540_v62 = vpack.c.b16 %v1536_v60, %v1536_v60  ;;  %v1541_v63 = vpack.c.b16 %v1537_v61, %v1537_v61  ;;  %v8602_v60 = vld [vmem:[#allocation8 + $0x7] ss:$0 sm:$0xff]  ;;  %v8603_v61 = vld [vmem:[#allocation8 + $0x6] ss:$0 sm:$0xff] }
 0x247   : > { %v1550_v0 = vsel %vm1548_vm9, %v1540_v62, 0  ;;  %v1553_v1 = vsel %vm1548_vm9, %v1541_v63, 0  ;;  %vm2188_vm9 = vcmask 130048  }
 0x248   : > { %1561 = vmatpush.bf16.msra.mxu3 %v1550_v0  ;;  %1574 = vmatpush.bf16.msra.mxu1 %v1553_v1 }
 0x24a   : > { %v6882_v4 = vld [vmem:[#allocation2] sm:$0xf]  ;;  %v8038_v5 = vld [vmem:[#allocation2 + $0x4] sm:$0xf] }
 0x24b   : > { %v6883_v7 = vor.u32 %v8039_v2, %v6882_v4  ;;  %v6887_v8 = vor.u32 %v8038_v5, %v6884_v6  ;;  %v1816_v2 = vld [vmem:[%s11245_s9 + $0x8] sm:$0xff]  ;;  %v8067_v6 = vld [vmem:[#allocation12 + $0x30] sm:$0xff]  ;;  %s11254_s9 = smov 123  }
 0x24d   : > { %1562 = vmatpush.bf16.msra.mxu3 %v6883_v7  ;;  %1575 = vmatpush.bf16.msra.mxu1 %v6887_v8  ;;  %v8604_v7 = vld [vmem:[#allocation8 + $0x3] ss:$0 sm:$0xff]  ;;  %v8605_v8 = vld [vmem:[#allocation8 + $0x2] ss:$0 sm:$0xff] }
 0x250   : > { %6888 = vmatmul.msk.bf16.vlgmr.msra.gmra.mxu3 %vm1544_vm10, %v1522_v9  ;;  %6889 = vmatmul.msk.bf16.vlgmr.msra.gmra.mxu1 %vm1544_vm10, %v1522_v9 }
 0x251   : > { %1730 = vmatpush.bf16.msrb.mxu3 %v8055_v3  ;;  %v8068_v3 = vld [vmem:[#allocation12 + $0x38] sm:$0xff] }
 0x252   : > { %1952 = vmatpush.bf16.msrb.mxu1 %v8068_v3  ;;  %v8610_v3 = vld [vmem:[#allocation9 + $0x5] ss:$0 sm:$0xff] }
 0x255   : > { %1731 = vmatpush.bf16.msrb.mxu3 %v8054_v10 }
 0x256   : > { %1953 = vmatpush.bf16.msrb.mxu1 %v8067_v6 }
 0x259   : > { %1732 = vmatpush.bf16.msrb.mxu3 %v8053_v11  ;;  %v8066_v11 = vld [vmem:[#allocation12 + $0x28] sm:$0xff] }
 0x25a   : > { %1954 = vmatpush.bf16.msrb.mxu1 %v8066_v11  ;;  %v8613_v11 = vld [vmem:[#allocation9 + $0x1] ss:$0 sm:$0xff] }
 0x25d   : > { %1733 = vmatpush.bf16.msrb.mxu3 %v8052_v12 }
 0x261   : > { %1734 = vmatpush.bf16.msrb.mxu3 %v8051_v13 }
 0x265   : > { %1735 = vmatpush.bf16.msrb.mxu3 %v8050_v14 }
 0x266   : > { %v1527_v20 = vpop.permute.xlu1 %1526 }
 0x269   : > { %1736 = vmatpush.bf16.msrb.mxu3 %v8049_v15 }
 0x26d   : > { %1737 = vmatpush.bf16.msrb.mxu3 %v8048_v17  ;;  %v8065_v17 = vld [vmem:[#allocation12 + $0x20] sm:$0xff] }
 0x26e   : > { %1955 = vmatpush.bf16.msrb.mxu1 %v8065_v17 }
 0x2cd   : > { %v1577_v21 = vpop.f32.mrf.mxu1 }
 0x2ce   : > { %v1578_v22 = vadd.f32 %v1577_v21, %v1527_v20 }
 0x2d0   : > { %vm1582_vm11 = vcmp.ge.f32.partialorder %v1578_v22, 0.0  ;;  %v1584_v23 = vmul.f32 0.2, %v1578_v22 }
 0x2d2   : > { %v9962_v24 = vsel %vm1582_vm11, %v1578_v22, %v1584_v23 }
 0x2d3   : > { %v1564_v25 = vpop.f32.mrf.mxu3  ;;  %v1588_v27 = vpack.c.bf16 %v9962_v24, %v9962_v24 }
 0x2d4   : > { %v1565_v29 = vadd.f32 %v1564_v25, %v1527_v20 }
 0x2d5   : > { %v1579_v30 = vpop.f32.mrf.mxu1  ;;  %1738 = vmatmul.bf16.vlgmr.msrb.gmra.mxu3 %v1588_v27 }
 0x2d6   : > { %vm1581_vm12 = vcmp.ge.f32.partialorder %v1565_v29, 0.0  ;;  %v1583_v31 = vmul.f32 0.2, %v1565_v29 }
 0x2d8   : > { %v9966_v32 = vsel %vm1581_vm12, %v1565_v29, %v1583_v31 }
 0x2d9   : > { %v1587_v33 = vpack.c.bf16 %v9966_v32, %v9966_v32 }
 0x2db   : > { %v1566_v34 = vpop.f32.mrf.mxu3  ;;  %1725 = vmatmul.bf16.vlgmr.msra.gmra.mxu2 %v1587_v33 }
 0x358   : > { %v1739_v35 = vpop.f32.mrf.mxu3 }
 0x35e   : > { %v1726_v37 = vpop.f32.mrf.mxu2 }
 0x35f   : > { %v1740_v38 = vadd.f32 %v1739_v35, %v1726_v37  ;;  %v8060_v37 = vld [vmem:[#allocation20] sm:$0xff] }
 0x360   : > { %v1741_v39 = vpop.f32.mrf.mxu3 }
 0x361   : > { %v1773_v40 = vmul.f32 %v8598_v36, %v1740_v38  ;;  %1791 = vrot.lane.b32.xlu1 %v1740_v38, %s11151_s2  ;;  %1784 = vrot.lane.b32.xlu0 %v1740_v38, %s11149_s1  ;;  %v8063_v39 = vld [vmem:[#allocation12 + $0x10] sm:$0xff]  ;;  %s11153_s1 = smov 123   ;;  %s11157_s2 = smov 5  }
 0x362   : > { %1798 = vrot.lane.b32.xlu2 %v1740_v38, %s11143_s5  ;;  %s11246_s5 = sld [smem:[#allocation50_spill]] }
 0x363   : > { %v1774_v41 = vpack.c.bf16 %v1773_v40, %v1773_v40  ;;  %v8062_v40 = vld [vmem:[#allocation12 + $0x8] sm:$0xff] }
 0x365   : > { %1775 = vst [vmem:[#allocation2 + $0x20] sm:$0xf] %v1774_v41  ;;  %v8061_v41 = vld [vmem:[#allocation12] sm:$0xff] }
 0x366   : > { %v1728_v42 = vpop.f32.mrf.mxu2 }
 0x369   : > { %1765 = vrot.lane.b32.xlu1 %v1740_v38, %s11169_s4  ;;  %1758 = vrot.lane.b32.xlu0 %v1740_v38, %s11147_s6  ;;  %s11159_s6 = smov 4  }
 0x36a   : > { %1777 = vrot.lane.b32.xlu2 %v1740_v38, %s9351_s12 }
 0x36c   : > { %v6968_v25 = vld [vmem:[#allocation2 + $0x20] sm:$0xf] }
 0x371   : > { %1819 = vperm.xlu1 %8595, %v1815_v43   ;;  %1751 = vrot.lane.b32.xlu0 %v1740_v38, %s11145_s3  ;;  %s11166_s3 = smov 3  }
 0x372   : > { %1744 = vrot.lane.b32.xlu2 %v1740_v38, %s11141_s22  ;;  %v8064_v38 = vld [vmem:[#allocation12 + $0x18] sm:$0xff]  ;;  %s11155_s22 = smov 124  }
 0x373   : > { %1956 = vmatpush.bf16.msrb.mxu1 %v8064_v38 }
 0x377   : > { %1957 = vmatpush.bf16.msrb.mxu1 %v8063_v39 }
 0x37a   : > { %1824 = vperm.xlu2 %8596, %v1816_v2  }
 0x37b   : > { %1958 = vmatpush.bf16.msrb.mxu1 %v8062_v40 }
 0x37f   : > { %1959 = vmatpush.bf16.msrb.mxu1 %v8061_v41 }
 0x3bc   : > { %v1799_v45 = vpop.permute.xlu2 %1798 }
 0x3bd   : > { %v1801_v46 = vmul.f32 %v8599_v44, %v1799_v45 }
 0x3bf   : > { %v1802_v47 = vpack.c.bf16 %v1801_v46, %v1801_v46 }
 0x3c1   : > { %1803 = vst [vmem:[#allocation2 + $0x40] sm:$0xf] %v1802_v47 }
 0x3c4   : > { %v1778_v49 = vpop.permute.xlu2 %1777 }
 0x3c5   : > { %v1780_v50 = vmul.f32 %v8600_v48, %v1778_v49 }
 0x3c7   : > { %v1781_v51 = vpack.c.bf16 %v1780_v50, %v1780_v50 }
 0x3c8   : > { %v1812_v52 = vld [vmem:[#allocation2 + $0x40] sm:$0xf] }
 0x3c9   : > { %1782 = vst [vmem:[#allocation2 + $0x28] sm:$0xf] %v1781_v51  ;;  %v1849_v54 = vunpack.c.l.b16 %v1812_v52 }
 0x3cb   : > { %v1854_v55 = vpack.c.b16 %v1849_v54, %v1849_v54 }
 0x3cc   : > { %v1745_v56 = vpop.permute.xlu2 %1744 }
 0x3cd   : > { %v1747_v57 = vmul.f32 %v8601_v53, %v1745_v56  ;;  %v1865_v58 = vsel %vm1863_vm13, %v1854_v55, 0  ;;  %v8608_v53 = vld [vmem:[#allocation9 + $0x4] ss:$0 sm:$0xff] }
 0x3ce   : > { %1870 = vmatpush.bf16.msra.mxu0 %v1865_v58 }
 0x3cf   : > { %v1748_v59 = vpack.c.bf16 %v1747_v57, %v1747_v57 }
 0x3d0   : > { %v8058_v21 = vld [vmem:[#allocation2 + $0x24] sm:$0xf0] }
 0x3d1   : > { %1749 = vst [vmem:[#allocation2] sm:$0xf] %v1748_v59  ;;  %v6969_v27 = vor.u32 %v8058_v21, %v6968_v25 }
 0x3d3   : > { %v1792_v62 = vpop.permute.xlu1 %1791  ;;  %v1785_v63 = vpop.permute.xlu0 %1784 }
 0x3d4   : > { %v1794_v0 = vmul.f32 %v8602_v60, %v1792_v62  ;;  %v1787_v1 = vmul.f32 %v8603_v61, %v1785_v63  ;;  %v1825_v45 = vpop.permute.xlu2 %1824  ;;  %v2093_v60 = vld [vmem:[%s11246_s5 + $0x8] sm:$0xff]  ;;  %v2092_v61 = vld [vmem:[%s11246_s5] sm:$0xff]  ;;  %v2095_v62 = vld [vmem:[%s11246_s5 + $0x18] sm:$0xff] }
 0x3d5   : > { %v8609_v63 = vld [vmem:[#allocation9 + $0x6] ss:$0 sm:$0xff] }
 0x3d6   : > { %v1795_v4 = vpack.c.bf16 %v1794_v0, %v1794_v0  ;;  %v1788_v5 = vpack.c.bf16 %v1787_v1, %v1787_v1 }
 0x3d8   : > { %1796 = vst [vmem:[#allocation2 + $0x38] sm:$0xf] %v1795_v4  ;;  %v6960_v34 = vld [vmem:[#allocation2] sm:$0xf] }
 0x3d9   : > { %1789 = vst [vmem:[#allocation2 + $0x30] sm:$0xf] %v1788_v5 }
 0x3db   : > { %v1766_v9 = vpop.permute.xlu1 %1765  ;;  %v1759_v10 = vpop.permute.xlu0 %1758 }
 0x3dc   : > { %v1768_v12 = vmul.f32 %v8604_v7, %v1766_v9  ;;  %v1761_v13 = vmul.f32 %v8605_v8, %v1759_v10  ;;  %v10007_v7 = vld [vmem:[#allocation9 + $0x2] ss:$0 sm:$0xff] }
 0x3de   : > { %v1769_v14 = vpack.c.bf16 %v1768_v12, %v1768_v12  ;;  %v1762_v15 = vpack.c.bf16 %v1761_v13, %v1761_v13  ;;  %v8612_v12 = vld [vmem:[#allocation9 + $0x7] ss:$0 sm:$0xff] }
 0x3df   : > { %v8059_v16 = vld [vmem:[#allocation2 + $0x34] sm:$0xf0] }
 0x3e0   : > { %1770 = vst [vmem:[#allocation2 + $0x18] sm:$0xf] %v1769_v14  ;;  %v6972_v18 = vld [vmem:[#allocation2 + $0x30] sm:$0xf] }
 0x3e1   : > { %1763 = vst [vmem:[#allocation2 + $0x10] sm:$0xf] %v1762_v15  ;;  %v6973_v20 = vor.u32 %v8059_v16, %v6972_v18 }
 0x3e3   : > { %1871 = vmatpush.bf16.msra.mxu0 %v6973_v20  ;;  %v1752_v22 = vpop.permute.xlu0 %1751  ;;  %v1820_v43 = vpop.permute.xlu1 %1819 }
 0x3e4   : > { %v1754_v23 = vmul.f32 %v8606_v19, %v1752_v22  ;;  %v8615_v22 = vld [vmem:[#allocation9] ss:$0 sm:$0xff] }
 0x3e6   : > { %v1755_v29 = vpack.c.bf16 %v1754_v23, %v1754_v23  ;;  %v8614_v23 = vld [vmem:[#allocation9 + $0x3] ss:$0 sm:$0xff] }
 0x3e7   : > { %1872 = vmatpush.bf16.msra.mxu0 %v6969_v27  ;;  %v8057_v30 = vld [vmem:[#allocation2 + $0x14] sm:$0xf0] }
 0x3e8   : > { %1756 = vst [vmem:[#allocation2 + $0x8] sm:$0xf] %v1755_v29  ;;  %v6964_v31 = vld [vmem:[#allocation2 + $0x10] sm:$0xf] }
 0x3e9   : > { %v6965_v33 = vor.u32 %v8057_v30, %v6964_v31 }
 0x3eb   : > { %1873 = vmatpush.bf16.msra.mxu0 %v6965_v33 }
 0x3ef   : > { %v8056_v35 = vld [vmem:[#allocation2 + $0x4] sm:$0xf0] }
 0x3f0   : > { %v6961_v36 = vor.u32 %v8056_v35, %v6960_v34 }
 0x3f2   : > { %1874 = vmatpush.bf16.msra.mxu0 %v6961_v36 }
 0x3f5   : > { %6974 = vmatmul.msk.bf16.vlgmr.msra.gmra.mxu0 %vm1859_vm14, %v8060_v37 }
 0x472   : > { %v1876_v42 = vpop.f32.mrf.mxu0 }
 0x473   : > { %v1877_v44 = vadd.f32 %v1876_v42, %v1820_v43  ;;  %v8616_v43 = vld [vmem:[#allocation9 + $0x8] ss:$0 sm:$0xff] }
 0x475   : > { %v1883_v47 = vmul.f32 0.2, %v1877_v44  ;;  %vm1881_vm15 = vcmp.ge.f32.partialorder %v1877_v44, 0.0 }
 0x477   : > { %v9982_v50 = vsel %vm1881_vm15, %v1877_v44, %v1883_v47 }
 0x47a   : > { %v1878_v46 = vpop.f32.mrf.mxu0 }
 0x47b   : > { %v1879_v48 = vadd.f32 %v1878_v46, %v1825_v45 }
 0x47d   : > { %vm1882_vm0 = vcmp.ge.f32.partialorder %v1879_v48, 0.0  ;;  %v1884_v49 = vmul.f32 0.2, %v1879_v48 }
 0x47f   : > { %v9984_v51 = vsel %vm1882_vm0, %v1879_v48, %v1884_v49  ;;  %vm2772_vm0 = vcmask 261120  }
 0x480   : > { %v1887_v52 = vpack.c.bf16 %v9984_v51, %v9982_v50 }
 0x482   : > { %1960 = vmatmul.bf16.vlgmr.msrb.gmra.mxu1 %v1887_v52 }
 0x4ff   : > { %v1961_v54 = vpop.f32.mrf.mxu1 }
 0x500   : > { %v2016_v55 = vmul.f32 %v8608_v53, %v1961_v54  ;;  %2023 = vrot.lane.b32.xlu1 %v1961_v54, %s9351_s12  ;;  %2035 = vrot.lane.b32.xlu2 %v1961_v54, %s11161_s30 }
 0x501   : > { %2047 = vrot.lane.b32.xlu0 %v1961_v54, %s11155_s22 }
 0x502   : > { %v2018_v56 = vpack.c.bf16 %v2016_v55, %v2016_v55 }
 0x504   : > { %2020 = vst [vmem:[#allocation2 + $0x40] sm:$0xf] %v2018_v56 }
 0x507   : > { %v1963_v57 = vpop.f32.mrf.mxu1 }
 0x508   : > { %v2017_v58 = vmul.f32 %v8608_v53, %v1963_v57  ;;  %2025 = vrot.lane.b32.xlu2 %v1963_v57, %s9351_s12  ;;  %2049 = vrot.lane.b32.xlu1 %v1963_v57, %s11155_s22  ;;  %s9370_s22 = smov 2  }
 0x509   : > { %2003 = vrot.lane.b32.xlu0 %v1961_v54, %s11169_s4 }
 0x50a   : > { %v2019_v59 = vpack.c.bf16 %v2017_v58, %v2017_v58 }
 0x50c   : > { %2021 = vst [vmem:[#allocation2 + $0x48] sm:$0xf] %v2019_v59 }
 0x510   : > { %1991 = vrot.lane.b32.xlu2 %v1961_v54, %s11166_s3  ;;  %1979 = vrot.lane.b32.xlu1 %v1961_v54, %s11159_s6 }
 0x511   : > { %2037 = vrot.lane.b32.xlu0 %v1963_v57, %s11161_s30 }
 0x518   : > { %1981 = vrot.lane.b32.xlu2 %v1963_v57, %s11159_s6  ;;  %2005 = vrot.lane.b32.xlu1 %v1963_v57, %s11169_s4 }
 0x519   : > { %2059 = vrot.lane.b32.xlu0 %v1961_v54, %s11153_s1 }
 0x520   : > { %1967 = vrot.lane.b32.xlu2 %v1961_v54, %s11157_s2  ;;  %2061 = vrot.lane.b32.xlu1 %v1963_v57, %s11153_s1  ;;  %s9369_s1 = smov 126  }
 0x521   : > { %1993 = vrot.lane.b32.xlu0 %v1963_v57, %s11166_s3 }
 0x528   : > { %2103 = vperm.xlu2 %8596, %v2093_v60   ;;  %2098 = vperm.xlu1 %8595, %v2092_v61  }
 0x529   : > { %1969 = vrot.lane.b32.xlu0 %v1963_v57, %s11157_s2  ;;  %s11247_s2 = sld [smem:[#allocation52_spill]] }
 0x530   : > { %2113 = vperm.xlu1 %8595, %v2095_v62  }
 0x55a   : > { %v2036_v0 = vpop.permute.xlu2 %2035 }
 0x55b   : > { %v2040_v1 = vmul.f32 %v8609_v63, %v2036_v0 }
 0x55d   : > { %v2042_v2 = vpack.c.bf16 %v2040_v1, %v2040_v1 }
 0x55f   : > { %2044 = vst [vmem:[#allocation2 + $0x60] sm:$0xf] %v2042_v2  ;;  %v8073_v2 = vld [vmem:[#allocation2 + $0x44] sm:$0xf0] }
 0x562   : > { %v2026_v4 = vpop.permute.xlu2 %2025 }
 0x563   : > { %v2029_v5 = vmul.f32 %v8610_v3, %v2026_v4  ;;  %v7041_v4 = vld [vmem:[#allocation2 + $0x40] sm:$0xf] }
 0x565   : > { %v2031_v6 = vpack.c.bf16 %v2029_v5, %v2029_v5  ;;  %v7042_v5 = vor.u32 %v8073_v2, %v7041_v4 }
 0x566   : > { %v7049_v55 = vld [vmem:[#allocation2 + $0x60] sm:$0xf] }
 0x567   : > { %2033 = vst [vmem:[#allocation2 + $0x58] sm:$0xf] %v2031_v6 }
 0x56a   : > { %v1992_v8 = vpop.permute.xlu2 %1991 }
 0x56b   : > { %v1996_v9 = vmul.f32 %v10007_v7, %v1992_v8 }
 0x56d   : > { %v1998_v10 = vpack.c.bf16 %v1996_v9, %v1996_v9 }
 0x56e   : > { %v8074_v62 = vld [vmem:[#allocation2 + $0x54] sm:$0xf0] }
 0x56f   : > { %2000 = vst [vmem:[#allocation2 + $0x20] sm:$0xf] %v1998_v10 }
 0x572   : > { %v2024_v13 = vpop.permute.xlu1 %2023  ;;  %v1982_v14 = vpop.permute.xlu2 %1981 }
 0x573   : > { %v2028_v15 = vmul.f32 %v8610_v3, %v2024_v13  ;;  %v2048_v16 = vpop.permute.xlu0 %2047  ;;  %v1985_v17 = vmul.f32 %v8613_v11, %v1982_v14  ;;  %v7011_v13 = vld [vmem:[#allocation21 + $0x8] sm:$0xf0]  ;;  %v2094_v14 = vld [vmem:[%s11246_s5 + $0x10] sm:$0xff]  ;;  %s11253_s5 = sld [smem:[#allocation60_spill]] }
 0x574   : > { %v2052_v18 = vmul.f32 %v8612_v12, %v2048_v16  ;;  %2108 = vperm.xlu0 %8597, %v2094_v14  }
 0x575   : > { %v2030_v19 = vpack.c.bf16 %v2028_v15, %v2028_v15  ;;  %v1987_v20 = vpack.c.bf16 %v1985_v17, %v1985_v17 }
 0x576   : > { %v2054_v21 = vpack.c.bf16 %v2052_v18, %v2052_v18  ;;  %v7033_v18 = vld [vmem:[#allocation2 + $0x20] sm:$0xf] }
 0x577   : > { %2032 = vst [vmem:[#allocation2 + $0x50] sm:$0xf] %v2030_v19 }
 0x578   : > { %2056 = vst [vmem:[#allocation2 + $0x70] sm:$0xf] %v2054_v21  ;;  %v8088_v21 = vld [vmem:[#allocation14 + $0x30] sm:$0xff] }
 0x579   : > { %1989 = vst [vmem:[#allocation2 + $0x18] sm:$0xf] %v1987_v20 }
 0x57a   : > { %v1968_v25 = vpop.permute.xlu2 %1967  ;;  %v2050_v27 = vpop.permute.xlu1 %2049 }
 0x57b   : > { %v2004_v29 = vpop.permute.xlu0 %2003  ;;  %v1972_v30 = vmul.f32 %v8615_v22, %v1968_v25  ;;  %v2053_v31 = vmul.f32 %v8612_v12, %v2050_v27  ;;  %v8078_v12 = vld [vmem:[#allocation21 + $0x4] sm:$0xf] }
 0x57c   : > { %v2008_v33 = vmul.f32 %v8614_v23, %v2004_v29  ;;  %v7014_v25 = vor.u32 %v8078_v12, %v7011_v13  ;;  %v8087_v29 = vld [vmem:[#allocation14 + $0x28] sm:$0xff] }
 0x57d   : > { %v1974_v34 = vpack.c.bf16 %v1972_v30, %v1972_v30  ;;  %v2055_v35 = vpack.c.bf16 %v2053_v31, %v2053_v31  ;;  %v7009_v31 = vld [vmem:[#allocation21] sm:$0xf] }
 0x57e   : > { %v2010_v36 = vpack.c.bf16 %v2008_v33, %v2008_v33  ;;  %v7045_v58 = vld [vmem:[#allocation2 + $0x50] sm:$0xf]  ;;  %v8079_v33 = vld [vmem:[#allocation21 + $0x4] sm:$0xf0] }
 0x57f   : > { %1976 = vst [vmem:[#allocation2] sm:$0xf] %v1974_v34  ;;  %v7053_v44 = vld [vmem:[#allocation2 + $0x70] sm:$0xf]  ;;  %v7046_v0 = vor.u32 %v8074_v62, %v7045_v58 }
 0x580   : > { %2012 = vst [vmem:[#allocation2 + $0x30] sm:$0xf] %v2010_v36  ;;  %v8070_v27 = vld [vmem:[#allocation2 + $0x14] sm:$0xf0] }
 0x581   : > { %2057 = vst [vmem:[#allocation2 + $0x78] sm:$0xf] %v2055_v35 }
 0x582   : > { %v1980_v37 = vpop.permute.xlu1 %1979 }
 0x583   : > { %v2038_v38 = vpop.permute.xlu0 %2037  ;;  %v1984_v39 = vmul.f32 %v8613_v11, %v1980_v37  ;;  %v7010_v37 = vor.u32 %v8079_v33, %v7009_v31 }
 0x584   : > { %v2041_v40 = vmul.f32 %v8609_v63, %v2038_v38  ;;  %v8080_v38 = vld [vmem:[#allocation21 + $0x14] sm:$0xf] }
 0x585   : > { %v1986_v41 = vpack.c.bf16 %v1984_v39, %v1984_v39  ;;  %v7019_v39 = vld [vmem:[#allocation21 + $0x18] sm:$0xf0] }
 0x586   : > { %v2043_v42 = vpack.c.bf16 %v2041_v40, %v2041_v40  ;;  %v7025_v34 = vld [vmem:[#allocation2] sm:$0xf]  ;;  %v7022_v40 = vor.u32 %v8080_v38, %v7019_v39  ;;  %v2556_v38 = vld [vmem:[%s11247_s2] sm:$0xff]  ;;  %v2558_v39 = vld [vmem:[%s11247_s2 + $0x10] sm:$0xff] }
 0x587   : > { %1988 = vst [vmem:[#allocation2 + $0x10] sm:$0xf] %v1986_v41  ;;  %v7037_v9 = vld [vmem:[#allocation2 + $0x30] sm:$0xf]  ;;  %v7017_v41 = vld [vmem:[#allocation21 + $0x10] sm:$0xf] }
 0x588   : > { %2045 = vst [vmem:[#allocation2 + $0x68] sm:$0xf] %v2043_v42  ;;  %v8076_v45 = vld [vmem:[#allocation2 + $0x74] sm:$0xf0]  ;;  %v8081_v42 = vld [vmem:[#allocation21 + $0x14] sm:$0xf0] }
 0x589   : > { %v7054_v46 = vor.u32 %v8076_v45, %v7053_v44  ;;  %v8086_v44 = vld [vmem:[#allocation14 + $0x20] sm:$0xff]  ;;  %v8085_v45 = vld [vmem:[#allocation14 + $0x18] sm:$0xff] }
 0x58a   : > { %v2006_v47 = vpop.permute.xlu1 %2005 }
 0x58b   : > { %2195 = vmatpush.bf16.msrb.mxu0 %v7054_v46  ;;  %v2060_v48 = vpop.permute.xlu0 %2059  ;;  %v2009_v49 = vmul.f32 %v8614_v23, %v2006_v47  ;;  %v8084_v46 = vld [vmem:[#allocation14 + $0x10] sm:$0xff]  ;;  %v8083_v47 = vld [vmem:[#allocation14 + $0x8] sm:$0xff] }
 0x58c   : > { %v2064_v52 = vmul.f32 %v8616_v43, %v2060_v48  ;;  %v8082_v48 = vld [vmem:[#allocation14] sm:$0xff] }
 0x58d   : > { %v2011_v53 = vpack.c.bf16 %v2009_v49, %v2009_v49 }
 0x58e   : > { %v2066_v54 = vpack.c.bf16 %v2064_v52, %v2064_v52 }
 0x58f   : > { %2013 = vst [vmem:[#allocation2 + $0x38] sm:$0xf] %v2011_v53  ;;  %v8075_v56 = vld [vmem:[#allocation2 + $0x64] sm:$0xf0] }
 0x590   : > { %2068 = vst [vmem:[#allocation2 + $0x80] sm:$0xf] %v2066_v54  ;;  %v7050_v57 = vor.u32 %v8075_v56, %v7049_v55 }
 0x592   : > { %2196 = vmatpush.bf16.msrb.mxu0 %v7050_v57  ;;  %v2062_v59 = vpop.permute.xlu1 %2061  ;;  %v2104_v57 = vpop.permute.xlu2 %2103 }
 0x593   : > { %v1994_v60 = vpop.permute.xlu0 %1993  ;;  %v2065_v61 = vmul.f32 %v8616_v43, %v2062_v59  ;;  %v7018_v43 = vor.u32 %v8081_v42, %v7017_v41  ;;  %v2557_v41 = vld [vmem:[%s11247_s2 + $0x8] sm:$0xff]  ;;  %v10058_v42 = vld [vmem:[#allocation11 + $0x7] ss:$0 sm:$0xff] }
 0x594   : > { %v1997_v63 = vmul.f32 %v10007_v7, %v1994_v60  ;;  %v8089_v7 = vld [vmem:[#allocation14 + $0x38] sm:$0xff] }
 0x595   : > { %v2067_v1 = vpack.c.bf16 %v2065_v61, %v2065_v61  ;;  %2311 = vmatpush.bf16.msra.mxu3 %v8089_v7 }
 0x596   : > { %v1999_v3 = vpack.c.bf16 %v1997_v63, %v1997_v63  ;;  %2197 = vmatpush.bf16.msrb.mxu0 %v7046_v0  ;;  %v8072_v6 = vld [vmem:[#allocation2 + $0x34] sm:$0xf0] }
 0x597   : > { %2069 = vst [vmem:[#allocation2 + $0x88] sm:$0xf] %v2067_v1  ;;  %v7038_v11 = vor.u32 %v8072_v6, %v7037_v9  ;;  %v7057_v16 = vld [vmem:[#allocation2 + $0x80] sm:$0xf] }
 0x598   : > { %2001 = vst [vmem:[#allocation2 + $0x28] sm:$0xf] %v1999_v3 }
 0x599   : > { %2312 = vmatpush.bf16.msra.mxu3 %v8088_v21 }
 0x59a   : > { %2198 = vmatpush.bf16.msrb.mxu0 %v7042_v5  ;;  %v2099_v53 = vpop.permute.xlu1 %2098 }
 0x59b   : > { %v1970_v8 = vpop.permute.xlu0 %1969 }
 0x59c   : > { %v1973_v10 = vmul.f32 %v8615_v22, %v1970_v8  ;;  %v7029_v22 = vld [vmem:[#allocation2 + $0x10] sm:$0xf] }
 0x59d   : > { %v7030_v30 = vor.u32 %v8070_v27, %v7029_v22  ;;  %2313 = vmatpush.bf16.msra.mxu3 %v8087_v29 }
 0x59e   : > { %v1975_v15 = vpack.c.bf16 %v1973_v10, %v1973_v10  ;;  %2199 = vmatpush.bf16.msrb.mxu0 %v7038_v11  ;;  %v8077_v17 = vld [vmem:[#allocation2 + $0x84] sm:$0xf0] }
 0x59f   : > { %v8071_v19 = vld [vmem:[#allocation2 + $0x24] sm:$0xf0]  ;;  %v7058_v20 = vor.u32 %v8077_v17, %v7057_v16  ;;  %v8617_v17 = vld [vmem:[#allocation11 + $0x4] ss:$0 sm:$0xff] }
 0x5a0   : > { %1977 = vst [vmem:[#allocation2 + $0x8] sm:$0xf] %v1975_v15  ;;  %v7034_v23 = vor.u32 %v8071_v19, %v7033_v18 }
 0x5a1   : > { %2221 = vmatpush.bf16.msrb.mxu2 %v7058_v20  ;;  %2314 = vmatpush.bf16.msra.mxu3 %v8086_v44 }
 0x5a2   : > { %2200 = vmatpush.bf16.msrb.mxu0 %v7034_v23  ;;  %v2114_v8 = vpop.permute.xlu1 %2113 }
 0x5a4   : > { %7059 = vmatmul.msk.bf16.vlgmr.msrb.gmra.mxu2 %vm2188_vm9, %v7014_v25 }
 0x5a5   : > { %2315 = vmatpush.bf16.msra.mxu3 %v8085_v45 }
 0x5a6   : > { %2201 = vmatpush.bf16.msrb.mxu0 %v7030_v30 }
 0x5a7   : > { %v8069_v35 = vld [vmem:[#allocation2 + $0x4] sm:$0xf0] }
 0x5a8   : > { %v7026_v36 = vor.u32 %v8069_v35, %v7025_v34  ;;  %v2562_v34 = vld [vmem:[%s11247_s2 + $0x30] sm:$0xff]  ;;  %v2561_v35 = vld [vmem:[%s11247_s2 + $0x28] sm:$0xff] }
 0x5a9   : > { %2316 = vmatpush.bf16.msra.mxu3 %v8084_v46 }
 0x5aa   : > { %2202 = vmatpush.bf16.msrb.mxu0 %v7026_v36  ;;  %v2563_v36 = vld [vmem:[%s11247_s2 + $0x38] sm:$0xff] }
 0x5ad   : > { %2203 = vmatmul.bf16.vlgmr.msrb.gmra.mxu0 %v7010_v37  ;;  %2317 = vmatpush.bf16.msra.mxu3 %v8083_v47  ;;  %v2560_v37 = vld [vmem:[%s11247_s2 + $0x20] sm:$0xff] }
 0x5b1   : > { %2318 = vmatpush.bf16.msra.mxu3 %v8082_v48 }
 0x5b4   : > { %7060 = vmatmul.msk.bf16.gmra.mxu2 %vm2188_vm9, %v7022_v40  ;;  %v2559_v40 = vld [vmem:[%s11247_s2 + $0x18] sm:$0xff]  ;;  %s11252_s2 = smov 125  }
 0x5bd   : > { %2208 = vmatmul.bf16.gmra.mxu0 %v7018_v43 }
 0x5e6   : > { %v2109_v1 = vpop.permute.xlu0 %2108 }
 0x627   : > { %v2223_v49 = vpop.f32.mrf.mxu2 }
 0x62a   : > { %v2204_v52 = vpop.f32.mrf.mxu0 }
 0x62b   : > { %v2205_v54 = vadd.f32 %v2204_v52, %v2099_v53  ;;  %v8620_v52 = vld [vmem:[#allocation11 + $0x3] ss:$0 sm:$0xff] }
 0x62d   : > { %v2224_v56 = vadd.f32 %v2223_v49, %v2205_v54  ;;  %v8619_v49 = vld [vmem:[#allocation11 + $0x2] ss:$0 sm:$0xff] }
 0x62f   : > { %v2225_v55 = vpop.f32.mrf.mxu2  ;;  %v2237_v60 = vmul.f32 0.2, %v2224_v56  ;;  %vm2233_vm10 = vcmp.ge.f32.partialorder %v2224_v56, 0.0 }
 0x631   : > { %v10014_v63 = vsel %vm2233_vm10, %v2224_v56, %v2237_v60 }
 0x632   : > { %v2206_v58 = vpop.f32.mrf.mxu0 }
 0x633   : > { %v2207_v59 = vadd.f32 %v2206_v58, %v2104_v57 }
 0x635   : > { %v2226_v61 = vadd.f32 %v2225_v55, %v2207_v59 }
 0x637   : > { %vm2234_vm11 = vcmp.ge.f32.partialorder %v2226_v61, 0.0  ;;  %v2238_v62 = vmul.f32 0.2, %v2226_v61  ;;  %v2228_v2 = vpop.f32.mrf.mxu2 }
 0x639   : > { %v10016_v0 = vsel %vm2234_vm11, %v2226_v61, %v2238_v62 }
 0x63a   : > { %v2209_v3 = vpop.f32.mrf.mxu0  ;;  %v2245_v4 = vpack.c.bf16 %v10016_v0, %v10014_v63 }
 0x63b   : > { %v2210_v5 = vadd.f32 %v2209_v3, %v2109_v1 }
 0x63c   : > { %2319 = vmatmul.bf16.vlgmr.msra.gmra.mxu3 %v2245_v4  ;;  %v8621_v4 = vld [vmem:[#allocation11 + $0x5] ss:$0 sm:$0xff] }
 0x63d   : > { %v2229_v6 = vadd.f32 %v2228_v2, %v2210_v5  ;;  %v8622_v5 = vld [vmem:[#allocation11 + $0x6] ss:$0 sm:$0xff] }
 0x63f   : > { %v2230_v11 = vpop.f32.mrf.mxu2  ;;  %v2239_v12 = vmul.f32 0.2, %v2229_v6  ;;  %vm2235_vm12 = vcmp.ge.f32.partialorder %v2229_v6, 0.0 }
 0x641   : > { %v10020_v7 = vsel %vm2235_vm12, %v2229_v6, %v2239_v12 }
 0x642   : > { %v2211_v9 = vpop.f32.mrf.mxu0 }
 0x643   : > { %v2212_v10 = vadd.f32 %v2211_v9, %v2114_v8 }
 0x645   : > { %v2231_v13 = vadd.f32 %v2230_v11, %v2212_v10 }
 0x647   : > { %vm2236_vm15 = vcmp.ge.f32.partialorder %v2231_v13, 0.0  ;;  %v2240_v14 = vmul.f32 0.2, %v2231_v13 }
 0x649   : > { %v10022_v15 = vsel %vm2236_vm15, %v2231_v13, %v2240_v14 }
 0x64a   : > { %v2246_v16 = vpack.c.bf16 %v10022_v15, %v10020_v7 }
 0x64c   : > { %2324 = vmatmul.bf16.gmra.mxu3 %v2246_v16 }
 0x6bf   : > { %v2320_v18 = vpop.f32.mrf.mxu3 }
 0x6c0   : > { %v2412_v19 = vmul.f32 %v8617_v17, %v2320_v18  ;;  %2375 = vrot.lane.b32.xlu0 %v2320_v18, %s11169_s4  ;;  %2461 = vrot.lane.b32.xlu1 %v2320_v18, %s9369_s1 }
 0x6c2   : > { %v2416_v20 = vpack.c.bf16 %v2412_v19, %v2412_v19 }
 0x6c4   : > { %2420 = vst [vmem:[#allocation2 + $0x80] sm:$0xf] %v2416_v20 }
 0x6c7   : > { %v2322_v21 = vpop.f32.mrf.mxu3 }
 0x6c8   : > { %v2413_v23 = vmul.f32 %v8617_v17, %v2322_v21  ;;  %2377 = vrot.lane.b32.xlu1 %v2322_v21, %s11169_s4  ;;  %2463 = vrot.lane.b32.xlu2 %v2322_v21, %s9369_s1 }
 0x6ca   : > { %v2417_v25 = vpack.c.bf16 %v2413_v23, %v2413_v23 }
 0x6cc   : > { %2421 = vst [vmem:[#allocation2 + $0x88] sm:$0xf] %v2417_v25 }
 0x6cf   : > { %v2325_v22 = vpop.f32.mrf.mxu3 }
 0x6d0   : > { %v2414_v27 = vmul.f32 %v8617_v17, %v2325_v22  ;;  %2357 = vrot.lane.b32.xlu0 %v2325_v22, %s9370_s22  ;;  %2465 = vrot.lane.b32.xlu2 %v2325_v22, %s9369_s1 }
 0x6d2   : > { %v2418_v29 = vpack.c.bf16 %v2414_v27, %v2414_v27 }
 0x6d4   : > { %2422 = vst [vmem:[#allocation2 + $0x90] sm:$0xf] %v2418_v29 }
 0x6d7   : > { %v2327_v30 = vpop.f32.mrf.mxu3 }
 0x6d8   : > { %v2415_v31 = vmul.f32 %v8617_v17, %v2327_v30  ;;  %2379 = vrot.lane.b32.xlu2 %v2325_v22, %s11169_s4  ;;  %2381 = vrot.lane.b32.xlu0 %v2327_v30, %s11169_s4 }
 0x6d9   : > { %2467 = vrot.lane.b32.xlu1 %v2327_v30, %s9369_s1 }
 0x6da   : > { %v2419_v33 = vpack.c.bf16 %v2415_v31, %v2415_v31 }
 0x6dc   : > { %2423 = vst [vmem:[#allocation2 + $0x98] sm:$0xf] %v2419_v33 }
 0x6e0   : > { %2429 = vrot.lane.b32.xlu2 %v2325_v22, %s9351_s12  ;;  %2431 = vrot.lane.b32.xlu0 %v2327_v30, %s9351_s12 }
 0x6e1   : > { %2425 = vrot.lane.b32.xlu1 %v2320_v18, %s9351_s12 }
 0x6e8   : > { %2427 = vrot.lane.b32.xlu2 %v2322_v21, %s9351_s12  ;;  %2355 = vrot.lane.b32.xlu0 %v2322_v21, %s9370_s22 }
 0x6e9   : > { %2335 = vrot.lane.b32.xlu1 %v2325_v22, %s11166_s3 }
 0x6f0   : > { %2353 = vrot.lane.b32.xlu2 %v2320_v18, %s9370_s22  ;;  %2331 = vrot.lane.b32.xlu0 %v2320_v18, %s11166_s3 }
 0x6f1   : > { %2359 = vrot.lane.b32.xlu1 %v2327_v30, %s9370_s22 }
 0x6f8   : > { %2487 = vrot.lane.b32.xlu2 %v2325_v22, %s11161_s30  ;;  %2489 = vrot.lane.b32.xlu0 %v2327_v30, %s11161_s30 }
 0x6f9   : > { %2333 = vrot.lane.b32.xlu1 %v2322_v21, %s11166_s3 }
 0x700   : > { %2337 = vrot.lane.b32.xlu2 %v2327_v30, %s11166_s3  ;;  %2596 = vperm.xlu0 %8597, %v2562_v34  }
 0x701   : > { %2483 = vrot.lane.b32.xlu1 %v2320_v18, %s11161_s30  ;;  %v10063_v18 = vld [vmem:[#allocation11 + $0x1] ss:$0 sm:$0xff] }
 0x708   : > { %2485 = vrot.lane.b32.xlu2 %v2322_v21, %s11161_s30  ;;  %2591 = vperm.xlu0 %8597, %v2561_v35  }
 0x709   : > { %2601 = vperm.xlu1 %8595, %v2563_v36  }
 0x710   : > { %2586 = vperm.xlu2 %8596, %v2560_v37   ;;  %2566 = vperm.xlu0 %8597, %v2556_v38  }
 0x711   : > { %2576 = vperm.xlu1 %8595, %v2558_v39  }
 0x718   : > { %2581 = vperm.xlu2 %8596, %v2559_v40  }
 0x719   : > { %2571 = vperm.xlu1 %8595, %v2557_v41  }
 0x722   : > { %v2464_v43 = vpop.permute.xlu2 %2463 }
 0x723   : > { %v2471_v44 = vmul.f32 %v10058_v42, %v2464_v43  ;;  %v10068_v43 = vld [vmem:[#allocation11 + $0x8] ss:$0 sm:$0xff] }
 0x725   : > { %v2475_v45 = vpack.c.bf16 %v2471_v44, %v2471_v44 }
 0x727   : > { %2479 = vst [vmem:[#allocation2 + $0xe8] sm:$0xf] %v2475_v45 }
 0x72a   : > { %v2466_v46 = vpop.permute.xlu2 %2465 }
 0x72b   : > { %v2472_v47 = vmul.f32 %v10058_v42, %v2466_v46 }
 0x72d   : > { %v2476_v48 = vpack.c.bf16 %v2472_v47, %v2472_v47 }
 0x72f   : > { %2480 = vst [vmem:[#allocation2 + $0xf0] sm:$0xf] %v2476_v48 }
 0x732   : > { %v2376_v53 = vpop.permute.xlu0 %2375  ;;  %v2462_v54 = vpop.permute.xlu1 %2461 }
 0x733   : > { %v2384_v55 = vmul.f32 %v8619_v49, %v2376_v53  ;;  %v2398_v56 = vmul.f32 %v8620_v52, %v2376_v53  ;;  %v2470_v57 = vmul.f32 %v10058_v42, %v2462_v54  ;;  %v2380_v58 = vpop.permute.xlu2 %2379 }
 0x734   : > { %v2386_v59 = vmul.f32 %v8619_v49, %v2380_v58  ;;  %v2400_v60 = vmul.f32 %v8620_v52, %v2380_v58  ;;  %v10071_v58 = vld [vmem:[#allocation11] ss:$0 sm:$0xff] }
 0x735   : > { %v2388_v61 = vpack.c.bf16 %v2384_v55, %v2384_v55  ;;  %v2402_v62 = vpack.c.bf16 %v2398_v56, %v2398_v56  ;;  %v2474_v1 = vpack.c.bf16 %v2470_v57, %v2470_v57 }
 0x736   : > { %v2390_v2 = vpack.c.bf16 %v2386_v59, %v2386_v59  ;;  %v2404_v3 = vpack.c.bf16 %v2400_v60, %v2400_v60 }
 0x737   : > { %2392 = vst [vmem:[#allocation2 + $0x40] sm:$0xf] %v2388_v61 }
 0x738   : > { %2406 = vst [vmem:[#allocation2 + $0x60] sm:$0xf] %v2402_v62  ;;  %v7203_v62 = vld [vmem:[#allocation2 + $0xf0] sm:$0xf] }
 0x739   : > { %2478 = vst [vmem:[#allocation2 + $0xe0] sm:$0xf] %v2474_v1 }
 0x73a   : > { %2394 = vst [vmem:[#allocation2 + $0x50] sm:$0xf] %v2390_v2  ;;  %v2378_v6 = vpop.permute.xlu1 %2377 }
 0x73b   : > { %2408 = vst [vmem:[#allocation2 + $0x70] sm:$0xf] %v2404_v3  ;;  %v2385_v8 = vmul.f32 %v8619_v49, %v2378_v6  ;;  %v2399_v9 = vmul.f32 %v8620_v52, %v2378_v6  ;;  %v2430_v10 = vpop.permute.xlu2 %2429 }
 0x73c   : > { %v2436_v11 = vmul.f32 %v8621_v4, %v2430_v10  ;;  %v2450_v12 = vmul.f32 %v8622_v5, %v2430_v10 }
 0x73d   : > { %v2389_v13 = vpack.c.bf16 %v2385_v8, %v2385_v8  ;;  %v2403_v14 = vpack.c.bf16 %v2399_v9, %v2399_v9 }
 0x73e   : > { %v2440_v16 = vpack.c.bf16 %v2436_v11, %v2436_v11  ;;  %v2454_v17 = vpack.c.bf16 %v2450_v12, %v2450_v12 }
 0x73f   : > { %2393 = vst [vmem:[#allocation2 + $0x48] sm:$0xf] %v2389_v13  ;;  %v7167_v12 = vld [vmem:[#allocation2 + $0x60] sm:$0xf] }
 0x740   : > { %2407 = vst [vmem:[#allocation2 + $0x68] sm:$0xf] %v2403_v14  ;;  %v7199_v9 = vld [vmem:[#allocation2 + $0xe0] sm:$0xf] }
 0x741   : > { %2444 = vst [vmem:[#allocation2 + $0xb0] sm:$0xf] %v2440_v16  ;;  %v8104_v16 = vld [vmem:[#allocation2 + $0xe4] sm:$0xf0] }
 0x742   : > { %2458 = vst [vmem:[#allocation2 + $0xd0] sm:$0xf] %v2454_v17  ;;  %v2358_v19 = vpop.permute.xlu0 %2357  ;;  %v7171_v59 = vld [vmem:[#allocation2 + $0x70] sm:$0xf] }
 0x743   : > { %v2364_v20 = vmul.f32 %v10063_v18, %v2358_v19  ;;  %v2428_v21 = vpop.permute.xlu2 %2427 }
 0x744   : > { %v2435_v23 = vmul.f32 %v8621_v4, %v2428_v21  ;;  %v2449_v25 = vmul.f32 %v8622_v5, %v2428_v21 }
 0x745   : > { %v2368_v22 = vpack.c.bf16 %v2364_v20, %v2364_v20  ;;  %v7200_v20 = vor.u32 %v8104_v16, %v7199_v9 }
 0x746   : > { %v2439_v27 = vpack.c.bf16 %v2435_v23, %v2435_v23  ;;  %v2453_v29 = vpack.c.bf16 %v2449_v25, %v2449_v25  ;;  %v7163_v23 = vld [vmem:[#allocation2 + $0x50] sm:$0xf] }
 0x747   : > { %2372 = vst [vmem:[#allocation2 + $0x30] sm:$0xf] %v2368_v22 }
 0x748   : > { %2443 = vst [vmem:[#allocation2 + $0xa8] sm:$0xf] %v2439_v27 }
 0x749   : > { %2457 = vst [vmem:[#allocation2 + $0xc8] sm:$0xf] %v2453_v29  ;;  %v7195_v25 = vld [vmem:[#allocation2 + $0xd0] sm:$0xf] }
 0x74a   : > { %v2382_v30 = vpop.permute.xlu0 %2381 }
 0x74b   : > { %v2354_v31 = vpop.permute.xlu2 %2353  ;;  %v2387_v33 = vmul.f32 %v8619_v49, %v2382_v30  ;;  %v2401_v34 = vmul.f32 %v8620_v52, %v2382_v30  ;;  %v2468_v35 = vpop.permute.xlu1 %2467 }
 0x74c   : > { %v2362_v36 = vmul.f32 %v10063_v18, %v2354_v31  ;;  %v2473_v37 = vmul.f32 %v10058_v42, %v2468_v35  ;;  %v8094_v31 = vld [vmem:[#allocation2 + $0x44] sm:$0xf0] }
 0x74d   : > { %v2391_v38 = vpack.c.bf16 %v2387_v33, %v2387_v33  ;;  %v2405_v39 = vpack.c.bf16 %v2401_v34, %v2401_v34 }
 0x74e   : > { %v2366_v40 = vpack.c.bf16 %v2362_v36, %v2362_v36  ;;  %v2477_v41 = vpack.c.bf16 %v2473_v37, %v2473_v37 }
 0x74f   : > { %2395 = vst [vmem:[#allocation2 + $0x58] sm:$0xf] %v2391_v38 }
 0x750   : > { %2370 = vst [vmem:[#allocation2 + $0x20] sm:$0xf] %v2366_v40 }
 0x751   : > { %2409 = vst [vmem:[#allocation2 + $0x78] sm:$0xf] %v2405_v39  ;;  %v7159_v39 = vld [vmem:[#allocation2 + $0x40] sm:$0xf] }
 0x752   : > { %2481 = vst [vmem:[#allocation2 + $0xf8] sm:$0xf] %v2477_v41  ;;  %v2432_v44 = vpop.permute.xlu0 %2431  ;;  %v7160_v41 = vor.u32 %v8094_v31, %v7159_v39 }
 0x753   : > { %v2488_v45 = vpop.permute.xlu2 %2487  ;;  %v2437_v46 = vmul.f32 %v8621_v4, %v2432_v44  ;;  %v2451_v47 = vmul.f32 %v8622_v5, %v2432_v44  ;;  %v2426_v48 = vpop.permute.xlu1 %2425  ;;  %v8102_v44 = vld [vmem:[#allocation2 + $0xc4] sm:$0xf0] }
 0x754   : > { %v2494_v49 = vmul.f32 %v10068_v43, %v2488_v45  ;;  %v2434_v52 = vmul.f32 %v8621_v4, %v2426_v48  ;;  %v2448_v53 = vmul.f32 %v8622_v5, %v2426_v48  ;;  %v8096_v4 = vld [vmem:[#allocation2 + $0x64] sm:$0xf0] }
 0x755   : > { %v2441_v42 = vpack.c.bf16 %v2437_v46, %v2437_v46  ;;  %v2455_v54 = vpack.c.bf16 %v2451_v47, %v2451_v47  ;;  %v7168_v14 = vor.u32 %v8096_v4, %v7167_v12 }
 0x756   : > { %v2498_v55 = vpack.c.bf16 %v2494_v49, %v2494_v49  ;;  %v2438_v56 = vpack.c.bf16 %v2434_v52, %v2434_v52  ;;  %v2452_v57 = vpack.c.bf16 %v2448_v53, %v2448_v53  ;;  %v8095_v21 = vld [vmem:[#allocation2 + $0x54] sm:$0xf0]  ;;  %v7187_v49 = vld [vmem:[#allocation2 + $0xb0] sm:$0xf] }
 0x757   : > { %2445 = vst [vmem:[#allocation2 + $0xb8] sm:$0xf] %v2441_v42  ;;  %v7164_v27 = vor.u32 %v8095_v21, %v7163_v23  ;;  %v7151_v9 = vld [vmem:[#allocation2 + $0x20] sm:$0xf] }
 0x758   : > { %2502 = vst [vmem:[#allocation2 + $0x110] sm:$0xf] %v2498_v55  ;;  %v8097_v60 = vld [vmem:[#allocation2 + $0x74] sm:$0xf0] }
 0x759   : > { %2459 = vst [vmem:[#allocation2 + $0xd8] sm:$0xf] %v2455_v54  ;;  %v7172_v61 = vor.u32 %v8097_v60, %v7171_v59  ;;  %v8105_v1 = vld [vmem:[#allocation2 + $0xf4] sm:$0xf0] }
 0x75a   : > { %2442 = vst [vmem:[#allocation2 + $0xa0] sm:$0xf] %v2438_v56  ;;  %v7204_v2 = vor.u32 %v8105_v1, %v7203_v62  ;;  %v2356_v3 = vpop.permute.xlu0 %2355  ;;  %v7155_v62 = vld [vmem:[#allocation2 + $0x30] sm:$0xf] }
 0x75b   : > { %2456 = vst [vmem:[#allocation2 + $0xc0] sm:$0xf] %v2452_v57  ;;  %2785 = vmatpush.bf16.msra.mxu1 %v7172_v61  ;;  %v2338_v5 = vpop.permute.xlu2 %2337  ;;  %v2363_v6 = vmul.f32 %v10063_v18, %v2356_v3  ;;  %v2336_v8 = vpop.permute.xlu1 %2335  ;;  %v8100_v57 = vld [vmem:[#allocation2 + $0xa4] sm:$0xf0]  ;;  %v8099_v61 = vld [vmem:[#allocation2 + $0x94] sm:$0xf0] }
 0x75c   : > { %2814 = vmatpush.bf16.msra.mxu2 %v7204_v2  ;;  %v2343_v10 = vmul.f32 %v10071_v58, %v2338_v5  ;;  %v2342_v11 = vmul.f32 %v10071_v58, %v2336_v8  ;;  %v7179_v3 = vld [vmem:[#allocation2 + $0x90] sm:$0xf]  ;;  %v8098_v8 = vld [vmem:[#allocation2 + $0x84] sm:$0xf0] }
 0x75d   : > { %v2367_v13 = vpack.c.bf16 %v2363_v6, %v2363_v6  ;;  %v7180_v4 = vor.u32 %v8099_v61, %v7179_v3  ;;  %v8117_v61 = vld [vmem:[#allocation23 + $0x4c] sm:$0xf]  ;;  %v8118_v3 = vld [vmem:[#allocation23 + $0x50] sm:$0xf0] }
 0x75e   : > { %v2347_v17 = vpack.c.bf16 %v2343_v10, %v2343_v10  ;;  %v2346_v19 = vpack.c.bf16 %v2342_v11, %v2342_v11  ;;  %v8101_v48 = vld [vmem:[#allocation2 + $0xb4] sm:$0xf0]  ;;  %v8108_v10 = vld [vmem:[#allocation23 + $0x4] sm:$0xf]  ;;  %v7097_v11 = vld [vmem:[#allocation23 + $0xc] sm:$0xf0] }
 0x75f   : > { %2371 = vst [vmem:[#allocation2 + $0x28] sm:$0xf] %v2367_v13  ;;  %2786 = vmatpush.bf16.msra.mxu1 %v7168_v14  ;;  %v7188_v52 = vor.u32 %v8101_v48, %v7187_v49  ;;  %v7175_v13 = vld [vmem:[#allocation2 + $0x80] sm:$0xf]  ;;  %v7211_v14 = vld [vmem:[#allocation2 + $0x110] sm:$0xf]  ;;  %v7100_v23 = vor.u32 %v8108_v10, %v7097_v11 }
 0x760   : > { %2351 = vst [vmem:[#allocation2 + $0x18] sm:$0xf] %v2347_v17  ;;  %2815 = vmatpush.bf16.msra.mxu2 %v7200_v20  ;;  %v8103_v22 = vld [vmem:[#allocation2 + $0xd4] sm:$0xf0]  ;;  %v7176_v17 = vor.u32 %v8098_v8, %v7175_v13  ;;  %v7115_v48 = vld [vmem:[#allocation23 + $0x20] sm:$0xf] }
 0x761   : > { %2350 = vst [vmem:[#allocation2 + $0x10] sm:$0xf] %v2346_v19  ;;  %v7196_v29 = vor.u32 %v8103_v22, %v7195_v25  ;;  %v8113_v49 = vld [vmem:[#allocation23 + $0x28] sm:$0xf0] }
 0x762   : > { %v2332_v30 = vpop.permute.xlu0 %2331  ;;  %v7191_v36 = vld [vmem:[#allocation2 + $0xc0] sm:$0xf] }
 0x763   : > { %2787 = vmatpush.bf16.msra.mxu1 %v7164_v27  ;;  %v2486_v33 = vpop.permute.xlu2 %2485  ;;  %v2340_v34 = vmul.f32 %v10071_v58, %v2332_v30  ;;  %v2360_v35 = vpop.permute.xlu1 %2359  ;;  %v7192_v47 = vor.u32 %v8102_v44, %v7191_v36 }
 0x764   : > { %2816 = vmatpush.bf16.msra.mxu2 %v7196_v29  ;;  %v2493_v37 = vmul.f32 %v10068_v43, %v2486_v33  ;;  %v2365_v38 = vmul.f32 %v10063_v18, %v2360_v35  ;;  %v7183_v18 = vld [vmem:[#allocation2 + $0xa0] sm:$0xf]  ;;  %v8109_v29 = vld [vmem:[#allocation23 + $0x8] sm:$0xf0]  ;;  %v8110_v35 = vld [vmem:[#allocation23 + $0x10] sm:$0xf0] }
 0x765   : > { %v2344_v40 = vpack.c.bf16 %v2340_v34, %v2340_v34  ;;  %v7184_v60 = vor.u32 %v8100_v57, %v7183_v18  ;;  %v7103_v34 = vld [vmem:[#allocation23 + $0x8] sm:$0xf]  ;;  %v7119_v18 = vld [vmem:[#allocation23 + $0x30] sm:$0xf]  ;;  %v7127_v57 = vld [vmem:[#allocation23 + $0x38] sm:$0xf] }
 0x766   : > { %v2497_v45 = vpack.c.bf16 %v2493_v37, %v2493_v37  ;;  %v2369_v46 = vpack.c.bf16 %v2365_v38, %v2365_v38  ;;  %v8092_v5 = vld [vmem:[#allocation2 + $0x24] sm:$0xf0]  ;;  %v7104_v39 = vor.u32 %v8110_v35, %v7103_v34 }
 0x767   : > { %2348 = vst [vmem:[#allocation2] sm:$0xf] %v2344_v40  ;;  %2788 = vmatpush.bf16.msra.mxu1 %v7160_v41  ;;  %v7152_v12 = vor.u32 %v8092_v5, %v7151_v9  ;;  %v8091_v20 = vld [vmem:[#allocation2 + $0x14] sm:$0xf0]  ;;  %v8111_v40 = vld [vmem:[#allocation23 + $0x1c] sm:$0xf] }
 0x768   : > { %2501 = vst [vmem:[#allocation2 + $0x108] sm:$0xf] %v2497_v45  ;;  %2817 = vmatpush.bf16.msra.mxu2 %v7192_v47  ;;  %v7147_v19 = vld [vmem:[#allocation2 + $0x10] sm:$0xf]  ;;  %v7109_v41 = vld [vmem:[#allocation23 + $0x24] sm:$0xf0] }
 0x769   : > { %2373 = vst [vmem:[#allocation2 + $0x38] sm:$0xf] %v2369_v46  ;;  %v7148_v22 = vor.u32 %v8091_v20, %v7147_v19  ;;  %v7112_v44 = vor.u32 %v8111_v40, %v7109_v41  ;;  %v7107_v45 = vld [vmem:[#allocation23 + $0x18] sm:$0xf]  ;;  %v8112_v46 = vld [vmem:[#allocation23 + $0x20] sm:$0xf0] }
 0x76a   : > { %v2490_v53 = vpop.permute.xlu0 %2489  ;;  %v7108_v47 = vor.u32 %v8112_v46, %v7107_v45  ;;  %v7139_v5 = vld [vmem:[#allocation23 + $0x50] sm:$0xf] }
 0x76b   : > { %v2495_v42 = vmul.f32 %v10068_v43, %v2490_v53  ;;  %v2334_v54 = vpop.permute.xlu1 %2333  ;;  %v8114_v53 = vld [vmem:[#allocation23 + $0x34] sm:$0xf] }
 0x76c   : > { %2818 = vmatpush.bf16.msra.mxu2 %v7188_v52  ;;  %v2341_v55 = vmul.f32 %v10071_v58, %v2334_v54  ;;  %v7116_v52 = vor.u32 %v8113_v49, %v7115_v48 }
 0x76d   : > { %v2499_v56 = vpack.c.bf16 %v2495_v42, %v2495_v42  ;;  %v7121_v42 = vld [vmem:[#allocation23 + $0x3c] sm:$0xf0] }
 0x76e   : > { %v2345_v59 = vpack.c.bf16 %v2341_v55, %v2341_v55  ;;  %v7143_v30 = vld [vmem:[#allocation2] sm:$0xf]  ;;  %v7124_v54 = vor.u32 %v8114_v53, %v7121_v42 }
 0x76f   : > { %2503 = vst [vmem:[#allocation2 + $0x118] sm:$0xf] %v2499_v56  ;;  %v8106_v37 = vld [vmem:[#allocation2 + $0x104] sm:$0xf0]  ;;  %v8115_v55 = vld [vmem:[#allocation23 + $0x38] sm:$0xf0] }
 0x770   : > { %2349 = vst [vmem:[#allocation2 + $0x8] sm:$0xf] %v2345_v59  ;;  %2819 = vmatpush.bf16.msra.mxu2 %v7184_v60  ;;  %v8093_v1 = vld [vmem:[#allocation2 + $0x34] sm:$0xf0]  ;;  %v7120_v56 = vor.u32 %v8115_v55, %v7119_v18  ;;  %v8116_v59 = vld [vmem:[#allocation23 + $0x40] sm:$0xf0] }
 0x771   : > { %v7156_v2 = vor.u32 %v8093_v1, %v7155_v62  ;;  %v7128_v60 = vor.u32 %v8116_v59, %v7127_v57  ;;  %v7133_v62 = vld [vmem:[#allocation23 + $0x54] sm:$0xf0] }
 0x772   : > { %v7136_v1 = vor.u32 %v8117_v61, %v7133_v62 }
 0x773   : > { %2789 = vmatpush.bf16.msra.mxu1 %v7156_v2  ;;  %v2484_v6 = vpop.permute.xlu1 %2483  ;;  %v7131_v2 = vld [vmem:[#allocation23 + $0x48] sm:$0xf] }
 0x774   : > { %2820 = vmatpush.bf16.msra.mxu2 %v7180_v4  ;;  %v2492_v58 = vmul.f32 %v10068_v43, %v2484_v6  ;;  %v7095_v43 = vld [vmem:[#allocation23] sm:$0xf]  ;;  %v7132_v4 = vor.u32 %v8118_v3, %v7131_v2  ;;  %v8119_v6 = vld [vmem:[#allocation23 + $0x58] sm:$0xf0] }
 0x775   : > { %v7096_v33 = vor.u32 %v8109_v29, %v7095_v43  ;;  %v7140_v8 = vor.u32 %v8119_v6, %v7139_v5 }
 0x776   : > { %v2496_v16 = vpack.c.bf16 %v2492_v58, %v2492_v58  ;;  %v8107_v21 = vld [vmem:[#allocation2 + $0x114] sm:$0xf0]  ;;  %v10086_v58 = vpop.permute.xlu0 %2596 }
 0x777   : > { %2790 = vmatpush.bf16.msra.mxu1 %v7152_v12  ;;  %v7212_v25 = vor.u32 %v8107_v21, %v7211_v14  ;;  %v8090_v27 = vld [vmem:[#allocation2 + $0x4] sm:$0xf0]  ;;  %v10092_v21 = vld [vmem:[#allocation11 + $0x4] ss:$0 sm:$0xff] }
 0x778   : > { %2500 = vst [vmem:[#allocation2 + $0x100] sm:$0xf] %v2496_v16  ;;  %2821 = vmatpush.bf16.msra.mxu2 %v7176_v17  ;;  %v7144_v31 = vor.u32 %v8090_v27, %v7143_v30 }
 0x779   : > { %2849 = vmatpush.bf16.msra.mxu0 %v7212_v25 }
 0x77b   : > { %2822 = vmatmul.bf16.vlgmr.msra.gmra.mxu2 %v7100_v23  ;;  %2791 = vmatpush.bf16.msra.mxu1 %v7148_v22  ;;  %v10088_v9 = vpop.permute.xlu1 %2601 }
 0x77e   : > { %v10090_v10 = vpop.permute.xlu0 %2591 }
 0x77f   : > { %2792 = vmatpush.bf16.msra.mxu1 %v7144_v31  ;;  %v7207_v36 = vld [vmem:[#allocation2 + $0x100] sm:$0xf] }
 0x780   : > { %v7208_v38 = vor.u32 %v8106_v37, %v7207_v36  ;;  %v2587_v36 = vpop.permute.xlu2 %2586 }
 0x782   : > { %2793 = vmatmul.bf16.vlgmr.msra.gmra.mxu1 %v7096_v33  ;;  %2850 = vmatpush.bf16.msra.mxu0 %v7208_v38 }
 0x783   : > { %v2577_v11 = vpop.permute.xlu1 %2576 }
 0x785   : > { %7213 = vmatmul.msk.bf16.vlgmr.msra.gmra.mxu0 %vm2772_vm0, %v7104_v39 }
 0x786   : > { %v2567_v13 = vpop.permute.xlu0 %2566 }
 0x788   : > { %v2582_v53 = vpop.permute.xlu2 %2581 }
 0x78b   : > { %2827 = vmatmul.bf16.gmra.mxu2 %v7112_v44  ;;  %v2572_v22 = vpop.permute.xlu1 %2571 }
 0x792   : > { %2798 = vmatmul.bf16.gmra.mxu1 %v7108_v47 }
 0x795   : > { %7214 = vmatmul.msk.bf16.gmra.mxu0 %vm2772_vm0, %v7116_v52 }
 0x79b   : > { %2832 = vmatmul.bf16.gmra.mxu2 %v7124_v54 }
 0x7a2   : > { %2803 = vmatmul.bf16.gmra.mxu1 %v7120_v56 }
 0x7a5   : > { %7215 = vmatmul.msk.bf16.gmra.mxu0 %vm2772_vm0, %v7128_v60 }
 0x7ab   : > { %2837 = vmatmul.bf16.gmra.mxu2 %v7136_v1 }
 0x7b2   : > { %2808 = vmatmul.bf16.gmra.mxu1 %v7132_v4 }
 0x7b5   : > { %7216 = vmatmul.msk.bf16.gmra.mxu0 %vm2772_vm0, %v7140_v8 }
 0x7fe   : > { %v2823_v12 = vpop.f32.mrf.mxu2 }
 0x7ff   : > { %v2794_v14 = vpop.f32.mrf.mxu1 }
 0x800   : > { %v2795_v16 = vadd.f32 %v2794_v14, %v2567_v13 }
 0x802   : > { %v2824_v17 = vadd.f32 %v2823_v12, %v2795_v16  ;;  %v2852_v19 = vpop.f32.mrf.mxu0 }
 0x804   : > { %v2853_v20 = vadd.f32 %v2852_v19, %v2824_v17 }
 0x806   : > { %vm2872_vm10 = vcmp.ge.f32.partialorder %v2853_v20, 0.0  ;;  %v2880_v23 = vmul.f32 0.2, %v2853_v20  ;;  %v2825_v25 = vpop.f32.mrf.mxu2 }
 0x807   : > { %v2796_v27 = vpop.f32.mrf.mxu1 }
 0x808   : > { %v10094_v43 = vsel %vm2872_vm10, %v2853_v20, %v2880_v23  ;;  %v2797_v29 = vadd.f32 %v2796_v27, %v2572_v22  ;;  %v8636_v27 = vld [vmem:[#allocation9 + $0x4] ss:$0 sm:$0xff] }
 0x809   : > { %v3050_v30 = vmul.f32 %v10092_v21, %v10094_v43  ;;  %2897 = vrot.lane.b32.xlu1 %v10094_v43, %s11166_s3  ;;  %2939 = vrot.lane.b32.xlu2 %v10094_v43, %s9370_s22 }
 0x80a   : > { %v2826_v31 = vadd.f32 %v2825_v25, %v2797_v29  ;;  %v2854_v33 = vpop.f32.mrf.mxu0 }
 0x80b   : > { %v3058_v34 = vpack.c.bf16 %v3050_v30, %v3050_v30 }
 0x80c   : > { %v2855_v35 = vadd.f32 %v2854_v33, %v2826_v31 }
 0x80d   : > { %3066 = vst [vmem:[#allocation2 + $0x100] sm:$0xf] %v3058_v34  ;;  %v3981_v34 = vmul.f32 %v8636_v27, %v10014_v63 }
 0x80e   : > { %vm2873_vm11 = vcmp.ge.f32.partialorder %v2855_v35, 0.0  ;;  %v2881_v37 = vmul.f32 0.2, %v2855_v35  ;;  %v2828_v38 = vpop.f32.mrf.mxu2 }
 0x80f   : > { %v2799_v39 = vpop.f32.mrf.mxu1 }
 0x810   : > { %v10102_v40 = vsel %vm2873_vm11, %v2855_v35, %v2881_v37  ;;  %v2800_v41 = vadd.f32 %v2799_v39, %v2577_v11 }
 0x811   : > { %v3051_v44 = vmul.f32 %v10092_v21, %v10102_v40  ;;  %2941 = vrot.lane.b32.xlu0 %v10102_v40, %s9370_s22  ;;  %2899 = vrot.lane.b32.xlu2 %v10102_v40, %s11166_s3 }
 0x812   : > { %v2829_v45 = vadd.f32 %v2828_v38, %v2800_v41  ;;  %v2857_v46 = vpop.f32.mrf.mxu0 }
 0x813   : > { %v3059_v47 = vpack.c.bf16 %v3051_v44, %v3051_v44 }
 0x814   : > { %v2858_v48 = vadd.f32 %v2857_v46, %v2829_v45 }
 0x815   : > { %3067 = vst [vmem:[#allocation2 + $0x108] sm:$0xf] %v3059_v47 }
 0x816   : > { %vm2874_vm12 = vcmp.ge.f32.partialorder %v2858_v48, 0.0  ;;  %v2882_v49 = vmul.f32 0.2, %v2858_v48  ;;  %v2830_v52 = vpop.f32.mrf.mxu2 }
 0x817   : > { %v2801_v42 = vpop.f32.mrf.mxu1 }
 0x818   : > { %v10110_v54 = vsel %vm2874_vm12, %v2858_v48, %v2882_v49  ;;  %v2802_v18 = vadd.f32 %v2801_v42, %v2582_v53  ;;  %v3982_v48 = vmul.f32 %v8636_v27, %v10016_v0 }
 0x819   : > { %v3052_v55 = vmul.f32 %v10092_v21, %v10110_v54  ;;  %2943 = vrot.lane.b32.xlu0 %v10110_v54, %s9370_s22  ;;  %2901 = vrot.lane.b32.xlu2 %v10110_v54, %s11166_s3 }
 0x81a   : > { %v2831_v56 = vadd.f32 %v2830_v52, %v2802_v18  ;;  %v2859_v57 = vpop.f32.mrf.mxu0 }
 0x81b   : > { %v3060_v59 = vpack.c.bf16 %v3052_v55, %v3052_v55 }
 0x81c   : > { %v2860_v60 = vadd.f32 %v2859_v57, %v2831_v56  ;;  %v3986_v56 = vpack.c.bf16 %v3982_v48, %v3982_v48 }
 0x81d   : > { %3068 = vst [vmem:[#allocation2 + $0x110] sm:$0xf] %v3060_v59 }
 0x81e   : > { %vm2875_vm15 = vcmp.ge.f32.partialorder %v2860_v60, 0.0  ;;  %v2883_v61 = vmul.f32 0.2, %v2860_v60  ;;  %v2833_v62 = vpop.f32.mrf.mxu2 }
 0x81f   : > { %v2804_v1 = vpop.f32.mrf.mxu1 }
 0x820   : > { %v10118_v2 = vsel %vm2875_vm15, %v2860_v60, %v2883_v61  ;;  %v2805_v3 = vadd.f32 %v2804_v1, %v2587_v36  ;;  %v3983_v61 = vmul.f32 %v8636_v27, %v10020_v7 }
 0x821   : > { %v3053_v4 = vmul.f32 %v10092_v21, %v10118_v2  ;;  %2903 = vrot.lane.b32.xlu0 %v10118_v2, %s11166_s3  ;;  %2945 = vrot.lane.b32.xlu1 %v10118_v2, %s9370_s22 }
 0x822   : > { %v2834_v5 = vadd.f32 %v2833_v62, %v2805_v3  ;;  %v2862_v6 = vpop.f32.mrf.mxu0 }
 0x823   : > { %v3061_v8 = vpack.c.bf16 %v3053_v4, %v3053_v4  ;;  %v3987_v4 = vpack.c.bf16 %v3983_v61, %v3983_v61 }
 0x824   : > { %v2863_v11 = vadd.f32 %v2862_v6, %v2834_v5  ;;  %v3984_v5 = vmul.f32 %v8636_v27, %v10022_v15 }
 0x825   : > { %3069 = vst [vmem:[#allocation2 + $0x118] sm:$0xf] %v3061_v8 }
 0x826   : > { %vm2876_vm10 = vcmp.ge.f32.partialorder %v2863_v11, 0.0  ;;  %v2884_v12 = vmul.f32 0.2, %v2863_v11  ;;  %v2835_v13 = vpop.f32.mrf.mxu2 }
 0x827   : > { %v2806_v14 = vpop.f32.mrf.mxu1 }
 0x828   : > { %v10126_v16 = vsel %vm2876_vm10, %v2863_v11, %v2884_v12  ;;  %v2807_v17 = vadd.f32 %v2806_v14, %v10090_v10  ;;  %v10198_v11 = vld [vmem:[#allocation11 + $0x1] ss:$0 sm:$0xff]  ;;  %vm3600_vm10 = vcmask 523264  }
 0x829   : > { %2905 = vrot.lane.b32.xlu0 %v10126_v16, %s11166_s3  ;;  %2947 = vrot.lane.b32.xlu1 %v10126_v16, %s9370_s22  ;;  %v3054_v19 = vmul.f32 %v10092_v21, %v10126_v16 }
 0x82a   : > { %2989 = vrot.lane.b32.xlu2 %v10126_v16, %s11169_s4  ;;  %v2836_v20 = vadd.f32 %v2835_v13, %v2807_v17  ;;  %v2864_v23 = vpop.f32.mrf.mxu0  ;;  %v10207_v17 = vld [vmem:[#allocation11] ss:$0 sm:$0xff] }
 0x82b   : > { %v3062_v25 = vpack.c.bf16 %v3054_v19, %v3054_v19 }
 0x82c   : > { %v2865_v22 = vadd.f32 %v2864_v23, %v2836_v20 }
 0x82d   : > { %3070 = vst [vmem:[#allocation2 + $0x120] sm:$0xf] %v3062_v25 }
 0x82e   : > { %vm2877_vm11 = vcmp.ge.f32.partialorder %v2865_v22, 0.0  ;;  %v2885_v10 = vmul.f32 0.2, %v2865_v22  ;;  %v2838_v29 = vpop.f32.mrf.mxu2 }
 0x82f   : > { %v2809_v30 = vpop.f32.mrf.mxu1 }
 0x830   : > { %v10137_v31 = vsel %vm2877_vm11, %v2865_v22, %v2885_v10  ;;  %v2810_v33 = vadd.f32 %v2809_v30, %v10086_v58  ;;  %v3985_v58 = vpack.c.bf16 %v3981_v34, %v3981_v34  ;;  %v10232_v34 = vld [vmem:[#allocation11 + $0x3] ss:$0 sm:$0xff] }
 0x831   : > { %2991 = vrot.lane.b32.xlu0 %v10137_v31, %s11169_s4  ;;  %2907 = vrot.lane.b32.xlu1 %v10137_v31, %s11166_s3  ;;  %v3055_v35 = vmul.f32 %v10092_v21, %v10137_v31 }
 0x832   : > { %2949 = vrot.lane.b32.xlu2 %v10137_v31, %s9370_s22  ;;  %v2839_v36 = vadd.f32 %v2838_v29, %v2810_v33  ;;  %v2867_v37 = vpop.f32.mrf.mxu0  ;;  %v10230_v33 = vld [vmem:[#allocation11 + $0x2] ss:$0 sm:$0xff] }
 0x833   : > { %v3063_v38 = vpack.c.bf16 %v3055_v35, %v3055_v35 }
 0x834   : > { %v2868_v39 = vadd.f32 %v2867_v37, %v2839_v36  ;;  %v10149_v41 = vld [vmem:[#allocation2 + $0x120] sm:$0xf] }
 0x835   : > { %3071 = vst [vmem:[#allocation2 + $0x128] sm:$0xf] %v3063_v38 }
 0x836   : > { %vm2878_vm12 = vcmp.ge.f32.partialorder %v2868_v39, 0.0  ;;  %v2886_v44 = vmul.f32 0.2, %v2868_v39  ;;  %3989 = vst [vmem:[#allocation2 + $0x120] sm:$0xf] %v3985_v58  ;;  %v2840_v49 = vpop.f32.mrf.mxu2 }
 0x837   : > { %v2811_v45 = vpop.f32.mrf.mxu1 }
 0x838   : > { %v10151_v46 = vsel %vm2878_vm12, %v2868_v39, %v2886_v44  ;;  %v2812_v47 = vadd.f32 %v2811_v45, %v10088_v9 }
 0x839   : > { %2993 = vrot.lane.b32.xlu0 %v10151_v46, %s11169_s4  ;;  %2909 = vrot.lane.b32.xlu1 %v10151_v46, %s11166_s3  ;;  %v3056_v52 = vmul.f32 %v10092_v21, %v10151_v46 }
 0x83a   : > { %2951 = vrot.lane.b32.xlu2 %v10151_v46, %s9370_s22  ;;  %v2841_v53 = vadd.f32 %v2840_v49, %v2812_v47  ;;  %v2869_v42 = vpop.f32.mrf.mxu0 }
 0x83b   : > { %v3064_v18 = vpack.c.bf16 %v3056_v52, %v3056_v52 }
 0x83c   : > { %v2870_v55 = vadd.f32 %v2869_v42, %v2841_v53  ;;  %v10163_v9 = vld [vmem:[#allocation2 + $0x124] sm:$0xf0] }
 0x83d   : > { %3072 = vst [vmem:[#allocation2 + $0x130] sm:$0xf] %v3064_v18  ;;  %v7332_v57 = vor.u32 %v10163_v9, %v10149_v41 }
 0x83e   : > { %vm2879_vm15 = vcmp.ge.f32.partialorder %v2870_v55, 0.0  ;;  %v2887_v59 = vmul.f32 0.2, %v2870_v55  ;;  %3990 = vst [vmem:[#allocation2 + $0x128] sm:$0xf] %v3986_v56 }
 0x840   : > { %v2895_v60 = vsel %vm2879_vm15, %v2870_v55, %v2887_v59 }
 0x841   : > { %2953 = vrot.lane.b32.xlu0 %v2895_v60, %s9370_s22  ;;  %3155 = vrot.lane.b32.xlu1 %v10151_v46, %s9369_s1  ;;  %v3057_v62 = vmul.f32 %v10092_v21, %v2895_v60  ;;  %v3988_v21 = vpack.c.bf16 %v3984_v5, %v3984_v5  ;;  %s11248_s22 = sld [smem:[#allocation54_spill]] }
 0x842   : > { %3087 = vrot.lane.b32.xlu2 %v10151_v46, %s9351_s12 }
 0x843   : > { %v3065_v1 = vpack.c.bf16 %v3057_v62, %v3057_v62 }
 0x844   : > { %v10174_v3 = vld [vmem:[#allocation2 + $0x130] sm:$0xf] }
 0x845   : > { %3073 = vst [vmem:[#allocation2 + $0x138] sm:$0xf] %v3065_v1  ;;  %v10260_v1 = vld [vmem:[#allocation11 + $0x6] ss:$0 sm:$0xff] }
 0x846   : > { %3991 = vst [vmem:[#allocation2 + $0x130] sm:$0xf] %v3987_v4 }
 0x847   : > { %v3311_v49 = vld [vmem:[%s11248_s22 + $0x8] sm:$0xff]  ;;  %v3310_v53 = vld [vmem:[%s11248_s22] sm:$0xff]  ;;  %v3313_v62 = vld [vmem:[%s11248_s22 + $0x18] sm:$0xff] }
 0x849   : > { %2985 = vrot.lane.b32.xlu0 %v10110_v54, %s11169_s4  ;;  %2987 = vrot.lane.b32.xlu1 %v10118_v2, %s11169_s4 }
 0x84a   : > { %3153 = vrot.lane.b32.xlu2 %v10137_v31, %s9369_s1 }
 0x84c   : > { %v10183_v6 = vld [vmem:[#allocation2 + $0x134] sm:$0xf0] }
 0x84d   : > { %v7336_v8 = vor.u32 %v10183_v6, %v10174_v3  ;;  %3992 = vst [vmem:[#allocation2 + $0x138] sm:$0xf] %v3988_v21 }
 0x851   : > { %2981 = vrot.lane.b32.xlu0 %v10094_v43, %s11169_s4  ;;  %3151 = vrot.lane.b32.xlu1 %v10126_v16, %s9369_s1 }
 0x852   : > { %2911 = vrot.lane.b32.xlu2 %v2895_v60, %s11166_s3 }
 0x859   : > { %3085 = vrot.lane.b32.xlu0 %v10137_v31, %s9351_s12  ;;  %2983 = vrot.lane.b32.xlu1 %v10102_v40, %s11169_s4 }
 0x85a   : > { %3083 = vrot.lane.b32.xlu2 %v10126_v16, %s9351_s12 }
 0x861   : > { %3079 = vrot.lane.b32.xlu0 %v10110_v54, %s9351_s12  ;;  %3147 = vrot.lane.b32.xlu1 %v10110_v54, %s9369_s1 }
 0x862   : > { %3149 = vrot.lane.b32.xlu2 %v10118_v2, %s9369_s1 }
 0x863   : > { %v2940_v12 = vpop.permute.xlu2 %2939 }
 0x864   : > { %v2956_v13 = vmul.f32 %v10198_v11, %v2940_v12 }
 0x866   : > { %v2964_v14 = vpack.c.bf16 %v2956_v13, %v2956_v13 }
 0x868   : > { %2972 = vst [vmem:[#allocation2 + $0x40] sm:$0xf] %v2964_v14 }
 0x869   : > { %3089 = vrot.lane.b32.xlu0 %v2895_v60, %s9351_s12  ;;  %2995 = vrot.lane.b32.xlu1 %v2895_v60, %s11169_s4 }
 0x86a   : > { %3157 = vrot.lane.b32.xlu2 %v2895_v60, %s9369_s1 }
 0x86b   : > { %v2900_v19 = vpop.permute.xlu2 %2899 }
 0x86c   : > { %v2915_v20 = vmul.f32 %v10207_v17, %v2900_v19 }
 0x86e   : > { %v2923_v23 = vpack.c.bf16 %v2915_v20, %v2915_v20 }
 0x870   : > { %2931 = vst [vmem:[#allocation2 + $0x8] sm:$0xf] %v2923_v23 }
 0x871   : > { %3145 = vrot.lane.b32.xlu0 %v10102_v40, %s9369_s1  ;;  %3081 = vrot.lane.b32.xlu1 %v10118_v2, %s9351_s12 }
 0x872   : > { %3143 = vrot.lane.b32.xlu2 %v10094_v43, %s9369_s1  ;;  %s11249_s1 = smov 5  }
 0x873   : > { %v2902_v25 = vpop.permute.xlu2 %2901 }
 0x874   : > { %v2916_v22 = vmul.f32 %v10207_v17, %v2902_v25 }
 0x876   : > { %v2924_v27 = vpack.c.bf16 %v2916_v22, %v2916_v22 }
 0x878   : > { %2932 = vst [vmem:[#allocation2 + $0x10] sm:$0xf] %v2924_v27  ;;  %v10270_v27 = vld [vmem:[#allocation11 + $0x7] ss:$0 sm:$0xff] }
 0x879   : > { %3197 = vrot.lane.b32.xlu0 %v10151_v46, %s11161_s30  ;;  %3075 = vrot.lane.b32.xlu1 %v10094_v43, %s9351_s12 }
 0x87a   : > { %3077 = vrot.lane.b32.xlu2 %v10102_v40, %s9351_s12 }
 0x87b   : > { %v2898_v10 = vpop.permute.xlu1 %2897 }
 0x87c   : > { %v2914_v29 = vmul.f32 %v10207_v17, %v2898_v10 }
 0x87e   : > { %v2922_v30 = vpack.c.bf16 %v2914_v29, %v2914_v29 }
 0x880   : > { %2930 = vst [vmem:[#allocation2] sm:$0xf] %v2922_v30 }
 0x881   : > { %3195 = vrot.lane.b32.xlu0 %v10137_v31, %s11161_s30  ;;  %3199 = vrot.lane.b32.xlu1 %v2895_v60, %s11161_s30  ;;  %v3312_v60 = vld [vmem:[%s11248_s22 + $0x10] sm:$0xff] }
 0x882   : > { %3193 = vrot.lane.b32.xlu2 %v10126_v16, %s11161_s30 }
 0x883   : > { %v2942_v35 = vpop.permute.xlu0 %2941 }
 0x884   : > { %v2957_v36 = vmul.f32 %v10198_v11, %v2942_v35  ;;  %v2990_v37 = vpop.permute.xlu2 %2989 }
 0x885   : > { %v3002_v38 = vmul.f32 %v10230_v33, %v2990_v37  ;;  %v3028_v39 = vmul.f32 %v10232_v34, %v2990_v37 }
 0x886   : > { %v2965_v58 = vpack.c.bf16 %v2957_v36, %v2957_v36 }
 0x887   : > { %v3010_v31 = vpack.c.bf16 %v3002_v38, %v3002_v38  ;;  %v3036_v44 = vpack.c.bf16 %v3028_v39, %v3028_v39 }
 0x888   : > { %2973 = vst [vmem:[#allocation2 + $0x48] sm:$0xf] %v2965_v58 }
 0x889   : > { %3018 = vst [vmem:[#allocation2 + $0xa0] sm:$0xf] %v3010_v31  ;;  %3185 = vrot.lane.b32.xlu0 %v10094_v43, %s11161_s30  ;;  %3189 = vrot.lane.b32.xlu1 %v10110_v54, %s11161_s30 }
 0x88a   : > { %3044 = vst [vmem:[#allocation2 + $0xe0] sm:$0xf] %v3036_v44  ;;  %3191 = vrot.lane.b32.xlu2 %v10118_v2, %s11161_s30 }
 0x88b   : > { %v2944_v16 = vpop.permute.xlu0 %2943 }
 0x88c   : > { %v2958_v45 = vmul.f32 %v10198_v11, %v2944_v16  ;;  %v2950_v46 = vpop.permute.xlu2 %2949 }
 0x88d   : > { %v2961_v47 = vmul.f32 %v10198_v11, %v2950_v46 }
 0x88e   : > { %v2966_v48 = vpack.c.bf16 %v2958_v45, %v2958_v45 }
 0x88f   : > { %v2969_v52 = vpack.c.bf16 %v2961_v47, %v2961_v47 }
 0x890   : > { %2974 = vst [vmem:[#allocation2 + $0x50] sm:$0xf] %v2966_v48 }
 0x891   : > { %2977 = vst [vmem:[#allocation2 + $0x68] sm:$0xf] %v2969_v52  ;;  %3321 = vperm.xlu0 %8597, %v3311_v49   ;;  %3187 = vrot.lane.b32.xlu1 %v10102_v40, %s11161_s30  ;;  %v10258_v40 = vld [vmem:[#allocation11 + $0x5] ss:$0 sm:$0xff] }
 0x892   : > { %3316 = vperm.xlu2 %8596, %v3310_v53  }
 0x893   : > { %v2904_v43 = vpop.permute.xlu0 %2903  ;;  %v2946_v54 = vpop.permute.xlu1 %2945 }
 0x894   : > { %v2917_v2 = vmul.f32 %v10207_v17, %v2904_v43  ;;  %v2959_v42 = vmul.f32 %v10198_v11, %v2946_v54  ;;  %v2952_v18 = vpop.permute.xlu2 %2951 }
 0x895   : > { %v2962_v55 = vmul.f32 %v10198_v11, %v2952_v18 }
 0x896   : > { %v2925_v56 = vpack.c.bf16 %v2917_v2, %v2917_v2  ;;  %v2967_v59 = vpack.c.bf16 %v2959_v42, %v2959_v42 }
 0x897   : > { %v2970_v61 = vpack.c.bf16 %v2962_v55, %v2962_v55 }
 0x898   : > { %2933 = vst [vmem:[#allocation2 + $0x18] sm:$0xf] %v2925_v56 }
 0x899   : > { %2975 = vst [vmem:[#allocation2 + $0x58] sm:$0xf] %v2967_v59  ;;  %3867 = vrot.lane.b32.xlu0 %v10020_v7, %s11159_s6  ;;  %3326 = vperm.xlu1 %8595, %v3312_v60  }
 0x89a   : > { %2978 = vst [vmem:[#allocation2 + $0x70] sm:$0xf] %v2970_v61  ;;  %3331 = vperm.xlu2 %8596, %v3313_v62  }
 0x89b   : > { %v2906_v4 = vpop.permute.xlu0 %2905  ;;  %v2948_v5 = vpop.permute.xlu1 %2947 }
 0x89c   : > { %v2918_v21 = vmul.f32 %v10207_v17, %v2906_v4  ;;  %v2960_v12 = vmul.f32 %v10198_v11, %v2948_v5  ;;  %v3088_v13 = vpop.permute.xlu2 %3087 }
 0x89d   : > { %v3098_v14 = vmul.f32 %v10258_v40, %v3088_v13  ;;  %v3124_v19 = vmul.f32 %v10260_v1, %v3088_v13 }
 0x89e   : > { %v2926_v20 = vpack.c.bf16 %v2918_v21, %v2918_v21  ;;  %v2968_v23 = vpack.c.bf16 %v2960_v12, %v2960_v12 }
 0x89f   : > { %v3106_v25 = vpack.c.bf16 %v3098_v14, %v3098_v14  ;;  %v3132_v22 = vpack.c.bf16 %v3124_v19, %v3124_v19 }
 0x8a0   : > { %2934 = vst [vmem:[#allocation2 + $0x20] sm:$0xf] %v2926_v20 }
 0x8a1   : > { %2976 = vst [vmem:[#allocation2 + $0x60] sm:$0xf] %v2968_v23  ;;  %3865 = vrot.lane.b32.xlu0 %v10016_v0, %s11159_s6  ;;  %3869 = vrot.lane.b32.xlu1 %v10022_v15, %s11159_s6 }
 0x8a2   : > { %3114 = vst [vmem:[#allocation2 + $0x170] sm:$0xf] %v3106_v25  ;;  %3863 = vrot.lane.b32.xlu2 %v10014_v63, %s11159_s6  ;;  %s11250_s6 = smov 124  }
 0x8a3   : > { %3140 = vst [vmem:[#allocation2 + $0x1b0] sm:$0xf] %v3132_v22  ;;  %v2992_v10 = vpop.permute.xlu0 %2991  ;;  %v2908_v29 = vpop.permute.xlu1 %2907 }
 0x8a4   : > { %v3003_v30 = vmul.f32 %v10230_v33, %v2992_v10  ;;  %v3029_v35 = vmul.f32 %v10232_v34, %v2992_v10  ;;  %v2919_v36 = vmul.f32 %v10207_v17, %v2908_v29  ;;  %v3154_v37 = vpop.permute.xlu2 %3153 }
 0x8a5   : > { %v3165_v38 = vmul.f32 %v10270_v27, %v3154_v37 }
 0x8a6   : > { %v3011_v39 = vpack.c.bf16 %v3003_v30, %v3003_v30  ;;  %v3037_v58 = vpack.c.bf16 %v3029_v35, %v3029_v35  ;;  %v2927_v31 = vpack.c.bf16 %v2919_v36, %v2919_v36  ;;  %v7287_v30 = vld [vmem:[#allocation2 + $0x70] sm:$0xf] }
 0x8a7   : > { %v3173_v44 = vpack.c.bf16 %v3165_v38, %v3165_v38 }
 0x8a8   : > { %3019 = vst [vmem:[#allocation2 + $0xa8] sm:$0xf] %v3011_v39  ;;  %v7283_v38 = vld [vmem:[#allocation2 + $0x60] sm:$0xf] }
 0x8a9   : > { %3045 = vst [vmem:[#allocation2 + $0xe8] sm:$0xf] %v3037_v58  ;;  %3827 = vrot.lane.b32.xlu0 %v10022_v15, %s11249_s1  ;;  %3821 = vrot.lane.b32.xlu1 %v10014_v63, %s11249_s1 }
 0x8aa   : > { %2935 = vst [vmem:[#allocation2 + $0x28] sm:$0xf] %v2927_v31  ;;  %3825 = vrot.lane.b32.xlu2 %v10020_v7, %s11249_s1  ;;  %v8126_v31 = vld [vmem:[#allocation2 + $0x64] sm:$0xf0] }
 0x8ab   : > { %3181 = vst [vmem:[#allocation2 + $0x1e8] sm:$0xf] %v3173_v44  ;;  %v2994_v16 = vpop.permute.xlu0 %2993  ;;  %v2910_v45 = vpop.permute.xlu1 %2909 }
 0x8ac   : > { %v3004_v46 = vmul.f32 %v10230_v33, %v2994_v16  ;;  %v3030_v47 = vmul.f32 %v10232_v34, %v2994_v16  ;;  %v2920_v48 = vmul.f32 %v10207_v17, %v2910_v45  ;;  %v2912_v49 = vpop.permute.xlu2 %2911 }
 0x8ad   : > { %v2921_v52 = vmul.f32 %v10207_v17, %v2912_v49  ;;  %v8125_v49 = vld [vmem:[#allocation2 + $0x54] sm:$0xf0] }
 0x8ae   : > { %v3012_v53 = vpack.c.bf16 %v3004_v46, %v3004_v46  ;;  %v3038_v43 = vpack.c.bf16 %v3030_v47, %v3030_v47  ;;  %v2928_v54 = vpack.c.bf16 %v2920_v48, %v2920_v48  ;;  %v7284_v47 = vor.u32 %v8126_v31, %v7283_v38 }
 0x8af   : > { %v2929_v2 = vpack.c.bf16 %v2921_v52, %v2921_v52 }
 0x8b0   : > { %3020 = vst [vmem:[#allocation2 + $0xb0] sm:$0xf] %v3012_v53 }
 0x8b1   : > { %3046 = vst [vmem:[#allocation2 + $0xf0] sm:$0xf] %v3038_v43  ;;  %3951 = vrot.lane.b32.xlu0 %v10020_v7, %s11169_s4  ;;  %3953 = vrot.lane.b32.xlu1 %v10022_v15, %s11169_s4 }
 0x8b2   : > { %2936 = vst [vmem:[#allocation2 + $0x30] sm:$0xf] %v2928_v54  ;;  %3823 = vrot.lane.b32.xlu2 %v10016_v0, %s11249_s1 }
 0x8b3   : > { %2937 = vst [vmem:[#allocation2 + $0x38] sm:$0xf] %v2929_v2  ;;  %v2954_v42 = vpop.permute.xlu0 %2953  ;;  %v3156_v18 = vpop.permute.xlu1 %3155  ;;  %v7279_v2 = vld [vmem:[#allocation2 + $0x50] sm:$0xf] }
 0x8b4   : > { %v2963_v17 = vmul.f32 %v10198_v11, %v2954_v42  ;;  %v3166_v55 = vmul.f32 %v10270_v27, %v3156_v18  ;;  %v3084_v56 = vpop.permute.xlu2 %3083  ;;  %v7280_v42 = vor.u32 %v8125_v49, %v7279_v2  ;;  %v8124_v18 = vld [vmem:[#allocation2 + $0x44] sm:$0xf0] }
 0x8b5   : > { %v3096_v59 = vmul.f32 %v10258_v40, %v3084_v56  ;;  %v3122_v60 = vmul.f32 %v10260_v1, %v3084_v56 }
 0x8b6   : > { %v2971_v61 = vpack.c.bf16 %v2963_v17, %v2963_v17  ;;  %v3174_v62 = vpack.c.bf16 %v3166_v55, %v3166_v55  ;;  %v7275_v17 = vld [vmem:[#allocation2 + $0x40] sm:$0xf] }
 0x8b7   : > { %v3104_v4 = vpack.c.bf16 %v3096_v59, %v3096_v59  ;;  %v3130_v5 = vpack.c.bf16 %v3122_v60, %v3122_v60  ;;  %v7276_v59 = vor.u32 %v8124_v18, %v7275_v17  ;;  %v10343_v17 = vld [vmem:[#allocation11 + $0x8] ss:$0 sm:$0xff] }
 0x8b8   : > { %2979 = vst [vmem:[#allocation2 + $0x78] sm:$0xf] %v2971_v61 }
 0x8b9   : > { %3182 = vst [vmem:[#allocation2 + $0x1f0] sm:$0xf] %v3174_v62  ;;  %4103 = vrot.lane.b32.xlu0 %v10020_v7, %s11250_s6  ;;  %3947 = vrot.lane.b32.xlu1 %v10014_v63, %s11169_s4 }
 0x8ba   : > { %3112 = vst [vmem:[#allocation2 + $0x160] sm:$0xf] %v3104_v4  ;;  %3949 = vrot.lane.b32.xlu2 %v10016_v0, %s11169_s4 }
 0x8bb   : > { %3138 = vst [vmem:[#allocation2 + $0x1a0] sm:$0xf] %v3130_v5  ;;  %v2986_v11 = vpop.permute.xlu0 %2985  ;;  %v2988_v21 = vpop.permute.xlu1 %2987 }
 0x8bc   : > { %v3000_v12 = vmul.f32 %v10230_v33, %v2986_v11  ;;  %v3026_v13 = vmul.f32 %v10232_v34, %v2986_v11  ;;  %v3001_v14 = vmul.f32 %v10230_v33, %v2988_v21  ;;  %v3027_v19 = vmul.f32 %v10232_v34, %v2988_v21  ;;  %v3150_v20 = vpop.permute.xlu2 %3149  ;;  %v7271_v21 = vld [vmem:[#allocation2 + $0x30] sm:$0xf] }
 0x8bd   : > { %v3163_v23 = vmul.f32 %v10270_v27, %v3150_v20 }
 0x8be   : > { %v3008_v25 = vpack.c.bf16 %v3000_v12, %v3000_v12  ;;  %v3034_v22 = vpack.c.bf16 %v3026_v13, %v3026_v13  ;;  %v3009_v10 = vpack.c.bf16 %v3001_v14, %v3001_v14  ;;  %v3035_v29 = vpack.c.bf16 %v3027_v19, %v3027_v19  ;;  %v8123_v12 = vld [vmem:[#allocation2 + $0x34] sm:$0xf0] }
 0x8bf   : > { %v8127_v35 = vld [vmem:[#allocation2 + $0x74] sm:$0xf0]  ;;  %v3171_v36 = vpack.c.bf16 %v3163_v23, %v3163_v23 }
 0x8c0   : > { %3016 = vst [vmem:[#allocation2 + $0x90] sm:$0xf] %v3008_v25  ;;  %v7288_v37 = vor.u32 %v8127_v35, %v7287_v30  ;;  %v7272_v25 = vor.u32 %v8123_v12, %v7271_v21  ;;  %v8120_v12 = vld [vmem:[#allocation2 + $0x4] sm:$0xf0] }
 0x8c1   : > { %3042 = vst [vmem:[#allocation2 + $0xd0] sm:$0xf] %v3034_v22  ;;  %4019 = vrot.lane.b32.xlu0 %v10020_v7, %s9351_s12  ;;  %4105 = vrot.lane.b32.xlu1 %v10022_v15, %s11250_s6  ;;  %v8122_v22 = vld [vmem:[#allocation2 + $0x24] sm:$0xf0] }
 0x8c2   : > { %3017 = vst [vmem:[#allocation2 + $0x98] sm:$0xf] %v3009_v10  ;;  %4099 = vrot.lane.b32.xlu2 %v10014_v63, %s11250_s6  ;;  %3607 = vmatpush.bf16.msrb.mxu3 %v7288_v37  ;;  %v7383_v10 = vld [vmem:[#allocation2 + $0x1f0] sm:$0xf]  ;;  %v7267_v37 = vld [vmem:[#allocation2 + $0x20] sm:$0xf] }
 0x8c3   : > { %3043 = vst [vmem:[#allocation2 + $0xd8] sm:$0xf] %v3035_v29  ;;  %v2982_v39 = vpop.permute.xlu0 %2981  ;;  %v3152_v58 = vpop.permute.xlu1 %3151 }
 0x8c4   : > { %3179 = vst [vmem:[#allocation2 + $0x1d8] sm:$0xf] %v3171_v36  ;;  %v2998_v44 = vmul.f32 %v10230_v33, %v2982_v39  ;;  %v3024_v16 = vmul.f32 %v10232_v34, %v2982_v39  ;;  %v3164_v45 = vmul.f32 %v10270_v27, %v3152_v58  ;;  %v3158_v46 = vpop.permute.xlu2 %3157 }
 0x8c5   : > { %v3167_v48 = vmul.f32 %v10270_v27, %v3158_v46 }
 0x8c6   : > { %v3006_v52 = vpack.c.bf16 %v2998_v44, %v2998_v44  ;;  %v3032_v53 = vpack.c.bf16 %v3024_v16, %v3024_v16  ;;  %v3172_v43 = vpack.c.bf16 %v3164_v45, %v3164_v45  ;;  %3608 = vmatpush.bf16.msrb.mxu3 %v7284_v47  ;;  %v7268_v44 = vor.u32 %v8122_v22, %v7267_v37 }
 0x8c7   : > { %v3175_v54 = vpack.c.bf16 %v3167_v48, %v3167_v48 }
 0x8c8   : > { %3014 = vst [vmem:[#allocation2 + $0x80] sm:$0xf] %v3006_v52  ;;  %v8150_v52 = vld [vmem:[#allocation2 + $0x1e4] sm:$0xf0] }
 0x8c9   : > { %3040 = vst [vmem:[#allocation2 + $0xc0] sm:$0xf] %v3032_v53  ;;  %4101 = vrot.lane.b32.xlu0 %v10016_v0, %s11250_s6  ;;  %4021 = vrot.lane.b32.xlu1 %v10022_v15, %s9351_s12  ;;  %v8121_v53 = vld [vmem:[#allocation2 + $0x14] sm:$0xf0] }
 0x8ca   : > { %3180 = vst [vmem:[#allocation2 + $0x1e0] sm:$0xf] %v3172_v43  ;;  %3911 = vrot.lane.b32.xlu2 %v10022_v15, %s11166_s3  ;;  %3609 = vmatpush.bf16.msrb.mxu3 %v7280_v42  ;;  %v7263_v42 = vld [vmem:[#allocation2 + $0x10] sm:$0xf] }
 0x8cb   : > { %3183 = vst [vmem:[#allocation2 + $0x1f8] sm:$0xf] %v3175_v54  ;;  %v3086_v55 = vpop.permute.xlu0 %3085  ;;  %v2984_v56 = vpop.permute.xlu1 %2983  ;;  %v7264_v18 = vor.u32 %v8121_v53, %v7263_v42  ;;  %v7347_v53 = vld [vmem:[#allocation2 + $0x160] sm:$0xf]  ;;  %v7239_v42 = vld [vmem:[#allocation24 + $0x28] sm:$0xf] }
 0x8cc   : > { %v3097_v60 = vmul.f32 %v10258_v40, %v3086_v55  ;;  %v3123_v61 = vmul.f32 %v10260_v1, %v3086_v55  ;;  %v2999_v62 = vmul.f32 %v10230_v33, %v2984_v56  ;;  %v3025_v4 = vmul.f32 %v10232_v34, %v2984_v56  ;;  %v3144_v5 = vpop.permute.xlu2 %3143  ;;  %v7259_v55 = vld [vmem:[#allocation2] sm:$0xf] }
 0x8cd   : > { %v3160_v11 = vmul.f32 %v10270_v27, %v3144_v5 }
 0x8ce   : > { %v3105_v13 = vpack.c.bf16 %v3097_v60, %v3097_v60  ;;  %v3131_v14 = vpack.c.bf16 %v3123_v61, %v3123_v61  ;;  %v3007_v19 = vpack.c.bf16 %v2999_v62, %v2999_v62  ;;  %3610 = vmatpush.bf16.msrb.mxu3 %v7276_v59  ;;  %v3033_v20 = vpack.c.bf16 %v3025_v4, %v3025_v4  ;;  %v7219_v60 = vld [vmem:[#allocation24] sm:$0xf]  ;;  %v8158_v61 = vld [vmem:[#allocation24 + $0x10] sm:$0xf0] }
 0x8cf   : > { %v3168_v23 = vpack.c.bf16 %v3160_v11, %v3160_v11  ;;  %v7291_v9 = vld [vmem:[#allocation2 + $0x80] sm:$0xf] }
 0x8d0   : > { %3113 = vst [vmem:[#allocation2 + $0x168] sm:$0xf] %v3105_v13 }
 0x8d1   : > { %3139 = vst [vmem:[#allocation2 + $0x1a8] sm:$0xf] %v3131_v14  ;;  %4015 = vrot.lane.b32.xlu0 %v10014_v63, %s9351_s12  ;;  %4017 = vrot.lane.b32.xlu1 %v10016_v0, %s9351_s12  ;;  %v7379_v16 = vld [vmem:[#allocation2 + $0x1e0] sm:$0xf]  ;;  %v7260_v14 = vor.u32 %v8120_v12, %v7259_v55 }
 0x8d2   : > { %3015 = vst [vmem:[#allocation2 + $0x88] sm:$0xf] %v3007_v19  ;;  %3907 = vrot.lane.b32.xlu2 %v10016_v0, %s11166_s3  ;;  %3611 = vmatpush.bf16.msrb.mxu3 %v7272_v25  ;;  %v8151_v29 = vld [vmem:[#allocation2 + $0x1f4] sm:$0xf0]  ;;  %v7380_v54 = vor.u32 %v8150_v52, %v7379_v16  ;;  %v7220_v25 = vor.u32 %v8158_v61, %v7219_v60  ;;  %v8134_v61 = vld [vmem:[#allocation2 + $0xe4] sm:$0xf0] }
 0x8d3   : > { %3041 = vst [vmem:[#allocation2 + $0xc8] sm:$0xf] %v3033_v20  ;;  %v7384_v30 = vor.u32 %v8151_v29, %v7383_v10  ;;  %v3080_v35 = vpop.permute.xlu0 %3079  ;;  %v3148_v36 = vpop.permute.xlu1 %3147  ;;  %v8149_v29 = vld [vmem:[#allocation2 + $0x1d4] sm:$0xf0] }
 0x8d4   : > { %3176 = vst [vmem:[#allocation2 + $0x1c0] sm:$0xf] %v3168_v23  ;;  %v3094_v38 = vmul.f32 %v10258_v40, %v3080_v35  ;;  %v3120_v39 = vmul.f32 %v10260_v1, %v3080_v35  ;;  %v3162_v58 = vmul.f32 %v10270_v27, %v3148_v36  ;;  %v3078_v31 = vpop.permute.xlu2 %3077 }
 0x8d5   : > { %3664 = vmatpush.bf16.msrb.mxu2 %v7384_v30  ;;  %v3093_v45 = vmul.f32 %v10258_v40, %v3078_v31  ;;  %v3119_v46 = vmul.f32 %v10260_v1, %v3078_v31 }
 0x8d6   : > { %v3102_v47 = vpack.c.bf16 %v3094_v38, %v3094_v38  ;;  %v3128_v48 = vpack.c.bf16 %v3120_v39, %v3120_v39  ;;  %v3170_v49 = vpack.c.bf16 %v3162_v58, %v3162_v58  ;;  %3612 = vmatpush.bf16.msrb.mxu3 %v7268_v44 }
 0x8d7   : > { %v3101_v43 = vpack.c.bf16 %v3093_v45, %v3093_v45  ;;  %v3127_v2 = vpack.c.bf16 %v3119_v46, %v3119_v46  ;;  %v7351_v46 = vld [vmem:[#allocation2 + $0x170] sm:$0xf]  ;;  %v8142_v52 = vld [vmem:[#allocation2 + $0x164] sm:$0xf0] }
 0x8d8   : > { %3110 = vst [vmem:[#allocation2 + $0x150] sm:$0xf] %v3102_v47 }
 0x8d9   : > { %3136 = vst [vmem:[#allocation2 + $0x190] sm:$0xf] %v3128_v48  ;;  %3665 = vmatpush.bf16.msrb.mxu2 %v7380_v54  ;;  %4063 = vrot.lane.b32.xlu0 %v10022_v15, %s11161_s30 }
 0x8da   : > { %3178 = vst [vmem:[#allocation2 + $0x1d0] sm:$0xf] %v3170_v49  ;;  %3909 = vrot.lane.b32.xlu1 %v10020_v7, %s11166_s3  ;;  %4061 = vrot.lane.b32.xlu2 %v10020_v7, %s11161_s30  ;;  %v7319_v49 = vld [vmem:[#allocation2 + $0xf0] sm:$0xf] }
 0x8db   : > { %3109 = vst [vmem:[#allocation2 + $0x148] sm:$0xf] %v3101_v43  ;;  %3613 = vmatpush.bf16.msrb.mxu3 %v7264_v18  ;;  %v3090_v56 = vpop.permute.xlu0 %3089  ;;  %v2996_v59 = vpop.permute.xlu1 %2995  ;;  %v8163_v18 = vld [vmem:[#allocation24 + $0x38] sm:$0xf0] }
 0x8dc   : > { %3135 = vst [vmem:[#allocation2 + $0x188] sm:$0xf] %v3127_v2  ;;  %v3099_v62 = vmul.f32 %v10258_v40, %v3090_v56  ;;  %v3125_v4 = vmul.f32 %v10260_v1, %v3090_v56  ;;  %v3005_v5 = vmul.f32 %v10230_v33, %v2996_v59  ;;  %v3031_v11 = vmul.f32 %v10232_v34, %v2996_v59  ;;  %v3194_v21 = vpop.permute.xlu2 %3193 }
 0x8dd   : > { %v3206_v13 = vmul.f32 %v10343_v17, %v3194_v21  ;;  %v7315_v21 = vld [vmem:[#allocation2 + $0xe0] sm:$0xf]  ;;  %v7240_v12 = vor.u32 %v8163_v18, %v7239_v42 }
 0x8de   : > { %v3107_v19 = vpack.c.bf16 %v3099_v62, %v3099_v62  ;;  %v3133_v20 = vpack.c.bf16 %v3125_v4, %v3125_v4  ;;  %v3013_v23 = vpack.c.bf16 %v3005_v5, %v3005_v5  ;;  %v3039_v22 = vpack.c.bf16 %v3031_v11, %v3031_v11 }
 0x8df   : > { %3614 = vmatpush.bf16.msrb.mxu3 %v7260_v14  ;;  %v3214_v10 = vpack.c.bf16 %v3206_v13, %v3206_v13  ;;  %v7348_v62 = vor.u32 %v8142_v52, %v7347_v53  ;;  %v7311_v13 = vld [vmem:[#allocation2 + $0xd0] sm:$0xf]  ;;  %v7316_v14 = vor.u32 %v8134_v61, %v7315_v21  ;;  %v10373_v53 = vld [vmem:[#allocation9 + $0x1] ss:$0 sm:$0xff] }
 0x8e0   : > { %3115 = vst [vmem:[#allocation2 + $0x178] sm:$0xf] %v3107_v19  ;;  %v8133_v19 = vld [vmem:[#allocation2 + $0xd4] sm:$0xf0] }
 0x8e1   : > { %3141 = vst [vmem:[#allocation2 + $0x1b8] sm:$0xf] %v3133_v20  ;;  %4057 = vrot.lane.b32.xlu0 %v10014_v63, %s11161_s30  ;;  %v7375_v33 = vld [vmem:[#allocation2 + $0x1d0] sm:$0xf]  ;;  %v7371_v20 = vld [vmem:[#allocation2 + $0x1c0] sm:$0xf] }
 0x8e2   : > { %3021 = vst [vmem:[#allocation2 + $0xb8] sm:$0xf] %v3013_v23  ;;  %3905 = vrot.lane.b32.xlu1 %v10014_v63, %s11166_s3  ;;  %3615 = vmatmul.bf16.vlgmr.msrb.gmra.mxu3 %v7220_v25  ;;  %v7376_v34 = vor.u32 %v8149_v29, %v7375_v33  ;;  %v7312_v33 = vor.u32 %v8133_v19, %v7311_v13  ;;  %v7299_v13 = vld [vmem:[#allocation2 + $0xa0] sm:$0xf]  ;;  %v7229_v19 = vld [vmem:[#allocation24 + $0x1c] sm:$0xf0] }
 0x8e3   : > { %3047 = vst [vmem:[#allocation2 + $0xf8] sm:$0xf] %v3039_v22  ;;  %v3146_v30 = vpop.permute.xlu0 %3145  ;;  %v3082_v35 = vpop.permute.xlu1 %3081 }
 0x8e4   : > { %3222 = vst [vmem:[#allocation2 + $0x220] sm:$0xf] %v3214_v10  ;;  %3666 = vmatpush.bf16.msrb.mxu2 %v7376_v34  ;;  %v3161_v36 = vmul.f32 %v10270_v27, %v3146_v30  ;;  %v3095_v37 = vmul.f32 %v10258_v40, %v3082_v35  ;;  %v3121_v38 = vmul.f32 %v10260_v1, %v3082_v35  ;;  %v3192_v39 = vpop.permute.xlu2 %3191  ;;  %v7367_v30 = vld [vmem:[#allocation2 + $0x1b0] sm:$0xf] }
 0x8e5   : > { %v3205_v58 = vmul.f32 %v10343_v17, %v3192_v39 }
 0x8e6   : > { %v3169_v31 = vpack.c.bf16 %v3161_v36, %v3161_v36  ;;  %v3103_v44 = vpack.c.bf16 %v3095_v37, %v3095_v37  ;;  %v3129_v16 = vpack.c.bf16 %v3121_v38, %v3121_v38  ;;  %v8132_v38 = vld [vmem:[#allocation2 + $0xc4] sm:$0xf0] }
 0x8e7   : > { %v3213_v45 = vpack.c.bf16 %v3205_v58, %v3205_v58  ;;  %v8143_v47 = vld [vmem:[#allocation2 + $0x174] sm:$0xf0]  ;;  %v8146_v58 = vld [vmem:[#allocation2 + $0x1a4] sm:$0xf0] }
 0x8e8   : > { %3177 = vst [vmem:[#allocation2 + $0x1c8] sm:$0xf] %v3169_v31  ;;  %v7352_v48 = vor.u32 %v8143_v47, %v7351_v46  ;;  %v8147_v10 = vld [vmem:[#allocation2 + $0x1b4] sm:$0xf0]  ;;  %v8140_v46 = vld [vmem:[#allocation2 + $0x144] sm:$0xf0] }
 0x8e9   : > { %3111 = vst [vmem:[#allocation2 + $0x158] sm:$0xf] %v3103_v44  ;;  %v7368_v39 = vor.u32 %v8147_v10, %v7367_v30  ;;  %v7363_v47 = vld [vmem:[#allocation2 + $0x1a0] sm:$0xf] }
 0x8ea   : > { %3137 = vst [vmem:[#allocation2 + $0x198] sm:$0xf] %v3129_v16  ;;  %4059 = vrot.lane.b32.xlu1 %v10016_v0, %s11161_s30  ;;  %v8135_v27 = vld [vmem:[#allocation2 + $0xf4] sm:$0xf0]  ;;  %3645 = vmatpush.bf16.msrb.mxu1 %v7352_v48  ;;  %v7307_v16 = vld [vmem:[#allocation2 + $0xc0] sm:$0xf]  ;;  %v7364_v52 = vor.u32 %v8146_v58, %v7363_v47 }
 0x8eb   : > { %3221 = vst [vmem:[#allocation2 + $0x218] sm:$0xf] %v3213_v45  ;;  %v7320_v43 = vor.u32 %v8135_v27, %v7319_v49  ;;  %v3198_v54 = vpop.permute.xlu0 %3197  ;;  %v3076_v2 = vpop.permute.xlu1 %3075  ;;  %v7308_v45 = vor.u32 %v8132_v38, %v7307_v16  ;;  %v8131_v48 = vld [vmem:[#allocation2 + $0xb4] sm:$0xf0]  ;;  %v8128_v58 = vld [vmem:[#allocation2 + $0x84] sm:$0xf0] }
 0x8ec   : > { %v3208_v55 = vmul.f32 %v10343_v17, %v3198_v54  ;;  %v3092_v56 = vmul.f32 %v10258_v40, %v3076_v2  ;;  %v3118_v59 = vmul.f32 %v10260_v1, %v3076_v2  ;;  %v10367_v60 = vpop.permute.xlu2 %3316  ;;  %v7343_v40 = vld [vmem:[#allocation2 + $0x150] sm:$0xf]  ;;  %v8156_v47 = vld [vmem:[#allocation24 + $0x4] sm:$0xf]  ;;  %s11251_s30 = smov 4  }
 0x8ed   : > { %3626 = vmatpush.bf16.msra.mxu3 %v7320_v43  ;;  %v7303_v54 = vld [vmem:[#allocation2 + $0xb0] sm:$0xf] }
 0x8ee   : > { %v3216_v4 = vpack.c.bf16 %v3208_v55, %v3208_v55  ;;  %v3100_v5 = vpack.c.bf16 %v3092_v56, %v3092_v56  ;;  %v3126_v11 = vpack.c.bf16 %v3118_v59, %v3118_v59  ;;  %3646 = vmatpush.bf16.msrb.mxu1 %v7348_v62  ;;  %v7304_v2 = vor.u32 %v8131_v48, %v7303_v54  ;;  %v7359_v55 = vld [vmem:[#allocation2 + $0x190] sm:$0xf]  ;;  %v8130_v62 = vld [vmem:[#allocation2 + $0xa4] sm:$0xf0]  ;;  %v7221_v48 = vld [vmem:[#allocation24 + $0x14] sm:$0xf0] }
 0x8ef   : > { %v8148_v23 = vld [vmem:[#allocation2 + $0x1c4] sm:$0xf0]  ;;  %v8173_v54 = vld [vmem:[#allocation17 + $0x38] sm:$0xff] }
 0x8f0   : > { %3224 = vst [vmem:[#allocation2 + $0x230] sm:$0xf] %v3216_v4  ;;  %v8141_v25 = vld [vmem:[#allocation2 + $0x154] sm:$0xf0]  ;;  %v7372_v1 = vor.u32 %v8148_v23, %v7371_v20  ;;  %v7300_v23 = vor.u32 %v8130_v62, %v7299_v13 }
 0x8f1   : > { %3108 = vst [vmem:[#allocation2 + $0x140] sm:$0xf] %v3100_v5  ;;  %3627 = vmatpush.bf16.msra.mxu3 %v7316_v14  ;;  %v7344_v22 = vor.u32 %v8141_v25, %v7343_v40  ;;  %v8145_v43 = vld [vmem:[#allocation2 + $0x194] sm:$0xf0]  ;;  %v8157_v14 = vld [vmem:[#allocation24 + $0xc] sm:$0xf] }
 0x8f2   : > { %3134 = vst [vmem:[#allocation2 + $0x180] sm:$0xf] %v3126_v11  ;;  %3620 = vmatmul.bf16.gmra.mxu3 %v7240_v12  ;;  %3667 = vmatpush.bf16.msrb.mxu2 %v7372_v1  ;;  %v7360_v4 = vor.u32 %v8145_v43, %v7359_v55  ;;  %v7295_v40 = vld [vmem:[#allocation2 + $0x90] sm:$0xf]  ;;  %v8129_v25 = vld [vmem:[#allocation2 + $0x94] sm:$0xf0]  ;;  %v7232_v30 = vor.u32 %v8157_v14, %v7229_v19 }
 0x8f3   : > { %3647 = vmatpush.bf16.msrb.mxu1 %v7344_v22  ;;  %v3196_v29 = vpop.permute.xlu0 %3195  ;;  %v3200_v34 = vpop.permute.xlu1 %3199  ;;  %v8144_v1 = vld [vmem:[#allocation2 + $0x184] sm:$0xf0]  ;;  %v7296_v38 = vor.u32 %v8129_v25, %v7295_v40  ;;  %v8159_v43 = vld [vmem:[#allocation24 + $0x18] sm:$0xf0]  ;;  %v8162_v19 = vld [vmem:[#allocation24 + $0x34] sm:$0xf] }
 0x8f4   : > { %v3207_v35 = vmul.f32 %v10343_v17, %v3196_v29  ;;  %v3209_v36 = vmul.f32 %v10343_v17, %v3200_v34  ;;  %v10371_v37 = vpop.permute.xlu2 %3331  ;;  %v10381_v34 = vld [vmem:[#allocation9] ss:$0 sm:$0xff]  ;;  %v8160_v14 = vld [vmem:[#allocation24 + $0x20] sm:$0xf0] }
 0x8f5   : > { %3628 = vmatpush.bf16.msra.mxu3 %v7312_v33 }
 0x8f6   : > { %v3215_v31 = vpack.c.bf16 %v3207_v35, %v3207_v35  ;;  %v3217_v44 = vpack.c.bf16 %v3209_v36, %v3209_v36  ;;  %3668 = vmatpush.bf16.msrb.mxu2 %v7368_v39  ;;  %v8137_v35 = vld [vmem:[#allocation2 + $0x114] sm:$0xf0] }
 0x8f7   : > { %v7399_v10 = vld [vmem:[#allocation2 + $0x230] sm:$0xf] }
 0x8f8   : > { %3223 = vst [vmem:[#allocation2 + $0x228] sm:$0xf] %v3215_v31  ;;  %v7339_v49 = vld [vmem:[#allocation2 + $0x140] sm:$0xf]  ;;  %v7327_v31 = vld [vmem:[#allocation2 + $0x110] sm:$0xf] }
 0x8f9   : > { %3225 = vst [vmem:[#allocation2 + $0x238] sm:$0xf] %v3217_v44  ;;  %3629 = vmatpush.bf16.msra.mxu3 %v7308_v45  ;;  %v7340_v27 = vor.u32 %v8140_v46, %v7339_v49  ;;  %v7355_v11 = vld [vmem:[#allocation2 + $0x180] sm:$0xf]  ;;  %v7328_v45 = vor.u32 %v8137_v35, %v7327_v31  ;;  %v8136_v49 = vld [vmem:[#allocation2 + $0x104] sm:$0xf0] }
 0x8fa   : > { %3669 = vmatpush.bf16.msrb.mxu2 %v7364_v52  ;;  %v7356_v22 = vor.u32 %v8144_v1, %v7355_v11  ;;  %v7395_v44 = vld [vmem:[#allocation2 + $0x220] sm:$0xf]  ;;  %v7241_v31 = vld [vmem:[#allocation24 + $0x3c] sm:$0xf0] }
 0x8fb   : > { %3648 = vmatpush.bf16.msrb.mxu1 %v7340_v27  ;;  %v3186_v42 = vpop.permute.xlu0 %3185  ;;  %v3190_v18 = vpop.permute.xlu1 %3189  ;;  %v7292_v27 = vor.u32 %v8128_v58, %v7291_v9  ;;  %v8171_v1 = vld [vmem:[#allocation17 + $0x28] sm:$0xff]  ;;  %v8161_v58 = vld [vmem:[#allocation24 + $0x2c] sm:$0xf]  ;;  %v10400_v9 = vld [vmem:[#allocation9 + $0x7] ss:$0 sm:$0xff] }
 0x8fc   : > { %v3202_v56 = vmul.f32 %v10343_v17, %v3186_v42  ;;  %v3204_v59 = vmul.f32 %v10343_v17, %v3190_v18  ;;  %v3864_v61 = vpop.permute.xlu2 %3863  ;;  %v8153_v18 = vld [vmem:[#allocation2 + $0x214] sm:$0xf0] }
 0x8fd   : > { %3630 = vmatpush.bf16.msra.mxu3 %v7304_v2  ;;  %v3871_v5 = vmul.f32 %v10373_v53, %v3864_v61  ;;  %v7224_v2 = vor.u32 %v8156_v47, %v7221_v48  ;;  %v8172_v61 = vld [vmem:[#allocation17 + $0x30] sm:$0xff]  ;;  %v8169_v48 = vld [vmem:[#allocation17 + $0x18] sm:$0xff] }
 0x8fe   : > { %v3210_v21 = vpack.c.bf16 %v3202_v56, %v3202_v56  ;;  %v3212_v12 = vpack.c.bf16 %v3204_v59, %v3204_v59  ;;  %3670 = vmatpush.bf16.msrb.mxu2 %v7360_v4  ;;  %v8164_v47 = vld [vmem:[#allocation24 + $0x40] sm:$0xf0] }
 0x8ff   : > { %v3875_v20 = vpack.c.bf16 %v3871_v5, %v3871_v5  ;;  %3649 = vmatpush.bf16.msrb.mxu1 %v7336_v8  ;;  %v8154_v36 = vld [vmem:[#allocation2 + $0x224] sm:$0xf0] }
 0x900   : > { %3218 = vst [vmem:[#allocation2 + $0x200] sm:$0xf] %v3210_v21  ;;  %v8155_v33 = vld [vmem:[#allocation2 + $0x234] sm:$0xf0]  ;;  %v7396_v46 = vor.u32 %v8154_v36, %v7395_v44 }
 0x901   : > { %3220 = vst [vmem:[#allocation2 + $0x210] sm:$0xf] %v3212_v12  ;;  %3631 = vmatpush.bf16.msra.mxu3 %v7300_v23  ;;  %v7400_v29 = vor.u32 %v8155_v33, %v7399_v10  ;;  %v7235_v12 = vld [vmem:[#allocation24 + $0x10] sm:$0xf]  ;;  %v10394_v10 = vld [vmem:[#allocation9 + $0x3] ss:$0 sm:$0xff] }
 0x902   : > { %3879 = vst [vmem:[#allocation2 + $0x60] sm:$0xf] %v3875_v20  ;;  %3671 = vmatpush.bf16.msrb.mxu2 %v7356_v22  ;;  %v7249_v20 = vld [vmem:[#allocation24 + $0x44] sm:$0xf0]  ;;  %v7236_v33 = vor.u32 %v8160_v14, %v7235_v12  ;;  %v8166_v14 = vld [vmem:[#allocation17] sm:$0xff] }
 0x903   : > { %3650 = vmatpush.bf16.msrb.mxu1 %v7332_v57  ;;  %3687 = vmatpush.bf16.msrb.mxu0 %v7400_v29  ;;  %v10386_v3 = vpop.permute.xlu0 %3321  ;;  %v3188_v6 = vpop.permute.xlu1 %3187  ;;  %v7323_v57 = vld [vmem:[#allocation2 + $0x100] sm:$0xf]  ;;  %v7252_v29 = vor.u32 %v8162_v19, %v7249_v20 }
 0x904   : > { %v3203_v8 = vmul.f32 %v10343_v17, %v3188_v6  ;;  %v3826_v39 = vpop.permute.xlu2 %3825  ;;  %v7227_v17 = vld [vmem:[#allocation24 + $0x8] sm:$0xf]  ;;  %v7324_v55 = vor.u32 %v8136_v49, %v7323_v57 }
 0x905   : > { %3632 = vmatpush.bf16.msra.mxu3 %v7296_v38  ;;  %v3831_v16 = vmul.f32 %v10381_v34, %v3826_v39  ;;  %3672 = vmatmul.bf16.vlgmr.msrb.gmra.mxu2 %v7232_v30  ;;  %v7228_v59 = vor.u32 %v8159_v43, %v7227_v17  ;;  %v8170_v30 = vld [vmem:[#allocation17 + $0x20] sm:$0xff]  ;;  %v8168_v49 = vld [vmem:[#allocation17 + $0x10] sm:$0xff] }
 0x906   : > { %v3211_v41 = vpack.c.bf16 %v3203_v8, %v3203_v8 }
 0x907   : > { %v3835_v52 = vpack.c.bf16 %v3831_v16, %v3831_v16  ;;  %3651 = vmatpush.bf16.msrb.mxu1 %v7328_v45  ;;  %3688 = vmatpush.bf16.msrb.mxu0 %v7396_v46  ;;  %v7387_v40 = vld [vmem:[#allocation2 + $0x200] sm:$0xf]  ;;  %v7247_v46 = vld [vmem:[#allocation24 + $0x30] sm:$0xf] }
 0x908   : > { %3219 = vst [vmem:[#allocation2 + $0x208] sm:$0xf] %v3211_v41  ;;  %v7391_v42 = vld [vmem:[#allocation2 + $0x210] sm:$0xf]  ;;  %v7244_v41 = vor.u32 %v8161_v58, %v7241_v31  ;;  %v7248_v57 = vor.u32 %v8164_v47, %v7247_v46  ;;  %v10414_v47 = vld [vmem:[#allocation9 + $0x5] ss:$0 sm:$0xff] }
 0x909   : > { %3839 = vst [vmem:[#allocation2 + $0x30] sm:$0xf] %v3835_v52  ;;  %3633 = vmatpush.bf16.msra.mxu3 %v7292_v27  ;;  %v7392_v56 = vor.u32 %v8153_v18, %v7391_v42 }
 0x90b   : > { %3652 = vmatpush.bf16.msrb.mxu1 %v7324_v55  ;;  %3689 = vmatpush.bf16.msrb.mxu0 %v7392_v56  ;;  %v3868_v62 = vpop.permute.xlu0 %3867  ;;  %v10390_v4 = vpop.permute.xlu1 %3326  ;;  %v7255_v55 = vld [vmem:[#allocation24 + $0x38] sm:$0xf]  ;;  %v8165_v56 = vld [vmem:[#allocation24 + $0x48] sm:$0xf0] }
 0x90c   : > { %3634 = vmatmul.bf16.vlgmr.msra.gmra.mxu3 %v7224_v2  ;;  %v3873_v5 = vmul.f32 %v10373_v53, %v3868_v62  ;;  %v3824_v11 = vpop.permute.xlu2 %3823  ;;  %v7256_v12 = vor.u32 %v8165_v56, %v7255_v55 }
 0x90d   : > { %3780 = vmatpush.bf16.msrb.mxu3 %v8173_v54  ;;  %v3830_v21 = vmul.f32 %v10381_v34, %v3824_v11 }
 0x90e   : > { %v3877_v13 = vpack.c.bf16 %v3873_v5, %v3873_v5  ;;  %3653 = vmatmul.bf16.vlgmr.msrb.gmra.mxu1 %v7228_v59 }
 0x90f   : > { %v3834_v23 = vpack.c.bf16 %v3830_v21, %v3830_v21  ;;  %v8152_v25 = vld [vmem:[#allocation2 + $0x204] sm:$0xf0]  ;;  %v10405_v21 = vld [vmem:[#allocation9 + $0x2] ss:$0 sm:$0xff] }
 0x910   : > { %3881 = vst [vmem:[#allocation2 + $0x70] sm:$0xf] %v3877_v13  ;;  %v7388_v22 = vor.u32 %v8152_v25, %v7387_v40 }
 0x911   : > { %3781 = vmatpush.bf16.msrb.mxu3 %v8172_v61  ;;  %3838 = vst [vmem:[#allocation2 + $0x28] sm:$0xf] %v3834_v23  ;;  %v8167_v61 = vld [vmem:[#allocation17 + $0x8] sm:$0xff] }
 0x912   : > { %3690 = vmatpush.bf16.msrb.mxu0 %v7388_v22 }
 0x913   : > { %v3866_v35 = vpop.permute.xlu0 %3865  ;;  %v3870_v36 = vpop.permute.xlu1 %3869 }
 0x914   : > { %v3872_v38 = vmul.f32 %v10373_v53, %v3866_v35  ;;  %v3874_v6 = vmul.f32 %v10373_v53, %v3870_v36  ;;  %v3950_v8 = vpop.permute.xlu2 %3949 }
 0x915   : > { %3782 = vmatpush.bf16.msrb.mxu3 %v8171_v1  ;;  %v3956_v39 = vmul.f32 %v10394_v10, %v3950_v8  ;;  %7401 = vmatmul.msk.bf16.vlgmr.msrb.gmra.mxu0 %vm3600_vm10, %v7236_v33  ;;  %v7501_v1 = vld [vmem:[#allocation2 + $0x60] sm:$0xf] }
 0x916   : > { %3677 = vmatmul.bf16.gmra.mxu2 %v7252_v29  ;;  %v3876_v44 = vpack.c.bf16 %v3872_v38, %v3872_v38  ;;  %v3878_v16 = vpack.c.bf16 %v3874_v6, %v3874_v6 }
 0x917   : > { %v3960_v45 = vpack.c.bf16 %v3956_v39, %v3956_v39  ;;  %v7505_v62 = vld [vmem:[#allocation2 + $0x70] sm:$0xf] }
 0x918   : > { %3880 = vst [vmem:[#allocation2 + $0x68] sm:$0xf] %v3876_v44 }
 0x919   : > { %3783 = vmatpush.bf16.msrb.mxu3 %v8170_v30  ;;  %3882 = vst [vmem:[#allocation2 + $0x78] sm:$0xf] %v3878_v16 }
 0x91a   : > { %3964 = vst [vmem:[#allocation2 + $0xe8] sm:$0xf] %v3960_v45 }
 0x91b   : > { %v3828_v52 = vpop.permute.xlu0 %3827  ;;  %v3822_v27 = vpop.permute.xlu1 %3821 }
 0x91c   : > { %3639 = vmatmul.bf16.gmra.mxu3 %v7244_v41  ;;  %v3832_v17 = vmul.f32 %v10381_v34, %v3828_v52  ;;  %v3829_v43 = vmul.f32 %v10381_v34, %v3822_v27  ;;  %v4100_v54 = vpop.permute.xlu2 %4099  ;;  %v10416_v41 = vld [vmem:[#allocation9 + $0x6] ss:$0 sm:$0xff] }
 0x91d   : > { %3784 = vmatpush.bf16.msrb.mxu3 %v8169_v48  ;;  %v4107_v2 = vmul.f32 %v10400_v9, %v4100_v54 }
 0x91e   : > { %v3836_v42 = vpack.c.bf16 %v3832_v17, %v3832_v17  ;;  %v3833_v18 = vpack.c.bf16 %v3829_v43, %v3829_v43  ;;  %3658 = vmatmul.bf16.gmra.mxu1 %v7248_v57 }
 0x91f   : > { %v4111_v59 = vpack.c.bf16 %v4107_v2, %v4107_v2  ;;  %v8180_v13 = vld [vmem:[#allocation2 + $0x64] sm:$0xf0] }
 0x920   : > { %3840 = vst [vmem:[#allocation2 + $0x38] sm:$0xf] %v3836_v42  ;;  %v8181_v5 = vld [vmem:[#allocation2 + $0x74] sm:$0xf0]  ;;  %v7502_v33 = vor.u32 %v8180_v13, %v7501_v1 }
 0x921   : > { %3785 = vmatpush.bf16.msrb.mxu3 %v8168_v49  ;;  %3837 = vst [vmem:[#allocation2 + $0x20] sm:$0xf] %v3833_v18  ;;  %v7506_v11 = vor.u32 %v8181_v5, %v7505_v62  ;;  %v8188_v55 = vld [vmem:[#allocation2 + $0xe4] sm:$0xf0] }
 0x922   : > { %4115 = vst [vmem:[#allocation2 + $0x1e0] sm:$0xf] %v4111_v59 }
 0x923   : > { %4541 = vmatpush.bf16.msra.mxu1 %v7506_v11  ;;  %v3952_v19 = vpop.permute.xlu0 %3951  ;;  %v3954_v20 = vpop.permute.xlu1 %3953 }
 0x924   : > { %v3957_v23 = vmul.f32 %v10394_v10, %v3952_v19  ;;  %v3958_v40 = vmul.f32 %v10394_v10, %v3954_v20  ;;  %v3912_v25 = vpop.permute.xlu2 %3911 }
 0x925   : > { %3786 = vmatpush.bf16.msrb.mxu3 %v8167_v61  ;;  %v3916_v22 = vmul.f32 %v10405_v21, %v3912_v25  ;;  %7402 = vmatmul.msk.bf16.gmra.mxu0 %vm3600_vm10, %v7256_v12 }
 0x926   : > { %v3961_v29 = vpack.c.bf16 %v3957_v23, %v3957_v23  ;;  %v3962_v30 = vpack.c.bf16 %v3958_v40, %v3958_v40 }
 0x927   : > { %v3920_v35 = vpack.c.bf16 %v3916_v22, %v3916_v22  ;;  %4542 = vmatpush.bf16.msra.mxu1 %v7502_v33 }
 0x928   : > { %3965 = vst [vmem:[#allocation2 + $0xf0] sm:$0xf] %v3961_v29 }
 0x929   : > { %3787 = vmatpush.bf16.msrb.mxu3 %v8166_v14  ;;  %3966 = vst [vmem:[#allocation2 + $0xf8] sm:$0xf] %v3962_v30  ;;  %v7597_v33 = vld [vmem:[#allocation2 + $0x1e0] sm:$0xf] }
 0x92a   : > { %3924 = vst [vmem:[#allocation2 + $0xb8] sm:$0xf] %v3920_v35 }
 0x92b   : > { %v4104_v36 = vpop.permute.xlu0 %4103  ;;  %v3948_v38 = vpop.permute.xlu1 %3947 }
 0x92c   : > { %v4109_v6 = vmul.f32 %v10400_v9, %v4104_v36  ;;  %v3955_v8 = vmul.f32 %v10394_v10, %v3948_v38  ;;  %v3908_v39 = vpop.permute.xlu2 %3907 }
 0x92d   : > { %v3914_v58 = vmul.f32 %v10405_v21, %v3908_v39 }
 0x92e   : > { %v4113_v31 = vpack.c.bf16 %v4109_v6, %v4109_v6  ;;  %v3959_v44 = vpack.c.bf16 %v3955_v8, %v3955_v8 }
 0x92f   : > { %v3918_v16 = vpack.c.bf16 %v3914_v58, %v3914_v58  ;;  %v7537_v45 = vld [vmem:[#allocation2 + $0xf0] sm:$0xf] }
 0x930   : > { %4117 = vst [vmem:[#allocation2 + $0x1f0] sm:$0xf] %v4113_v31  ;;  %v8189_v46 = vld [vmem:[#allocation2 + $0xf4] sm:$0xf0] }
 0x931   : > { %3963 = vst [vmem:[#allocation2 + $0xe0] sm:$0xf] %v3959_v44  ;;  %v7538_v48 = vor.u32 %v8189_v46, %v7537_v45 }
 0x932   : > { %3922 = vst [vmem:[#allocation2 + $0xa8] sm:$0xf] %v3918_v16 }
 0x933   : > { %4560 = vmatpush.bf16.msra.mxu2 %v7538_v48  ;;  %v4020_v57 = vpop.permute.xlu0 %4019  ;;  %v4106_v49 = vpop.permute.xlu1 %4105 }
 0x934   : > { %v4025_v52 = vmul.f32 %v10414_v47, %v4020_v57  ;;  %v4110_v27 = vmul.f32 %v10400_v9, %v4106_v49  ;;  %v4062_v17 = vpop.permute.xlu2 %4061 }
 0x935   : > { %v4067_v43 = vmul.f32 %v10416_v41, %v4062_v17 }
 0x936   : > { %v4029_v54 = vpack.c.bf16 %v4025_v52, %v4025_v52  ;;  %v4114_v2 = vpack.c.bf16 %v4110_v27, %v4110_v27 }
 0x937   : > { %v4071_v42 = vpack.c.bf16 %v4067_v43, %v4067_v43  ;;  %v7601_v13 = vld [vmem:[#allocation2 + $0x1f0] sm:$0xf] }
 0x938   : > { %4033 = vst [vmem:[#allocation2 + $0x170] sm:$0xf] %v4029_v54  ;;  %v7533_v18 = vld [vmem:[#allocation2 + $0xe0] sm:$0xf] }
 0x939   : > { %4118 = vst [vmem:[#allocation2 + $0x1f8] sm:$0xf] %v4114_v2  ;;  %v7534_v56 = vor.u32 %v8188_v55, %v7533_v18 }
 0x93a   : > { %4075 = vst [vmem:[#allocation2 + $0x1b0] sm:$0xf] %v4071_v42 }
 0x93b   : > { %4561 = vmatpush.bf16.msra.mxu2 %v7534_v56  ;;  %v4102_v59 = vpop.permute.xlu0 %4101  ;;  %v4022_v61 = vpop.permute.xlu1 %4021 }
 0x93c   : > { %v4108_v62 = vmul.f32 %v10400_v9, %v4102_v59  ;;  %v4026_v5 = vmul.f32 %v10414_v47, %v4022_v61 }
 0x93e   : > { %v4112_v11 = vpack.c.bf16 %v4108_v62, %v4108_v62  ;;  %v4030_v12 = vpack.c.bf16 %v4026_v5, %v4026_v5 }
 0x93f   : > { %v7569_v30 = vld [vmem:[#allocation2 + $0x170] sm:$0xf] }
 0x940   : > { %4116 = vst [vmem:[#allocation2 + $0x1e8] sm:$0xf] %v4112_v11  ;;  %v8205_v14 = vld [vmem:[#allocation2 + $0x1f4] sm:$0xf0] }
 0x941   : > { %4034 = vst [vmem:[#allocation2 + $0x178] sm:$0xf] %v4030_v12  ;;  %v7602_v19 = vor.u32 %v8205_v14, %v7601_v13 }
 0x943   : > { %4598 = vmatpush.bf16.msra.mxu3 %v7602_v19  ;;  %v4016_v20 = vpop.permute.xlu0 %4015  ;;  %v4018_v23 = vpop.permute.xlu1 %4017 }
 0x944   : > { %v4023_v40 = vmul.f32 %v10414_v47, %v4016_v20  ;;  %v4024_v25 = vmul.f32 %v10414_v47, %v4018_v23 }
 0x946   : > { %v4027_v1 = vpack.c.bf16 %v4023_v40, %v4023_v40  ;;  %v4028_v22 = vpack.c.bf16 %v4024_v25, %v4024_v25 }
 0x947   : > { %v8204_v29 = vld [vmem:[#allocation2 + $0x1e4] sm:$0xf0] }
 0x948   : > { %4031 = vst [vmem:[#allocation2 + $0x160] sm:$0xf] %v4027_v1  ;;  %v8197_v35 = vld [vmem:[#allocation2 + $0x174] sm:$0xf0]  ;;  %v7598_v36 = vor.u32 %v8204_v29, %v7597_v33 }
 0x949   : > { %4032 = vst [vmem:[#allocation2 + $0x168] sm:$0xf] %v4028_v22  ;;  %v7570_v38 = vor.u32 %v8197_v35, %v7569_v30 }
 0x94a   : > { %4599 = vmatpush.bf16.msra.mxu3 %v7598_v36 }
 0x94b   : > { %4579 = vmatpush.bf16.msra.mxu0 %v7570_v38  ;;  %v4064_v6 = vpop.permute.xlu0 %4063 }
 0x94c   : > { %v4068_v8 = vmul.f32 %v10416_v41, %v4064_v6  ;;  %v3910_v39 = vpop.permute.xlu1 %3909 }
 0x94d   : > { %v3915_v58 = vmul.f32 %v10405_v21, %v3910_v39 }
 0x94e   : > { %v4072_v31 = vpack.c.bf16 %v4068_v8, %v4068_v8 }
 0x94f   : > { %v3919_v44 = vpack.c.bf16 %v3915_v58, %v3915_v58  ;;  %v7565_v16 = vld [vmem:[#allocation2 + $0x160] sm:$0xf] }
 0x950   : > { %4076 = vst [vmem:[#allocation2 + $0x1b8] sm:$0xf] %v4072_v31  ;;  %v8196_v45 = vld [vmem:[#allocation2 + $0x164] sm:$0xf0] }
 0x951   : > { %3923 = vst [vmem:[#allocation2 + $0xb0] sm:$0xf] %v3919_v44  ;;  %v7566_v46 = vor.u32 %v8196_v45, %v7565_v16 }
 0x953   : > { %4580 = vmatpush.bf16.msra.mxu0 %v7566_v46  ;;  %v4058_v48 = vpop.permute.xlu0 %4057 }
 0x954   : > { %v4065_v57 = vmul.f32 %v10416_v41, %v4058_v48  ;;  %v3906_v49 = vpop.permute.xlu1 %3905 }
 0x955   : > { %v3913_v52 = vmul.f32 %v10405_v21, %v3906_v49 }
 0x956   : > { %v4069_v27 = vpack.c.bf16 %v4065_v57, %v4065_v57 }
 0x957   : > { %v3917_v17 = vpack.c.bf16 %v3913_v52, %v3913_v52 }
 0x958   : > { %4073 = vst [vmem:[#allocation2 + $0x1a0] sm:$0xf] %v4069_v27 }
 0x959   : > { %3921 = vst [vmem:[#allocation2 + $0xa0] sm:$0xf] %v3917_v17 }
 0x95c   : > { %v4060_v43 = vpop.permute.xlu1 %4059 }
 0x95d   : > { %v4066_v54 = vmul.f32 %v10416_v41, %v4060_v43 }
 0x95f   : > { %v4070_v2 = vpack.c.bf16 %v4066_v54, %v4066_v54 }
 0x961   : > { %4074 = vst [vmem:[#allocation2 + $0x1a8] sm:$0xf] %v4070_v2 }
 0x965   : > { %v3616_v42 = vpop.f32.mrf.mxu3 }
 0x966   : > { %v3617_v62 = vadd.f32 %v3616_v42, %v10367_v60 }
 0x96d   : > { %v3618_v18 = vpop.f32.mrf.mxu3 }
 0x96e   : > { %v3619_v19 = vadd.f32 %v3618_v18, %v10386_v3 }
 0x975   : > { %v3621_v55 = vpop.f32.mrf.mxu3 }
 0x976   : > { %v3622_v35 = vadd.f32 %v3621_v55, %v10390_v4 }
 0x97d   : > { %v3623_v56 = vpop.f32.mrf.mxu3 }
 0x97e   : > { %v3624_v45 = vadd.f32 %v3623_v56, %v10371_v37  ;;  %v8678_v37 = vld [vmem:[#allocation9 + $0x4] ss:$0 sm:$0xff] }
 0x988   : > { %v3673_v61 = vpop.f32.mrf.mxu2 }
 0x98b   : > { %v3654_v59 = vpop.f32.mrf.mxu1 }
 0x98f   : > { %v3635_v5 = vpop.f32.mrf.mxu3 }
 0x990   : > { %v3636_v11 = vadd.f32 %v3635_v5, %v3617_v62  ;;  %v3675_v40 = vpop.f32.mrf.mxu2 }
 0x992   : > { %v3655_v12 = vadd.f32 %v3654_v59, %v3636_v11  ;;  %v3692_v13 = vpop.f32.mrf.mxu0 }
 0x993   : > { %v3656_v14 = vpop.f32.mrf.mxu1 }
 0x994   : > { %v3674_v20 = vadd.f32 %v3673_v61, %v3655_v12 }
 0x996   : > { %v3693_v1 = vadd.f32 %v3692_v13, %v3674_v20 }
 0x997   : > { %v3637_v23 = vpop.f32.mrf.mxu3 }
 0x998   : > { %v3638_v25 = vadd.f32 %v3637_v23, %v3619_v19  ;;  %v3706_v36 = vmul.f32 0.2, %v3693_v1  ;;  %vm3702_vm11 = vcmp.ge.f32.partialorder %v3693_v1, 0.0 }
 0x999   : > { %v3678_v6 = vpop.f32.mrf.mxu2 }
 0x99a   : > { %v3657_v22 = vadd.f32 %v3656_v14, %v3638_v25  ;;  %v3694_v33 = vpop.f32.mrf.mxu0  ;;  %v3710_v3 = vsel %vm3702_vm11, %v3693_v1, %v3706_v36  ;;  %v4246_v1 = vld [vmem:[%s11253_s5 + $0x8] sm:$0xff] }
 0x99b   : > { %v3659_v30 = vpop.f32.mrf.mxu1 }
 0x99c   : > { %v3676_v29 = vadd.f32 %v3675_v40, %v3657_v22  ;;  %v4245_v22 = vld [vmem:[%s11253_s5] sm:$0xff] }
 0x99e   : > { %v3695_v60 = vadd.f32 %v3694_v33, %v3676_v29 }
 0x99f   : > { %v3640_v38 = vpop.f32.mrf.mxu3 }
 0x9a0   : > { %vm3703_vm12 = vcmp.ge.f32.partialorder %v3695_v60, 0.0  ;;  %v3707_v8 = vmul.f32 0.2, %v3695_v60  ;;  %v3641_v39 = vadd.f32 %v3640_v38, %v3622_v35  ;;  %v4248_v35 = vld [vmem:[%s11253_s5 + $0x18] sm:$0xff] }
 0x9a1   : > { %v3680_v49 = vpop.f32.mrf.mxu2 }
 0x9a2   : > { %v3711_v58 = vsel %vm3703_vm12, %v3695_v60, %v3707_v8  ;;  %v3660_v31 = vadd.f32 %v3659_v30, %v3641_v39  ;;  %v3697_v44 = vpop.f32.mrf.mxu0 }
 0x9a3   : > { %v3714_v16 = vpack.c.bf16 %v3711_v58, %v3710_v3  ;;  %v3661_v57 = vpop.f32.mrf.mxu1 }
 0x9a4   : > { %v3679_v46 = vadd.f32 %v3678_v6, %v3660_v31 }
 0x9a5   : > { %3788 = vmatmul.bf16.vlgmr.msrb.gmra.mxu3 %v3714_v16 }
 0x9a6   : > { %v3698_v52 = vadd.f32 %v3697_v44, %v3679_v46 }
 0x9a7   : > { %v3642_v48 = vpop.f32.mrf.mxu3 }
 0x9a8   : > { %v3643_v4 = vadd.f32 %v3642_v48, %v3624_v45  ;;  %v3708_v54 = vmul.f32 0.2, %v3698_v52  ;;  %vm3704_vm15 = vcmp.ge.f32.partialorder %v3698_v52, 0.0 }
 0x9aa   : > { %v3662_v27 = vadd.f32 %v3661_v57, %v3643_v4  ;;  %v3699_v17 = vpop.f32.mrf.mxu0  ;;  %v3712_v18 = vsel %vm3704_vm15, %v3698_v52, %v3708_v54 }
 0x9ac   : > { %v3681_v43 = vadd.f32 %v3680_v49, %v3662_v27 }
 0x9ae   : > { %v3700_v2 = vadd.f32 %v3699_v17, %v3681_v43 }
 0x9b0   : > { %v3709_v42 = vmul.f32 0.2, %v3700_v2  ;;  %vm3705_vm11 = vcmp.ge.f32.partialorder %v3700_v2, 0.0 }
 0x9b2   : > { %v3713_v55 = vsel %vm3705_vm11, %v3700_v2, %v3709_v42 }
 0x9b3   : > { %v3715_v59 = vpack.c.bf16 %v3713_v55, %v3712_v18 }
 0x9b5   : > { %3793 = vmatmul.bf16.gmra.mxu3 %v3715_v59 }
 0xa28   : > { %v3789_v61 = vpop.f32.mrf.mxu3 }
 0xa29   : > { %v3969_v56 = vmul.f32 %v8678_v37, %v3789_v61  ;;  %3926 = vrot.lane.b32.xlu1 %v3789_v61, %s11169_s4  ;;  %3800 = vrot.lane.b32.xlu2 %v3789_v61, %s11249_s1 }
 0xa2a   : > { %3842 = vrot.lane.b32.xlu0 %v3789_v61, %s11251_s30 }
 0xa2b   : > { %v3973_v62 = vpack.c.bf16 %v3969_v56, %v3969_v56 }
 0xa2d   : > { %3977 = vst [vmem:[#allocation2 + $0x100] sm:$0xf] %v3973_v62 }
 0xa30   : > { %v3791_v5 = vpop.f32.mrf.mxu3 }
 0xa31   : > { %v3970_v11 = vmul.f32 %v8678_v37, %v3791_v5  ;;  %4078 = vrot.lane.b32.xlu2 %v3789_v61, %s11250_s6  ;;  %3844 = vrot.lane.b32.xlu1 %v3791_v5, %s11251_s30 }
 0xa32   : > { %3994 = vrot.lane.b32.xlu0 %v3789_v61, %s9351_s12 }
 0xa33   : > { %v3974_v12 = vpack.c.bf16 %v3970_v11, %v3970_v11 }
 0xa35   : > { %3978 = vst [vmem:[#allocation2 + $0x108] sm:$0xf] %v3974_v12 }
 0xa38   : > { %v3794_v13 = vpop.f32.mrf.mxu3 }
 0xa39   : > { %v3971_v14 = vmul.f32 %v8678_v37, %v3794_v13  ;;  %3928 = vrot.lane.b32.xlu2 %v3791_v5, %s11169_s4  ;;  %3996 = vrot.lane.b32.xlu1 %v3791_v5, %s9351_s12 }
 0xa3a   : > { %3802 = vrot.lane.b32.xlu0 %v3791_v5, %s11249_s1 }
 0xa3b   : > { %v3975_v19 = vpack.c.bf16 %v3971_v14, %v3971_v14 }
 0xa3d   : > { %3979 = vst [vmem:[#allocation2 + $0x110] sm:$0xf] %v3975_v19 }
 0xa40   : > { %v3796_v20 = vpop.f32.mrf.mxu3 }
 0xa41   : > { %v3972_v23 = vmul.f32 %v8678_v37, %v3796_v20  ;;  %3804 = vrot.lane.b32.xlu2 %v3794_v13, %s11249_s1  ;;  %3846 = vrot.lane.b32.xlu1 %v3794_v13, %s11251_s30 }
 0xa42   : > { %4080 = vrot.lane.b32.xlu0 %v3791_v5, %s11250_s6 }
 0xa43   : > { %v3976_v40 = vpack.c.bf16 %v3972_v23, %v3972_v23 }
 0xa45   : > { %3980 = vst [vmem:[#allocation2 + $0x118] sm:$0xf] %v3976_v40 }
 0xa49   : > { %4082 = vrot.lane.b32.xlu2 %v3794_v13, %s11250_s6  ;;  %3930 = vrot.lane.b32.xlu1 %v3794_v13, %s11169_s4 }
 0xa4a   : > { %3998 = vrot.lane.b32.xlu0 %v3794_v13, %s9351_s12 }
 0xa51   : > { %3888 = vrot.lane.b32.xlu1 %v3794_v13, %s11166_s3  ;;  %3848 = vrot.lane.b32.xlu2 %v3796_v20, %s11251_s30 }
 0xa52   : > { %3886 = vrot.lane.b32.xlu0 %v3791_v5, %s11166_s3 }
 0xa59   : > { %4040 = vrot.lane.b32.xlu1 %v3794_v13, %s11252_s2  ;;  %3884 = vrot.lane.b32.xlu2 %v3789_v61, %s11166_s3 }
 0xa5a   : > { %3806 = vrot.lane.b32.xlu0 %v3796_v20, %s11249_s1 }
 0xa61   : > { %4000 = vrot.lane.b32.xlu1 %v3796_v20, %s9351_s12  ;;  %3932 = vrot.lane.b32.xlu2 %v3796_v20, %s11169_s4 }
 0xa62   : > { %4084 = vrot.lane.b32.xlu0 %v3796_v20, %s11250_s6 }
 0xa69   : > { %4147 = vrot.lane.b32.xlu1 %v10022_v15, %s11254_s9  ;;  %4036 = vrot.lane.b32.xlu2 %v3789_v61, %s11252_s2  ;;  %v4247_v15 = vld [vmem:[%s11253_s5 + $0x10] sm:$0xff]  ;;  %s11256_s5 = smov 3  }
 0xa6a   : > { %4145 = vrot.lane.b32.xlu0 %v10020_v7, %s11254_s9 }
 0xa71   : > { %4141 = vrot.lane.b32.xlu1 %v10014_v63, %s11254_s9  ;;  %3890 = vrot.lane.b32.xlu2 %v3796_v20, %s11166_s3 }
 0xa72   : > { %4038 = vrot.lane.b32.xlu0 %v3791_v5, %s11252_s2 }
 0xa79   : > { %4126 = vrot.lane.b32.xlu1 %v3796_v20, %s11254_s9  ;;  %4042 = vrot.lane.b32.xlu2 %v3796_v20, %s11252_s2 }
 0xa7a   : > { %4124 = vrot.lane.b32.xlu0 %v3794_v13, %s11254_s9 }
 0xa81   : > { %4261 = vperm.xlu1 %8595, %v4247_v15   ;;  %4143 = vrot.lane.b32.xlu2 %v10016_v0, %s11254_s9 }
 0xa82   : > { %4122 = vrot.lane.b32.xlu0 %v3791_v5, %s11254_s9 }
 0xa83   : > { %v3801_v7 = vpop.permute.xlu2 %3800 }
 0xa84   : > { %v3809_v63 = vmul.f32 %v10381_v34, %v3801_v7 }
 0xa86   : > { %v3813_v25 = vpack.c.bf16 %v3809_v63, %v3809_v63 }
 0xa88   : > { %3817 = vst [vmem:[#allocation2] sm:$0xf] %v3813_v25 }
 0xa89   : > { %4256 = vperm.xlu1 %8595, %v4246_v1   ;;  %4120 = vrot.lane.b32.xlu2 %v3789_v61, %s11254_s9 }
 0xa8a   : > { %4251 = vperm.xlu0 %8597, %v4245_v22  }
 0xa8b   : > { %v4079_v33 = vpop.permute.xlu2 %4078 }
 0xa8c   : > { %v4087_v29 = vmul.f32 %v10400_v9, %v4079_v33 }
 0xa8e   : > { %v4091_v30 = vpack.c.bf16 %v4087_v29, %v4087_v29 }
 0xa90   : > { %4095 = vst [vmem:[#allocation2 + $0x1c0] sm:$0xf] %v4091_v30 }
 0xa91   : > { %4266 = vperm.xlu2 %8596, %v4248_v35  }
 0xa93   : > { %v3929_v0 = vpop.permute.xlu2 %3928 }
 0xa94   : > { %v3936_v36 = vmul.f32 %v10394_v10, %v3929_v0 }
 0xa96   : > { %v3940_v60 = vpack.c.bf16 %v3936_v36, %v3936_v36 }
 0xa98   : > { %3944 = vst [vmem:[#allocation2 + $0xc8] sm:$0xf] %v3940_v60 }
 0xa9b   : > { %v3927_v38 = vpop.permute.xlu1 %3926  ;;  %v3805_v6 = vpop.permute.xlu2 %3804 }
 0xa9c   : > { %v3935_v8 = vmul.f32 %v10394_v10, %v3927_v38  ;;  %v3843_v39 = vpop.permute.xlu0 %3842  ;;  %v3811_v3 = vmul.f32 %v10381_v34, %v3805_v6 }
 0xa9d   : > { %v3851_v58 = vmul.f32 %v10373_v53, %v3843_v39 }
 0xa9e   : > { %v3939_v31 = vpack.c.bf16 %v3935_v8, %v3935_v8  ;;  %v3815_v44 = vpack.c.bf16 %v3811_v3, %v3811_v3  ;;  %v8177_v3 = vld [vmem:[#allocation2 + $0x34] sm:$0xf0] }
 0xa9f   : > { %v3855_v16 = vpack.c.bf16 %v3851_v58, %v3851_v58 }
 0xaa0   : > { %3943 = vst [vmem:[#allocation2 + $0xc0] sm:$0xf] %v3939_v31 }
 0xaa1   : > { %3859 = vst [vmem:[#allocation2 + $0x40] sm:$0xf] %v3855_v16  ;;  %v7489_v16 = vld [vmem:[#allocation2 + $0x30] sm:$0xf] }
 0xaa2   : > { %3819 = vst [vmem:[#allocation2 + $0x10] sm:$0xf] %v3815_v44 }
 0xaa3   : > { %v3845_v45 = vpop.permute.xlu1 %3844  ;;  %v4083_v46 = vpop.permute.xlu2 %4082 }
 0xaa4   : > { %v3995_v48 = vpop.permute.xlu0 %3994  ;;  %v3852_v57 = vmul.f32 %v10373_v53, %v3845_v45  ;;  %v4089_v4 = vmul.f32 %v10400_v9, %v4083_v46  ;;  %v7490_v46 = vor.u32 %v8177_v3, %v7489_v16  ;;  %v7439_v3 = vld [vmem:[#allocation27 + $0x14] sm:$0xf0] }
 0xaa5   : > { %v4003_v49 = vmul.f32 %v10414_v47, %v3995_v48 }
 0xaa6   : > { %v3856_v52 = vpack.c.bf16 %v3852_v57, %v3852_v57  ;;  %v4093_v27 = vpack.c.bf16 %v4089_v4, %v4089_v4  ;;  %v7485_v57 = vld [vmem:[#allocation2 + $0x20] sm:$0xf] }
 0xaa7   : > { %v4007_v17 = vpack.c.bf16 %v4003_v49, %v4003_v49 }
 0xaa8   : > { %3860 = vst [vmem:[#allocation2 + $0x48] sm:$0xf] %v3856_v52  ;;  %v7493_v60 = vld [vmem:[#allocation2 + $0x40] sm:$0xf] }
 0xaa9   : > { %4011 = vst [vmem:[#allocation2 + $0x140] sm:$0xf] %v4007_v17  ;;  %v7525_v17 = vld [vmem:[#allocation2 + $0xc0] sm:$0xf] }
 0xaaa   : > { %4097 = vst [vmem:[#allocation2 + $0x1d0] sm:$0xf] %v4093_v27  ;;  %v8176_v27 = vld [vmem:[#allocation2 + $0x24] sm:$0xf0] }
 0xaab   : > { %v3997_v43 = vpop.permute.xlu1 %3996  ;;  %v3849_v54 = vpop.permute.xlu2 %3848 }
 0xaac   : > { %v3803_v2 = vpop.permute.xlu0 %3802  ;;  %v4004_v42 = vmul.f32 %v10414_v47, %v3997_v43  ;;  %v3854_v18 = vmul.f32 %v10373_v53, %v3849_v54 }
 0xaad   : > { %v3810_v55 = vmul.f32 %v10381_v34, %v3803_v2 }
 0xaae   : > { %v4008_v59 = vpack.c.bf16 %v4004_v42, %v4004_v42  ;;  %v3858_v61 = vpack.c.bf16 %v3854_v18, %v3854_v18  ;;  %v7486_v42 = vor.u32 %v8176_v27, %v7485_v57 }
 0xaaf   : > { %v3814_v37 = vpack.c.bf16 %v3810_v55, %v3810_v55  ;;  %v8178_v35 = vld [vmem:[#allocation2 + $0x44] sm:$0xf0] }
 0xab0   : > { %4012 = vst [vmem:[#allocation2 + $0x148] sm:$0xf] %v4008_v59  ;;  %v7494_v8 = vor.u32 %v8178_v35, %v7493_v60  ;;  %v8186_v55 = vld [vmem:[#allocation2 + $0xc4] sm:$0xf0]  ;;  %v8212_v60 = vld [vmem:[#allocation27 + $0x10] sm:$0xf0] }
 0xab1   : > { %3818 = vst [vmem:[#allocation2 + $0x8] sm:$0xf] %v3814_v37  ;;  %v7526_v37 = vor.u32 %v8186_v55, %v7525_v17  ;;  %v7593_v17 = vld [vmem:[#allocation2 + $0x1d0] sm:$0xf] }
 0xab2   : > { %3862 = vst [vmem:[#allocation2 + $0x58] sm:$0xf] %v3858_v61 }
 0xab3   : > { %v3847_v56 = vpop.permute.xlu1 %3846  ;;  %v3885_v62 = vpop.permute.xlu2 %3884 }
 0xab4   : > { %v4081_v5 = vpop.permute.xlu0 %4080  ;;  %v3853_v11 = vmul.f32 %v10373_v53, %v3847_v56  ;;  %v3893_v12 = vmul.f32 %v10405_v21, %v3885_v62  ;;  %v7521_v62 = vld [vmem:[#allocation2 + $0xb0] sm:$0xf] }
 0xab5   : > { %v4088_v13 = vmul.f32 %v10400_v9, %v4081_v5  ;;  %v8185_v5 = vld [vmem:[#allocation2 + $0xb4] sm:$0xf0] }
 0xab6   : > { %v3857_v14 = vpack.c.bf16 %v3853_v11, %v3853_v11  ;;  %v3897_v19 = vpack.c.bf16 %v3893_v12, %v3893_v12  ;;  %v7522_v11 = vor.u32 %v8185_v5, %v7521_v62  ;;  %v7589_v5 = vld [vmem:[#allocation2 + $0x1c0] sm:$0xf] }
 0xab7   : > { %v4092_v20 = vpack.c.bf16 %v4088_v13, %v4088_v13 }
 0xab8   : > { %3861 = vst [vmem:[#allocation2 + $0x50] sm:$0xf] %v3857_v14  ;;  %v7517_v14 = vld [vmem:[#allocation2 + $0xa0] sm:$0xf] }
 0xab9   : > { %4096 = vst [vmem:[#allocation2 + $0x1c8] sm:$0xf] %v4092_v20  ;;  %v8179_v29 = vld [vmem:[#allocation2 + $0x54] sm:$0xf0] }
 0xaba   : > { %3901 = vst [vmem:[#allocation2 + $0x80] sm:$0xf] %v3897_v19 }
 0xabb   : > { %v3931_v23 = vpop.permute.xlu1 %3930  ;;  %v3933_v40 = vpop.permute.xlu2 %3932 }
 0xabc   : > { %v3999_v15 = vpop.permute.xlu0 %3998  ;;  %v3937_v7 = vmul.f32 %v10394_v10, %v3931_v23  ;;  %v3938_v63 = vmul.f32 %v10394_v10, %v3933_v40  ;;  %v8184_v23 = vld [vmem:[#allocation2 + $0xa4] sm:$0xf0] }
 0xabd   : > { %v4005_v25 = vmul.f32 %v10414_v47, %v3999_v15 }
 0xabe   : > { %v3941_v53 = vpack.c.bf16 %v3937_v7, %v3937_v7  ;;  %v3942_v1 = vpack.c.bf16 %v3938_v63, %v3938_v63  ;;  %v7518_v7 = vor.u32 %v8184_v23, %v7517_v14 }
 0xabf   : > { %v4009_v22 = vpack.c.bf16 %v4005_v25, %v4005_v25  ;;  %v7497_v33 = vld [vmem:[#allocation2 + $0x50] sm:$0xf] }
 0xac0   : > { %3945 = vst [vmem:[#allocation2 + $0xd0] sm:$0xf] %v3941_v53  ;;  %v7498_v30 = vor.u32 %v8179_v29, %v7497_v33  ;;  %v7481_v25 = vld [vmem:[#allocation2 + $0x10] sm:$0xf] }
 0xac1   : > { %4013 = vst [vmem:[#allocation2 + $0x150] sm:$0xf] %v4009_v22 }
 0xac2   : > { %3946 = vst [vmem:[#allocation2 + $0xd8] sm:$0xf] %v3942_v1  ;;  %4543 = vmatpush.bf16.msra.mxu1 %v7498_v30  ;;  %v10505_v1 = vld [vmem:[#allocation9 + $0x8] ss:$0 sm:$0xff]  ;;  %v8174_v30 = vld [vmem:[#allocation2 + $0x4] sm:$0xf0] }
 0xac3   : > { %v3889_v0 = vpop.permute.xlu1 %3888  ;;  %v4037_v36 = vpop.permute.xlu2 %4036 }
 0xac4   : > { %v3887_v38 = vpop.permute.xlu0 %3886  ;;  %v3895_v6 = vmul.f32 %v10405_v21, %v3889_v0  ;;  %v4045_v10 = vmul.f32 %v10416_v41, %v4037_v36  ;;  %v7437_v36 = vld [vmem:[#allocation27] sm:$0xf] }
 0xac5   : > { %v3894_v39 = vmul.f32 %v10405_v21, %v3887_v38 }
 0xac6   : > { %v3899_v58 = vpack.c.bf16 %v3895_v6, %v3895_v6  ;;  %v4049_v31 = vpack.c.bf16 %v4045_v10, %v4045_v10  ;;  %4544 = vmatpush.bf16.msra.mxu1 %v7494_v8  ;;  %v7477_v8 = vld [vmem:[#allocation2] sm:$0xf] }
 0xac7   : > { %v3898_v44 = vpack.c.bf16 %v3894_v39, %v3894_v39  ;;  %v7529_v45 = vld [vmem:[#allocation2 + $0xd0] sm:$0xf] }
 0xac8   : > { %3903 = vst [vmem:[#allocation2 + $0x90] sm:$0xf] %v3899_v58  ;;  %v8210_v39 = vld [vmem:[#allocation27 + $0x4] sm:$0xf] }
 0xac9   : > { %3902 = vst [vmem:[#allocation2 + $0x88] sm:$0xf] %v3898_v44  ;;  %v8187_v48 = vld [vmem:[#allocation2 + $0xd4] sm:$0xf0]  ;;  %v7509_v44 = vld [vmem:[#allocation2 + $0x80] sm:$0xf] }
 0xaca   : > { %4053 = vst [vmem:[#allocation2 + $0x180] sm:$0xf] %v4049_v31  ;;  %4545 = vmatpush.bf16.msra.mxu1 %v7490_v46  ;;  %v7530_v4 = vor.u32 %v8187_v48, %v7529_v45  ;;  %v7478_v31 = vor.u32 %v8174_v30, %v7477_v8  ;;  %v7438_v48 = vor.u32 %v8212_v60, %v7437_v36  ;;  %v8215_v36 = vld [vmem:[#allocation27 + $0x2c] sm:$0xf]  ;;  %v7459_v60 = vld [vmem:[#allocation27 + $0x3c] sm:$0xf0] }
 0xacb   : > { %v4041_v49 = vpop.permute.xlu1 %4040  ;;  %v3891_v52 = vpop.permute.xlu2 %3890 }
 0xacc   : > { %4562 = vmatpush.bf16.msra.mxu2 %v7530_v4  ;;  %v4047_v43 = vmul.f32 %v10416_v41, %v4041_v49  ;;  %v3807_v54 = vpop.permute.xlu0 %3806  ;;  %v3896_v2 = vmul.f32 %v10405_v21, %v3891_v52  ;;  %v7442_v4 = vor.u32 %v8210_v39, %v7439_v3  ;;  %v7561_v49 = vld [vmem:[#allocation2 + $0x150] sm:$0xf] }
 0xacd   : > { %v3812_v18 = vmul.f32 %v10381_v34, %v3807_v54 }
 0xace   : > { %v4051_v59 = vpack.c.bf16 %v4047_v43, %v4047_v43  ;;  %v3900_v61 = vpack.c.bf16 %v3896_v2, %v3896_v2  ;;  %4546 = vmatpush.bf16.msra.mxu1 %v7486_v42  ;;  %v8194_v2 = vld [vmem:[#allocation2 + $0x144] sm:$0xf0] }
 0xacf   : > { %v3816_v56 = vpack.c.bf16 %v3812_v18, %v3812_v18  ;;  %v7513_v33 = vld [vmem:[#allocation2 + $0x90] sm:$0xf]  ;;  %v8202_v42 = vld [vmem:[#allocation2 + $0x1c4] sm:$0xf0] }
 0xad0   : > { %4055 = vst [vmem:[#allocation2 + $0x190] sm:$0xf] %v4051_v59  ;;  %4563 = vmatpush.bf16.msra.mxu2 %v7526_v37  ;;  %v8182_v0 = vld [vmem:[#allocation2 + $0x84] sm:$0xf0]  ;;  %v7557_v59 = vld [vmem:[#allocation2 + $0x140] sm:$0xf] }
 0xad1   : > { %3820 = vst [vmem:[#allocation2 + $0x18] sm:$0xf] %v3816_v56  ;;  %v7510_v46 = vor.u32 %v8182_v0, %v7509_v44  ;;  %v7558_v62 = vor.u32 %v8194_v2, %v7557_v59  ;;  %v7581_v0 = vld [vmem:[#allocation2 + $0x1a0] sm:$0xf]  ;;  %v7545_v44 = vld [vmem:[#allocation2 + $0x110] sm:$0xf] }
 0xad2   : > { %3904 = vst [vmem:[#allocation2 + $0x98] sm:$0xf] %v3900_v61  ;;  %v7447_v2 = vld [vmem:[#allocation27 + $0x1c] sm:$0xf0] }
 0xad3   : > { %v4001_v12 = vpop.permute.xlu1 %4000  ;;  %v4043_v13 = vpop.permute.xlu2 %4042 }
 0xad4   : > { %4564 = vmatpush.bf16.msra.mxu2 %v7522_v11  ;;  %v4006_v21 = vmul.f32 %v10414_v47, %v4001_v12  ;;  %v4085_v34 = vpop.permute.xlu0 %4084  ;;  %v4048_v19 = vmul.f32 %v10416_v41, %v4043_v13  ;;  %v7590_v12 = vor.u32 %v8202_v42, %v7589_v5  ;;  %v8193_v13 = vld [vmem:[#allocation2 + $0x134] sm:$0xf0] }
 0xad5   : > { %v4090_v20 = vmul.f32 %v10400_v9, %v4085_v34  ;;  %v8201_v34 = vld [vmem:[#allocation2 + $0x1b4] sm:$0xf0] }
 0xad6   : > { %v4010_v40 = vpack.c.bf16 %v4006_v21, %v4006_v21  ;;  %v4052_v15 = vpack.c.bf16 %v4048_v19, %v4048_v19 }
 0xad7   : > { %v4094_v63 = vpack.c.bf16 %v4090_v20, %v4090_v20  ;;  %v7553_v20 = vld [vmem:[#allocation2 + $0x130] sm:$0xf] }
 0xad8   : > { %4014 = vst [vmem:[#allocation2 + $0x158] sm:$0xf] %v4010_v40  ;;  %4565 = vmatpush.bf16.msra.mxu2 %v7518_v7  ;;  %v8175_v53 = vld [vmem:[#allocation2 + $0x14] sm:$0xf0]  ;;  %v7554_v40 = vor.u32 %v8193_v13, %v7553_v20  ;;  %v7453_v13 = vld [vmem:[#allocation27 + $0x10] sm:$0xf] }
 0xad9   : > { %4098 = vst [vmem:[#allocation2 + $0x1d8] sm:$0xf] %v4094_v63  ;;  %v7482_v22 = vor.u32 %v8175_v53, %v7481_v25  ;;  %v8183_v47 = vld [vmem:[#allocation2 + $0x94] sm:$0xf0]  ;;  %v8192_v53 = vld [vmem:[#allocation2 + $0x124] sm:$0xf0] }
 0xada   : > { %4056 = vst [vmem:[#allocation2 + $0x198] sm:$0xf] %v4052_v15  ;;  %v7514_v29 = vor.u32 %v8183_v47, %v7513_v33  ;;  %v7585_v15 = vld [vmem:[#allocation2 + $0x1b0] sm:$0xf]  ;;  %v7549_v33 = vld [vmem:[#allocation2 + $0x120] sm:$0xf] }
 0xadb   : > { %4547 = vmatpush.bf16.msra.mxu1 %v7482_v22  ;;  %v4148_v9 = vpop.permute.xlu1 %4147  ;;  %v4144_v35 = vpop.permute.xlu2 %4143  ;;  %v7586_v63 = vor.u32 %v8201_v34, %v7585_v15  ;;  %v7457_v47 = vld [vmem:[#allocation27 + $0x28] sm:$0xf] }
 0xadc   : > { %4566 = vmatpush.bf16.msra.mxu2 %v7514_v29  ;;  %v4152_v38 = vmul.f32 %v10505_v1, %v4148_v9  ;;  %v4146_v6 = vpop.permute.xlu0 %4145  ;;  %v4150_v10 = vmul.f32 %v10505_v1, %v4144_v35  ;;  %v8217_v29 = vld [vmem:[#allocation27 + $0x38] sm:$0xf0]  ;;  %v7550_v35 = vor.u32 %v8192_v53, %v7549_v33  ;;  %v7467_v15 = vld [vmem:[#allocation27 + $0x44] sm:$0xf0]  ;;  %v8219_v53 = vld [vmem:[#allocation27 + $0x48] sm:$0xf0] }
 0xadd   : > { %v4151_v58 = vmul.f32 %v10505_v1, %v4146_v6  ;;  %v7458_v39 = vor.u32 %v8217_v29, %v7457_v47 }
 0xade   : > { %v4156_v16 = vpack.c.bf16 %v4152_v38, %v4152_v38  ;;  %v4154_v45 = vpack.c.bf16 %v4150_v10, %v4150_v10  ;;  %v8191_v10 = vld [vmem:[#allocation2 + $0x114] sm:$0xf0] }
 0xadf   : > { %v4155_v57 = vpack.c.bf16 %v4151_v58, %v4151_v58  ;;  %4548 = vmatpush.bf16.msra.mxu1 %v7478_v31  ;;  %v8195_v52 = vld [vmem:[#allocation2 + $0x154] sm:$0xf0]  ;;  %v7462_v31 = vor.u32 %v8215_v36, %v7459_v60 }
 0xae0   : > { %4160 = vst [vmem:[#allocation2 + $0x238] sm:$0xf] %v4156_v16  ;;  %4567 = vmatpush.bf16.msra.mxu2 %v7510_v46  ;;  %v7562_v27 = vor.u32 %v8195_v52, %v7561_v49  ;;  %v8203_v43 = vld [vmem:[#allocation2 + $0x1d4] sm:$0xf0]  ;;  %v7546_v46 = vor.u32 %v8191_v10, %v7545_v44  ;;  %v8190_v49 = vld [vmem:[#allocation2 + $0x104] sm:$0xf0] }
 0xae1   : > { %4159 = vst [vmem:[#allocation2 + $0x230] sm:$0xf] %v4155_v57  ;;  %v7594_v54 = vor.u32 %v8203_v43, %v7593_v17  ;;  %v8199_v3 = vld [vmem:[#allocation2 + $0x194] sm:$0xf0]  ;;  %v8213_v17 = vld [vmem:[#allocation27 + $0x18] sm:$0xf0] }
 0xae2   : > { %4158 = vst [vmem:[#allocation2 + $0x228] sm:$0xf] %v4154_v45  ;;  %4549 = vmatmul.bf16.vlgmr.msra.gmra.mxu1 %v7438_v48  ;;  %4581 = vmatpush.bf16.msra.mxu0 %v7562_v27  ;;  %v7577_v48 = vld [vmem:[#allocation2 + $0x190] sm:$0xf]  ;;  %v7445_v27 = vld [vmem:[#allocation27 + $0x8] sm:$0xf] }
 0xae3   : > { %4568 = vmatmul.bf16.vlgmr.msra.gmra.mxu2 %v7442_v4  ;;  %4600 = vmatpush.bf16.msra.mxu3 %v7594_v54  ;;  %v4142_v18 = vpop.permute.xlu1 %4141  ;;  %v4121_v55 = vpop.permute.xlu2 %4120  ;;  %v7578_v4 = vor.u32 %v8199_v3, %v7577_v48  ;;  %v7541_v43 = vld [vmem:[#allocation2 + $0x100] sm:$0xf]  ;;  %v8211_v54 = vld [vmem:[#allocation27 + $0xc] sm:$0xf] }
 0xae4   : > { %v4149_v61 = vmul.f32 %v10505_v1, %v4142_v18  ;;  %v4039_v37 = vpop.permute.xlu0 %4038  ;;  %v4129_v56 = vmul.f32 %v10505_v1, %v4121_v55  ;;  %v7542_v18 = vor.u32 %v8190_v49, %v7541_v43  ;;  %v7573_v55 = vld [vmem:[#allocation2 + $0x180] sm:$0xf] }
 0xae5   : > { %v4046_v11 = vmul.f32 %v10416_v41, %v4039_v37  ;;  %v8200_v41 = vld [vmem:[#allocation2 + $0x1a4] sm:$0xf0]  ;;  %v7446_v37 = vor.u32 %v8213_v17, %v7445_v27 }
 0xae6   : > { %v4153_v14 = vpack.c.bf16 %v4149_v61, %v4149_v61  ;;  %v4133_v21 = vpack.c.bf16 %v4129_v56, %v4129_v56  ;;  %4582 = vmatpush.bf16.msra.mxu0 %v7558_v62  ;;  %v7582_v6 = vor.u32 %v8200_v41, %v7581_v0  ;;  %v7450_v56 = vor.u32 %v8211_v54, %v7447_v2 }
 0xae7   : > { %v4050_v19 = vpack.c.bf16 %v4046_v11, %v4046_v11  ;;  %4601 = vmatpush.bf16.msra.mxu3 %v7590_v12  ;;  %v8209_v23 = vld [vmem:[#allocation2 + $0x234] sm:$0xf0] }
 0xae8   : > { %4157 = vst [vmem:[#allocation2 + $0x220] sm:$0xf] %v4153_v14  ;;  %v7617_v7 = vld [vmem:[#allocation2 + $0x230] sm:$0xf] }
 0xae9   : > { %4054 = vst [vmem:[#allocation2 + $0x188] sm:$0xf] %v4050_v19  ;;  %v7618_v25 = vor.u32 %v8209_v23, %v7617_v7  ;;  %v8208_v45 = vld [vmem:[#allocation2 + $0x224] sm:$0xf0]  ;;  %v8214_v14 = vld [vmem:[#allocation27 + $0x20] sm:$0xf0] }
 0xaea   : > { %4137 = vst [vmem:[#allocation2 + $0x200] sm:$0xf] %v4133_v21  ;;  %4583 = vmatpush.bf16.msra.mxu0 %v7554_v40  ;;  %v7454_v20 = vor.u32 %v8214_v14, %v7453_v13  ;;  %v8218_v23 = vld [vmem:[#allocation27 + $0x40] sm:$0xf0]  ;;  %v8216_v40 = vld [vmem:[#allocation27 + $0x34] sm:$0xf] }
 0xaeb   : > { %4602 = vmatpush.bf16.msra.mxu3 %v7586_v63  ;;  %4621 = vmatpush.bf16.msrb.mxu1 %v7618_v25  ;;  %v4127_v22 = vpop.permute.xlu1 %4126  ;;  %v7470_v63 = vor.u32 %v8216_v40, %v7467_v15  ;;  %v7473_v25 = vld [vmem:[#allocation27 + $0x38] sm:$0xf] }
 0xaec   : > { %v4132_v30 = vmul.f32 %v10505_v1, %v4127_v22  ;;  %v4125_v9 = vpop.permute.xlu0 %4124  ;;  %v7474_v41 = vor.u32 %v8219_v53, %v7473_v25  ;;  %v10542_v53 = vld [vmem:[#allocation8 + $0x4] ss:$0 sm:$0xff] }
 0xaed   : > { %v4131_v38 = vmul.f32 %v10505_v1, %v4125_v9 }
 0xaee   : > { %v4136_v8 = vpack.c.bf16 %v4132_v30, %v4132_v30  ;;  %4584 = vmatpush.bf16.msra.mxu0 %v7550_v35 }
 0xaef   : > { %v4135_v58 = vpack.c.bf16 %v4131_v38, %v4131_v38  ;;  %4603 = vmatpush.bf16.msra.mxu3 %v7582_v6  ;;  %v7613_v16 = vld [vmem:[#allocation2 + $0x220] sm:$0xf] }
 0xaf0   : > { %4140 = vst [vmem:[#allocation2 + $0x218] sm:$0xf] %v4136_v8  ;;  %v7614_v57 = vor.u32 %v8208_v45, %v7613_v16  ;;  %v8198_v52 = vld [vmem:[#allocation2 + $0x184] sm:$0xf0]  ;;  %v8644_v16 = vld [vmem:[#allocation9 + $0x4] ss:$0 sm:$0xff] }
 0xaf1   : > { %4139 = vst [vmem:[#allocation2 + $0x210] sm:$0xf] %v4135_v58  ;;  %v7574_v61 = vor.u32 %v8198_v52, %v7573_v55  ;;  %v7605_v21 = vld [vmem:[#allocation2 + $0x200] sm:$0xf] }
 0xaf2   : > { %4554 = vmatmul.bf16.gmra.mxu1 %v7458_v39  ;;  %4585 = vmatpush.bf16.msra.mxu0 %v7546_v46 }
 0xaf3   : > { %4573 = vmatmul.bf16.gmra.mxu2 %v7462_v31  ;;  %4604 = vmatpush.bf16.msra.mxu3 %v7578_v4  ;;  %v4262_v9 = vpop.permute.xlu1 %4261 }
 0xaf4   : > { %4622 = vmatpush.bf16.msrb.mxu1 %v7614_v57  ;;  %v4123_v42 = vpop.permute.xlu0 %4122 }
 0xaf5   : > { %v4130_v59 = vmul.f32 %v10505_v1, %v4123_v42  ;;  %v7465_v1 = vld [vmem:[#allocation27 + $0x30] sm:$0xf] }
 0xaf6   : > { %4586 = vmatpush.bf16.msra.mxu0 %v7542_v18  ;;  %v7466_v7 = vor.u32 %v8218_v23, %v7465_v1 }
 0xaf7   : > { %v4134_v62 = vpack.c.bf16 %v4130_v59, %v4130_v59  ;;  %4605 = vmatpush.bf16.msra.mxu3 %v7574_v61  ;;  %v8207_v5 = vld [vmem:[#allocation2 + $0x214] sm:$0xf0] }
 0xaf8   : > { %v7609_v11 = vld [vmem:[#allocation2 + $0x210] sm:$0xf] }
 0xaf9   : > { %4138 = vst [vmem:[#allocation2 + $0x208] sm:$0xf] %v4134_v62  ;;  %4587 = vmatmul.bf16.vlgmr.msra.gmra.mxu0 %v7446_v37  ;;  %v7610_v12 = vor.u32 %v8207_v5, %v7609_v11  ;;  %v4267_v62 = vpop.permute.xlu2 %4266 }
 0xafa   : > { %4606 = vmatmul.bf16.vlgmr.msra.gmra.mxu3 %v7450_v56 }
 0xafb   : > { %4623 = vmatpush.bf16.msrb.mxu1 %v7610_v12  ;;  %v4257_v3 = vpop.permute.xlu1 %4256 }
 0xafc   : > { %v4252_v35 = vpop.permute.xlu0 %4251 }
 0xb00   : > { %v8206_v34 = vld [vmem:[#allocation2 + $0x204] sm:$0xf0] }
 0xb01   : > { %v7606_v19 = vor.u32 %v8206_v34, %v7605_v21 }
 0xb03   : > { %4624 = vmatpush.bf16.msrb.mxu1 %v7606_v19 }
 0xb06   : > { %7619 = vmatmul.msk.bf16.vlgmr.msrb.gmra.mxu1 %vm3600_vm10, %v7454_v20 }
 0xb09   : > { %4592 = vmatmul.bf16.gmra.mxu0 %v7466_v7 }
 0xb0a   : > { %4611 = vmatmul.bf16.gmra.mxu3 %v7470_v63 }
 0xb16   : > { %7620 = vmatmul.msk.bf16.gmra.mxu1 %vm3600_vm10, %v7474_v41 }
 0xb5f   : > { %v4550_v22 = vpop.f32.mrf.mxu1 }
 0xb60   : > { %v4551_v36 = vadd.f32 %v4550_v22, %v4252_v35 }
 0xb66   : > { %v4569_v29 = vpop.f32.mrf.mxu2 }
 0xb67   : > { %v4552_v33 = vpop.f32.mrf.mxu1  ;;  %v4570_v38 = vadd.f32 %v4569_v29, %v4551_v36 }
 0xb68   : > { %v4553_v31 = vadd.f32 %v4552_v33, %v4257_v3  ;;  %v5239_v33 = vmul.f32 %v10542_v53, %v9982_v50 }
 0xb6e   : > { %v4571_v6 = vpop.f32.mrf.mxu2 }
 0xb6f   : > { %v4555_v47 = vpop.f32.mrf.mxu1  ;;  %v4572_v46 = vadd.f32 %v4571_v6, %v4553_v31  ;;  %v10593_v31 = vld [vmem:[#allocation9] ss:$0 sm:$0xff] }
 0xb70   : > { %v4556_v2 = vadd.f32 %v4555_v47, %v4262_v9  ;;  %v5241_v9 = vpack.c.bf16 %v5239_v33, %v5239_v33 }
 0xb76   : > { %v4588_v30 = vpop.f32.mrf.mxu0  ;;  %v4574_v49 = vpop.f32.mrf.mxu2 }
 0xb77   : > { %v4557_v0 = vpop.f32.mrf.mxu1  ;;  %v4589_v10 = vadd.f32 %v4588_v30, %v4570_v38  ;;  %v4575_v55 = vadd.f32 %v4574_v49, %v4556_v2  ;;  %v8648_v49 = vld [vmem:[#allocation9 + $0x1] ss:$0 sm:$0xff] }
 0xb78   : > { %v4558_v14 = vadd.f32 %v4557_v0, %v4267_v62  ;;  %v5240_v0 = vmul.f32 %v10542_v53, %v9984_v51 }
 0xb7a   : > { %v5242_v36 = vpack.c.bf16 %v5240_v0, %v5240_v0 }
 0xb7d   : > { %v4607_v60 = vpop.f32.mrf.mxu3 }
 0xb7e   : > { %v4590_v8 = vpop.f32.mrf.mxu0  ;;  %v4608_v39 = vadd.f32 %v4607_v60, %v4589_v10  ;;  %v4576_v11 = vpop.f32.mrf.mxu2 }
 0xb7f   : > { %v4591_v57 = vadd.f32 %v4590_v8, %v4572_v46  ;;  %v4577_v19 = vadd.f32 %v4576_v11, %v4558_v14  ;;  %v10586_v8 = vld [vmem:[#allocation9 + $0x2] ss:$0 sm:$0xff]  ;;  %v10602_v46 = vld [vmem:[#allocation9 + $0x3] ss:$0 sm:$0xff] }
 0xb83   : > { %v4626_v58 = vpop.f32.mrf.mxu1 }
 0xb84   : > { %v4627_v44 = vadd.f32 %v4626_v58, %v4608_v39 }
 0xb85   : > { %v4609_v45 = vpop.f32.mrf.mxu3 }
 0xb86   : > { %vm4636_vm10 = vcmp.ge.f32.partialorder %v4627_v44, 0.0  ;;  %v4640_v48 = vmul.f32 0.2, %v4627_v44  ;;  %v4610_v27 = vadd.f32 %v4609_v45, %v4591_v57  ;;  %v4593_v43 = vpop.f32.mrf.mxu0 }
 0xb87   : > { %v4594_v61 = vadd.f32 %v4593_v43, %v4575_v55 }
 0xb88   : > { %v10518_v4 = vsel %vm4636_vm10, %v4627_v44, %v4640_v48 }
 0xb89   : > { %v4738_v52 = vmul.f32 %v8644_v16, %v10518_v4  ;;  %4671 = vrot.lane.b32.xlu0 %v10518_v4, %s11251_s30  ;;  %4693 = vrot.lane.b32.xlu2 %v10518_v4, %s11166_s3 }
 0xb8a   : > { %4715 = vrot.lane.b32.xlu1 %v10518_v4, %s11169_s4 }
 0xb8b   : > { %v4742_v17 = vpack.c.bf16 %v4738_v52, %v4738_v52  ;;  %v4628_v54 = vpop.f32.mrf.mxu1 }
 0xb8c   : > { %v4629_v42 = vadd.f32 %v4628_v54, %v4610_v27 }
 0xb8d   : > { %4746 = vst [vmem:[#allocation2 + $0x80] sm:$0xf] %v4742_v17  ;;  %v4612_v18 = vpop.f32.mrf.mxu3 }
 0xb8e   : > { %vm4637_vm12 = vcmp.ge.f32.partialorder %v4629_v42, 0.0  ;;  %v4641_v59 = vmul.f32 0.2, %v4629_v42  ;;  %v4613_v5 = vadd.f32 %v4612_v18, %v4594_v61  ;;  %v4595_v34 = vpop.f32.mrf.mxu0 }
 0xb8f   : > { %v4596_v23 = vadd.f32 %v4595_v34, %v4577_v19 }
 0xb90   : > { %v10527_v37 = vsel %vm4637_vm12, %v4629_v42, %v4641_v59  ;;  %v10619_v59 = vld [vmem:[#allocation9 + $0x7] ss:$0 sm:$0xff] }
 0xb91   : > { %v4739_v56 = vmul.f32 %v8644_v16, %v10527_v37  ;;  %4795 = vrot.lane.b32.xlu0 %v10518_v4, %s11250_s6  ;;  %4649 = vrot.lane.b32.xlu2 %v10518_v4, %s11249_s1 }
 0xb92   : > { %4673 = vrot.lane.b32.xlu1 %v10527_v37, %s11251_s30 }
 0xb93   : > { %v4743_v12 = vpack.c.bf16 %v4739_v56, %v4739_v56  ;;  %v4631_v13 = vpop.f32.mrf.mxu1 }
 0xb94   : > { %v4632_v21 = vadd.f32 %v4631_v13, %v4613_v5 }
 0xb95   : > { %4747 = vst [vmem:[#allocation2 + $0x88] sm:$0xf] %v4743_v12  ;;  %v4614_v1 = vpop.f32.mrf.mxu3 }
 0xb96   : > { %vm4638_vm15 = vcmp.ge.f32.partialorder %v4632_v21, 0.0  ;;  %v4642_v20 = vmul.f32 0.2, %v4632_v21  ;;  %v4615_v7 = vadd.f32 %v4614_v1, %v4596_v23 }
 0xb98   : > { %v4646_v40 = vsel %vm4638_vm15, %v4632_v21, %v4642_v20  ;;  %v10629_v21 = vld [vmem:[#allocation9 + $0x5] ss:$0 sm:$0xff] }
 0xb99   : > { %v4740_v15 = vmul.f32 %v8644_v16, %v4646_v40  ;;  %4695 = vrot.lane.b32.xlu0 %v10527_v37, %s11166_s3  ;;  %4717 = vrot.lane.b32.xlu2 %v10527_v37, %s11169_s4 }
 0xb9a   : > { %4797 = vrot.lane.b32.xlu1 %v10527_v37, %s11250_s6 }
 0xb9b   : > { %v4744_v63 = vpack.c.bf16 %v4740_v15, %v4740_v15  ;;  %v4633_v25 = vpop.f32.mrf.mxu1 }
 0xb9c   : > { %v4634_v41 = vadd.f32 %v4633_v25, %v4615_v7 }
 0xb9d   : > { %4748 = vst [vmem:[#allocation2 + $0x90] sm:$0xf] %v4744_v63 }
 0xb9e   : > { %vm4639_vm11 = vcmp.ge.f32.partialorder %v4634_v41, 0.0  ;;  %v4643_v22 = vmul.f32 0.2, %v4634_v41 }
 0xba0   : > { %v4647_v47 = vsel %vm4639_vm11, %v4634_v41, %v4643_v22 }
 0xba1   : > { %v4741_v29 = vmul.f32 %v8644_v16, %v4647_v47  ;;  %4697 = vrot.lane.b32.xlu0 %v4646_v40, %s11166_s3  ;;  %4719 = vrot.lane.b32.xlu2 %v4646_v40, %s11169_s4  ;;  %s11255_s3 = sld [smem:[#allocation56_spill]] }
 0xba2   : > { %4675 = vrot.lane.b32.xlu1 %v4646_v40, %s11251_s30 }
 0xba3   : > { %v4745_v30 = vpack.c.bf16 %v4741_v29, %v4741_v29 }
 0xba4   : > { %v10549_v35 = vld [vmem:[#allocation2 + $0x90] sm:$0xf] }
 0xba5   : > { %4749 = vst [vmem:[#allocation2 + $0x98] sm:$0xf] %v4745_v30 }
 0xba6   : > { %5243 = vst [vmem:[#allocation2 + $0x90] sm:$0xf] %v5241_v9 }
 0xba7   : > { %v4878_v6 = vld [vmem:[%s11255_s3] sm:$0xff]  ;;  %v4879_v10 = vld [vmem:[%s11255_s3 + $0x8] sm:$0xff]  ;;  %s11263_s3 = smov 9  }
 0xba9   : > { %4721 = vrot.lane.b32.xlu0 %v4647_v47, %s11169_s4  ;;  %4799 = vrot.lane.b32.xlu2 %v4646_v40, %s11250_s6 }
 0xbaa   : > { %4653 = vrot.lane.b32.xlu1 %v4646_v40, %s11249_s1 }
 0xbac   : > { %v10556_v60 = vld [vmem:[#allocation2 + $0x94] sm:$0xf0] }
 0xbad   : > { %v7672_v38 = vor.u32 %v10556_v60, %v10549_v35  ;;  %5244 = vst [vmem:[#allocation2 + $0x98] sm:$0xf] %v5242_v36 }
 0xbb1   : > { %4651 = vrot.lane.b32.xlu0 %v10527_v37, %s11249_s1  ;;  %4755 = vrot.lane.b32.xlu2 %v4646_v40, %s9351_s12 }
 0xbb2   : > { %4699 = vrot.lane.b32.xlu1 %v4647_v47, %s11256_s5  ;;  %s11257_s5 = smov 120  }
 0xbb9   : > { %4773 = vrot.lane.b32.xlu0 %v10518_v4, %s11252_s2  ;;  %4677 = vrot.lane.b32.xlu2 %v4647_v47, %s11251_s30  ;;  %s11259_s30 = smov 7  }
 0xbba   : > { %4777 = vrot.lane.b32.xlu1 %v4646_v40, %s11252_s2 }
 0xbc1   : > { %4801 = vrot.lane.b32.xlu0 %v4647_v47, %s11250_s6  ;;  %4655 = vrot.lane.b32.xlu2 %v4647_v47, %s11249_s1  ;;  %s11258_s6 = smov 121   ;;  %s11262_s1 = sld [smem:[#allocation62_spill]] }
 0xbc2   : > { %4775 = vrot.lane.b32.xlu1 %v10527_v37, %s11252_s2 }
 0xbc9   : > { %4821 = vrot.lane.b32.xlu0 %v4646_v40, %s11254_s9  ;;  %4779 = vrot.lane.b32.xlu2 %v4647_v47, %s11252_s2  ;;  %s11261_s2 = smov 119  }
 0xbca   : > { %4751 = vrot.lane.b32.xlu1 %v10518_v4, %s9351_s12 }
 0xbd1   : > { %4757 = vrot.lane.b32.xlu0 %v4647_v47, %s9351_s12  ;;  %4753 = vrot.lane.b32.xlu2 %v10527_v37, %s9351_s12 }
 0xbd2   : > { %4823 = vrot.lane.b32.xlu1 %v4647_v47, %s11254_s9 }
 0xbd9   : > { %4819 = vrot.lane.b32.xlu0 %v10527_v37, %s11254_s9  ;;  %4817 = vrot.lane.b32.xlu2 %v10518_v4, %s11254_s9  ;;  %s11260_s9 = smov 8  }
 0xbda   : > { %4882 = vperm.xlu1 %8595, %v4878_v6  }
 0xbe1   : > { %5221 = vrot.lane.b32.xlu0 %v9982_v50, %s11169_s4  ;;  %4887 = vperm.xlu2 %8596, %v4879_v10  }
 0xbe2   : > { %5223 = vrot.lane.b32.xlu1 %v9984_v51, %s11169_s4 }
 0xbe3   : > { %v4694_v39 = vpop.permute.xlu2 %4693 }
 0xbe4   : > { %v4702_v3 = vmul.f32 %v10586_v8, %v4694_v39 }
 0xbe6   : > { %v4706_v58 = vpack.c.bf16 %v4702_v3, %v4702_v3 }
 0xbe8   : > { %4710 = vst [vmem:[#allocation2 + $0x40] sm:$0xf] %v4706_v58 }
 0xbe9   : > { %5303 = vrot.lane.b32.xlu0 %v9984_v51, %s11257_s5  ;;  %5301 = vrot.lane.b32.xlu2 %v9982_v50, %s11257_s5 }
 0xbea   : > { %5279 = vrot.lane.b32.xlu1 %v9982_v50, %s11258_s6 }
 0xbeb   : > { %v4650_v44 = vpop.permute.xlu2 %4649 }
 0xbec   : > { %v4658_v16 = vmul.f32 %v10593_v31, %v4650_v44 }
 0xbee   : > { %v4662_v45 = vpack.c.bf16 %v4658_v16, %v4658_v16 }
 0xbf0   : > { %4666 = vst [vmem:[#allocation2] sm:$0xf] %v4662_v45 }
 0xbf1   : > { %5201 = vrot.lane.b32.xlu0 %v9984_v51, %s11259_s30  ;;  %5199 = vrot.lane.b32.xlu2 %v9982_v50, %s11259_s30 }
 0xbf2   : > { %5177 = vrot.lane.b32.xlu1 %v9982_v50, %s11260_s9 }
 0xbf3   : > { %v4718_v48 = vpop.permute.xlu2 %4717 }
 0xbf4   : > { %v4725_v57 = vmul.f32 %v10602_v46, %v4718_v48  ;;  %v8651_v48 = vld [vmem:[#allocation9 + $0x6] ss:$0 sm:$0xff] }
 0xbf6   : > { %v4729_v4 = vpack.c.bf16 %v4725_v57, %v4725_v57 }
 0xbf8   : > { %4733 = vst [vmem:[#allocation2 + $0x68] sm:$0xf] %v4729_v4 }
 0xbf9   : > { %5257 = vrot.lane.b32.xlu0 %v9982_v50, %s9351_s12  ;;  %5281 = vrot.lane.b32.xlu2 %v9984_v51, %s11258_s6 }
 0xbfa   : > { %5259 = vrot.lane.b32.xlu1 %v9984_v51, %s9351_s12 }
 0xbfb   : > { %v4672_v52 = vpop.permute.xlu0 %4671  ;;  %v4720_v27 = vpop.permute.xlu2 %4719 }
 0xbfc   : > { %v4680_v17 = vmul.f32 %v8648_v49, %v4672_v52  ;;  %v4726_v43 = vmul.f32 %v10602_v46, %v4720_v27  ;;  %v4716_v54 = vpop.permute.xlu1 %4715 }
 0xbfd   : > { %v4724_v2 = vmul.f32 %v10602_v46, %v4716_v54 }
 0xbfe   : > { %v4684_v42 = vpack.c.bf16 %v4680_v17, %v4680_v17  ;;  %v4730_v18 = vpack.c.bf16 %v4726_v43, %v4726_v43 }
 0xbff   : > { %v4728_v55 = vpack.c.bf16 %v4724_v2, %v4724_v2 }
 0xc00   : > { %4688 = vst [vmem:[#allocation2 + $0x20] sm:$0xf] %v4684_v42 }
 0xc01   : > { %4734 = vst [vmem:[#allocation2 + $0x70] sm:$0xf] %v4730_v18  ;;  %5323 = vrot.lane.b32.xlu0 %v9982_v50, %s11261_s2  ;;  %5179 = vrot.lane.b32.xlu2 %v9984_v51, %s11260_s9 }
 0xc02   : > { %4732 = vst [vmem:[#allocation2 + $0x60] sm:$0xf] %v4728_v55  ;;  %5325 = vrot.lane.b32.xlu1 %v9984_v51, %s11261_s2 }
 0xc03   : > { %v4796_v61 = vpop.permute.xlu0 %4795  ;;  %v4800_v37 = vpop.permute.xlu2 %4799 }
 0xc04   : > { %v4804_v56 = vmul.f32 %v10619_v59, %v4796_v61  ;;  %v4806_v62 = vmul.f32 %v10619_v59, %v4800_v37  ;;  %v4674_v5 = vpop.permute.xlu1 %4673 }
 0xc05   : > { %v4681_v11 = vmul.f32 %v8648_v49, %v4674_v5 }
 0xc06   : > { %v4808_v12 = vpack.c.bf16 %v4804_v56, %v4804_v56  ;;  %v4810_v13 = vpack.c.bf16 %v4806_v62, %v4806_v62  ;;  %v8226_v56 = vld [vmem:[#allocation2 + $0x64] sm:$0xf0] }
 0xc07   : > { %v4685_v14 = vpack.c.bf16 %v4681_v11, %v4681_v11 }
 0xc08   : > { %4812 = vst [vmem:[#allocation2 + $0xe0] sm:$0xf] %v4808_v12  ;;  %v7663_v2 = vld [vmem:[#allocation2 + $0x70] sm:$0xf] }
 0xc09   : > { %4814 = vst [vmem:[#allocation2 + $0xf0] sm:$0xf] %v4810_v13  ;;  %v7659_v55 = vld [vmem:[#allocation2 + $0x60] sm:$0xf] }
 0xc0a   : > { %4689 = vst [vmem:[#allocation2 + $0x28] sm:$0xf] %v4685_v14  ;;  %v7660_v11 = vor.u32 %v8226_v56, %v7659_v55 }
 0xc0b   : > { %v4696_v34 = vpop.permute.xlu0 %4695  ;;  %v4756_v19 = vpop.permute.xlu2 %4755 }
 0xc0c   : > { %v4703_v20 = vmul.f32 %v10586_v8, %v4696_v34  ;;  %v4762_v1 = vmul.f32 %v10629_v21, %v4756_v19  ;;  %v4798_v23 = vpop.permute.xlu1 %4797  ;;  %v10641_v34 = vld [vmem:[#allocation9 + $0x8] ss:$0 sm:$0xff] }
 0xc0d   : > { %v4805_v40 = vmul.f32 %v10619_v59, %v4798_v23 }
 0xc0e   : > { %v4707_v15 = vpack.c.bf16 %v4703_v20, %v4703_v20  ;;  %v4766_v7 = vpack.c.bf16 %v4762_v1, %v4762_v1 }
 0xc0f   : > { %v4809_v63 = vpack.c.bf16 %v4805_v40, %v4805_v40 }
 0xc10   : > { %4711 = vst [vmem:[#allocation2 + $0x48] sm:$0xf] %v4707_v15 }
 0xc11   : > { %4770 = vst [vmem:[#allocation2 + $0xb0] sm:$0xf] %v4766_v7 }
 0xc12   : > { %4813 = vst [vmem:[#allocation2 + $0xe8] sm:$0xf] %v4809_v63 }
 0xc13   : > { %v4698_v25 = vpop.permute.xlu0 %4697  ;;  %v4678_v41 = vpop.permute.xlu2 %4677 }
 0xc14   : > { %v4704_v22 = vmul.f32 %v10586_v8, %v4698_v25  ;;  %v4683_v33 = vmul.f32 %v8648_v49, %v4678_v41  ;;  %v4676_v47 = vpop.permute.xlu1 %4675 }
 0xc15   : > { %v4682_v29 = vmul.f32 %v8648_v49, %v4676_v47 }
 0xc16   : > { %v4708_v30 = vpack.c.bf16 %v4704_v22, %v4704_v22  ;;  %v4687_v9 = vpack.c.bf16 %v4683_v33, %v4683_v33  ;;  %v7651_v22 = vld [vmem:[#allocation2 + $0x40] sm:$0xf] }
 0xc17   : > { %v4686_v0 = vpack.c.bf16 %v4682_v29, %v4682_v29  ;;  %v8224_v15 = vld [vmem:[#allocation2 + $0x44] sm:$0xf0] }
 0xc18   : > { %4712 = vst [vmem:[#allocation2 + $0x50] sm:$0xf] %v4708_v30  ;;  %v7652_v29 = vor.u32 %v8224_v15, %v7651_v22 }
 0xc19   : > { %4691 = vst [vmem:[#allocation2 + $0x38] sm:$0xf] %v4687_v9 }
 0xc1a   : > { %4690 = vst [vmem:[#allocation2 + $0x30] sm:$0xf] %v4686_v0 }
 0xc1b   : > { %v4722_v36 = vpop.permute.xlu0 %4721  ;;  %v4656_v6 = vpop.permute.xlu2 %4655 }
 0xc1c   : > { %v4727_v10 = vmul.f32 %v10602_v46, %v4722_v36  ;;  %v4661_v39 = vmul.f32 %v10593_v31, %v4656_v6  ;;  %v4654_v3 = vpop.permute.xlu1 %4653 }
 0xc1d   : > { %v4660_v58 = vmul.f32 %v10593_v31, %v4654_v3 }
 0xc1e   : > { %v4731_v44 = vpack.c.bf16 %v4727_v10, %v4727_v10  ;;  %v4665_v16 = vpack.c.bf16 %v4661_v39, %v4661_v39 }
 0xc1f   : > { %v4664_v45 = vpack.c.bf16 %v4660_v58, %v4660_v58  ;;  %v7655_v19 = vld [vmem:[#allocation2 + $0x50] sm:$0xf] }
 0xc20   : > { %4735 = vst [vmem:[#allocation2 + $0x78] sm:$0xf] %v4731_v44  ;;  %v8223_v0 = vld [vmem:[#allocation2 + $0x34] sm:$0xf0]  ;;  %v7643_v44 = vld [vmem:[#allocation2 + $0x20] sm:$0xf] }
 0xc21   : > { %4669 = vst [vmem:[#allocation2 + $0x18] sm:$0xf] %v4665_v16  ;;  %v7647_v9 = vld [vmem:[#allocation2 + $0x30] sm:$0xf] }
 0xc22   : > { %4668 = vst [vmem:[#allocation2 + $0x10] sm:$0xf] %v4664_v45  ;;  %v7648_v36 = vor.u32 %v8223_v0, %v7647_v9  ;;  %v10660_v0 = vld [vmem:[#allocation8 + $0x3] ss:$0 sm:$0xff] }
 0xc23   : > { %v4652_v57 = vpop.permute.xlu0 %4651  ;;  %v4780_v4 = vpop.permute.xlu2 %4779 }
 0xc24   : > { %v4659_v49 = vmul.f32 %v10593_v31, %v4652_v57  ;;  %v4785_v52 = vmul.f32 %v8651_v48, %v4780_v4  ;;  %v4700_v27 = vpop.permute.xlu1 %4699 }
 0xc25   : > { %v4705_v46 = vmul.f32 %v10586_v8, %v4700_v27 }
 0xc26   : > { %v4663_v17 = vpack.c.bf16 %v4659_v49, %v4659_v49  ;;  %v4789_v43 = vpack.c.bf16 %v4785_v52, %v4785_v52 }
 0xc27   : > { %v4709_v54 = vpack.c.bf16 %v4705_v46, %v4705_v46  ;;  %v8227_v42 = vld [vmem:[#allocation2 + $0x74] sm:$0xf0]  ;;  %v10649_v46 = vld [vmem:[#allocation8 + $0x7] ss:$0 sm:$0xff] }
 0xc28   : > { %4667 = vst [vmem:[#allocation2 + $0x8] sm:$0xf] %v4663_v17  ;;  %v7664_v18 = vor.u32 %v8227_v42, %v7663_v2  ;;  %v8221_v49 = vld [vmem:[#allocation2 + $0x14] sm:$0xf0]  ;;  %v8234_v17 = vld [vmem:[#allocation2 + $0xe4] sm:$0xf0] }
 0xc29   : > { %4793 = vst [vmem:[#allocation2 + $0xd8] sm:$0xf] %v4789_v43  ;;  %v7639_v4 = vld [vmem:[#allocation2 + $0x10] sm:$0xf] }
 0xc2a   : > { %4713 = vst [vmem:[#allocation2 + $0x58] sm:$0xf] %v4709_v54  ;;  %5016 = vmatpush.bf16.msrb.mxu2 %v7664_v18  ;;  %v7640_v43 = vor.u32 %v8221_v49, %v7639_v4  ;;  %v7691_v18 = vld [vmem:[#allocation2 + $0xe0] sm:$0xf] }
 0xc2b   : > { %v4774_v61 = vpop.permute.xlu0 %4773  ;;  %v4754_v37 = vpop.permute.xlu2 %4753  ;;  %v7692_v56 = vor.u32 %v8234_v17, %v7691_v18  ;;  %v7631_v17 = vld [vmem:[#allocation26 + $0x8] sm:$0xf] }
 0xc2c   : > { %v4782_v62 = vmul.f32 %v8651_v48, %v4774_v61  ;;  %v4761_v31 = vmul.f32 %v10629_v21, %v4754_v37  ;;  %v4778_v5 = vpop.permute.xlu1 %4777 }
 0xc2d   : > { %v4784_v8 = vmul.f32 %v8651_v48, %v4778_v5 }
 0xc2e   : > { %v4786_v12 = vpack.c.bf16 %v4782_v62, %v4782_v62  ;;  %v4765_v13 = vpack.c.bf16 %v4761_v31, %v4761_v31  ;;  %5017 = vmatpush.bf16.msrb.mxu2 %v7660_v11  ;;  %v7623_v62 = vld [vmem:[#allocation26] sm:$0xf]  ;;  %v8239_v31 = vld [vmem:[#allocation26 + $0x8] sm:$0xf0] }
 0xc2f   : > { %v4788_v14 = vpack.c.bf16 %v4784_v8, %v4784_v8  ;;  %v8220_v42 = vld [vmem:[#allocation2 + $0x4] sm:$0xf0]  ;;  %v7635_v11 = vld [vmem:[#allocation2] sm:$0xf] }
 0xc30   : > { %4790 = vst [vmem:[#allocation2 + $0xc0] sm:$0xf] %v4786_v12 }
 0xc31   : > { %4769 = vst [vmem:[#allocation2 + $0xa8] sm:$0xf] %v4765_v13  ;;  %v8225_v20 = vld [vmem:[#allocation2 + $0x54] sm:$0xf0] }
 0xc32   : > { %4792 = vst [vmem:[#allocation2 + $0xd0] sm:$0xf] %v4788_v14  ;;  %v7656_v1 = vor.u32 %v8225_v20, %v7655_v19  ;;  %v7636_v14 = vor.u32 %v8220_v42, %v7635_v11  ;;  %v7624_v20 = vor.u32 %v8239_v31, %v7623_v62  ;;  %v7625_v62 = vld [vmem:[#allocation26 + $0xc] sm:$0xf0]  ;;  %v7667_v11 = vld [vmem:[#allocation2 + $0x80] sm:$0xf] }
 0xc33   : > { %v4802_v23 = vpop.permute.xlu0 %4801  ;;  %v4818_v40 = vpop.permute.xlu2 %4817 }
 0xc34   : > { %5018 = vmatpush.bf16.msrb.mxu2 %v7656_v1  ;;  %v4807_v7 = vmul.f32 %v10619_v59, %v4802_v23  ;;  %v4826_v63 = vmul.f32 %v10641_v34, %v4818_v40  ;;  %v4776_v25 = vpop.permute.xlu1 %4775  ;;  %v8222_v59 = vld [vmem:[#allocation2 + $0x24] sm:$0xf0]  ;;  %v8233_v1 = vld [vmem:[#allocation2 + $0xd4] sm:$0xf0] }
 0xc35   : > { %v4783_v41 = vmul.f32 %v8651_v48, %v4776_v25  ;;  %v7644_v45 = vor.u32 %v8222_v59, %v7643_v44  ;;  %v7695_v48 = vld [vmem:[#allocation2 + $0xf0] sm:$0xf]  ;;  %v10654_v23 = vld [vmem:[#allocation8 + $0x2] ss:$0 sm:$0xff]  ;;  %v10662_v59 = vld [vmem:[#allocation8 + $0x6] ss:$0 sm:$0xff] }
 0xc36   : > { %v4811_v33 = vpack.c.bf16 %v4807_v7, %v4807_v7  ;;  %v4830_v47 = vpack.c.bf16 %v4826_v63, %v4826_v63 }
 0xc37   : > { %v4787_v30 = vpack.c.bf16 %v4783_v41, %v4783_v41  ;;  %v7683_v63 = vld [vmem:[#allocation2 + $0xc0] sm:$0xf] }
 0xc38   : > { %4815 = vst [vmem:[#allocation2 + $0xf8] sm:$0xf] %v4811_v33  ;;  %5019 = vmatpush.bf16.msrb.mxu2 %v7652_v29 }
 0xc39   : > { %4834 = vst [vmem:[#allocation2 + $0x100] sm:$0xf] %v4830_v47  ;;  %v7687_v8 = vld [vmem:[#allocation2 + $0xd0] sm:$0xf] }
 0xc3a   : > { %4791 = vst [vmem:[#allocation2 + $0xc8] sm:$0xf] %v4787_v30  ;;  %v7679_v30 = vld [vmem:[#allocation2 + $0xb0] sm:$0xf] }
 0xc3b   : > { %v4822_v6 = vpop.permute.xlu0 %4821  ;;  %v10645_v10 = vpop.permute.xlu2 %4887 }
 0xc3c   : > { %5020 = vmatpush.bf16.msrb.mxu2 %v7648_v36  ;;  %v4828_v39 = vmul.f32 %v10641_v34, %v4822_v6  ;;  %v4752_v3 = vpop.permute.xlu1 %4751 }
 0xc3d   : > { %v4760_v58 = vmul.f32 %v10629_v21, %v4752_v3 }
 0xc3e   : > { %v4832_v16 = vpack.c.bf16 %v4828_v39, %v4828_v39 }
 0xc3f   : > { %v4764_v57 = vpack.c.bf16 %v4760_v58, %v4760_v58  ;;  %v8235_v52 = vld [vmem:[#allocation2 + $0xf4] sm:$0xf0] }
 0xc40   : > { %4836 = vst [vmem:[#allocation2 + $0x110] sm:$0xf] %v4832_v16  ;;  %5021 = vmatpush.bf16.msrb.mxu2 %v7644_v45  ;;  %v7696_v27 = vor.u32 %v8235_v52, %v7695_v48  ;;  %v8230_v16 = vld [vmem:[#allocation2 + $0xa4] sm:$0xf0] }
 0xc41   : > { %4768 = vst [vmem:[#allocation2 + $0xa0] sm:$0xf] %v4764_v57  ;;  %v8232_v40 = vld [vmem:[#allocation2 + $0xc4] sm:$0xf0] }
 0xc42   : > { %5030 = vmatpush.bf16.msrb.mxu0 %v7696_v27  ;;  %v7684_v33 = vor.u32 %v8232_v40, %v7683_v63 }
 0xc43   : > { %v4758_v54 = vpop.permute.xlu0 %4757  ;;  %v5302_v2 = vpop.permute.xlu2 %5301 }
 0xc44   : > { %5022 = vmatpush.bf16.msrb.mxu2 %v7640_v43  ;;  %v4763_v55 = vmul.f32 %v10629_v21, %v4758_v54  ;;  %v5305_v61 = vmul.f32 %v10649_v46, %v5302_v2  ;;  %v4824_v37 = vpop.permute.xlu1 %4823  ;;  %v7688_v21 = vor.u32 %v8233_v1, %v7687_v8  ;;  %v8240_v43 = vld [vmem:[#allocation26 + $0x10] sm:$0xf0]  ;;  %v7699_v2 = vld [vmem:[#allocation2 + $0x100] sm:$0xf] }
 0xc45   : > { %v4829_v5 = vmul.f32 %v10641_v34, %v4824_v37  ;;  %v8228_v37 = vld [vmem:[#allocation2 + $0x84] sm:$0xf0] }
 0xc46   : > { %v4767_v12 = vpack.c.bf16 %v4763_v55, %v4763_v55  ;;  %v5307_v13 = vpack.c.bf16 %v5305_v61, %v5305_v61  ;;  %5031 = vmatpush.bf16.msrb.mxu0 %v7692_v56  ;;  %v10667_v55 = vld [vmem:[#allocation8 + $0x1] ss:$0 sm:$0xff]  ;;  %v7632_v61 = vor.u32 %v8240_v43, %v7631_v17  ;;  %v8238_v56 = vld [vmem:[#allocation26 + $0x4] sm:$0xf]  ;;  %v8248_v43 = vld [vmem:[#allocation15 + $0x38] sm:$0xff] }
 0xc47   : > { %v4833_v19 = vpack.c.bf16 %v4829_v5, %v4829_v5  ;;  %v7703_v6 = vld [vmem:[#allocation2 + $0x110] sm:$0xf]  ;;  %5129 = vmatpush.bf16.msrb.mxu3 %v8248_v43 }
 0xc48   : > { %4771 = vst [vmem:[#allocation2 + $0xb8] sm:$0xf] %v4767_v12  ;;  %5023 = vmatpush.bf16.msrb.mxu2 %v7636_v14  ;;  %v7668_v14 = vor.u32 %v8228_v37, %v7667_v11  ;;  %v8242_v37 = vld [vmem:[#allocation15 + $0x8] sm:$0xff] }
 0xc49   : > { %5309 = vst [vmem:[#allocation2 + $0xf0] sm:$0xf] %v5307_v13 }
 0xc4a   : > { %4837 = vst [vmem:[#allocation2 + $0x118] sm:$0xf] %v4833_v19  ;;  %5032 = vmatpush.bf16.msrb.mxu0 %v7688_v21 }
 0xc4b   : > { %5024 = vmatmul.bf16.vlgmr.msrb.gmra.mxu2 %v7624_v20  ;;  %v4820_v15 = vpop.permute.xlu0 %4819  ;;  %v5200_v7 = vpop.permute.xlu2 %5199  ;;  %v7628_v20 = vor.u32 %v8238_v56, %v7625_v62  ;;  %v8241_v62 = vld [vmem:[#allocation15] sm:$0xff] }
 0xc4c   : > { %v4827_v25 = vmul.f32 %v10641_v34, %v4820_v15  ;;  %v5203_v41 = vmul.f32 %v10654_v23, %v5200_v7  ;;  %v10658_v22 = vpop.permute.xlu1 %4882  ;;  %v7675_v34 = vld [vmem:[#allocation2 + $0xa0] sm:$0xf] }
 0xc4d   : > { %v7676_v4 = vor.u32 %v8230_v16, %v7675_v34 }
 0xc4e   : > { %v4831_v47 = vpack.c.bf16 %v4827_v25, %v4827_v25  ;;  %v5205_v29 = vpack.c.bf16 %v5203_v41, %v5203_v41  ;;  %5033 = vmatpush.bf16.msrb.mxu0 %v7684_v33 }
 0xc4f   : > { %v8231_v9 = vld [vmem:[#allocation2 + $0xb4] sm:$0xf0] }
 0xc50   : > { %4835 = vst [vmem:[#allocation2 + $0x108] sm:$0xf] %v4831_v47  ;;  %v7680_v36 = vor.u32 %v8231_v9, %v7679_v30  ;;  %v7812_v47 = vld [vmem:[#allocation2 + $0xf0] sm:$0xf]  ;;  %v10678_v9 = vld [vmem:[#allocation8 + $0x5] ss:$0 sm:$0xff] }
 0xc51   : > { %5207 = vst [vmem:[#allocation2 + $0x50] sm:$0xf] %v5205_v29  ;;  %v8237_v39 = vld [vmem:[#allocation2 + $0x114] sm:$0xf0] }
 0xc52   : > { %5034 = vmatpush.bf16.msrb.mxu0 %v7680_v36  ;;  %v7704_v3 = vor.u32 %v8237_v39, %v7703_v6 }
 0xc53   : > { %v5222_v58 = vpop.permute.xlu0 %5221  ;;  %v5282_v44 = vpop.permute.xlu2 %5281 }
 0xc54   : > { %5050 = vmatpush.bf16.msra.mxu2 %v7704_v3  ;;  %v5225_v45 = vmul.f32 %v10660_v0, %v5222_v58  ;;  %v5284_v48 = vmul.f32 %v10662_v59, %v5282_v44  ;;  %v5224_v57 = vpop.permute.xlu1 %5223  ;;  %v10682_v44 = vld [vmem:[#allocation8 + $0x8] ss:$0 sm:$0xff] }
 0xc55   : > { %v5226_v49 = vmul.f32 %v10660_v0, %v5224_v57 }
 0xc56   : > { %v5227_v52 = vpack.c.bf16 %v5225_v45, %v5225_v45  ;;  %v5286_v27 = vpack.c.bf16 %v5284_v48, %v5284_v48  ;;  %5035 = vmatpush.bf16.msrb.mxu0 %v7676_v4 }
 0xc57   : > { %v5228_v54 = vpack.c.bf16 %v5226_v49, %v5226_v49  ;;  %v8236_v42 = vld [vmem:[#allocation2 + $0x104] sm:$0xf0] }
 0xc58   : > { %5229 = vst [vmem:[#allocation2 + $0x70] sm:$0xf] %v5227_v52  ;;  %v7700_v18 = vor.u32 %v8236_v42, %v7699_v2  ;;  %v8246_v2 = vld [vmem:[#allocation15 + $0x28] sm:$0xff]  ;;  %v8245_v42 = vld [vmem:[#allocation15 + $0x20] sm:$0xff] }
 0xc59   : > { %5288 = vst [vmem:[#allocation2 + $0xd8] sm:$0xf] %v5286_v27 }
 0xc5a   : > { %5230 = vst [vmem:[#allocation2 + $0x78] sm:$0xf] %v5228_v54  ;;  %5036 = vmatpush.bf16.msrb.mxu0 %v7672_v38  ;;  %5051 = vmatpush.bf16.msra.mxu2 %v7700_v18  ;;  %v8247_v54 = vld [vmem:[#allocation15 + $0x30] sm:$0xff]  ;;  %v8244_v18 = vld [vmem:[#allocation15 + $0x18] sm:$0xff] }
 0xc5b   : > { %v5304_v31 = vpop.permute.xlu0 %5303  ;;  %v5180_v5 = vpop.permute.xlu2 %5179  ;;  %5130 = vmatpush.bf16.msrb.mxu3 %v8247_v54 }
 0xc5c   : > { %v5306_v8 = vmul.f32 %v10649_v46, %v5304_v31  ;;  %v5182_v12 = vmul.f32 %v10667_v55, %v5180_v5  ;;  %v5280_v13 = vpop.permute.xlu1 %5279 }
 0xc5d   : > { %v5283_v19 = vmul.f32 %v10662_v59, %v5280_v13  ;;  %7705 = vmatmul.msk.bf16.vlgmr.msra.gmra.mxu2 %vm2772_vm0, %v7632_v61  ;;  %v8243_v61 = vld [vmem:[#allocation15 + $0x10] sm:$0xff] }
 0xc5e   : > { %v5308_v1 = vpack.c.bf16 %v5306_v8, %v5306_v8  ;;  %v5184_v35 = vpack.c.bf16 %v5182_v12, %v5182_v12  ;;  %5037 = vmatpush.bf16.msrb.mxu0 %v7668_v14 }
 0xc5f   : > { %v5285_v60 = vpack.c.bf16 %v5283_v19, %v5283_v19  ;;  %v7780_v38 = vld [vmem:[#allocation2 + $0x70] sm:$0xf]  ;;  %5131 = vmatpush.bf16.msrb.mxu3 %v8246_v2 }
 0xc60   : > { %5310 = vst [vmem:[#allocation2 + $0xf8] sm:$0xf] %v5308_v1 }
 0xc61   : > { %5186 = vst [vmem:[#allocation2 + $0x38] sm:$0xf] %v5184_v35  ;;  %5038 = vmatmul.bf16.vlgmr.msrb.gmra.mxu0 %v7628_v20  ;;  %v8256_v21 = vld [vmem:[#allocation2 + $0x74] sm:$0xf0] }
 0xc62   : > { %5287 = vst [vmem:[#allocation2 + $0xd0] sm:$0xf] %v5285_v60  ;;  %v7781_v40 = vor.u32 %v8256_v21, %v7780_v38 }
 0xc63   : > { %v5202_v15 = vpop.permute.xlu0 %5201  ;;  %5132 = vmatpush.bf16.msrb.mxu3 %v8245_v42 }
 0xc64   : > { %5511 = vmatpush.bf16.msra.mxu1 %v7781_v40  ;;  %v5204_v7 = vmul.f32 %v10654_v23, %v5202_v15  ;;  %v5178_v63 = vpop.permute.xlu1 %5177 }
 0xc65   : > { %v5181_v25 = vmul.f32 %v10667_v55, %v5178_v63 }
 0xc66   : > { %v5206_v41 = vpack.c.bf16 %v5204_v7, %v5204_v7 }
 0xc67   : > { %v5183_v33 = vpack.c.bf16 %v5181_v25, %v5181_v25  ;;  %v8264_v29 = vld [vmem:[#allocation2 + $0xf4] sm:$0xf0]  ;;  %5133 = vmatpush.bf16.msrb.mxu3 %v8244_v18 }
 0xc68   : > { %5208 = vst [vmem:[#allocation2 + $0x58] sm:$0xf] %v5206_v41  ;;  %v7813_v30 = vor.u32 %v8264_v29, %v7812_v47 }
 0xc69   : > { %5185 = vst [vmem:[#allocation2 + $0x30] sm:$0xf] %v5183_v33 }
 0xc6a   : > { %5525 = vmatpush.bf16.msra.mxu0 %v7813_v30 }
 0xc6b   : > { %v5258_v36 = vpop.permute.xlu0 %5257  ;;  %5134 = vmatpush.bf16.msrb.mxu3 %v8243_v61 }
 0xc6c   : > { %v5261_v6 = vmul.f32 %v10678_v9, %v5258_v36  ;;  %v5260_v39 = vpop.permute.xlu1 %5259 }
 0xc6d   : > { %v5262_v34 = vmul.f32 %v10678_v9, %v5260_v39 }
 0xc6e   : > { %v5263_v3 = vpack.c.bf16 %v5261_v6, %v5261_v6 }
 0xc6f   : > { %v5264_v58 = vpack.c.bf16 %v5262_v34, %v5262_v34  ;;  %5135 = vmatpush.bf16.msrb.mxu3 %v8242_v37 }
 0xc70   : > { %5265 = vst [vmem:[#allocation2 + $0xb0] sm:$0xf] %v5263_v3  ;;  %v10715_v3 = vld [vmem:[#allocation8] ss:$0 sm:$0xff] }
 0xc71   : > { %5266 = vst [vmem:[#allocation2 + $0xb8] sm:$0xf] %v5264_v58 }
 0xc73   : > { %v5324_v16 = vpop.permute.xlu0 %5323  ;;  %5136 = vmatpush.bf16.msrb.mxu3 %v8241_v62 }
 0xc74   : > { %v5327_v45 = vmul.f32 %v10682_v44, %v5324_v16  ;;  %v5326_v48 = vpop.permute.xlu1 %5325 }
 0xc75   : > { %v5328_v57 = vmul.f32 %v10682_v44, %v5326_v48 }
 0xc76   : > { %v5329_v4 = vpack.c.bf16 %v5327_v45, %v5327_v45 }
 0xc77   : > { %v5330_v49 = vpack.c.bf16 %v5328_v57, %v5328_v57 }
 0xc78   : > { %5331 = vst [vmem:[#allocation2 + $0x110] sm:$0xf] %v5329_v4 }
 0xc79   : > { %5332 = vst [vmem:[#allocation2 + $0x118] sm:$0xf] %v5330_v49 }
 0xc7f   : > { %v7820_v52 = vld [vmem:[#allocation2 + $0x110] sm:$0xf] }
 0xc80   : > { %v8266_v27 = vld [vmem:[#allocation2 + $0x114] sm:$0xf0] }
 0xc81   : > { %v7821_v17 = vor.u32 %v8266_v27, %v7820_v52 }
 0xc83   : > { %5545 = vmatpush.bf16.msrb.mxu2 %v7821_v17 }
 0xcce   : > { %v5025_v56 = vpop.f32.mrf.mxu2 }
 0xccf   : > { %v5026_v11 = vadd.f32 %v5025_v56, %v10658_v22 }
 0xcd6   : > { %v5027_v31 = vpop.f32.mrf.mxu2 }
 0xcd7   : > { %v5028_v13 = vadd.f32 %v5027_v31, %v10645_v10 }
 0xcde   : > { %v5039_v5 = vpop.f32.mrf.mxu0 }
 0xcdf   : > { %v5040_v12 = vadd.f32 %v5039_v5, %v5026_v11  ;;  %v8254_v5 = vld [vmem:[#allocation2 + $0x54] sm:$0xf0] }
 0xce0   : > { %v5053_v8 = vpop.f32.mrf.mxu2 }
 0xce1   : > { %v5054_v14 = vadd.f32 %v5053_v8, %v5040_v12 }
 0xce3   : > { %v5060_v35 = vmul.f32 0.2, %v5054_v14  ;;  %vm5058_vm10 = vcmp.ge.f32.partialorder %v5054_v14, 0.0 }
 0xce5   : > { %v5062_v21 = vsel %vm5058_vm10, %v5054_v14, %v5060_v35 }
 0xce6   : > { %v5041_v19 = vpop.f32.mrf.mxu0 }
 0xce7   : > { %v5042_v20 = vadd.f32 %v5041_v19, %v5028_v13  ;;  %v7772_v19 = vld [vmem:[#allocation2 + $0x50] sm:$0xf] }
 0xce8   : > { %v5055_v1 = vpop.f32.mrf.mxu2 }
 0xce9   : > { %v5056_v60 = vadd.f32 %v5055_v1, %v5042_v20  ;;  %v7773_v20 = vor.u32 %v8254_v5, %v7772_v19  ;;  %v8258_v5 = vld [vmem:[#allocation2 + $0x94] sm:$0xf0] }
 0xceb   : > { %vm5059_vm12 = vcmp.ge.f32.partialorder %v5056_v60, 0.0  ;;  %v5061_v38 = vmul.f32 0.2, %v5056_v60 }
 0xced   : > { %v5063_v40 = vsel %vm5059_vm12, %v5056_v60, %v5061_v38 }
 0xcee   : > { %v5064_v15 = vpack.c.bf16 %v5063_v40, %v5062_v21 }
 0xcf0   : > { %5137 = vmatmul.bf16.vlgmr.msrb.gmra.mxu3 %v5064_v15 }
 0xd73   : > { %v5138_v7 = vpop.f32.mrf.mxu3 }
 0xd74   : > { %v5233_v22 = vmul.f32 %v10542_v53, %v5138_v7  ;;  %5268 = vrot.lane.b32.xlu2 %v5138_v7, %s11258_s6  ;;  %5290 = vrot.lane.b32.xlu0 %v5138_v7, %s11257_s5 }
 0xd75   : > { %5210 = vrot.lane.b32.xlu1 %v5138_v7, %s11169_s4 }
 0xd76   : > { %v5235_v10 = vpack.c.bf16 %v5233_v22, %v5233_v22 }
 0xd78   : > { %5237 = vst [vmem:[#allocation2 + $0x80] sm:$0xf] %v5235_v10 }
 0xd7b   : > { %v5140_v63 = vpop.f32.mrf.mxu3 }
 0xd7c   : > { %v5234_v25 = vmul.f32 %v10542_v53, %v5140_v63  ;;  %5166 = vrot.lane.b32.xlu2 %v5138_v7, %s11260_s9  ;;  %5188 = vrot.lane.b32.xlu0 %v5138_v7, %s11259_s30  ;;  %v5373_v53 = vld [vmem:[%s11262_s1] sm:$0xff] }
 0xd7d   : > { %5246 = vrot.lane.b32.xlu1 %v5138_v7, %s9351_s12 }
 0xd7e   : > { %v5236_v41 = vpack.c.bf16 %v5234_v25, %v5234_v25  ;;  %v7804_v25 = vld [vmem:[#allocation2 + $0xd0] sm:$0xf] }
 0xd80   : > { %5238 = vst [vmem:[#allocation2 + $0x88] sm:$0xf] %v5236_v41 }
 0xd84   : > { %5157 = vrot.lane.b32.xlu0 %v9984_v51, %s11263_s3  ;;  %5212 = vrot.lane.b32.xlu2 %v5140_v63, %s11169_s4  ;;  %v5374_v51 = vld [vmem:[%s11262_s1 + $0x8] sm:$0xff]  ;;  %s11273_s1 = smov 16  }
 0xd85   : > { %5292 = vrot.lane.b32.xlu1 %v5140_v63, %s11257_s5 }
 0xd87   : > { %v8257_v19 = vld [vmem:[#allocation2 + $0x84] sm:$0xf0] }
 0xd8c   : > { %5270 = vrot.lane.b32.xlu0 %v5140_v63, %s11258_s6  ;;  %5155 = vrot.lane.b32.xlu2 %v9982_v50, %s11263_s3 }
 0xd8d   : > { %5190 = vrot.lane.b32.xlu1 %v5140_v63, %s11259_s30 }
 0xd94   : > { %5168 = vrot.lane.b32.xlu0 %v5140_v63, %s11260_s9  ;;  %5248 = vrot.lane.b32.xlu2 %v5140_v63, %s9351_s12 }
 0xd95   : > { %5312 = vrot.lane.b32.xlu1 %v5138_v7, %s11261_s2 }
 0xd9c   : > { %5144 = vrot.lane.b32.xlu0 %v5138_v7, %s11263_s3  ;;  %5314 = vrot.lane.b32.xlu2 %v5140_v63, %s11261_s2 }
 0xd9d   : > { %5146 = vrot.lane.b32.xlu1 %v5140_v63, %s11263_s3 }
 0xda4   : > { %5382 = vperm.xlu0 %8597, %v5374_v51   ;;  %5377 = vperm.xlu2 %8596, %v5373_v53  }
 0xdce   : > { %v5269_v33 = vpop.permute.xlu2 %5268 }
 0xdcf   : > { %v5273_v50 = vmul.f32 %v10662_v59, %v5269_v33  ;;  %v8262_v33 = vld [vmem:[#allocation2 + $0xd4] sm:$0xf0] }
 0xdd1   : > { %v5275_v47 = vpack.c.bf16 %v5273_v50, %v5273_v50 }
 0xdd3   : > { %5277 = vst [vmem:[#allocation2 + $0xc0] sm:$0xf] %v5275_v47 }
 0xdd6   : > { %v5167_v29 = vpop.permute.xlu2 %5166 }
 0xdd7   : > { %v5171_v30 = vmul.f32 %v10667_v55, %v5167_v29 }
 0xdd9   : > { %v5173_v36 = vpack.c.bf16 %v5171_v30, %v5171_v30 }
 0xddb   : > { %5175 = vst [vmem:[#allocation2 + $0x20] sm:$0xf] %v5173_v36 }
 0xdde   : > { %v5213_v6 = vpop.permute.xlu2 %5212 }
 0xddf   : > { %v5216_v39 = vmul.f32 %v10660_v0, %v5213_v6 }
 0xde1   : > { %v5218_v34 = vpack.c.bf16 %v5216_v39, %v5216_v39 }
 0xde3   : > { %5220 = vst [vmem:[#allocation2 + $0x68] sm:$0xf] %v5218_v34 }
 0xde6   : > { %v5291_v58 = vpop.permute.xlu0 %5290  ;;  %v5156_v16 = vpop.permute.xlu2 %5155 }
 0xde7   : > { %v5295_v45 = vmul.f32 %v10649_v46, %v5291_v58  ;;  %v5211_v48 = vpop.permute.xlu1 %5210  ;;  %v5159_v57 = vmul.f32 %v10715_v3, %v5156_v16  ;;  %v7764_v58 = vld [vmem:[#allocation2 + $0x30] sm:$0xf] }
 0xde8   : > { %v5215_v4 = vmul.f32 %v10660_v0, %v5211_v48  ;;  %v7796_v16 = vld [vmem:[#allocation2 + $0xb0] sm:$0xf] }
 0xde9   : > { %v5297_v49 = vpack.c.bf16 %v5295_v45, %v5295_v45  ;;  %v5161_v52 = vpack.c.bf16 %v5159_v57, %v5159_v57  ;;  %v8260_v45 = vld [vmem:[#allocation2 + $0xb4] sm:$0xf0] }
 0xdea   : > { %v5217_v27 = vpack.c.bf16 %v5215_v4, %v5215_v4  ;;  %v8255_v62 = vld [vmem:[#allocation2 + $0x64] sm:$0xf0]  ;;  %v8252_v57 = vld [vmem:[#allocation2 + $0x34] sm:$0xf0] }
 0xdeb   : > { %5299 = vst [vmem:[#allocation2 + $0xe0] sm:$0xf] %v5297_v49  ;;  %v7765_v49 = vor.u32 %v8252_v57, %v7764_v58 }
 0xdec   : > { %5219 = vst [vmem:[#allocation2 + $0x60] sm:$0xf] %v5217_v27 }
 0xded   : > { %5163 = vst [vmem:[#allocation2 + $0x10] sm:$0xf] %v5161_v52  ;;  %v7797_v52 = vor.u32 %v8260_v45, %v7796_v16 }
 0xdee   : > { %v5189_v17 = vpop.permute.xlu0 %5188  ;;  %v5249_v43 = vpop.permute.xlu2 %5248 }
 0xdef   : > { %v5193_v54 = vmul.f32 %v10654_v23, %v5189_v17  ;;  %v5247_v2 = vpop.permute.xlu1 %5246  ;;  %v5252_v42 = vmul.f32 %v10678_v9, %v5249_v43 }
 0xdf0   : > { %v5251_v18 = vmul.f32 %v10678_v9, %v5247_v2  ;;  %v7760_v2 = vld [vmem:[#allocation2 + $0x20] sm:$0xf] }
 0xdf1   : > { %v5195_v61 = vpack.c.bf16 %v5193_v54, %v5193_v54  ;;  %v5254_v37 = vpack.c.bf16 %v5252_v42, %v5252_v42 }
 0xdf2   : > { %v5253_v56 = vpack.c.bf16 %v5251_v18, %v5251_v18  ;;  %v7808_v10 = vld [vmem:[#allocation2 + $0xe0] sm:$0xf] }
 0xdf3   : > { %5197 = vst [vmem:[#allocation2 + $0x40] sm:$0xf] %v5195_v61  ;;  %v7776_v0 = vld [vmem:[#allocation2 + $0x60] sm:$0xf] }
 0xdf4   : > { %5255 = vst [vmem:[#allocation2 + $0xa0] sm:$0xf] %v5253_v56  ;;  %v7777_v31 = vor.u32 %v8255_v62, %v7776_v0  ;;  %v7748_v62 = vld [vmem:[#allocation29 + $0x8] sm:$0xf] }
 0xdf5   : > { %5256 = vst [vmem:[#allocation2 + $0xa8] sm:$0xf] %v5254_v37 }
 0xdf6   : > { %5512 = vmatpush.bf16.msra.mxu1 %v7777_v31  ;;  %v5158_v11 = vpop.permute.xlu0 %5157  ;;  %v5315_v8 = vpop.permute.xlu2 %5314  ;;  %v8269_v31 = vld [vmem:[#allocation29 + $0x10] sm:$0xf0] }
 0xdf7   : > { %v5160_v12 = vmul.f32 %v10715_v3, %v5158_v11  ;;  %v5293_v13 = vpop.permute.xlu1 %5292  ;;  %v5318_v14 = vmul.f32 %v10682_v44, %v5315_v8  ;;  %v7756_v11 = vld [vmem:[#allocation2 + $0x10] sm:$0xf] }
 0xdf8   : > { %v5296_v9 = vmul.f32 %v10649_v46, %v5293_v13  ;;  %v7788_v8 = vld [vmem:[#allocation2 + $0x90] sm:$0xf] }
 0xdf9   : > { %v5162_v1 = vpack.c.bf16 %v5160_v12, %v5160_v12  ;;  %v5320_v35 = vpack.c.bf16 %v5318_v14, %v5318_v14  ;;  %v7749_v12 = vor.u32 %v8269_v31, %v7748_v62  ;;  %v7789_v14 = vor.u32 %v8258_v5, %v7788_v8  ;;  %v8664_v62 = vld [vmem:[#allocation8 + $0x3] ss:$0 sm:$0xff]  ;;  %v8665_v31 = vld [vmem:[#allocation8 + $0x6] ss:$0 sm:$0xff] }
 0xdfa   : > { %v5298_v60 = vpack.c.bf16 %v5296_v9, %v5296_v9  ;;  %5513 = vmatpush.bf16.msra.mxu1 %v7773_v20  ;;  %v7768_v36 = vld [vmem:[#allocation2 + $0x40] sm:$0xf]  ;;  %v7740_v9 = vld [vmem:[#allocation29] sm:$0xf]  ;;  %v8268_v20 = vld [vmem:[#allocation29 + $0x8] sm:$0xf0] }
 0xdfb   : > { %5164 = vst [vmem:[#allocation2 + $0x18] sm:$0xf] %v5162_v1  ;;  %v7792_v17 = vld [vmem:[#allocation2 + $0xa0] sm:$0xf] }
 0xdfc   : > { %5300 = vst [vmem:[#allocation2 + $0xe8] sm:$0xf] %v5298_v60  ;;  %v8259_v43 = vld [vmem:[#allocation2 + $0xa4] sm:$0xf0]  ;;  %v7742_v60 = vld [vmem:[#allocation29 + $0xc] sm:$0xf0] }
 0xdfd   : > { %5322 = vst [vmem:[#allocation2 + $0x108] sm:$0xf] %v5320_v35  ;;  %v7793_v56 = vor.u32 %v8259_v43, %v7792_v17  ;;  %v8267_v35 = vld [vmem:[#allocation29 + $0x4] sm:$0xf] }
 0xdfe   : > { %v5271_v38 = vpop.permute.xlu0 %5270 }
 0xdff   : > { %v5274_v21 = vmul.f32 %v10662_v59, %v5271_v38  ;;  %v5191_v40 = vpop.permute.xlu1 %5190  ;;  %v7805_v59 = vor.u32 %v8262_v33, %v7804_v25  ;;  %v8661_v33 = vld [vmem:[#allocation8 + $0x4] ss:$0 sm:$0xff] }
 0xe00   : > { %v5194_v15 = vmul.f32 %v10654_v23, %v5191_v40  ;;  %v7800_v23 = vld [vmem:[#allocation2 + $0xc0] sm:$0xf] }
 0xe01   : > { %v5276_v7 = vpack.c.bf16 %v5274_v21, %v5274_v21  ;;  %v7784_v21 = vld [vmem:[#allocation2 + $0x80] sm:$0xf] }
 0xe02   : > { %v5196_v22 = vpack.c.bf16 %v5194_v15, %v5194_v15  ;;  %v7785_v15 = vor.u32 %v8257_v19, %v7784_v21 }
 0xe03   : > { %5278 = vst [vmem:[#allocation2 + $0xc8] sm:$0xf] %v5276_v7  ;;  %v8263_v63 = vld [vmem:[#allocation2 + $0xe4] sm:$0xf0]  ;;  %v7741_v7 = vor.u32 %v8268_v20, %v7740_v9 }
 0xe04   : > { %5198 = vst [vmem:[#allocation2 + $0x48] sm:$0xf] %v5196_v22  ;;  %v7809_v46 = vor.u32 %v8263_v63, %v7808_v10  ;;  %v8265_v37 = vld [vmem:[#allocation2 + $0x104] sm:$0xf0]  ;;  %v7745_v22 = vor.u32 %v8267_v35, %v7742_v60  ;;  %v5378_v10 = vpop.permute.xlu2 %5377 }
 0xe05   : > { %v8666_v20 = vld [vmem:[#allocation8 + $0x1] ss:$0 sm:$0xff] }
 0xe06   : > { %5526 = vmatpush.bf16.msra.mxu0 %v7809_v46  ;;  %v5169_v41 = vpop.permute.xlu0 %5168 }
 0xe07   : > { %v5172_v51 = vmul.f32 %v10667_v55, %v5169_v41  ;;  %v5313_v53 = vpop.permute.xlu1 %5312 }
 0xe08   : > { %v5317_v50 = vmul.f32 %v10682_v44, %v5313_v53 }
 0xe09   : > { %v5174_v47 = vpack.c.bf16 %v5172_v51, %v5172_v51 }
 0xe0a   : > { %v5319_v29 = vpack.c.bf16 %v5317_v50, %v5317_v50  ;;  %5527 = vmatpush.bf16.msra.mxu0 %v7805_v59  ;;  %v8261_v30 = vld [vmem:[#allocation2 + $0xc4] sm:$0xf0] }
 0xe0b   : > { %5176 = vst [vmem:[#allocation2 + $0x28] sm:$0xf] %v5174_v47  ;;  %v8253_v6 = vld [vmem:[#allocation2 + $0x44] sm:$0xf0]  ;;  %v7801_v39 = vor.u32 %v8261_v30, %v7800_v23 }
 0xe0c   : > { %5321 = vst [vmem:[#allocation2 + $0x100] sm:$0xf] %v5319_v29  ;;  %v7769_v34 = vor.u32 %v8253_v6, %v7768_v36 }
 0xe0e   : > { %5514 = vmatpush.bf16.msra.mxu1 %v7769_v34  ;;  %5528 = vmatpush.bf16.msra.mxu0 %v7801_v39  ;;  %v5145_v55 = vpop.permute.xlu0 %5144 }
 0xe0f   : > { %v5149_v44 = vmul.f32 %v10715_v3, %v5145_v55  ;;  %v5147_v48 = vpop.permute.xlu1 %5146 }
 0xe10   : > { %v5150_v4 = vmul.f32 %v10715_v3, %v5147_v48  ;;  %v8250_v3 = vld [vmem:[#allocation2 + $0x14] sm:$0xf0] }
 0xe11   : > { %v5151_v27 = vpack.c.bf16 %v5149_v44, %v5149_v44  ;;  %v7757_v13 = vor.u32 %v8250_v3, %v7756_v11  ;;  %v10738_v44 = vld [vmem:[#allocation6 + $0x4] ss:$8 sm:$0x3] }
 0xe12   : > { %v5152_v54 = vpack.c.bf16 %v5150_v4, %v5150_v4  ;;  %5515 = vmatpush.bf16.msra.mxu1 %v7765_v49  ;;  %5529 = vmatpush.bf16.msra.mxu0 %v7797_v52  ;;  %v8251_v42 = vld [vmem:[#allocation2 + $0x24] sm:$0xf0]  ;;  %v6009_v57 = vperm.slane %v10738_v44, 0  ;;  %v6010_v4 = vperm.slane %v10738_v44, 1 }
 0xe13   : > { %5153 = vst [vmem:[#allocation2] sm:$0xf] %v5151_v27  ;;  %v7761_v18 = vor.u32 %v8251_v42, %v7760_v2  ;;  %v7816_v61 = vld [vmem:[#allocation2 + $0x100] sm:$0xf] }
 0xe14   : > { %5154 = vst [vmem:[#allocation2 + $0x8] sm:$0xf] %v5152_v54  ;;  %v7817_v0 = vor.u32 %v8265_v37, %v7816_v61  ;;  %v6017_v49 = vmul.f32 %v6009_v57, %v9966_v32  ;;  %v6018_v52 = vmul.f32 %v6010_v4, %v9962_v24  ;;  %v8662_v54 = vld [vmem:[#allocation8 + $0x7] ss:$0 sm:$0xff]  ;;  %v8663_v61 = vld [vmem:[#allocation8 + $0x5] ss:$0 sm:$0xff] }
 0xe16   : > { %5516 = vmatpush.bf16.msra.mxu1 %v7761_v18  ;;  %5530 = vmatpush.bf16.msra.mxu0 %v7793_v56  ;;  %v5383_v59 = vpop.permute.xlu0 %5382  ;;  %v6019_v27 = vpack.c.bf16 %v6018_v52, %v6017_v49 }
 0xe17   : > { %5546 = vmatpush.bf16.msrb.mxu2 %v7817_v0 }
 0xe1a   : > { %5517 = vmatpush.bf16.msra.mxu1 %v7757_v13  ;;  %5531 = vmatpush.bf16.msra.mxu0 %v7789_v14  ;;  %v7752_v1 = vld [vmem:[#allocation2] sm:$0xf] }
 0xe1b   : > { %v8249_v38 = vld [vmem:[#allocation2 + $0x4] sm:$0xf0]  ;;  %7822 = vmatmul.msk.bf16.vlgmr.msrb.gmra.mxu2 %vm2772_vm0, %v7749_v12 }
 0xe1c   : > { %v7753_v40 = vor.u32 %v8249_v38, %v7752_v1 }
 0xe1e   : > { %5518 = vmatpush.bf16.msra.mxu1 %v7753_v40  ;;  %5532 = vmatpush.bf16.msra.mxu0 %v7785_v15 }
 0xe21   : > { %5519 = vmatmul.bf16.vlgmr.msra.gmra.mxu1 %v7741_v7  ;;  %5533 = vmatmul.bf16.vlgmr.msra.gmra.mxu0 %v7745_v22 }
 0xe9e   : > { %v5520_v63 = vpop.f32.mrf.mxu1  ;;  %v5534_v46 = vpop.f32.mrf.mxu0 }
 0xe9f   : > { %v5521_v25 = vadd.f32 %v5520_v63, %v5378_v10  ;;  %v5548_v41 = vpop.f32.mrf.mxu2  ;;  %v8667_v10 = vld [vmem:[#allocation8] ss:$0 sm:$0xff]  ;;  %v8668_v63 = vld [vmem:[#allocation8 + $0x2] ss:$0 sm:$0xff] }
 0xea1   : > { %v5535_v51 = vadd.f32 %v5534_v46, %v5521_v25 }
 0xea3   : > { %v5549_v53 = vadd.f32 %v5548_v41, %v5535_v51 }
 0xea5   : > { %vm5553_vm15 = vcmp.ge.f32.partialorder %v5549_v53, 0.0  ;;  %v5555_v50 = vmul.f32 0.2, %v5549_v53 }
 0xea6   : > { %v5522_v47 = vpop.f32.mrf.mxu1  ;;  %v5536_v36 = vpop.f32.mrf.mxu0 }
 0xea7   : > { %v5557_v29 = vsel %vm5553_vm15, %v5549_v53, %v5555_v50  ;;  %v5523_v23 = vadd.f32 %v5522_v47, %v5383_v59  ;;  %v5550_v34 = vpop.f32.mrf.mxu2 }
 0xea8   : > { %v5609_v30 = vmul.f32 %v8661_v33, %v5557_v29  ;;  %5628 = vrot.lane.b32.xlu0 %v5557_v29, %s11258_s6  ;;  %5640 = vrot.lane.b32.xlu1 %v5557_v29, %s11257_s5 }
 0xea9   : > { %v5537_v6 = vadd.f32 %v5536_v36, %v5523_v23 }
 0xeaa   : > { %v5611_v39 = vpack.c.bf16 %v5609_v30, %v5609_v30 }
 0xeab   : > { %v5551_v58 = vadd.f32 %v5550_v34, %v5537_v6 }
 0xeac   : > { %5613 = vst [vmem:[#allocation2 + $0x40] sm:$0xf] %v5611_v39 }
 0xead   : > { %vm5554_vm0 = vcmp.ge.f32.partialorder %v5551_v58, 0.0  ;;  %v5556_v16 = vmul.f32 0.2, %v5551_v58 }
 0xeaf   : > { %v5558_v45 = vsel %vm5554_vm0, %v5551_v58, %v5556_v16 }
 0xeb0   : > { %v5610_v55 = vmul.f32 %v8661_v33, %v5558_v45  ;;  %5642 = vrot.lane.b32.xlu2 %v5558_v45, %s11257_s5  ;;  %5618 = vrot.lane.b32.xlu0 %v5558_v45, %s9351_s12  ;;  %s11264_s5 = sld [smem:[#allocation58_spill]] }
 0xeb1   : > { %5630 = vrot.lane.b32.xlu1 %v5558_v45, %s11258_s6  ;;  %s11265_s6 = smov 112  }
 0xeb2   : > { %v5612_v48 = vpack.c.bf16 %v5610_v55, %v5610_v55 }
 0xeb4   : > { %5614 = vst [vmem:[#allocation2 + $0x48] sm:$0xf] %v5612_v48 }
 0xeb6   : > { %v5682_v43 = vld [vmem:[%s11264_s5] sm:$0xff]  ;;  %s11271_s5 = sld [smem:[#allocation46_spill]] }
 0xeb8   : > { %5616 = vrot.lane.b32.xlu2 %v5557_v29, %s9351_s12  ;;  %5584 = vrot.lane.b32.xlu0 %v5557_v29, %s11259_s30 }
 0xeb9   : > { %5596 = vrot.lane.b32.xlu1 %v5557_v29, %s11169_s4 }
 0xebb   : > { %v10751_v17 = vld [vmem:[#allocation2 + $0x44] sm:$0xf0] }
 0xebc   : > { %6020 = vst [vmem:[#allocation2 + $0x48] sm:$0xff] %v6019_v27 }
 0xec0   : > { %5598 = vrot.lane.b32.xlu2 %v5558_v45, %s11169_s4  ;;  %5574 = vrot.lane.b32.xlu0 %v5558_v45, %s11260_s9  ;;  %s11266_s4 = smov 113  }
 0xec1   : > { %5586 = vrot.lane.b32.xlu1 %v5558_v45, %s11259_s30  ;;  %s11267_s30 = smov 111  }
 0xec8   : > { %5572 = vrot.lane.b32.xlu2 %v5557_v29, %s11260_s9  ;;  %5652 = vrot.lane.b32.xlu0 %v5557_v29, %s11261_s2  ;;  %s11269_s9 = smov 15  }
 0xec9   : > { %5560 = vrot.lane.b32.xlu1 %v5557_v29, %s11263_s3 }
 0xed0   : > { %5562 = vrot.lane.b32.xlu2 %v5558_v45, %s11263_s3  ;;  %6091 = vrot.lane.b32.xlu0 %v9962_v24, %s11265_s6  ;;  %s11268_s3 = smov 1  }
 0xed1   : > { %5654 = vrot.lane.b32.xlu1 %v5558_v45, %s11261_s2  ;;  %s11270_s2 = sld [smem:[#allocation57_spill]] }
 0xed8   : > { %5685 = vperm.xlu2 %8596, %v5682_v43   ;;  %6063 = vrot.lane.b32.xlu0 %v9966_v32, %s11266_s4 }
 0xed9   : > { %6065 = vrot.lane.b32.xlu1 %v9962_v24, %s11266_s4 }
 0xee0   : > { %6089 = vrot.lane.b32.xlu2 %v9966_v32, %s11265_s6  ;;  %6117 = vrot.lane.b32.xlu0 %v9962_v24, %s11267_s30 }
 0xee1   : > { %6037 = vrot.lane.b32.xlu1 %v9966_v32, %s9351_s12 }
 0xee8   : > { %6039 = vrot.lane.b32.xlu2 %v9962_v24, %s9351_s12  ;;  %5997 = vrot.lane.b32.xlu0 %v9966_v32, %s11268_s3 }
 0xee9   : > { %5999 = vrot.lane.b32.xlu1 %v9962_v24, %s11268_s3 }
 0xef0   : > { %6115 = vrot.lane.b32.xlu2 %v9966_v32, %s11267_s30 }
 0xef1   : > { %5971 = vrot.lane.b32.xlu1 %v9966_v32, %s11269_s9 }
 0xef8   : > { %5973 = vrot.lane.b32.xlu2 %v9962_v24, %s11269_s9 }
 0xf0a   : > { %v5643_v2 = vpop.permute.xlu2 %5642 }
 0xf0b   : > { %v5646_v42 = vmul.f32 %v8662_v54, %v5643_v2  ;;  %v7841_v2 = vld [vmem:[#allocation2 + $0x40] sm:$0xf] }
 0xf0d   : > { %v5648_v18 = vpack.c.bf16 %v5646_v42, %v5646_v42  ;;  %v7842_v42 = vor.u32 %v10751_v17, %v7841_v2 }
 0xf0f   : > { %5650 = vst [vmem:[#allocation2 + $0x78] sm:$0xf] %v5648_v18 }
 0xf12   : > { %v5617_v37 = vpop.permute.xlu2 %5616 }
 0xf13   : > { %v5621_v56 = vmul.f32 %v8663_v61, %v5617_v37 }
 0xf15   : > { %v5623_v0 = vpack.c.bf16 %v5621_v56, %v5621_v56 }
 0xf16   : > { %v8277_v25 = vld [vmem:[#allocation2 + $0x74] sm:$0xf0] }
 0xf17   : > { %5625 = vst [vmem:[#allocation2 + $0x50] sm:$0xf] %v5623_v0 }
 0xf1a   : > { %v5599_v3 = vpop.permute.xlu2 %5598  ;;  %v5629_v5 = vpop.permute.xlu0 %5628 }
 0xf1b   : > { %v5602_v11 = vmul.f32 %v8664_v62, %v5599_v3  ;;  %v5633_v8 = vmul.f32 %v8665_v31, %v5629_v5  ;;  %v5641_v12 = vpop.permute.xlu1 %5640  ;;  %v10789_v5 = vld [vmem:[#allocation6 + $0x7] ss:$8 sm:$0x3] }
 0xf1c   : > { %v5645_v13 = vmul.f32 %v8662_v54, %v5641_v12  ;;  %v8669_v54 = vld [vmem:[#allocation8 + $0x8] ss:$0 sm:$0xff] }
 0xf1d   : > { %v5604_v14 = vpack.c.bf16 %v5602_v11, %v5602_v11  ;;  %v5635_v19 = vpack.c.bf16 %v5633_v8, %v5633_v8 }
 0xf1e   : > { %v5647_v9 = vpack.c.bf16 %v5645_v13, %v5645_v13  ;;  %v7845_v49 = vld [vmem:[#allocation2 + $0x50] sm:$0xf] }
 0xf1f   : > { %5606 = vst [vmem:[#allocation2 + $0x38] sm:$0xf] %v5604_v14  ;;  %v6081_v14 = vperm.slane %v10789_v5, 0 }
 0xf20   : > { %5637 = vst [vmem:[#allocation2 + $0x60] sm:$0xf] %v5635_v19  ;;  %v6082_v19 = vperm.slane %v10789_v5, 1 }
 0xf21   : > { %5649 = vst [vmem:[#allocation2 + $0x70] sm:$0xf] %v5647_v9 }
 0xf22   : > { %v5573_v1 = vpop.permute.xlu2 %5572  ;;  %v5619_v35 = vpop.permute.xlu0 %5618 }
 0xf23   : > { %v5577_v60 = vmul.f32 %v8666_v20, %v5573_v1  ;;  %v5622_v38 = vmul.f32 %v8663_v61, %v5619_v35  ;;  %v5631_v21 = vpop.permute.xlu1 %5630 }
 0xf24   : > { %v5634_v40 = vmul.f32 %v8665_v31, %v5631_v21 }
 0xf25   : > { %v5579_v15 = vpack.c.bf16 %v5577_v60, %v5577_v60  ;;  %v5624_v7 = vpack.c.bf16 %v5622_v38, %v5622_v38  ;;  %v5681_v38 = vld [vmem:[%s11270_s2] sm:$0xff]  ;;  %s11272_s2 = sld [smem:[#allocation64_spill]] }
 0xf26   : > { %v5636_v22 = vpack.c.bf16 %v5634_v40, %v5634_v40  ;;  %v5690_v2 = vunpack.c.h.b16 %v5681_v38 }
 0xf27   : > { %5581 = vst [vmem:[#allocation2 + $0x10] sm:$0xf] %v5579_v15  ;;  %v7849_v36 = vld [vmem:[#allocation2 + $0x60] sm:$0xf] }
 0xf28   : > { %5626 = vst [vmem:[#allocation2 + $0x58] sm:$0xf] %v5624_v7  ;;  %v7853_v46 = vld [vmem:[#allocation2 + $0x70] sm:$0xf] }
 0xf29   : > { %5638 = vst [vmem:[#allocation2 + $0x68] sm:$0xf] %v5636_v22  ;;  %v7854_v41 = vor.u32 %v8277_v25, %v7853_v46  ;;  %v5689_v25 = vunpack.c.l.b16 %v5681_v38 }
 0xf2a   : > { %v5563_v51 = vpop.permute.xlu2 %5562  ;;  %v5585_v53 = vpop.permute.xlu0 %5584 }
 0xf2b   : > { %5751 = vmatpush.bf16.msra.mxu3 %v7854_v41  ;;  %v5566_v33 = vmul.f32 %v8667_v10, %v5563_v51  ;;  %v5589_v50 = vmul.f32 %v8668_v63, %v5585_v53  ;;  %v5597_v59 = vpop.permute.xlu1 %5596  ;;  %v6144_v44 = vld [vmem:[%s11272_s2] sm:$0xff]  ;;  %s11275_s2 = sld [smem:[#allocation63_spill]] }
 0xf2c   : > { %v5601_v47 = vmul.f32 %v8664_v62, %v5597_v59  ;;  %v8273_v62 = vld [vmem:[#allocation2 + $0x34] sm:$0xf0] }
 0xf2d   : > { %v5568_v29 = vpack.c.bf16 %v5566_v33, %v5566_v33  ;;  %v5591_v23 = vpack.c.bf16 %v5589_v50, %v5589_v50 }
 0xf2e   : > { %v5603_v30 = vpack.c.bf16 %v5601_v47, %v5601_v47  ;;  %v7829_v7 = vld [vmem:[#allocation2 + $0x10] sm:$0xf]  ;;  %v7918_v47 = vld [vmem:[%s11271_s5 + $0x70] sm:$0xf] }
 0xf2f   : > { %5570 = vst [vmem:[#allocation2 + $0x8] sm:$0xf] %v5568_v29  ;;  %v8275_v58 = vld [vmem:[#allocation2 + $0x54] sm:$0xf0]  ;;  %v8294_v29 = vld [vmem:[%s11271_s5 + $0x74] sm:$0xf0] }
 0xf30   : > { %5593 = vst [vmem:[#allocation2 + $0x20] sm:$0xf] %v5591_v23  ;;  %v8276_v6 = vld [vmem:[#allocation2 + $0x64] sm:$0xf0]  ;;  %v7846_v27 = vor.u32 %v8275_v58, %v7845_v49 }
 0xf31   : > { %5605 = vst [vmem:[#allocation2 + $0x30] sm:$0xf] %v5603_v30  ;;  %v7850_v39 = vor.u32 %v8276_v6, %v7849_v36  ;;  %v5691_v30 = vpack.c.b16 %v5689_v25, %v5689_v25  ;;  %v7919_v36 = vor.u32 %v8294_v29, %v7918_v47  ;;  %v7910_v6 = vld [vmem:[%s11271_s5 + $0x60] sm:$0xf]  ;;  %v7904_v47 = vld [vmem:[%s11271_s5 + $0x58] sm:$0xf0] }
 0xf32   : > { %v5575_v34 = vpop.permute.xlu0 %5574  ;;  %v10786_v55 = vpop.permute.xlu2 %5685  ;;  %v10846_v25 = vld [vmem:[#allocation6 + $0x3] ss:$8 sm:$0x3] }
 0xf33   : > { %5752 = vmatpush.bf16.msra.mxu3 %v7850_v39  ;;  %v5578_v16 = vmul.f32 %v8666_v20, %v5575_v34  ;;  %v5587_v45 = vpop.permute.xlu1 %5586  ;;  %v8292_v34 = vld [vmem:[%s11271_s5 + $0x64] sm:$0xf0]  ;;  %5877 = vmatpush.bf16.msra.mxu2 %v7919_v36 }
 0xf34   : > { %v5590_v48 = vmul.f32 %v8668_v63, %v5587_v45  ;;  %v10814_v45 = vld [vmem:[#allocation6 + $0x10] ss:$8 sm:$0x3]  ;;  %v7911_v49 = vor.u32 %v8292_v34, %v7910_v6  ;;  %v5989_v6 = vperm.slane %v10846_v25, 0  ;;  %v5990_v34 = vperm.slane %v10846_v25, 1 }
 0xf35   : > { %v5580_v52 = vpack.c.bf16 %v5578_v16, %v5578_v16 }
 0xf36   : > { %v5592_v43 = vpack.c.bf16 %v5590_v48, %v5590_v48  ;;  %v8270_v51 = vld [vmem:[#allocation2 + $0x4] sm:$0xf0]  ;;  %v10816_v48 = vld [vmem:[#allocation6 + $0x5] ss:$8 sm:$0x3] }
 0xf37   : > { %5582 = vst [vmem:[#allocation2 + $0x18] sm:$0xf] %v5580_v52  ;;  %5753 = vmatpush.bf16.msra.mxu3 %v7846_v27  ;;  %v7833_v12 = vld [vmem:[#allocation2 + $0x20] sm:$0xf]  ;;  %5878 = vmatpush.bf16.msra.mxu2 %v7911_v49 }
 0xf38   : > { %5594 = vst [vmem:[#allocation2 + $0x28] sm:$0xf] %v5592_v43  ;;  %v7837_v61 = vld [vmem:[#allocation2 + $0x30] sm:$0xf]  ;;  %v8293_v43 = vld [vmem:[%s11271_s5 + $0x74] sm:$0xf] }
 0xf39   : > { %v7838_v3 = vor.u32 %v8273_v62, %v7837_v61 }
 0xf3a   : > { %v5653_v18 = vpop.permute.xlu0 %5652  ;;  %v6090_v11 = vpop.permute.xlu2 %6089 }
 0xf3b   : > { %5754 = vmatpush.bf16.msra.mxu3 %v7842_v42  ;;  %v5657_v37 = vmul.f32 %v8669_v54, %v5653_v18  ;;  %v5561_v56 = vpop.permute.xlu1 %5560  ;;  %v7902_v42 = vld [vmem:[%s11271_s5 + $0x50] sm:$0xf]  ;;  %v8290_v18 = vld [vmem:[%s11271_s5 + $0x54] sm:$0xf0] }
 0xf3c   : > { %v5565_v0 = vmul.f32 %v8667_v10, %v5561_v56  ;;  %v10802_v10 = vld [vmem:[#allocation6 + $0x6] ss:$8 sm:$0x3]  ;;  %v6107_v56 = vperm.slane %v10814_v45, 0 }
 0xf3d   : > { %v5659_v31 = vpack.c.bf16 %v5657_v37, %v5657_v37  ;;  %v6055_v50 = vperm.slane %v10802_v10, 0  ;;  %v6056_v59 = vperm.slane %v10802_v10, 1 }
 0xf3e   : > { %v5567_v8 = vpack.c.bf16 %v5565_v0, %v5565_v0  ;;  %v8271_v20 = vld [vmem:[#allocation2 + $0x14] sm:$0xf0]  ;;  %v6108_v0 = vperm.slane %v10814_v45, 1 }
 0xf3f   : > { %5661 = vst [vmem:[#allocation2 + $0x80] sm:$0xf] %v5659_v31  ;;  %5755 = vmatpush.bf16.msra.mxu3 %v7838_v3  ;;  %v8272_v13 = vld [vmem:[#allocation2 + $0x24] sm:$0xf0]  ;;  %v7830_v22 = vor.u32 %v8271_v20, %v7829_v7  ;;  %v8291_v3 = vld [vmem:[%s11271_s5 + $0x64] sm:$0xf]  ;;  %v5692_v20 = vpack.c.b16 %v5690_v2, %v5690_v2 }
 0xf40   : > { %5569 = vst [vmem:[#allocation2] sm:$0xf] %v5567_v8  ;;  %v7834_v17 = vor.u32 %v8272_v13, %v7833_v12  ;;  %v6029_v12 = vperm.slane %v10816_v48, 0  ;;  %v6030_v13 = vperm.slane %v10816_v48, 1 }
 0xf42   : > { %v6092_v9 = vpop.permute.xlu0 %6091  ;;  %v6040_v53 = vpop.permute.xlu2 %6039 }
 0xf43   : > { %5756 = vmatpush.bf16.msra.mxu3 %v7834_v17  ;;  %v6093_v1 = vsel %vm1481_vm6, %v6090_v11, %v6092_v9  ;;  %v6094_v35 = vsel %vm1481_vm6, %v6092_v9, %v6090_v11  ;;  %v5655_v60 = vpop.permute.xlu1 %5654  ;;  %v7912_v11 = vld [vmem:[%s11271_s5 + $0x68] sm:$0xf0]  ;;  %v7903_v17 = vor.u32 %v8290_v18, %v7902_v42  ;;  %v10867_v18 = vld [vmem:[#allocation6 + $0x2] ss:$8 sm:$0x3] }
 0xf44   : > { %v6095_v21 = vmul.f32 %v6093_v1, %v6081_v14  ;;  %v6096_v40 = vmul.f32 %v6094_v35, %v6082_v19  ;;  %v5658_v15 = vmul.f32 %v8669_v54, %v5655_v60  ;;  %v7920_v54 = vld [vmem:[%s11271_s5 + $0x78] sm:$0xf0]  ;;  %v7894_v35 = vld [vmem:[%s11271_s5 + $0x40] sm:$0xf]  ;;  %v8288_v60 = vld [vmem:[%s11271_s5 + $0x44] sm:$0xf0] }
 0xf45   : > { %v7923_v31 = vor.u32 %v8293_v43, %v7920_v54  ;;  %5879 = vmatpush.bf16.msra.mxu2 %v7903_v17  ;;  %v7895_v29 = vor.u32 %v8288_v60, %v7894_v35  ;;  %v8284_v43 = vld [vmem:[%s11271_s5 + $0x24] sm:$0xf0]  ;;  %v5963_v17 = vperm.slane %v10867_v18, 0  ;;  %v7880_v35 = vld [vmem:[%s11271_s5 + $0x28] sm:$0xf0] }
 0xf46   : > { %v6097_v63 = vpack.c.bf16 %v6096_v40, %v6095_v21  ;;  %v5660_v46 = vpack.c.bf16 %v5658_v15, %v5658_v15  ;;  %v7857_v37 = vld [vmem:[#allocation2 + $0x80] sm:$0xf]  ;;  %v7915_v15 = vor.u32 %v8291_v3, %v7912_v11  ;;  %v7888_v3 = vld [vmem:[%s11271_s5 + $0x38] sm:$0xf0] }
 0xf47   : > { %5757 = vmatpush.bf16.msra.mxu3 %v7830_v22  ;;  %v7825_v41 = vld [vmem:[#allocation2] sm:$0xf] }
 0xf48   : > { %6098 = vst [vmem:[#allocation2 + $0x78] sm:$0xff] %v6097_v63  ;;  %v7826_v33 = vor.u32 %v8270_v51, %v7825_v41 }
 0xf49   : > { %5662 = vst [vmem:[#allocation2 + $0x88] sm:$0xf] %v5660_v46  ;;  %5880 = vmatpush.bf16.msra.mxu2 %v7895_v29 }
 0xf4a   : > { %v6064_v23 = vpop.permute.xlu0 %6063  ;;  %v6116_v9 = vpop.permute.xlu2 %6115 }
 0xf4b   : > { %5758 = vmatpush.bf16.msra.mxu3 %v7826_v33  ;;  %v6066_v39 = vpop.permute.xlu1 %6065  ;;  %v8289_v33 = vld [vmem:[%s11271_s5 + $0x54] sm:$0xf] }
 0xf4c   : > { %v6067_v58 = vsel %vm1455_vm5, %v6064_v23, %v6066_v39  ;;  %v6068_v16 = vsel %vm1455_vm5, %v6066_v39, %v6064_v23  ;;  %v7907_v39 = vor.u32 %v8289_v33, %v7904_v47  ;;  %v7872_v47 = vld [vmem:[%s11271_s5 + $0x18] sm:$0xf0] }
 0xf4d   : > { %v6069_v52 = vmul.f32 %v6067_v58, %v6055_v50  ;;  %v6070_v27 = vmul.f32 %v6068_v16, %v6056_v59  ;;  %v8287_v58 = vld [vmem:[%s11271_s5 + $0x44] sm:$0xf]  ;;  %v7896_v16 = vld [vmem:[%s11271_s5 + $0x48] sm:$0xf0] }
 0xf4e   : > { %5759 = vmatmul.bf16.vlgmr.msra.gmra.mxu3 %v5691_v30  ;;  %v8286_v30 = vld [vmem:[%s11271_s5 + $0x34] sm:$0xf0] }
 0xf4f   : > { %v6071_v61 = vpack.c.bf16 %v6070_v27, %v6069_v52  ;;  %v7878_v27 = vld [vmem:[%s11271_s5 + $0x20] sm:$0xf] }
 0xf50   : > { %v8278_v62 = vld [vmem:[#allocation2 + $0x84] sm:$0xf0]  ;;  %v7879_v11 = vor.u32 %v8284_v43, %v7878_v27 }
 0xf51   : > { %6072 = vst [vmem:[#allocation2 + $0x68] sm:$0xff] %v6071_v61  ;;  %v7858_v8 = vor.u32 %v8278_v62, %v7857_v37  ;;  %v7899_v61 = vor.u32 %v8287_v58, %v7896_v16 }
 0xf52   : > { %v6118_v1 = vpop.permute.xlu0 %6117  ;;  %v5974_v60 = vpop.permute.xlu2 %5973 }
 0xf53   : > { %5771 = vmatpush.bf16.msrb.mxu1 %v7858_v8  ;;  %v6119_v38 = vsel %vm1507_vm7, %v6116_v9, %v6118_v1  ;;  %v6120_v21 = vsel %vm1507_vm7, %v6118_v1, %v6116_v9  ;;  %v6038_v40 = vpop.permute.xlu1 %6037  ;;  %v8283_v1 = vld [vmem:[%s11271_s5 + $0x24] sm:$0xf] }
 0xf54   : > { %v6121_v7 = vmul.f32 %v6119_v38, %v6107_v56  ;;  %v6122_v22 = vmul.f32 %v6120_v21, %v6108_v0  ;;  %v6041_v63 = vsel %vm1429_vm4, %v6038_v40, %v6040_v53  ;;  %v6042_v46 = vsel %vm1429_vm4, %v6040_v53, %v6038_v40  ;;  %v7886_v53 = vld [vmem:[%s11271_s5 + $0x30] sm:$0xf] }
 0xf55   : > { %v6043_v41 = vmul.f32 %v6041_v63, %v6029_v12  ;;  %v6044_v51 = vmul.f32 %v6042_v46, %v6030_v13  ;;  %v7887_v49 = vor.u32 %v8286_v30, %v7886_v53  ;;  %v7870_v46 = vld [vmem:[%s11271_s5 + $0x10] sm:$0xf]  ;;  %v8280_v53 = vld [vmem:[%s11271_s5 + $0x4] sm:$0xf0]  ;;  %v8279_v30 = vld [vmem:[%s11271_s5 + $0x4] sm:$0xf] }
 0xf56   : > { %v6123_v23 = vpack.c.bf16 %v6122_v22, %v6121_v7  ;;  %7859 = vmatmul.msk.bf16.vlgmr.msrb.gmra.mxu1 %vm2188_vm9, %v5692_v20  ;;  %v5964_v20 = vperm.slane %v10867_v18, 1 }
 0xf57   : > { %5890 = vmatpush.bf16.msra.mxu1 %v7923_v31  ;;  %v6045_v36 = vpack.c.bf16 %v6044_v51, %v6043_v41  ;;  %5881 = vmatpush.bf16.msra.mxu2 %v7887_v49  ;;  %v8285_v31 = vld [vmem:[%s11271_s5 + $0x34] sm:$0xf]  ;;  %v8282_v41 = vld [vmem:[%s11271_s5 + $0x14] sm:$0xf0] }
 0xf58   : > { %6124 = vst [vmem:[#allocation2 + $0x88] sm:$0xff] %v6123_v23  ;;  %v7891_v9 = vor.u32 %v8285_v31, %v7888_v3  ;;  %v8281_v51 = vld [vmem:[%s11271_s5 + $0x14] sm:$0xf]  ;;  %v7871_v33 = vor.u32 %v8282_v41, %v7870_v46  ;;  %v7862_v23 = vld [vmem:[%s11271_s5] sm:$0xf] }
 0xf59   : > { %6046 = vst [vmem:[#allocation2 + $0x58] sm:$0xff] %v6045_v36  ;;  %v7875_v29 = vor.u32 %v8281_v51, %v7872_v47  ;;  %v7863_v36 = vor.u32 %v8280_v53, %v7862_v23  ;;  %v10951_v23 = vld [vmem:[#allocation6 + $0x1] ss:$8 sm:$0x3] }
 0xf5a   : > { %v5998_v52 = vpop.permute.xlu0 %5997  ;;  %v5938_v53 = vperm.slane %v10951_v23, 1 }
 0xf5b   : > { %5891 = vmatpush.bf16.msra.mxu1 %v7915_v15  ;;  %v6000_v54 = vpop.permute.xlu1 %5999  ;;  %5882 = vmatpush.bf16.msra.mxu2 %v7879_v11  ;;  %v7883_v15 = vor.u32 %v8283_v1, %v7880_v35 }
 0xf5c   : > { %v6001_v2 = vsel %vm1385_vm3, %v5998_v52, %v6000_v54  ;;  %v6002_v42 = vsel %vm1385_vm3, %v6000_v54, %v5998_v52 }
 0xf5d   : > { %v6003_v37 = vmul.f32 %v6002_v42, %v5989_v6  ;;  %v6004_v62 = vmul.f32 %v6001_v2, %v5990_v34 }
 0xf5f   : > { %5892 = vmatpush.bf16.msra.mxu1 %v7907_v39  ;;  %v6005_v8 = vpack.c.bf16 %v6004_v62, %v6003_v37  ;;  %5883 = vmatpush.bf16.msra.mxu2 %v7871_v33  ;;  %v7864_v39 = vld [vmem:[%s11271_s5 + $0x8] sm:$0xf0]  ;;  %s11274_s5 = smov 17  }
 0xf60   : > { %v7867_v58 = vor.u32 %v8279_v30, %v7864_v39 }
 0xf61   : > { %6006 = vst [vmem:[#allocation2 + $0x38] sm:$0xff] %v6005_v8 }
 0xf63   : > { %5893 = vmatpush.bf16.msra.mxu1 %v7899_v61  ;;  %v5972_v38 = vpop.permute.xlu1 %5971  ;;  %5884 = vmatpush.bf16.msra.mxu2 %v7863_v36 }
 0xf64   : > { %v5975_v21 = vsel %vm1359_vm1, %v5972_v38, %v5974_v60  ;;  %v5976_v40 = vsel %vm1359_vm1, %v5974_v60, %v5972_v38 }
 0xf65   : > { %v5977_v7 = vmul.f32 %v5976_v40, %v5963_v17  ;;  %v5978_v22 = vmul.f32 %v5975_v21, %v5964_v20 }
 0xf67   : > { %5894 = vmatpush.bf16.msra.mxu1 %v7891_v9  ;;  %v5979_v63 = vpack.c.bf16 %v5978_v22, %v5977_v7 }
 0xf69   : > { %5980 = vst [vmem:[#allocation2 + $0x28] sm:$0xff] %v5979_v63 }
 0xf6b   : > { %5895 = vmatpush.bf16.msra.mxu1 %v7883_v15 }
 0xf6f   : > { %5896 = vmatpush.bf16.msra.mxu1 %v7875_v29 }
 0xf73   : > { %5897 = vmatpush.bf16.msra.mxu1 %v7867_v58 }
 0xfd1   : > { %v5760_v16 = vpop.f32.mrf.mxu3 }
 0xfd2   : > { %v5761_v49 = vadd.f32 %v5760_v16, %v10786_v55 }
 0xfd3   : > { %v5773_v52 = vpop.f32.mrf.mxu1 }
 0xfd4   : > { %v5774_v27 = vadd.f32 %v5773_v52, %v5761_v49 }
 0xfd6   : > { %vm5777_vm11 = vcmp.ge.f32.partialorder %v5774_v27, 0.0  ;;  %v5778_v43 = vmul.f32 0.2, %v5774_v27 }
 0xfd8   : > { %v5779_v54 = vsel %vm5777_vm11, %v5774_v27, %v5778_v43  ;;  %v8310_v43 = vld [vmem:[#allocation2 + $0x74] sm:$0xf0] }
 0xfd9   : > { %v5780_v2 = vpack.c.bf16 %v5779_v54, %v5779_v54  ;;  %v5762_v42 = vpop.f32.mrf.mxu3 }
 0xfdb   : > { %5885 = vmatmul.bf16.vlgmr.msra.gmra.mxu2 %v5780_v2  ;;  %5898 = vmatmul.bf16.vlgmr.msra.gmra.mxu1 %v5780_v2  ;;  %v5775_v61 = vpop.f32.mrf.mxu1 }
 0xfdc   : > { %v7984_v61 = vld [vmem:[#allocation2 + $0x78] sm:$0xf0] }
0x1058   : > { %v5899_v37 = vpop.f32.mrf.mxu1 }
0x1059   : > { %6024 = vrot.lane.b32.xlu0 %v5899_v37, %s9351_s12  ;;  %6050 = vrot.lane.b32.xlu2 %v5899_v37, %s11266_s4  ;;  %v6014_v55 = vmul.f32 %v6010_v4, %v5899_v37 }
0x105a   : > { %6076 = vrot.lane.b32.xlu1 %v5899_v37, %s11265_s6 }
0x105e   : > { %v5886_v62 = vpop.f32.mrf.mxu2 }
0x105f   : > { %v6013_v31 = vmul.f32 %v6009_v57, %v5886_v62 }
0x1060   : > { %v5901_v3 = vpop.f32.mrf.mxu1 }
0x1061   : > { %v6015_v11 = vpack.c.bf16 %v6014_v55, %v6013_v31  ;;  %5958 = vrot.lane.b32.xlu0 %v5899_v37, %s11269_s9  ;;  %5984 = vrot.lane.b32.xlu2 %v5899_v37, %s11268_s3 }
0x1062   : > { %6102 = vrot.lane.b32.xlu1 %v5899_v37, %s11267_s30 }
0x1063   : > { %6016 = vst [vmem:[#allocation2 + $0x40] sm:$0xff] %v6015_v11 }
0x1066   : > { %v5888_v8 = vpop.f32.mrf.mxu2 }
0x1069   : > { %6022 = vrot.lane.b32.xlu2 %v5886_v62, %s9351_s12  ;;  %6074 = vrot.lane.b32.xlu0 %v5886_v62, %s11265_s6 }
0x106a   : > { %5932 = vrot.lane.b32.xlu1 %v5899_v37, %s11273_s1 }
0x1071   : > { %5945 = vrot.lane.b32.xlu2 %v9966_v32, %s11273_s1  ;;  %5947 = vrot.lane.b32.xlu0 %v9962_v24, %s11273_s1 }
0x1072   : > { %6048 = vrot.lane.b32.xlu1 %v5886_v62, %s11266_s4 }
0x1079   : > { %5956 = vrot.lane.b32.xlu2 %v5886_v62, %s11269_s9  ;;  %6100 = vrot.lane.b32.xlu0 %v5886_v62, %s11267_s30 }
0x107a   : > { %5982 = vrot.lane.b32.xlu1 %v5886_v62, %s11268_s3 }
0x1081   : > { %5906 = vrot.lane.b32.xlu2 %v5899_v37, %s11274_s5  ;;  %5930 = vrot.lane.b32.xlu0 %v5886_v62, %s11273_s1 }
0x1082   : > { %5904 = vrot.lane.b32.xlu1 %v5886_v62, %s11274_s5 }
0x1089   : > { %6147 = vperm.xlu2 %8596, %v6144_v44   ;;  %5919 = vrot.lane.b32.xlu0 %v9966_v32, %s11274_s5 }
0x108a   : > { %5921 = vrot.lane.b32.xlu1 %v9962_v24, %s11274_s5 }
0x10b3   : > { %v6051_v57 = vpop.permute.xlu2 %6050 }
0x10bb   : > { %v5985_v4 = vpop.permute.xlu2 %5984 }
0x10c3   : > { %v6023_v9 = vpop.permute.xlu2 %6022 }
0x10cb   : > { %v6025_v1 = vpop.permute.xlu0 %6024  ;;  %v5946_v35 = vpop.permute.xlu2 %5945 }
0x10cc   : > { %v6026_v60 = vsel %vm1429_vm4, %v6023_v9, %v6025_v1  ;;  %v6027_v38 = vsel %vm1429_vm4, %v6025_v1, %v6023_v9  ;;  %v6077_v21 = vpop.permute.xlu1 %6076  ;;  %v10983_v1 = vld [vmem:[#allocation6] ss:$8 sm:$0x3] }
0x10cd   : > { %v6033_v40 = vmul.f32 %v6029_v12, %v6026_v60  ;;  %v6034_v32 = vmul.f32 %v6030_v13, %v6027_v38  ;;  %v8308_v60 = vld [vmem:[#allocation2 + $0x64] sm:$0xf0]  ;;  %v7976_v38 = vld [vmem:[#allocation2 + $0x68] sm:$0xf0]  ;;  %v5911_v45 = vperm.slane %v10983_v1, 0 }
0x10cf   : > { %v6035_v15 = vpack.c.bf16 %v6034_v32, %v6033_v40 }
0x10d1   : > { %6036 = vst [vmem:[#allocation2 + $0x50] sm:$0xff] %v6035_v15  ;;  %v10988_v15 = vld [vmem:[%s11275_s2] sm:$0xff]  ;;  %s11276_s2 = sld [smem:[#allocation66_spill]] }
0x10d3   : > { %v5959_v24 = vpop.permute.xlu0 %5958  ;;  %v5957_v7 = vpop.permute.xlu2 %5956 }
0x10d4   : > { %v6103_v22 = vpop.permute.xlu1 %6102  ;;  %v5960_v63 = vsel %vm1359_vm1, %v5957_v7, %v5959_v24  ;;  %v5961_v46 = vsel %vm1359_vm1, %v5959_v24, %v5957_v7 }
0x10d5   : > { %v5967_v41 = vmul.f32 %v5963_v17, %v5961_v46  ;;  %v5968_v12 = vmul.f32 %v5964_v20, %v5960_v63  ;;  %v5937_v20 = vperm.slane %v10951_v23, 0  ;;  %v6152_v23 = vunpack.c.h.b16 %v10988_v15 }
0x10d7   : > { %v5969_v51 = vpack.c.bf16 %v5968_v12, %v5967_v41 }
0x10d8   : > { %v8305_v32 = vld [vmem:[#allocation2 + $0x54] sm:$0xf] }
0x10d9   : > { %5970 = vst [vmem:[#allocation2 + $0x20] sm:$0xff] %v5969_v51 }
0x10db   : > { %v6075_v48 = vpop.permute.xlu0 %6074  ;;  %v5907_v24 = vpop.permute.xlu2 %5906 }
0x10dc   : > { %v10941_v13 = vpop.permute.xlu1 %5932  ;;  %v6078_v33 = vsel %vm1481_vm6, %v6075_v48, %v6077_v21  ;;  %v6079_v47 = vsel %vm1481_vm6, %v6077_v21, %v6075_v48 }
0x10dd   : > { %v6085_v29 = vmul.f32 %v6081_v14, %v6078_v33  ;;  %v6086_v17 = vmul.f32 %v6082_v19, %v6079_v47  ;;  %v7968_v33 = vld [vmem:[#allocation2 + $0x58] sm:$0xf0] }
0x10df   : > { %v6087_v18 = vpack.c.bf16 %v6086_v17, %v6085_v29  ;;  %v7971_v17 = vor.u32 %v8305_v32, %v7968_v33 }
0x10e1   : > { %6088 = vst [vmem:[#allocation2 + $0x70] sm:$0xff] %v6087_v18 }
0x10e3   : > { %v5948_v30 = vpop.permute.xlu0 %5947 }
0x10e4   : > { %v6049_v36 = vpop.permute.xlu1 %6048  ;;  %v5949_v39 = vsel %vm1333_vm2, %v5946_v35, %v5948_v30  ;;  %v5950_v58 = vsel %vm1333_vm2, %v5948_v30, %v5946_v35  ;;  %v8312_v30 = vld [vmem:[#allocation2 + $0x84] sm:$0xf0] }
0x10e5   : > { %v6052_v5 = vsel %vm1455_vm5, %v6049_v36, %v6051_v57  ;;  %v6053_v14 = vsel %vm1455_vm5, %v6051_v57, %v6049_v36  ;;  %v5951_v19 = vmul.f32 %v5950_v58, %v5937_v20  ;;  %v5952_v16 = vmul.f32 %v5949_v39, %v5938_v53  ;;  %v7958_v36 = vld [vmem:[#allocation2 + $0x40] sm:$0xf]  ;;  %v8303_v39 = vld [vmem:[#allocation2 + $0x44] sm:$0xf] }
0x10e6   : > { %v6059_v49 = vmul.f32 %v6055_v50, %v6052_v5  ;;  %v6060_v52 = vmul.f32 %v6056_v59, %v6053_v14  ;;  %v7992_v14 = vld [vmem:[#allocation2 + $0x88] sm:$0xf0] }
0x10e7   : > { %v5953_v27 = vpack.c.bf16 %v5952_v16, %v5951_v19 }
0x10e8   : > { %v6061_v54 = vpack.c.bf16 %v6060_v52, %v6059_v49  ;;  %v7982_v2 = vld [vmem:[#allocation2 + $0x70] sm:$0xf]  ;;  %v8309_v42 = vld [vmem:[#allocation2 + $0x74] sm:$0xf] }
0x10e9   : > { %5954 = vst [vmem:[#allocation2 + $0x18] sm:$0xff] %v5953_v27  ;;  %v7983_v37 = vor.u32 %v8310_v43, %v7982_v2  ;;  %v7987_v62 = vor.u32 %v8309_v42, %v7984_v61  ;;  %v6154_v27 = vpack.c.b16 %v6152_v23, %v6152_v23 }
0x10ea   : > { %6062 = vst [vmem:[#allocation2 + $0x60] sm:$0xff] %v6061_v54 }
0x10eb   : > { %6249 = vmatpush.bf16.msrb.mxu0 %v7983_v37  ;;  %6275 = vmatpush.bf16.msrb.mxu2 %v7987_v62  ;;  %v6101_v55 = vpop.permute.xlu0 %6100  ;;  %v8302_v62 = vld [vmem:[#allocation2 + $0x34] sm:$0xf0] }
0x10ec   : > { %v5983_v31 = vpop.permute.xlu1 %5982  ;;  %v6104_v50 = vsel %vm1507_vm7, %v6101_v55, %v6103_v22  ;;  %v6105_v10 = vsel %vm1507_vm7, %v6103_v22, %v6101_v55  ;;  %v7952_v55 = vld [vmem:[#allocation2 + $0x38] sm:$0xf0] }
0x10ed   : > { %v5986_v59 = vsel %vm1385_vm3, %v5983_v31, %v5985_v4  ;;  %v5987_v3 = vsel %vm1385_vm3, %v5985_v4, %v5983_v31  ;;  %v6111_v11 = vmul.f32 %v6107_v56, %v6104_v50  ;;  %v6112_v8 = vmul.f32 %v6108_v0, %v6105_v10  ;;  %v7966_v4 = vld [vmem:[#allocation2 + $0x50] sm:$0xf] }
0x10ee   : > { %v5993_v44 = vmul.f32 %v5989_v6, %v5987_v3  ;;  %v5994_v57 = vmul.f32 %v5990_v34, %v5986_v59  ;;  %v5912_v0 = vperm.slane %v10983_v1, 1  ;;  %v8306_v34 = vld [vmem:[#allocation2 + $0x54] sm:$0xf0]  ;;  %v7942_v3 = vld [vmem:[#allocation2 + $0x20] sm:$0xf] }
0x10ef   : > { %v6113_v9 = vpack.c.bf16 %v6112_v8, %v6111_v11  ;;  %v7967_v46 = vor.u32 %v8306_v34, %v7966_v4  ;;  %v8299_v11 = vld [vmem:[#allocation2 + $0x24] sm:$0xf] }
0x10f0   : > { %v5995_v35 = vpack.c.bf16 %v5994_v57, %v5993_v44  ;;  %v8300_v44 = vld [vmem:[#allocation2 + $0x24] sm:$0xf0]  ;;  %v7944_v57 = vld [vmem:[#allocation2 + $0x28] sm:$0xf0]  ;;  %v7936_v4 = vld [vmem:[#allocation2 + $0x18] sm:$0xf0] }
0x10f1   : > { %6114 = vst [vmem:[#allocation2 + $0x80] sm:$0xff] %v6113_v9  ;;  %v7974_v21 = vld [vmem:[#allocation2 + $0x60] sm:$0xf]  ;;  %v8307_v56 = vld [vmem:[#allocation2 + $0x64] sm:$0xf]  ;;  %v7943_v9 = vor.u32 %v8300_v44, %v7942_v3  ;;  %v7947_v1 = vor.u32 %v8299_v11, %v7944_v57 }
0x10f2   : > { %5996 = vst [vmem:[#allocation2 + $0x30] sm:$0xff] %v5995_v35  ;;  %v7975_v6 = vor.u32 %v8308_v60, %v7974_v21  ;;  %v7979_v40 = vor.u32 %v8307_v56, %v7976_v38  ;;  %v8298_v38 = vld [vmem:[#allocation2 + $0x14] sm:$0xf0] }
0x10f3   : > { %v5931_v25 = vpop.permute.xlu0 %5930 }
0x10f4   : > { %v5905_v7 = vpop.permute.xlu1 %5904  ;;  %6250 = vmatpush.bf16.msrb.mxu0 %v7975_v6  ;;  %6276 = vmatpush.bf16.msrb.mxu2 %v7979_v40  ;;  %v5934_v22 = vsel %vm1333_vm2, %v5931_v25, %v10941_v13  ;;  %v5935_v63 = vsel %vm1333_vm2, %v10941_v13, %v5931_v25 }
0x10f5   : > { %v5908_v41 = vsel %vm1310_vm8, %v5905_v7, %v5907_v24  ;;  %v5909_v12 = vsel %vm1310_vm8, %v5907_v24, %v5905_v7  ;;  %v5941_v51 = vmul.f32 %v5937_v20, %v5935_v63  ;;  %v5942_v48 = vmul.f32 %v5938_v53, %v5934_v22  ;;  %v8304_v20 = vld [vmem:[#allocation2 + $0x44] sm:$0xf0]  ;;  %v7960_v53 = vld [vmem:[#allocation2 + $0x48] sm:$0xf0]  ;;  %v6148_v63 = vpop.permute.xlu2 %6147 }
0x10f6   : > { %v5915_v47 = vmul.f32 %v5911_v45, %v5909_v12  ;;  %v5916_v29 = vmul.f32 %v5912_v0, %v5908_v41  ;;  %v7959_v49 = vor.u32 %v8304_v20, %v7958_v36  ;;  %v7963_v52 = vor.u32 %v8303_v39, %v7960_v53  ;;  %v6455_v20 = vld [vmem:[%s11276_s2] sm:$0xff] }
0x10f7   : > { %v5943_v18 = vpack.c.bf16 %v5942_v48, %v5941_v51 }
0x10f8   : > { %v5917_v13 = vpack.c.bf16 %v5916_v29, %v5915_v47  ;;  %6251 = vmatpush.bf16.msrb.mxu0 %v7967_v46  ;;  %6277 = vmatpush.bf16.msrb.mxu2 %v7971_v17  ;;  %v7990_v58 = vld [vmem:[#allocation2 + $0x80] sm:$0xf]  ;;  %v8311_v5 = vld [vmem:[#allocation2 + $0x84] sm:$0xf] }
0x10f9   : > { %5944 = vst [vmem:[#allocation2 + $0x10] sm:$0xff] %v5943_v18  ;;  %v7991_v19 = vor.u32 %v8312_v30, %v7990_v58  ;;  %v7995_v16 = vor.u32 %v8311_v5, %v7992_v14  ;;  %v7950_v54 = vld [vmem:[#allocation2 + $0x30] sm:$0xf]  ;;  %v8301_v2 = vld [vmem:[#allocation2 + $0x34] sm:$0xf] }
0x10fa   : > { %5918 = vst [vmem:[#allocation2] sm:$0xff] %v5917_v13  ;;  %v7951_v10 = vor.u32 %v8302_v62, %v7950_v54  ;;  %v7955_v59 = vor.u32 %v8301_v2, %v7952_v55  ;;  %v6371_v47 = vld [vmem:[#allocation6 + $0x4] ss:$8 sm:$0x3] }
0x10fb   : > { %6269 = vmatpush.bf16.msrb.mxu3 %v7991_v19  ;;  %v5920_v43 = vpop.permute.xlu0 %5919  ;;  %v6373_v18 = vperm.slane %v6371_v47, 0  ;;  %v6374_v30 = vperm.slane %v6371_v47, 1  ;;  %v6429_v55 = vld [vmem:[#allocation6 + $0x10] ss:$8 sm:$0x3] }
0x10fc   : > { %v5922_v42 = vpop.permute.xlu1 %5921  ;;  %6252 = vmatpush.bf16.msrb.mxu0 %v7959_v49  ;;  %6278 = vmatpush.bf16.msrb.mxu2 %v7963_v52  ;;  %v6413_v49 = vld [vmem:[#allocation6 + $0x7] ss:$8 sm:$0x3] }
0x10fd   : > { %v5923_v61 = vsel %vm1310_vm8, %v5920_v43, %v5922_v42  ;;  %v5924_v37 = vsel %vm1310_vm8, %v5922_v42, %v5920_v43  ;;  %v6421_v52 = vperm.slane %v6413_v49, 0 }
0x10fe   : > { %v5925_v31 = vmul.f32 %v5924_v37, %v5911_v45  ;;  %v5926_v50 = vmul.f32 %v5923_v61, %v5912_v0  ;;  %7996 = vmatmul.msk.bf16.vlgmr.msrb.gmra.mxu3 %vm2188_vm9, %v6154_v27  ;;  %v6151_v45 = vunpack.c.l.b16 %v10988_v15 }
0x10ff   : > { %6295 = vmatpush.bf16.msra.mxu3 %v7995_v16 }
0x1100   : > { %v5927_v8 = vpack.c.bf16 %v5926_v50, %v5925_v31  ;;  %6253 = vmatpush.bf16.msrb.mxu0 %v7951_v10  ;;  %6279 = vmatpush.bf16.msrb.mxu2 %v7955_v59  ;;  %v7934_v35 = vld [vmem:[#allocation2 + $0x10] sm:$0xf]  ;;  %v8297_v60 = vld [vmem:[#allocation2 + $0x14] sm:$0xf]  ;;  %v6153_v24 = vpack.c.b16 %v6151_v45, %v6151_v45  ;;  %v6437_v50 = vperm.slane %v6429_v55, 0  ;;  %v6438_v10 = vperm.slane %v6429_v55, 1 }
0x1101   : > { %v7935_v21 = vor.u32 %v8298_v38, %v7934_v35  ;;  %v7939_v56 = vor.u32 %v8297_v60, %v7936_v4  ;;  %v7926_v0 = vld [vmem:[#allocation2] sm:$0xf]  ;;  %v8295_v40 = vld [vmem:[#allocation2 + $0x4] sm:$0xf] }
0x1102   : > { %5928 = vst [vmem:[#allocation2 + $0x8] sm:$0xff] %v5927_v8 }
0x1104   : > { %6254 = vmatpush.bf16.msrb.mxu0 %v7943_v9  ;;  %6280 = vmatpush.bf16.msrb.mxu2 %v7947_v1  ;;  %v6355_v9 = vld [vmem:[#allocation6 + $0x3] ss:$8 sm:$0x3] }
0x1105   : > { %v6363_v35 = vperm.slane %v6355_v9, 0  ;;  %v6364_v60 = vperm.slane %v6355_v9, 1 }
0x1108   : > { %6255 = vmatpush.bf16.msrb.mxu0 %v7935_v21  ;;  %6281 = vmatpush.bf16.msrb.mxu2 %v7939_v56 }
0x1109   : > { %v8296_v6 = vld [vmem:[#allocation2 + $0x4] sm:$0xf0]  ;;  %v7928_v25 = vld [vmem:[#allocation2 + $0x8] sm:$0xf0] }
0x110a   : > { %v7927_v34 = vor.u32 %v8296_v6, %v7926_v0  ;;  %v7931_v32 = vor.u32 %v8295_v40, %v7928_v25 }
0x110c   : > { %6256 = vmatpush.bf16.msrb.mxu0 %v7927_v34  ;;  %6282 = vmatpush.bf16.msrb.mxu2 %v7931_v32 }
0x110e   : > { %7997 = vmatmul.msk.bf16.vlgmr.msra.gmra.mxu3 %vm2188_vm9, %v6154_v27  ;;  %v6422_v27 = vperm.slane %v6413_v49, 1 }
0x110f   : > { %6257 = vmatmul.bf16.vlgmr.msrb.gmra.mxu0 %v6153_v24  ;;  %6283 = vmatmul.bf16.vlgmr.msrb.gmra.mxu2 %v6153_v24 }
0x1181   : > { %v6271_v7 = vpop.f32.mrf.mxu3 }
0x1189   : > { %v6273_v22 = vpop.f32.mrf.mxu3 }
0x118a   : > { %v6381_v22 = vld [vmem:[#allocation6 + $0x5] ss:$8 sm:$0x3] }
0x118c   : > { %v6258_v46 = vpop.f32.mrf.mxu0 }
0x118d   : > { %v6259_v15 = vadd.f32 %v6258_v46, %v6148_v63  ;;  %v6397_v46 = vld [vmem:[#allocation6 + $0x6] ss:$8 sm:$0x3] }
0x118f   : > { %v6272_v41 = vadd.f32 %v6271_v7, %v6259_v15  ;;  %v6389_v15 = vperm.slane %v6381_v22, 0 }
0x1191   : > { %vm6301_vm10 = vcmp.ge.f32.partialorder %v6272_v41, 0.0  ;;  %v6303_v12 = vmul.f32 0.2, %v6272_v41  ;;  %v6297_v51 = vpop.f32.mrf.mxu3 }
0x1192   : > { %v6284_v48 = vpop.f32.mrf.mxu2 }
0x1193   : > { %v6305_v33 = vsel %vm6301_vm10, %v6272_v41, %v6303_v12  ;;  %v6285_v29 = vadd.f32 %v6284_v48, %v6148_v63  ;;  %v6390_v41 = vperm.slane %v6381_v22, 1  ;;  %v6405_v12 = vperm.slane %v6397_v46, 0 }
0x1194   : > { %6414 = vrot.lane.b32.xlu1 %v6305_v33, %s11265_s6  ;;  %6398 = vrot.lane.b32.xlu2 %v6305_v33, %s11266_s4  ;;  %v6260_v17 = vpop.f32.mrf.mxu0  ;;  %v6377_v58 = vmul.f32 %v6373_v18, %v6305_v33 }
0x1195   : > { %v6298_v23 = vadd.f32 %v6297_v51, %v6285_v29  ;;  %6430 = vrot.lane.b32.xlu0 %v6305_v33, %s11267_s30  ;;  %v6406_v51 = vperm.slane %v6397_v46, 1 }
0x1197   : > { %vm6302_vm9 = vcmp.ge.f32.partialorder %v6298_v23, 0.0  ;;  %v6304_v36 = vmul.f32 0.2, %v6298_v23 }
0x1199   : > { %v6306_v39 = vsel %vm6302_vm9, %v6298_v23, %v6304_v36  ;;  %v6299_v13 = vpop.f32.mrf.mxu3 }
0x119a   : > { %v6378_v5 = vmul.f32 %v6374_v30, %v6306_v39  ;;  %v6286_v14 = vpop.f32.mrf.mxu2  ;;  %v6307_v13 = vld [vmem:[#allocation6] ss:$8 sm:$0x3] }
0x119c   : > { %v6379_v19 = vpack.c.bf16 %v6378_v5, %v6377_v58  ;;  %6340 = vrot.lane.b32.xlu2 %v6305_v33, %s11269_s9  ;;  %6432 = vrot.lane.b32.xlu1 %v6306_v39, %s11267_s30  ;;  %v6339_v5 = vld [vmem:[#allocation6 + $0x2] ss:$8 sm:$0x3] }
0x119d   : > { %6382 = vrot.lane.b32.xlu0 %v6305_v33, %s9351_s12  ;;  %v6347_v49 = vperm.slane %v6339_v5, 0 }
0x119e   : > { %6380 = vst [vmem:[#allocation2 + $0x20] sm:$0xff] %v6379_v19  ;;  %v6315_v19 = vperm.slane %v6307_v13, 0 }
0x11a4   : > { %6416 = vrot.lane.b32.xlu2 %v6306_v39, %s11265_s6  ;;  %6356 = vrot.lane.b32.xlu1 %v6305_v33, %s11268_s3  ;;  %s8321_s6 = sshll.u32 %s11226_s13, 4  ;;  %s6568_s13 = scalar_lea.sflag [#allocation5], %s9840_s27 }
0x11a5   : > { %6308 = vrot.lane.b32.xlu0 %v6305_v33, %s11274_s5 }
0x11ac   : > { %6358 = vrot.lane.b32.xlu2 %v6306_v39, %s11268_s3  ;;  %6384 = vrot.lane.b32.xlu1 %v6306_v39, %s9351_s12  ;;  %s11278_s12 = sld [smem:[#allocation67_spill]] }
0x11ad   : > { %6400 = vrot.lane.b32.xlu0 %v6306_v39, %s11266_s4  ;;  %s11277_s4 = sld [smem:[#allocation65_spill]] }
0x11b2   : > { %s6579_s30 = scalar_lea.hbm %s11278_s12, %s8321_s6 }
0x11b4   : > { %6324 = vrot.lane.b32.xlu2 %v6305_v33, %s11273_s1  ;;  %6310 = vrot.lane.b32.xlu1 %v6306_v39, %s11274_s5  ;;  %s6583_s5 = sshll.u32 %s6579_s30, 4  ;;  %s6584_s5 = int_to_ptr.hbm [resolvable:$true] %s6583_s5 }
0x11b5   : > { %6342 = vrot.lane.b32.xlu0 %v6306_v39, %s11269_s9  ;;  %s9203_s2 = sshra.s32 %s6584_s5, 4  ;;  %s9204_s2 = int_to_ptr.hbm [resolvable:$true] %s9203_s2 }
0x11b6   : > { %p9210_p6 = scmp.lt.s32.totalorder %s9204_s2, %s11278_s12 }
0x11bc   : > { %6458 = vperm.xlu1 %8595, %v6455_v20   ;;  %v6316_v20 = vperm.slane %v6307_v13, 1 }
0x11bd   : > { %6326 = vrot.lane.b32.xlu0 %v6306_v39, %s11273_s1  ;;  %s6879_s1 = sshll.u32 %s9840_s27, 4 }
0x11be   : > { %s1294_s3 = scalar_lea.vmem [#allocation30], %s6879_s1  ;;  %s9209_s1 = scalar_lea.hbm %s11278_s12, 32 }
0x11bf   : > { %s6581_s9 = sshll.u32 %s1294_s3, 4  ;;  %s6582_s9 = int_to_ptr.vmem [resolvable:$true] %s6581_s9 }
0x11ee   : > { %v6399_v53 = vpop.permute.xlu2 %6398 }
0x11f6   : > { %v11025_v16 = vpop.permute.xlu2 %6340 }
0x11fe   : > { %v6417_v43 = vpop.permute.xlu2 %6416 }
0x1206   : > { %v6415_v54 = vpop.permute.xlu1 %6414  ;;  %v6359_v21 = vpop.permute.xlu2 %6358 }
0x1207   : > { %v6418_v2 = vsel %vm1481_vm6, %v6415_v54, %v6417_v43  ;;  %v6419_v42 = vsel %vm1481_vm6, %v6417_v43, %v6415_v54  ;;  %v6431_v61 = vpop.permute.xlu0 %6430 }
0x1208   : > { %v6425_v37 = vmul.f32 %v6421_v52, %v6418_v2  ;;  %v6426_v62 = vmul.f32 %v6422_v27, %v6419_v42  ;;  %v6348_v52 = vperm.slane %v6339_v5, 1 }
0x120a   : > { %v6427_v31 = vpack.c.bf16 %v6426_v62, %v6425_v37 }
0x120c   : > { %6428 = vst [vmem:[#allocation2 + $0x38] sm:$0xff] %v6427_v31 }
0x120e   : > { %v6433_v59 = vpop.permute.xlu1 %6432 }
0x120f   : > { %v6383_v3 = vpop.permute.xlu0 %6382  ;;  %v6434_v11 = vsel %vm1507_vm7, %v6431_v61, %v6433_v59  ;;  %v6435_v8 = vsel %vm1507_vm7, %v6433_v59, %v6431_v61 }
0x1210   : > { %v6441_v44 = vmul.f32 %v6437_v50, %v6434_v11  ;;  %v6442_v57 = vmul.f32 %v6438_v10, %v6435_v8  ;;  %v6323_v50 = vld [vmem:[#allocation6 + $0x1] ss:$8 sm:$0x3] }
0x1212   : > { %v6443_v1 = vpack.c.bf16 %v6442_v57, %v6441_v44  ;;  %v6331_v44 = vperm.slane %v6323_v50, 0  ;;  %v6332_v57 = vperm.slane %v6323_v50, 1 }
0x1213   : > { %v8320_v59 = vld [vmem:[#allocation2 + $0x34] sm:$0xf0] }
0x1214   : > { %6444 = vst [vmem:[#allocation2 + $0x40] sm:$0xff] %v6443_v1  ;;  %v6486_v38 = vunpack.c.l.b16 %v6443_v1  ;;  %v6487_v4 = vunpack.c.h.b16 %v6443_v1 }
0x1216   : > { %v6357_v56 = vpop.permute.xlu1 %6356  ;;  %v6496_v45 = vpack.c.b16 %v6486_v38, %v6486_v38  ;;  %v6497_v0 = vpack.c.b16 %v6487_v4, %v6487_v4 }
0x1217   : > { %v6309_v6 = vpop.permute.xlu0 %6308  ;;  %v6360_v40 = vsel %vm1385_vm3, %v6357_v56, %v6359_v21  ;;  %v6361_v25 = vsel %vm1385_vm3, %v6359_v21, %v6357_v56  ;;  %v8016_v56 = vld [vmem:[#allocation2 + $0x20] sm:$0xf] }
0x1218   : > { %v6367_v34 = vmul.f32 %v6363_v35, %v6361_v25  ;;  %v6368_v32 = vmul.f32 %v6364_v60, %v6360_v40  ;;  %v6510_v24 = vsel %vm1863_vm13, %v6496_v45, 0  ;;  %v6513_v7 = vsel %vm1863_vm13, %v6497_v0, 0  ;;  %v8317_v45 = vld [vmem:[#allocation2 + $0x24] sm:$0xf] }
0x1219   : > { %6518 = vmatpush.bf16.msrb.mxu1 %v6510_v24  ;;  %6531 = vmatpush.bf16.msra.mxu0 %v6513_v7 }
0x121a   : > { %v6369_v63 = vpack.c.bf16 %v6368_v32, %v6367_v34 }
0x121c   : > { %6370 = vst [vmem:[#allocation2 + $0x18] sm:$0xff] %v6369_v63 }
0x121e   : > { %v6385_v48 = vpop.permute.xlu1 %6384 }
0x121f   : > { %v6401_v33 = vpop.permute.xlu0 %6400  ;;  %v6386_v47 = vsel %vm1429_vm4, %v6383_v3, %v6385_v48  ;;  %v6387_v29 = vsel %vm1429_vm4, %v6385_v48, %v6383_v3  ;;  %v8026_v3 = vld [vmem:[#allocation2 + $0x38] sm:$0xf0] }
0x1220   : > { %v6402_v17 = vsel %vm1455_vm5, %v6399_v53, %v6401_v33  ;;  %v6403_v23 = vsel %vm1455_vm5, %v6401_v33, %v6399_v53  ;;  %v6393_v18 = vmul.f32 %v6389_v15, %v6386_v47  ;;  %v6394_v30 = vmul.f32 %v6390_v41, %v6387_v29  ;;  %v6454_v33 = vld [vmem:[%s11277_s4] sm:$0xf]  ;;  %s9205_s4 = scalar_lea.hbm %s9204_s2, 16 }
0x1221   : > { %v6409_v36 = vmul.f32 %v6405_v12, %v6402_v17  ;;  %v6410_v39 = vmul.f32 %v6406_v51, %v6403_v23  ;;  %p9206_p2 = scmp.ne.s32.totalorder %s9204_s2, %s9205_s4  ;;  %p9211_p8 = scmp.lt.s32.totalorder %s9209_s1, %s9205_s4 }
0x1222   : > { %v6395_v58 = vpack.c.bf16 %v6394_v30, %v6393_v18 }
0x1223   : > { %v6411_v14 = vpack.c.bf16 %v6410_v39, %v6409_v36  ;;  %v8316_v32 = vld [vmem:[#allocation2 + $0x14] sm:$0xf0]  ;;  %v8010_v22 = vld [vmem:[#allocation2 + $0x18] sm:$0xf0]  ;;  %p9207_p9 = pnand %p9206_p2, %p9815_p10  ;;  %p9212_p12 = por %p9211_p8, %p9210_p6 }
0x1224   : > { %6396 = vst [vmem:[#allocation2 + $0x28] sm:$0xff] %v6395_v58 }
0x1225   : > { %6412 = vst [vmem:[#allocation2 + $0x30] sm:$0xff] %v6411_v14  ;;  %p9208_p11 = pneg %p9207_p9 }
0x1226   : > { %v6311_v27 = vpop.permute.xlu1 %6310 }
0x1227   : > { %v6343_v43 = vpop.permute.xlu0 %6342  ;;  %v6312_v54 = vsel %vm1310_vm8, %v6309_v6, %v6311_v27  ;;  %v6313_v53 = vsel %vm1310_vm8, %v6311_v27, %v6309_v6  ;;  %p9213_p13 = pnand %p9212_p12, %p9208_p11 }
0x1228   : > { %v6344_v2 = vsel %vm1359_vm1, %v11025_v16, %v6343_v43  ;;  %v6345_v42 = vsel %vm1359_vm1, %v6343_v43, %v11025_v16  ;;  %v6319_v61 = vmul.f32 %v6315_v19, %v6313_v53  ;;  %v6320_v37 = vmul.f32 %v6316_v20, %v6312_v54  ;;  %v6325_v16 = vpop.permute.xlu2 %6324 }
0x1229   : > { %v6351_v62 = vmul.f32 %v6347_v49, %v6345_v42  ;;  %v6352_v55 = vmul.f32 %v6348_v52, %v6344_v2  ;;  %v6542_v20 = vshrl.u32 %v1308_v26, 7 }
0x122a   : > { %v6321_v31 = vpack.c.bf16 %v6320_v37, %v6319_v61 }
0x122b   : > { %v6353_v10 = vpack.c.bf16 %v6352_v55, %v6351_v62  ;;  %v8318_v35 = vld [vmem:[#allocation2 + $0x24] sm:$0xf0]  ;;  %v8018_v60 = vld [vmem:[#allocation2 + $0x28] sm:$0xf0]  ;;  %vm6557_vm4 = vcmp.lt.s32.totalorder %v6542_v20, 2 }
0x122c   : > { %6322 = vst [vmem:[#allocation2] sm:$0xff] %v6321_v31  ;;  %v8024_v11 = vld [vmem:[#allocation2 + $0x30] sm:$0xf]  ;;  %v8319_v8 = vld [vmem:[#allocation2 + $0x34] sm:$0xf]  ;;  %v8017_v40 = vor.u32 %v8318_v35, %v8016_v56  ;;  %v8021_v25 = vor.u32 %v8317_v45, %v8018_v60 }
0x122d   : > { %6354 = vst [vmem:[#allocation2 + $0x10] sm:$0xff] %v6353_v10  ;;  %v8025_v9 = vor.u32 %v8320_v59, %v8024_v11  ;;  %v8029_v1 = vor.u32 %v8319_v8, %v8026_v3 }
0x122e   : > { %v6459_v47 = vpop.permute.xlu1 %6458 }
0x122f   : > { %v6327_v38 = vpop.permute.xlu0 %6326  ;;  %6519 = vmatpush.bf16.msrb.mxu1 %v8025_v9  ;;  %6532 = vmatpush.bf16.msra.mxu0 %v8029_v1 }
0x1230   : > { %v6328_v4 = vsel %vm1333_vm2, %v6325_v16, %v6327_v38  ;;  %v6329_v21 = vsel %vm1333_vm2, %v6327_v38, %v6325_v16  ;;  %vm6558_vm2 = vcmp.eq.s32.totalorder %v6542_v20, 2 }
0x1231   : > { %v6335_v0 = vmul.f32 %v6331_v44, %v6329_v21  ;;  %v6336_v6 = vmul.f32 %v6332_v57, %v6328_v4 }
0x1233   : > { %v6337_v34 = vpack.c.bf16 %v6336_v6, %v6335_v0  ;;  %6520 = vmatpush.bf16.msrb.mxu1 %v8017_v40  ;;  %6533 = vmatpush.bf16.msra.mxu0 %v8021_v25  ;;  %v8000_v28 = vld [vmem:[#allocation2] sm:$0xf]  ;;  %v8313_v41 = vld [vmem:[#allocation2 + $0x4] sm:$0xf] }
0x1234   : > { %v8008_v24 = vld [vmem:[#allocation2 + $0x10] sm:$0xf]  ;;  %v8315_v7 = vld [vmem:[#allocation2 + $0x14] sm:$0xf] }
0x1235   : > { %6338 = vst [vmem:[#allocation2 + $0x8] sm:$0xff] %v6337_v34  ;;  %v8009_v63 = vor.u32 %v8316_v32, %v8008_v24  ;;  %v8013_v46 = vor.u32 %v8315_v7, %v8010_v22 }
0x1237   : > { %6521 = vmatpush.bf16.msrb.mxu1 %v8009_v63  ;;  %6534 = vmatpush.bf16.msra.mxu0 %v8013_v46 }
0x123c   : > { %v8314_v15 = vld [vmem:[#allocation2 + $0x4] sm:$0xf0]  ;;  %v8002_v12 = vld [vmem:[#allocation2 + $0x8] sm:$0xf0] }
0x123d   : > { %v8001_v51 = vor.u32 %v8314_v15, %v8000_v28  ;;  %v8005_v48 = vor.u32 %v8313_v41, %v8002_v12 }
0x123f   : > { %6522 = vmatpush.bf16.msrb.mxu1 %v8001_v51  ;;  %6535 = vmatpush.bf16.msra.mxu0 %v8005_v48 }
0x1242   : > { %8030 = vmatmul.msk.bf16.vlgmr.msrb.gmra.mxu1 %vm1859_vm14, %v6454_v33  ;;  %8031 = vmatmul.msk.bf16.vlgmr.msra.gmra.mxu0 %vm1859_vm14, %v6454_v33 }
0x12bf   : > { %v6524_v29 = vpop.f32.mrf.mxu1  ;;  %v6537_v17 = vpop.f32.mrf.mxu0 }
0x12c0   : > { %v6525_v23 = vadd.f32 %v6524_v29, %v6459_v47  ;;  %v6538_v18 = vadd.f32 %v6537_v17, %v6459_v47 }
0x12c2   : > { %v6545_v30 = vmul.f32 1.442695, %v6525_v23  ;;  %v6547_v36 = vmul.f32 1.442695, %v6538_v18  ;;  %vm6543_vm1 = vcmp.gt.f32.partialorder %v6525_v23, 20.0  ;;  %vm6544_vm3 = vcmp.gt.f32.partialorder %v6538_v18, 20.0 }
0x12c4   : > { %8670 = vpow2.f32 %v6545_v30 }
0x12c5   : > { %8672 = vpow2.f32 %v6547_v36 }
0x12c7   : > { %v6526_v39 = vpop.f32.mrf.mxu1  ;;  %v6539_v13 = vpop.f32.mrf.mxu0 }
0x12ca   : > { %v8671_v58 = vpop.eup %8670 }
0x12cb   : > { %v8673_v5 = vpop.eup %8672  ;;  %v6549_v14 = vadd.f32 1.0, %v8671_v58 }
0x12cc   : > { %v6550_v19 = vadd.f32 1.0, %v8673_v5 }
0x12cd   : > { %8674 = vlog2.f32 %v6549_v14 }
0x12ce   : > { %8676 = vlog2.f32 %v6550_v19 }
0x12d3   : > { %v8675_v49 = vpop.eup %8674 }
0x12d4   : > { %v8677_v52 = vpop.eup %8676  ;;  %v6552_v27 = vmul.f32 0.6931472, %v8675_v49 }
0x12d5   : > { %v6554_v43 = vmul.f32 0.6931472, %v8677_v52 }
0x12d6   : > { %v6555_v54 = vsel %vm6543_vm1, %v6525_v23, %v6552_v27 }
0x12d7   : > { %v6559_v53 = vadd.f32 1.0, %v6555_v54  ;;  %v6556_v2 = vsel %vm6544_vm3, %v6538_v18, %v6554_v43 }
0x12d8   : > { %v6560_v42 = vadd.f32 1.0, %v6556_v2 }
0x12d9   : > { %v6561_v26 = vsel %vm6558_vm2, %v6555_v54, %v6559_v53 }
0x12da   : > { %v6563_v61 = vsel %vm6557_vm4, %v6525_v23, %v6561_v26  ;;  %v6562_v37 = vsel %vm6558_vm2, %v6556_v2, %v6560_v42 }
0x12db   : > { %v6564_v62 = vsel %vm6557_vm4, %v6538_v18, %v6562_v37  ;;  %6565 = vst [vmem:[%s1294_s3] sm:$0xff] %v6563_v61 }
0x12dc   : > { %6566 = vst [vmem:[%s1294_s3 + $0x8] sm:$0xff] %v6564_v62 }
0x12dd   : > { %9216 = shalt.err (!%p9213_p13)
}
0x12de   : > { %8388 = dma.vmem_to_hbm [thread:$0]  (%p9815_p10), %s6582_s9, 256, %s6584_s5, %s6568_s13  }
0x12df PF: > { %s6595_s27 = sand.u32 1, %s9275_s7   ;;  %p11279_p0 = scmp.ne.s32.totalorder %s11223_s16, 0 }
0x12e0   : > { %p11280_p4 = scmp.ge.s32.totalorder %s9287_s0, 2  ;;  %s6596_s6 = scalar_lea.sflag [#allocation5], %s6595_s27 }
0x12e2   : > { %p8444_p7 = pnand %p11280_p4, %p11279_p0 }
0x12e4   : > { %p8445_p1 = pneg %p8444_p7 }
0x12e6   : > { %9270 = dma.done.wait (%p8445_p1), %s6596_s6, 256  }
0x12e7   : > { %9272 = vsyncadd (%p8445_p1), %s6596_s6, 4294967040  ;;  %p88_p5 = scmp.ge.s32.totalorder %s9789_s26, 4   ;;  %s11281_s7 = smov %s9279_s10 }
0x12e8   : > { %s11282_s10 = smov %s9283_s11  ;;  %s11283_s11 = smov %s9800_s18 }
0x12e9   : > { %s11284_s0 = smov %s9789_s26  ;;  %90 = sbr.rel (!%p88_p5) target bundleno = 77 (0x4d), region = 302 }
0x12ee   :  { %6602 = vsyncpa [#allocation4], 1 }
0x12ef   :  { %6604 = vsyncpa [#allocation4 + $0x1], 1 }
0x12f0   :  { %6605 = vsyncpa [#allocation7], 1 }
0x12f1   :  { %6606 = vsyncpa [#allocation10], 1 }
0x12f2   :  { %6607 = vsyncpa [#allocation13], 1 }
0x12f3   :  { %6608 = vsyncpa [#allocation16], 1 }
0x12f4   :  { %6609 = vsyncpa [#allocation19], 1 }
0x12f5   :  { %6610 = vsyncpa [#allocation22], 1 }
0x12f6   :  { %6611 = vsyncpa [#allocation25], 1 }
0x12f7   :  { %6612 = vsyncpa [#allocation28], 1 }
0x12f8   :  { %6613 = vsyncpa [#allocation5], 1 }
0x12f9   :  { %6615 = vsyncpa [#allocation5 + $0x1], 1 }

</bundles_post_ra>
